<compile_context>
chip_gen: v5e
topology: v5e:2x2
jax: 0.10.0
libtpu: 0.0.40
codegen_flags: <defaults>
</compile_context>

<pallas_src>
import functools

import jax
import jax.numpy as jnp
from jax import lax
from jax.experimental import pallas as pl
from jax.experimental.pallas import tpu as pltpu


# ----------------------------- fused kernel -----------------------------

def _fused_kernel(
    x1_ref, x2_ref,
    wq_ref, bq_ref, wkv_ref, bkv_ref, wo_ref, bo_ref,
    ln_g_ref, ln_b_ref,
    wff1_ref, bff1_ref, wff2_ref, bff2_ref,
    w1_ref, b1_ref,
    w2_hbm_ref, b2_ref,
    wfc_hbm_ref, bfc_ref,
    wa_hbm_ref, ba_ref,
    wb_hbm_ref, bb_ref,
    wc_ref, bc_ref,
    wrho_ref, brho_ref,
    o_ref,
    w2_buf, wfc_buf, wa_buf, wb_buf, dma_sems,
    *, eps,
):
    f32 = jnp.float32
    bf16 = jnp.bfloat16

    # Kick off the DeepAttnMISL weight DMAs immediately; they overlap with the
    # attention / LN / FFN / first-phi prelude below.
    cp_w2 = pltpu.make_async_copy(w2_hbm_ref, w2_buf, dma_sems.at[0])
    cp_fc = pltpu.make_async_copy(wfc_hbm_ref, wfc_buf, dma_sems.at[1])
    cp_wa = pltpu.make_async_copy(wa_hbm_ref, wa_buf, dma_sems.at[2])
    cp_wb = pltpu.make_async_copy(wb_hbm_ref, wb_buf, dma_sems.at[3])
    cp_w2.start()
    cp_fc.start()
    cp_wa.start()
    cp_wb.start()

    x1 = x1_ref[...]                      # (S, M) f32
    x2 = x2_ref[...]                      # (S, M) f32
    m = x1.shape[-1]
    s_len = x1.shape[0]

    def mm(a, w, b=None):
        # cast activation to the (bf16) weight dtype; f32 MXU accumulation
        y = jnp.dot(a.astype(w.dtype), w, preferred_element_type=f32)
        if b is not None:
            y = y + b
        return y

    # ---- cross attention (single head; 1/sqrt(M) pre-folded into wq/bq) ----
    # TODO(synk): self.cross_attention is never defined in the reference
    # __init__; implemented as single-head scaled-dot-product attention
    # (== nn.MultiheadAttention(input_dim, num_heads=1) in eval mode).
    q = mm(x1, wq_ref[...], bq_ref[...])                       # (S, M)
    kv = mm(x2, wkv_ref[...], bkv_ref[...])                    # (S, 2M)
    k = kv[:, :m]
    v = kv[:, m:]
    s = lax.dot_general(q.astype(bf16), k.astype(bf16),
                        (((1,), (1,)), ((), ())),
                        preferred_element_type=f32)            # (S, S)
    s = s - jnp.max(s, axis=-1, keepdims=True)
    p = jnp.exp(s)
    p = p / jnp.sum(p, axis=-1, keepdims=True)
    attn = jnp.dot(p, v, preferred_element_type=f32)           # f32 PV (accuracy)
    attn_out = mm(attn, wo_ref[...], bo_ref[...])              # (S, M)

    # ---- layer_norm(x1 + attn_out)  (residual folded in) ----
    # TODO(synk): 'fused_features' is used before assignment in the reference
    # forward; reconstructed as layer_norm(x1 + attn_output).
    z = x1 + attn_out
    mu = jnp.mean(z, axis=-1, keepdims=True)
    zc = z - mu
    var = jnp.mean(zc * zc, axis=-1, keepdims=True)            # biased (torch LN)
    fused = zc * lax.rsqrt(var + eps) * ln_g_ref[...] + ln_b_ref[...]

    # ---- feed-forward with residual ----
    ff = mm(jnp.maximum(mm(fused, wff1_ref[...], bff1_ref[...]), 0.0),
            wff2_ref[...], bff2_ref[...])
    fused = fused + ff                                         # (S, M)

    # ---- DeepAttnMISL (dropout = identity in eval mode) ----
    kc = w2_buf.shape[0]
    l_dim = w2_buf.shape[1]

    # all first-layer phis in one matmul against the concatenated weights
    h1_all = jnp.maximum(mm(fused, w1_ref[...], b1_ref[...]), 0.0)   # (S, K*L)

    # per-cluster second phi layer; weights arrive via the overlapped DMA
    cp_w2.wait()
    h_parts = []
    for j in range(kc):                                        # static unroll
        h1 = h1_all[:, j * l_dim:(j + 1) * l_dim]              # (S, L)
        h_parts.append(jnp.maximum(mm(h1, w2_buf[j], b2_ref[j]), 0.0))
    h_all = jnp.concatenate(h_parts, axis=0)                   # (K*S, L)

    # shared-weight attention_net layers batched over all clusters at once
    cp_fc.wait()
    cp_wa.wait()
    cp_wb.wait()
    hfc_all = jnp.maximum(mm(h_all, wfc_buf[...], bfc_ref[...]), 0.0)  # (K*S, L)
    a_all = jnp.tanh(mm(hfc_all, wa_buf[...], ba_ref[...]))            # (K*S, D)
    g_all = jax.nn.sigmoid(mm(hfc_all, wb_buf[...], bb_ref[...]))      # (K*S, D)
    # 1-wide gated-attention logit as a lane reduce (no N=1 matmul)
    logit_all = (jnp.sum(a_all * g_all * wc_ref[...], axis=-1, keepdims=True)
                 + bc_ref[...])                                        # (K*S, 1)

    # softmax over clusters + pooling, streaming per-cluster slab slices
    max_l = logit_all[0:s_len]
    for j in range(1, kc):
        max_l = jnp.maximum(max_l, logit_all[j * s_len:(j + 1) * s_len])
    denom = jnp.zeros((s_len, 1), f32)
    pooled = jnp.zeros((s_len, l_dim), f32)
    for j in range(kc):
        wgt = jnp.exp(logit_all[j * s_len:(j + 1) * s_len] - max_l)    # (S, 1)
        denom = denom + wgt
        pooled = pooled + wgt * hfc_all[j * s_len:(j + 1) * s_len]
    pooled = pooled / denom                                            # (S, L)

    out = jnp.maximum(mm(pooled, wrho_ref[...], brho_ref[...]), 0.0)   # (S, M)
    o_ref[...] = out


# ----------------------------- parameters -----------------------------

def _init_linear(key, fan_in, fan_out):
    # PyTorch nn.Linear default init: U(-1/sqrt(fan_in), 1/sqrt(fan_in))
    k1, k2 = jax.random.split(key)
    bound = 1.0 / (fan_in ** 0.5)
    w = jax.random.uniform(k1, (fan_in, fan_out), jnp.float32, -bound, bound)
    b = jax.random.uniform(k2, (fan_out,), jnp.float32, -bound, bound)
    return w, b


def init_params(key, input_dim, num_clusters, size):
    """Raw f32 parameters (PyTorch-equivalent layout, matmul orientation)."""
    m = input_dim
    l_dim, d_dim = size[1], size[2]
    keys = iter(jax.random.split(key, 11 + 2 * num_clusters))

    wq, bq = _init_linear(next(keys), m, m)
    wk, bk = _init_linear(next(keys), m, m)
    wv, bv = _init_linear(next(keys), m, m)
    wo, bo = _init_linear(next(keys), m, m)
    wff1, bff1 = _init_linear(next(keys), m, 4 * m)
    wff2, bff2 = _init_linear(next(keys), 4 * m, m)

    w1s, b1s, w2s, b2s = [], [], [], []
    for _ in range(num_clusters):
        w1, b1 = _init_linear(next(keys), m, l_dim)
        w2, b2 = _init_linear(next(keys), l_dim, l_dim)
        w1s.append(w1); b1s.append(b1); w2s.append(w2); b2s.append(b2)

    wfc, bfc = _init_linear(next(keys), l_dim, l_dim)
    wa, ba = _init_linear(next(keys), l_dim, d_dim)
    wb, bb = _init_linear(next(keys), l_dim, d_dim)
    wc, bc = _init_linear(next(keys), d_dim, 1)
    wrho, brho = _init_linear(next(keys), l_dim, m)

    return {
        "wq": wq, "bq": bq.reshape(1, m),
        "wkv": jnp.concatenate([wk, wv], axis=1),                  # (M, 2M)
        "bkv": jnp.concatenate([bk, bv]).reshape(1, 2 * m),
        "wo": wo, "bo": bo.reshape(1, m),
        "ln_g": jnp.ones((1, m), jnp.float32),
        "ln_b": jnp.zeros((1, m), jnp.float32),
        "wff1": wff1, "bff1": bff1.reshape(1, 4 * m),
        "wff2": wff2, "bff2": bff2.reshape(1, m),
        "w1": jnp.concatenate(w1s, axis=1),                        # (M, K*L)
        "b1": jnp.concatenate(b1s).reshape(1, num_clusters * l_dim),
        "w2": jnp.stack(w2s, axis=0),                              # (K, L, L)
        "b2": jnp.stack(b2s, axis=0).reshape(num_clusters, 1, l_dim),
        "wfc": wfc, "bfc": bfc.reshape(1, l_dim),
        "wa": wa, "ba": ba.reshape(1, d_dim),
        "wb": wb, "bb": bb.reshape(1, d_dim),
        "wc": wc.T.reshape(1, d_dim),                              # row for lane-reduce
        "bc": bc.reshape(1, 1),
        "wrho": wrho, "brho": brho.reshape(1, m),
    }


# MXU weights stored in bf16 (once); biases / LN affine / gated-attn row stay f32.
_MXU_WEIGHTS = ("wq", "wkv", "wo", "wff1", "wff2",
                "w1", "w2", "wfc", "wa", "wb", "wrho")


def prepare_params(params, input_dim):
    """Kernel-ready params: scale folded into wq/bq, MXU weights pre-cast bf16."""
    p = dict(params)
    scale = jnp.float32(1.0 / (input_dim ** 0.5))
    p["wq"] = p["wq"] * scale
    p["bq"] = p["bq"] * scale
    for name in _MXU_WEIGHTS:
        p[name] = p[name].astype(jnp.bfloat16)
    return p


# ----------------------------- forward pass -----------------------------

def damisl_fusion2_forward(kparams, x1, x2):
    b, s, m = x1.shape
    assert b == 1, "reference forward (squeeze(0) in DeepAttnMISL) assumes batch 1"
    x1_t = x1[0].astype(jnp.float32)        # (S, M)
    x2_t = x2[0].astype(jnp.float32)        # (S, M)

    p = kparams
    kc, l_dim, _ = p["w2"].shape
    d_dim = p["wa"].shape[1]

    vmem = pl.BlockSpec(memory_space=pltpu.MemorySpace.VMEM)
    hbm = pl.BlockSpec(memory_space=pl.ANY)   # manual DMA, overlapped with prelude

    inputs = [
        (x1_t, vmem), (x2_t, vmem),
        (p["wq"], vmem), (p["bq"], vmem),
        (p["wkv"], vmem), (p["bkv"], vmem),
        (p["wo"], vmem), (p["bo"], vmem),
        (p["ln_g"], vmem), (p["ln_b"], vmem),
        (p["wff1"], vmem), (p["bff1"], vmem),
        (p["wff2"], vmem), (p["bff2"], vmem),
        (p["w1"], vmem), (p["b1"], vmem),
        (p["w2"], hbm), (p["b2"], vmem),
        (p["wfc"], hbm), (p["bfc"], vmem),
        (p["wa"], hbm), (p["ba"], vmem),
        (p["wb"], hbm), (p["bb"], vmem),
        (p["wc"], vmem), (p["bc"], vmem),
        (p["wrho"], vmem), (p["brho"], vmem),
    ]
    args = [a for a, _ in inputs]
    specs = [sp for _, sp in inputs]

    out = pl.pallas_call(
        functools.partial(_fused_kernel, eps=1e-5),
        out_shape=jax.ShapeDtypeStruct((s, m), jnp.float32),
        in_specs=specs,
        out_specs=pl.BlockSpec(memory_space=pltpu.MemorySpace.VMEM),
        scratch_shapes=[
            pltpu.VMEM((kc, l_dim, l_dim), jnp.bfloat16),   # w2
            pltpu.VMEM((l_dim, l_dim), jnp.bfloat16),       # wfc
            pltpu.VMEM((l_dim, d_dim), jnp.bfloat16),       # wa
            pltpu.VMEM((l_dim, d_dim), jnp.bfloat16),       # wb
            pltpu.SemaphoreType.DMA((4,)),
        ],
        compiler_params=pltpu.CompilerParams(
            vmem_limit_bytes=16 * 1024 * 1024,
        ),
    )(*args)
    return out.reshape(1, s, m)


# ----------------------------- pure-JAX reference -----------------------------

def _ref_forward(params, x1, x2, eps=1e-5):
    x1_t = x1[0]
    x2_t = x2[0]
    m = x1_t.shape[-1]
    q = x1_t @ params["wq"] + params["bq"]
    kv = x2_t @ params["wkv"] + params["bkv"]
    k, v = kv[:, :m], kv[:, m:]
    s = (q @ k.T) / jnp.sqrt(jnp.float32(m))
    attn = jax.nn.softmax(s, axis=-1) @ v
    attn_out = attn @ params["wo"] + params["bo"]
    z = x1_t + attn_out
    mu = jnp.mean(z, -1, keepdims=True)
    var = jnp.mean((z - mu) ** 2, -1, keepdims=True)
    fused = (z - mu) * lax.rsqrt(var + eps) * params["ln_g"] + params["ln_b"]
    ff = jnp.maximum(fused @ params["wff1"] + params["bff1"], 0.0) \
        @ params["wff2"] + params["bff2"]
    fused = fused + ff
    kc, l_dim, _ = params["w2"].shape
    h1_all = jnp.maximum(fused @ params["w1"] + params["b1"], 0.0)
    logits, hfcs = [], []
    for j in range(kc):
        h1 = h1_all[:, j * l_dim:(j + 1) * l_dim]
        h = jnp.maximum(h1 @ params["w2"][j] + params["b2"][j], 0.0)
        hfc = jnp.maximum(h @ params["wfc"] + params["bfc"], 0.0)
        a = jnp.tanh(hfc @ params["wa"] + params["ba"])
        g = jax.nn.sigmoid(hfc @ params["wb"] + params["bb"])
        logits.append(jnp.sum(a * g * params["wc"], -1, keepdims=True) + params["bc"])
        hfcs.append(hfc)
    pa = jax.nn.softmax(jnp.concatenate(logits, -1), axis=-1)     # (S, K)
    hstack = jnp.stack(hfcs, axis=1)                              # (S, K, L)
    pooled = jnp.einsum("nk,nkl->nl", pa, hstack)
    out = jnp.maximum(pooled @ params["wrho"] + params["brho"], 0.0)
    return out.reshape(1, out.shape[0], out.shape[1])


# ----------------------------- demo -----------------------------

if __name__ == "__main__":
    INPUT_DIM = 128
    NUM_CLUSTERS = 4
    SEQ = 16
    BATCH = 1
    SIZE = [1024, 512, 256]  # size_dict['small']

    key = jax.random.PRNGKey(0)
    pkey, xkey1, xkey2 = jax.random.split(key, 3)
    raw_params = init_params(pkey, INPUT_DIM, NUM_CLUSTERS, SIZE)
    kparams = prepare_params(raw_params, INPUT_DIM)     # bf16 weights, scale folded
    x1 = jax.random.normal(xkey1, (BATCH, SEQ, INPUT_DIM), jnp.float32)
    x2 = jax.random.normal(xkey2, (BATCH, SEQ, INPUT_DIM), jnp.float32)

    fwd = jax.jit(damisl_fusion2_forward)
    out = jax.block_until_ready(fwd(kparams, x1, x2))
    assert out.shape == (BATCH, SEQ, INPUT_DIM)
    assert bool(jnp.all(jnp.isfinite(out)))

    # sanity vs. f32 pure-JAX reference (kernel uses bf16 MXU operands)
    ref = _ref_forward(raw_params, x1, x2)
    max_err = float(jnp.max(jnp.abs(out - ref)))
    assert max_err < 1e-1, f"max abs err too large: {max_err}"

    print("KERNEL_OK")
</pallas_src>

<mosaic_0001>
module attributes {stable_mosaic.version = 11 : i64} {
  func.func @_fused_kernel(%arg0: memref<16x128xf32, #tpu.memory_space<vmem>>, %arg1: memref<16x128xf32, #tpu.memory_space<vmem>>, %arg2: memref<128x128xbf16, #tpu.memory_space<vmem>>, %arg3: memref<1x128xf32, #tpu.memory_space<vmem>>, %arg4: memref<128x256xbf16, #tpu.memory_space<vmem>>, %arg5: memref<1x256xf32, #tpu.memory_space<vmem>>, %arg6: memref<128x128xbf16, #tpu.memory_space<vmem>>, %arg7: memref<1x128xf32, #tpu.memory_space<vmem>>, %arg8: memref<1x128xf32, #tpu.memory_space<vmem>>, %arg9: memref<1x128xf32, #tpu.memory_space<vmem>>, %arg10: memref<128x512xbf16, #tpu.memory_space<vmem>>, %arg11: memref<1x512xf32, #tpu.memory_space<vmem>>, %arg12: memref<512x128xbf16, #tpu.memory_space<vmem>>, %arg13: memref<1x128xf32, #tpu.memory_space<vmem>>, %arg14: memref<128x2048xbf16, #tpu.memory_space<vmem>>, %arg15: memref<1x2048xf32, #tpu.memory_space<vmem>>, %arg16: memref<4x512x512xbf16, #tpu.memory_space<any>>, %arg17: memref<4x1x512xf32, #tpu.memory_space<vmem>>, %arg18: memref<512x512xbf16, #tpu.memory_space<any>>, %arg19: memref<1x512xf32, #tpu.memory_space<vmem>>, %arg20: memref<512x256xbf16, #tpu.memory_space<any>>, %arg21: memref<1x256xf32, #tpu.memory_space<vmem>>, %arg22: memref<512x256xbf16, #tpu.memory_space<any>>, %arg23: memref<1x256xf32, #tpu.memory_space<vmem>>, %arg24: memref<1x256xf32, #tpu.memory_space<vmem>>, %arg25: memref<1x1xf32, #tpu.memory_space<vmem>>, %arg26: memref<512x128xbf16, #tpu.memory_space<vmem>>, %arg27: memref<1x128xf32, #tpu.memory_space<vmem>>, %arg28: memref<16x128xf32, #tpu.memory_space<vmem>>, %arg29: memref<4x512x512xbf16, #tpu.memory_space<vmem>>, %arg30: memref<512x512xbf16, #tpu.memory_space<vmem>>, %arg31: memref<512x256xbf16, #tpu.memory_space<vmem>>, %arg32: memref<512x256xbf16, #tpu.memory_space<vmem>>, %arg33: memref<4x!tpu.dma_semaphore, #tpu.memory_space<semaphore_mem>>) attributes {dimension_semantics = [], scalar_prefetch = 0 : i64, scratch_operands = 5 : i64, tpu.core_type = #tpu.core_type<tc>} {
    %c0_i32 = arith.constant 0 : i32
    %0 = tpu.memref_slice %arg33[%c0_i32] : memref<4x!tpu.dma_semaphore, #tpu.memory_space<semaphore_mem>> -> memref<1x!tpu.dma_semaphore, #tpu.memory_space<semaphore_mem>>
    %1 = tpu.memref_squeeze %0 : memref<1x!tpu.dma_semaphore, #tpu.memory_space<semaphore_mem>> -> memref<!tpu.dma_semaphore, #tpu.memory_space<semaphore_mem>>
    tpu.enqueue_dma source(%arg16 : memref<4x512x512xbf16, #tpu.memory_space<any>>) target(%arg29 : memref<4x512x512xbf16, #tpu.memory_space<vmem>>) target_semaphore(%1 : memref<!tpu.dma_semaphore, #tpu.memory_space<semaphore_mem>>)
    %c1_i32 = arith.constant 1 : i32
    %2 = tpu.memref_slice %arg33[%c1_i32] : memref<4x!tpu.dma_semaphore, #tpu.memory_space<semaphore_mem>> -> memref<1x!tpu.dma_semaphore, #tpu.memory_space<semaphore_mem>>
    %3 = tpu.memref_squeeze %2 : memref<1x!tpu.dma_semaphore, #tpu.memory_space<semaphore_mem>> -> memref<!tpu.dma_semaphore, #tpu.memory_space<semaphore_mem>>
    tpu.enqueue_dma source(%arg18 : memref<512x512xbf16, #tpu.memory_space<any>>) target(%arg30 : memref<512x512xbf16, #tpu.memory_space<vmem>>) target_semaphore(%3 : memref<!tpu.dma_semaphore, #tpu.memory_space<semaphore_mem>>)
    %c2_i32 = arith.constant 2 : i32
    %4 = tpu.memref_slice %arg33[%c2_i32] : memref<4x!tpu.dma_semaphore, #tpu.memory_space<semaphore_mem>> -> memref<1x!tpu.dma_semaphore, #tpu.memory_space<semaphore_mem>>
    %5 = tpu.memref_squeeze %4 : memref<1x!tpu.dma_semaphore, #tpu.memory_space<semaphore_mem>> -> memref<!tpu.dma_semaphore, #tpu.memory_space<semaphore_mem>>
    tpu.enqueue_dma source(%arg20 : memref<512x256xbf16, #tpu.memory_space<any>>) target(%arg31 : memref<512x256xbf16, #tpu.memory_space<vmem>>) target_semaphore(%5 : memref<!tpu.dma_semaphore, #tpu.memory_space<semaphore_mem>>)
    %c3_i32 = arith.constant 3 : i32
    %6 = tpu.memref_slice %arg33[%c3_i32] : memref<4x!tpu.dma_semaphore, #tpu.memory_space<semaphore_mem>> -> memref<1x!tpu.dma_semaphore, #tpu.memory_space<semaphore_mem>>
    %7 = tpu.memref_squeeze %6 : memref<1x!tpu.dma_semaphore, #tpu.memory_space<semaphore_mem>> -> memref<!tpu.dma_semaphore, #tpu.memory_space<semaphore_mem>>
    tpu.enqueue_dma source(%arg22 : memref<512x256xbf16, #tpu.memory_space<any>>) target(%arg32 : memref<512x256xbf16, #tpu.memory_space<vmem>>) target_semaphore(%7 : memref<!tpu.dma_semaphore, #tpu.memory_space<semaphore_mem>>)
    %c0 = arith.constant 0 : index
    %c0_0 = arith.constant 0 : index
    %8 = vector.load %arg0[%c0, %c0_0] : memref<16x128xf32, #tpu.memory_space<vmem>>, vector<16x128xf32>
    %c0_1 = arith.constant 0 : index
    %c0_2 = arith.constant 0 : index
    %9 = vector.load %arg1[%c0_1, %c0_2] : memref<16x128xf32, #tpu.memory_space<vmem>>, vector<16x128xf32>
    %c0_3 = arith.constant 0 : index
    %c0_4 = arith.constant 0 : index
    %10 = vector.load %arg2[%c0_3, %c0_4] : memref<128x128xbf16, #tpu.memory_space<vmem>>, vector<128x128xbf16>
    %c0_5 = arith.constant 0 : index
    %c0_6 = arith.constant 0 : index
    %11 = vector.load %arg3[%c0_5, %c0_6] : memref<1x128xf32, #tpu.memory_space<vmem>>, vector<1x128xf32>
    %12 = arith.truncf %8 : vector<16x128xf32> to vector<16x128xbf16>
    %cst = arith.constant dense<0.000000e+00> : vector<16x128xf32>
    %13 = tpu.matmul %12, %10, %cst {dimension_numbers = #tpu.dot_dimension_numbers<[1], [0], [0], [1], [0, 0, 1, 1], [], []>} : vector<16x128xbf16>, vector<128x128xbf16>, vector<16x128xf32> -> vector<16x128xf32>
    %14 = vector.broadcast %11 : vector<1x128xf32> to vector<16x128xf32>
    %15 = arith.addf %13, %14 : vector<16x128xf32>
    %c0_7 = arith.constant 0 : index
    %c0_8 = arith.constant 0 : index
    %16 = vector.load %arg4[%c0_7, %c0_8] : memref<128x256xbf16, #tpu.memory_space<vmem>>, vector<128x256xbf16>
    %c0_9 = arith.constant 0 : index
    %c0_10 = arith.constant 0 : index
    %17 = vector.load %arg5[%c0_9, %c0_10] : memref<1x256xf32, #tpu.memory_space<vmem>>, vector<1x256xf32>
    %18 = arith.truncf %9 : vector<16x128xf32> to vector<16x128xbf16>
    %cst_11 = arith.constant dense<0.000000e+00> : vector<16x256xf32>
    %19 = tpu.matmul %18, %16, %cst_11 {dimension_numbers = #tpu.dot_dimension_numbers<[1], [0], [0], [1], [0, 0, 1, 1], [], []>} : vector<16x128xbf16>, vector<128x256xbf16>, vector<16x256xf32> -> vector<16x256xf32>
    %20 = vector.broadcast %17 : vector<1x256xf32> to vector<16x256xf32>
    %21 = arith.addf %19, %20 : vector<16x256xf32>
    %22 = vector.extract_strided_slice %21 {offsets = [0, 0], sizes = [16, 128], strides = [1, 1]} : vector<16x256xf32> to vector<16x128xf32>
    %23 = vector.extract_strided_slice %21 {offsets = [0, 128], sizes = [16, 128], strides = [1, 1]} : vector<16x256xf32> to vector<16x128xf32>
    %24 = arith.truncf %15 : vector<16x128xf32> to vector<16x128xbf16>
    %25 = arith.truncf %22 : vector<16x128xf32> to vector<16x128xbf16>
    %cst_12 = arith.constant dense<0.000000e+00> : vector<16x16xf32>
    %26 = tpu.matmul %24, %25, %cst_12 {dimension_numbers = #tpu.dot_dimension_numbers<[1], [1], [0], [0], [0, 0, 1, 0], [], []>} : vector<16x128xbf16>, vector<16x128xbf16>, vector<16x16xf32> -> vector<16x16xf32>
    %cst_13 = arith.constant dense<0xFF800000> : vector<16xf32>
    %27 = vector.multi_reduction <maximumf>, %26, %cst_13 [1] : vector<16x16xf32> to vector<16xf32>
    %28 = vector.shape_cast %27 : vector<16xf32> to vector<16x1xf32>
    %29 = vector.broadcast %28 : vector<16x1xf32> to vector<16x16xf32>
    %30 = arith.subf %26, %29 : vector<16x16xf32>
    %31 = math.exp %30 : vector<16x16xf32>
    %cst_14 = arith.constant dense<0.000000e+00> : vector<16xf32>
    %32 = vector.multi_reduction <add>, %31, %cst_14 [1] : vector<16x16xf32> to vector<16xf32>
    %33 = vector.shape_cast %32 : vector<16xf32> to vector<16x1xf32>
    %34 = vector.broadcast %33 : vector<16x1xf32> to vector<16x16xf32>
    %35 = arith.divf %31, %34 : vector<16x16xf32>
    %cst_15 = arith.constant dense<0.000000e+00> : vector<16x128xf32>
    %36 = tpu.matmul %35, %23, %cst_15 {dimension_numbers = #tpu.dot_dimension_numbers<[1], [0], [0], [1], [0, 0, 1, 1], [], []>} : vector<16x16xf32>, vector<16x128xf32>, vector<16x128xf32> -> vector<16x128xf32>
    %c0_16 = arith.constant 0 : index
    %c0_17 = arith.constant 0 : index
    %37 = vector.load %arg6[%c0_16, %c0_17] : memref<128x128xbf16, #tpu.memory_space<vmem>>, vector<128x128xbf16>
    %c0_18 = arith.constant 0 : index
    %c0_19 = arith.constant 0 : index
    %38 = vector.load %arg7[%c0_18, %c0_19] : memref<1x128xf32, #tpu.memory_space<vmem>>, vector<1x128xf32>
    %39 = arith.truncf %36 : vector<16x128xf32> to vector<16x128xbf16>
    %cst_20 = arith.constant dense<0.000000e+00> : vector<16x128xf32>
    %40 = tpu.matmul %39, %37, %cst_20 {dimension_numbers = #tpu.dot_dimension_numbers<[1], [0], [0], [1], [0, 0, 1, 1], [], []>} : vector<16x128xbf16>, vector<128x128xbf16>, vector<16x128xf32> -> vector<16x128xf32>
    %41 = vector.broadcast %38 : vector<1x128xf32> to vector<16x128xf32>
    %42 = arith.addf %40, %41 : vector<16x128xf32>
    %43 = arith.addf %8, %42 : vector<16x128xf32>
    %cst_21 = arith.constant dense<0.000000e+00> : vector<16xf32>
    %44 = vector.multi_reduction <add>, %43, %cst_21 [1] : vector<16x128xf32> to vector<16xf32>
    %45 = vector.shape_cast %44 : vector<16xf32> to vector<16x1xf32>
    %cst_22 = arith.constant 1.280000e+02 : f32
    %46 = vector.broadcast %cst_22 : f32 to vector<16x1xf32>
    %47 = arith.divf %45, %46 : vector<16x1xf32>
    %48 = vector.broadcast %47 : vector<16x1xf32> to vector<16x128xf32>
    %49 = arith.subf %43, %48 : vector<16x128xf32>
    %50 = arith.mulf %49, %49 : vector<16x128xf32>
    %cst_23 = arith.constant dense<0.000000e+00> : vector<16xf32>
    %51 = vector.multi_reduction <add>, %50, %cst_23 [1] : vector<16x128xf32> to vector<16xf32>
    %52 = vector.shape_cast %51 : vector<16xf32> to vector<16x1xf32>
    %cst_24 = arith.constant 1.280000e+02 : f32
    %53 = vector.broadcast %cst_24 : f32 to vector<16x1xf32>
    %54 = arith.divf %52, %53 : vector<16x1xf32>
    %cst_25 = arith.constant 9.99999974E-6 : f32
    %55 = vector.broadcast %cst_25 : f32 to vector<16x1xf32>
    %56 = arith.addf %54, %55 : vector<16x1xf32>
    %57 = math.rsqrt %56 : vector<16x1xf32>
    %58 = vector.broadcast %57 : vector<16x1xf32> to vector<16x128xf32>
    %59 = arith.mulf %49, %58 : vector<16x128xf32>
    %c0_26 = arith.constant 0 : index
    %c0_27 = arith.constant 0 : index
    %60 = vector.load %arg8[%c0_26, %c0_27] : memref<1x128xf32, #tpu.memory_space<vmem>>, vector<1x128xf32>
    %61 = vector.broadcast %60 : vector<1x128xf32> to vector<16x128xf32>
    %62 = arith.mulf %59, %61 : vector<16x128xf32>
    %c0_28 = arith.constant 0 : index
    %c0_29 = arith.constant 0 : index
    %63 = vector.load %arg9[%c0_28, %c0_29] : memref<1x128xf32, #tpu.memory_space<vmem>>, vector<1x128xf32>
    %64 = vector.broadcast %63 : vector<1x128xf32> to vector<16x128xf32>
    %65 = arith.addf %62, %64 : vector<16x128xf32>
    %c0_30 = arith.constant 0 : index
    %c0_31 = arith.constant 0 : index
    %66 = vector.load %arg10[%c0_30, %c0_31] : memref<128x512xbf16, #tpu.memory_space<vmem>>, vector<128x512xbf16>
    %c0_32 = arith.constant 0 : index
    %c0_33 = arith.constant 0 : index
    %67 = vector.load %arg11[%c0_32, %c0_33] : memref<1x512xf32, #tpu.memory_space<vmem>>, vector<1x512xf32>
    %68 = arith.truncf %65 : vector<16x128xf32> to vector<16x128xbf16>
    %cst_34 = arith.constant dense<0.000000e+00> : vector<16x512xf32>
    %69 = tpu.matmul %68, %66, %cst_34 {dimension_numbers = #tpu.dot_dimension_numbers<[1], [0], [0], [1], [0, 0, 1, 1], [], []>} : vector<16x128xbf16>, vector<128x512xbf16>, vector<16x512xf32> -> vector<16x512xf32>
    %70 = vector.broadcast %67 : vector<1x512xf32> to vector<16x512xf32>
    %71 = arith.addf %69, %70 : vector<16x512xf32>
    %cst_35 = arith.constant 0.000000e+00 : f32
    %72 = vector.broadcast %cst_35 : f32 to vector<16x512xf32>
    %73 = arith.maximumf %71, %72 : vector<16x512xf32>
    %c0_36 = arith.constant 0 : index
    %c0_37 = arith.constant 0 : index
    %74 = vector.load %arg12[%c0_36, %c0_37] : memref<512x128xbf16, #tpu.memory_space<vmem>>, vector<512x128xbf16>
    %c0_38 = arith.constant 0 : index
    %c0_39 = arith.constant 0 : index
    %75 = vector.load %arg13[%c0_38, %c0_39] : memref<1x128xf32, #tpu.memory_space<vmem>>, vector<1x128xf32>
    %76 = arith.truncf %73 : vector<16x512xf32> to vector<16x512xbf16>
    %cst_40 = arith.constant dense<0.000000e+00> : vector<16x128xf32>
    %77 = tpu.matmul %76, %74, %cst_40 {dimension_numbers = #tpu.dot_dimension_numbers<[1], [0], [0], [1], [0, 0, 1, 1], [], []>} : vector<16x512xbf16>, vector<512x128xbf16>, vector<16x128xf32> -> vector<16x128xf32>
    %78 = vector.broadcast %75 : vector<1x128xf32> to vector<16x128xf32>
    %79 = arith.addf %77, %78 : vector<16x128xf32>
    %80 = arith.addf %65, %79 : vector<16x128xf32>
    %c0_41 = arith.constant 0 : index
    %c0_42 = arith.constant 0 : index
    %81 = vector.load %arg14[%c0_41, %c0_42] : memref<128x2048xbf16, #tpu.memory_space<vmem>>, vector<128x2048xbf16>
    %c0_43 = arith.constant 0 : index
    %c0_44 = arith.constant 0 : index
    %82 = vector.load %arg15[%c0_43, %c0_44] : memref<1x2048xf32, #tpu.memory_space<vmem>>, vector<1x2048xf32>
    %83 = arith.truncf %80 : vector<16x128xf32> to vector<16x128xbf16>
    %cst_45 = arith.constant dense<0.000000e+00> : vector<16x2048xf32>
    %84 = tpu.matmul %83, %81, %cst_45 {dimension_numbers = #tpu.dot_dimension_numbers<[1], [0], [0], [1], [0, 0, 1, 1], [], []>} : vector<16x128xbf16>, vector<128x2048xbf16>, vector<16x2048xf32> -> vector<16x2048xf32>
    %85 = vector.broadcast %82 : vector<1x2048xf32> to vector<16x2048xf32>
    %86 = arith.addf %84, %85 : vector<16x2048xf32>
    %cst_46 = arith.constant 0.000000e+00 : f32
    %87 = vector.broadcast %cst_46 : f32 to vector<16x2048xf32>
    %88 = arith.maximumf %86, %87 : vector<16x2048xf32>
    %c0_i32_47 = arith.constant 0 : i32
    %89 = tpu.memref_slice %arg33[%c0_i32_47] : memref<4x!tpu.dma_semaphore, #tpu.memory_space<semaphore_mem>> -> memref<1x!tpu.dma_semaphore, #tpu.memory_space<semaphore_mem>>
    %90 = tpu.memref_squeeze %89 : memref<1x!tpu.dma_semaphore, #tpu.memory_space<semaphore_mem>> -> memref<!tpu.dma_semaphore, #tpu.memory_space<semaphore_mem>>
    tpu.wait_dma2 semaphore(%90 : memref<!tpu.dma_semaphore, #tpu.memory_space<semaphore_mem>>) src(%arg16 : memref<4x512x512xbf16, #tpu.memory_space<any>>) dst(%arg29 : memref<4x512x512xbf16, #tpu.memory_space<vmem>>)
    %91 = vector.extract_strided_slice %88 {offsets = [0, 0], sizes = [16, 512], strides = [1, 1]} : vector<16x2048xf32> to vector<16x512xf32>
    %c0_48 = arith.constant 0 : index
    %c0_49 = arith.constant 0 : index
    %c0_50 = arith.constant 0 : index
    %92 = vector.load %arg29[%c0_48, %c0_49, %c0_50] : memref<4x512x512xbf16, #tpu.memory_space<vmem>>, vector<1x512x512xbf16>
    %93 = vector.shape_cast %92 : vector<1x512x512xbf16> to vector<512x512xbf16>
    %c0_51 = arith.constant 0 : index
    %c0_52 = arith.constant 0 : index
    %c0_53 = arith.constant 0 : index
    %94 = vector.load %arg17[%c0_51, %c0_52, %c0_53] : memref<4x1x512xf32, #tpu.memory_space<vmem>>, vector<1x1x512xf32>
    %95 = vector.shape_cast %94 : vector<1x1x512xf32> to vector<1x512xf32>
    %96 = arith.truncf %91 : vector<16x512xf32> to vector<16x512xbf16>
    %cst_54 = arith.constant dense<0.000000e+00> : vector<16x512xf32>
    %97 = tpu.matmul %96, %93, %cst_54 {dimension_numbers = #tpu.dot_dimension_numbers<[1], [0], [0], [1], [0, 0, 1, 1], [], []>} : vector<16x512xbf16>, vector<512x512xbf16>, vector<16x512xf32> -> vector<16x512xf32>
    %98 = vector.broadcast %95 : vector<1x512xf32> to vector<16x512xf32>
    %99 = arith.addf %97, %98 : vector<16x512xf32>
    %cst_55 = arith.constant 0.000000e+00 : f32
    %100 = vector.broadcast %cst_55 : f32 to vector<16x512xf32>
    %101 = arith.maximumf %99, %100 : vector<16x512xf32>
    %102 = vector.extract_strided_slice %88 {offsets = [0, 512], sizes = [16, 512], strides = [1, 1]} : vector<16x2048xf32> to vector<16x512xf32>
    %c1 = arith.constant 1 : index
    %c0_56 = arith.constant 0 : index
    %c0_57 = arith.constant 0 : index
    %103 = vector.load %arg29[%c1, %c0_56, %c0_57] : memref<4x512x512xbf16, #tpu.memory_space<vmem>>, vector<1x512x512xbf16>
    %104 = vector.shape_cast %103 : vector<1x512x512xbf16> to vector<512x512xbf16>
    %c1_58 = arith.constant 1 : index
    %c0_59 = arith.constant 0 : index
    %c0_60 = arith.constant 0 : index
    %105 = vector.load %arg17[%c1_58, %c0_59, %c0_60] : memref<4x1x512xf32, #tpu.memory_space<vmem>>, vector<1x1x512xf32>
    %106 = vector.shape_cast %105 : vector<1x1x512xf32> to vector<1x512xf32>
    %107 = arith.truncf %102 : vector<16x512xf32> to vector<16x512xbf16>
    %cst_61 = arith.constant dense<0.000000e+00> : vector<16x512xf32>
    %108 = tpu.matmul %107, %104, %cst_61 {dimension_numbers = #tpu.dot_dimension_numbers<[1], [0], [0], [1], [0, 0, 1, 1], [], []>} : vector<16x512xbf16>, vector<512x512xbf16>, vector<16x512xf32> -> vector<16x512xf32>
    %109 = vector.broadcast %106 : vector<1x512xf32> to vector<16x512xf32>
    %110 = arith.addf %108, %109 : vector<16x512xf32>
    %cst_62 = arith.constant 0.000000e+00 : f32
    %111 = vector.broadcast %cst_62 : f32 to vector<16x512xf32>
    %112 = arith.maximumf %110, %111 : vector<16x512xf32>
    %113 = vector.extract_strided_slice %88 {offsets = [0, 1024], sizes = [16, 512], strides = [1, 1]} : vector<16x2048xf32> to vector<16x512xf32>
    %c2 = arith.constant 2 : index
    %c0_63 = arith.constant 0 : index
    %c0_64 = arith.constant 0 : index
    %114 = vector.load %arg29[%c2, %c0_63, %c0_64] : memref<4x512x512xbf16, #tpu.memory_space<vmem>>, vector<1x512x512xbf16>
    %115 = vector.shape_cast %114 : vector<1x512x512xbf16> to vector<512x512xbf16>
    %c2_65 = arith.constant 2 : index
    %c0_66 = arith.constant 0 : index
    %c0_67 = arith.constant 0 : index
    %116 = vector.load %arg17[%c2_65, %c0_66, %c0_67] : memref<4x1x512xf32, #tpu.memory_space<vmem>>, vector<1x1x512xf32>
    %117 = vector.shape_cast %116 : vector<1x1x512xf32> to vector<1x512xf32>
    %118 = arith.truncf %113 : vector<16x512xf32> to vector<16x512xbf16>
    %cst_68 = arith.constant dense<0.000000e+00> : vector<16x512xf32>
    %119 = tpu.matmul %118, %115, %cst_68 {dimension_numbers = #tpu.dot_dimension_numbers<[1], [0], [0], [1], [0, 0, 1, 1], [], []>} : vector<16x512xbf16>, vector<512x512xbf16>, vector<16x512xf32> -> vector<16x512xf32>
    %120 = vector.broadcast %117 : vector<1x512xf32> to vector<16x512xf32>
    %121 = arith.addf %119, %120 : vector<16x512xf32>
    %cst_69 = arith.constant 0.000000e+00 : f32
    %122 = vector.broadcast %cst_69 : f32 to vector<16x512xf32>
    %123 = arith.maximumf %121, %122 : vector<16x512xf32>
    %124 = vector.extract_strided_slice %88 {offsets = [0, 1536], sizes = [16, 512], strides = [1, 1]} : vector<16x2048xf32> to vector<16x512xf32>
    %c3 = arith.constant 3 : index
    %c0_70 = arith.constant 0 : index
    %c0_71 = arith.constant 0 : index
    %125 = vector.load %arg29[%c3, %c0_70, %c0_71] : memref<4x512x512xbf16, #tpu.memory_space<vmem>>, vector<1x512x512xbf16>
    %126 = vector.shape_cast %125 : vector<1x512x512xbf16> to vector<512x512xbf16>
    %c3_72 = arith.constant 3 : index
    %c0_73 = arith.constant 0 : index
    %c0_74 = arith.constant 0 : index
    %127 = vector.load %arg17[%c3_72, %c0_73, %c0_74] : memref<4x1x512xf32, #tpu.memory_space<vmem>>, vector<1x1x512xf32>
    %128 = vector.shape_cast %127 : vector<1x1x512xf32> to vector<1x512xf32>
    %129 = arith.truncf %124 : vector<16x512xf32> to vector<16x512xbf16>
    %cst_75 = arith.constant dense<0.000000e+00> : vector<16x512xf32>
    %130 = tpu.matmul %129, %126, %cst_75 {dimension_numbers = #tpu.dot_dimension_numbers<[1], [0], [0], [1], [0, 0, 1, 1], [], []>} : vector<16x512xbf16>, vector<512x512xbf16>, vector<16x512xf32> -> vector<16x512xf32>
    %131 = vector.broadcast %128 : vector<1x512xf32> to vector<16x512xf32>
    %132 = arith.addf %130, %131 : vector<16x512xf32>
    %cst_76 = arith.constant 0.000000e+00 : f32
    %133 = vector.broadcast %cst_76 : f32 to vector<16x512xf32>
    %134 = arith.maximumf %132, %133 : vector<16x512xf32>
    %135 = tpu.concatenate %101, %112, %123, %134 in 0 : vector<16x512xf32>, vector<16x512xf32>, vector<16x512xf32>, vector<16x512xf32> -> vector<64x512xf32>
    %c1_i32_77 = arith.constant 1 : i32
    %136 = tpu.memref_slice %arg33[%c1_i32_77] : memref<4x!tpu.dma_semaphore, #tpu.memory_space<semaphore_mem>> -> memref<1x!tpu.dma_semaphore, #tpu.memory_space<semaphore_mem>>
    %137 = tpu.memref_squeeze %136 : memref<1x!tpu.dma_semaphore, #tpu.memory_space<semaphore_mem>> -> memref<!tpu.dma_semaphore, #tpu.memory_space<semaphore_mem>>
    tpu.wait_dma2 semaphore(%137 : memref<!tpu.dma_semaphore, #tpu.memory_space<semaphore_mem>>) src(%arg18 : memref<512x512xbf16, #tpu.memory_space<any>>) dst(%arg30 : memref<512x512xbf16, #tpu.memory_space<vmem>>)
    %c2_i32_78 = arith.constant 2 : i32
    %138 = tpu.memref_slice %arg33[%c2_i32_78] : memref<4x!tpu.dma_semaphore, #tpu.memory_space<semaphore_mem>> -> memref<1x!tpu.dma_semaphore, #tpu.memory_space<semaphore_mem>>
    %139 = tpu.memref_squeeze %138 : memref<1x!tpu.dma_semaphore, #tpu.memory_space<semaphore_mem>> -> memref<!tpu.dma_semaphore, #tpu.memory_space<semaphore_mem>>
    tpu.wait_dma2 semaphore(%139 : memref<!tpu.dma_semaphore, #tpu.memory_space<semaphore_mem>>) src(%arg20 : memref<512x256xbf16, #tpu.memory_space<any>>) dst(%arg31 : memref<512x256xbf16, #tpu.memory_space<vmem>>)
    %c3_i32_79 = arith.constant 3 : i32
    %140 = tpu.memref_slice %arg33[%c3_i32_79] : memref<4x!tpu.dma_semaphore, #tpu.memory_space<semaphore_mem>> -> memref<1x!tpu.dma_semaphore, #tpu.memory_space<semaphore_mem>>
    %141 = tpu.memref_squeeze %140 : memref<1x!tpu.dma_semaphore, #tpu.memory_space<semaphore_mem>> -> memref<!tpu.dma_semaphore, #tpu.memory_space<semaphore_mem>>
    tpu.wait_dma2 semaphore(%141 : memref<!tpu.dma_semaphore, #tpu.memory_space<semaphore_mem>>) src(%arg22 : memref<512x256xbf16, #tpu.memory_space<any>>) dst(%arg32 : memref<512x256xbf16, #tpu.memory_space<vmem>>)
    %c0_80 = arith.constant 0 : index
    %c0_81 = arith.constant 0 : index
    %142 = vector.load %arg30[%c0_80, %c0_81] : memref<512x512xbf16, #tpu.memory_space<vmem>>, vector<512x512xbf16>
    %c0_82 = arith.constant 0 : index
    %c0_83 = arith.constant 0 : index
    %143 = vector.load %arg19[%c0_82, %c0_83] : memref<1x512xf32, #tpu.memory_space<vmem>>, vector<1x512xf32>
    %144 = arith.truncf %135 : vector<64x512xf32> to vector<64x512xbf16>
    %cst_84 = arith.constant dense<0.000000e+00> : vector<64x512xf32>
    %145 = tpu.matmul %144, %142, %cst_84 {dimension_numbers = #tpu.dot_dimension_numbers<[1], [0], [0], [1], [0, 0, 1, 1], [], []>} : vector<64x512xbf16>, vector<512x512xbf16>, vector<64x512xf32> -> vector<64x512xf32>
    %146 = vector.broadcast %143 : vector<1x512xf32> to vector<64x512xf32>
    %147 = arith.addf %145, %146 : vector<64x512xf32>
    %cst_85 = arith.constant 0.000000e+00 : f32
    %148 = vector.broadcast %cst_85 : f32 to vector<64x512xf32>
    %149 = arith.maximumf %147, %148 : vector<64x512xf32>
    %c0_86 = arith.constant 0 : index
    %c0_87 = arith.constant 0 : index
    %150 = vector.load %arg31[%c0_86, %c0_87] : memref<512x256xbf16, #tpu.memory_space<vmem>>, vector<512x256xbf16>
    %c0_88 = arith.constant 0 : index
    %c0_89 = arith.constant 0 : index
    %151 = vector.load %arg21[%c0_88, %c0_89] : memref<1x256xf32, #tpu.memory_space<vmem>>, vector<1x256xf32>
    %152 = arith.truncf %149 : vector<64x512xf32> to vector<64x512xbf16>
    %cst_90 = arith.constant dense<0.000000e+00> : vector<64x256xf32>
    %153 = tpu.matmul %152, %150, %cst_90 {dimension_numbers = #tpu.dot_dimension_numbers<[1], [0], [0], [1], [0, 0, 1, 1], [], []>} : vector<64x512xbf16>, vector<512x256xbf16>, vector<64x256xf32> -> vector<64x256xf32>
    %154 = vector.broadcast %151 : vector<1x256xf32> to vector<64x256xf32>
    %155 = arith.addf %153, %154 : vector<64x256xf32>
    %156 = math.tanh %155 : vector<64x256xf32>
    %c0_91 = arith.constant 0 : index
    %c0_92 = arith.constant 0 : index
    %157 = vector.load %arg32[%c0_91, %c0_92] : memref<512x256xbf16, #tpu.memory_space<vmem>>, vector<512x256xbf16>
    %c0_93 = arith.constant 0 : index
    %c0_94 = arith.constant 0 : index
    %158 = vector.load %arg23[%c0_93, %c0_94] : memref<1x256xf32, #tpu.memory_space<vmem>>, vector<1x256xf32>
    %159 = arith.truncf %149 : vector<64x512xf32> to vector<64x512xbf16>
    %cst_95 = arith.constant dense<0.000000e+00> : vector<64x256xf32>
    %160 = tpu.matmul %159, %157, %cst_95 {dimension_numbers = #tpu.dot_dimension_numbers<[1], [0], [0], [1], [0, 0, 1, 1], [], []>} : vector<64x512xbf16>, vector<512x256xbf16>, vector<64x256xf32> -> vector<64x256xf32>
    %161 = vector.broadcast %158 : vector<1x256xf32> to vector<64x256xf32>
    %162 = arith.addf %160, %161 : vector<64x256xf32>
    %163 = arith.negf %162 : vector<64x256xf32>
    %164 = math.exp %163 : vector<64x256xf32>
    %cst_96 = arith.constant 1.000000e+00 : f32
    %165 = vector.broadcast %cst_96 : f32 to vector<64x256xf32>
    %166 = arith.addf %165, %164 : vector<64x256xf32>
    %167 = arith.divf %165, %166 : vector<64x256xf32>
    %168 = arith.mulf %156, %167 : vector<64x256xf32>
    %c0_97 = arith.constant 0 : index
    %c0_98 = arith.constant 0 : index
    %169 = vector.load %arg24[%c0_97, %c0_98] : memref<1x256xf32, #tpu.memory_space<vmem>>, vector<1x256xf32>
    %170 = vector.broadcast %169 : vector<1x256xf32> to vector<64x256xf32>
    %171 = arith.mulf %168, %170 : vector<64x256xf32>
    %cst_99 = arith.constant dense<0.000000e+00> : vector<64xf32>
    %172 = vector.multi_reduction <add>, %171, %cst_99 [1] : vector<64x256xf32> to vector<64xf32>
    %173 = vector.shape_cast %172 : vector<64xf32> to vector<64x1xf32>
    %c0_100 = arith.constant 0 : index
    %c0_101 = arith.constant 0 : index
    %174 = vector.load %arg25[%c0_100, %c0_101] : memref<1x1xf32, #tpu.memory_space<vmem>>, vector<1x1xf32>
    %175 = vector.broadcast %174 : vector<1x1xf32> to vector<64x1xf32>
    %176 = arith.addf %173, %175 : vector<64x1xf32>
    %177 = vector.extract_strided_slice %176 {offsets = [0, 0], sizes = [16, 1], strides = [1, 1]} : vector<64x1xf32> to vector<16x1xf32>
    %178 = vector.extract_strided_slice %176 {offsets = [16, 0], sizes = [16, 1], strides = [1, 1]} : vector<64x1xf32> to vector<16x1xf32>
    %179 = arith.maximumf %177, %178 : vector<16x1xf32>
    %180 = vector.extract_strided_slice %176 {offsets = [32, 0], sizes = [16, 1], strides = [1, 1]} : vector<64x1xf32> to vector<16x1xf32>
    %181 = arith.maximumf %179, %180 : vector<16x1xf32>
    %182 = vector.extract_strided_slice %176 {offsets = [48, 0], sizes = [16, 1], strides = [1, 1]} : vector<64x1xf32> to vector<16x1xf32>
    %183 = arith.maximumf %181, %182 : vector<16x1xf32>
    %cst_102 = arith.constant 0.000000e+00 : f32
    %184 = vector.broadcast %cst_102 : f32 to vector<16x1xf32>
    %cst_103 = arith.constant 0.000000e+00 : f32
    %185 = vector.broadcast %cst_103 : f32 to vector<16x512xf32>
    %186 = vector.extract_strided_slice %176 {offsets = [0, 0], sizes = [16, 1], strides = [1, 1]} : vector<64x1xf32> to vector<16x1xf32>
    %187 = arith.subf %186, %183 : vector<16x1xf32>
    %188 = math.exp %187 : vector<16x1xf32>
    %189 = arith.addf %184, %188 : vector<16x1xf32>
    %190 = vector.extract_strided_slice %149 {offsets = [0, 0], sizes = [16, 512], strides = [1, 1]} : vector<64x512xf32> to vector<16x512xf32>
    %191 = vector.broadcast %188 : vector<16x1xf32> to vector<16x512xf32>
    %192 = arith.mulf %191, %190 : vector<16x512xf32>
    %193 = arith.addf %185, %192 : vector<16x512xf32>
    %194 = vector.extract_strided_slice %176 {offsets = [16, 0], sizes = [16, 1], strides = [1, 1]} : vector<64x1xf32> to vector<16x1xf32>
    %195 = arith.subf %194, %183 : vector<16x1xf32>
    %196 = math.exp %195 : vector<16x1xf32>
    %197 = arith.addf %189, %196 : vector<16x1xf32>
    %198 = vector.extract_strided_slice %149 {offsets = [16, 0], sizes = [16, 512], strides = [1, 1]} : vector<64x512xf32> to vector<16x512xf32>
    %199 = vector.broadcast %196 : vector<16x1xf32> to vector<16x512xf32>
    %200 = arith.mulf %199, %198 : vector<16x512xf32>
    %201 = arith.addf %193, %200 : vector<16x512xf32>
    %202 = vector.extract_strided_slice %176 {offsets = [32, 0], sizes = [16, 1], strides = [1, 1]} : vector<64x1xf32> to vector<16x1xf32>
    %203 = arith.subf %202, %183 : vector<16x1xf32>
    %204 = math.exp %203 : vector<16x1xf32>
    %205 = arith.addf %197, %204 : vector<16x1xf32>
    %206 = vector.extract_strided_slice %149 {offsets = [32, 0], sizes = [16, 512], strides = [1, 1]} : vector<64x512xf32> to vector<16x512xf32>
    %207 = vector.broadcast %204 : vector<16x1xf32> to vector<16x512xf32>
    %208 = arith.mulf %207, %206 : vector<16x512xf32>
    %209 = arith.addf %201, %208 : vector<16x512xf32>
    %210 = vector.extract_strided_slice %176 {offsets = [48, 0], sizes = [16, 1], strides = [1, 1]} : vector<64x1xf32> to vector<16x1xf32>
    %211 = arith.subf %210, %183 : vector<16x1xf32>
    %212 = math.exp %211 : vector<16x1xf32>
    %213 = arith.addf %205, %212 : vector<16x1xf32>
    %214 = vector.extract_strided_slice %149 {offsets = [48, 0], sizes = [16, 512], strides = [1, 1]} : vector<64x512xf32> to vector<16x512xf32>
    %215 = vector.broadcast %212 : vector<16x1xf32> to vector<16x512xf32>
    %216 = arith.mulf %215, %214 : vector<16x512xf32>
    %217 = arith.addf %209, %216 : vector<16x512xf32>
    %218 = vector.broadcast %213 : vector<16x1xf32> to vector<16x512xf32>
    %219 = arith.divf %217, %218 : vector<16x512xf32>
    %c0_104 = arith.constant 0 : index
    %c0_105 = arith.constant 0 : index
    %220 = vector.load %arg26[%c0_104, %c0_105] : memref<512x128xbf16, #tpu.memory_space<vmem>>, vector<512x128xbf16>
    %c0_106 = arith.constant 0 : index
    %c0_107 = arith.constant 0 : index
    %221 = vector.load %arg27[%c0_106, %c0_107] : memref<1x128xf32, #tpu.memory_space<vmem>>, vector<1x128xf32>
    %222 = arith.truncf %219 : vector<16x512xf32> to vector<16x512xbf16>
    %cst_108 = arith.constant dense<0.000000e+00> : vector<16x128xf32>
    %223 = tpu.matmul %222, %220, %cst_108 {dimension_numbers = #tpu.dot_dimension_numbers<[1], [0], [0], [1], [0, 0, 1, 1], [], []>} : vector<16x512xbf16>, vector<512x128xbf16>, vector<16x128xf32> -> vector<16x128xf32>
    %224 = vector.broadcast %221 : vector<1x128xf32> to vector<16x128xf32>
    %225 = arith.addf %223, %224 : vector<16x128xf32>
    %cst_109 = arith.constant 0.000000e+00 : f32
    %226 = vector.broadcast %cst_109 : f32 to vector<16x128xf32>
    %227 = arith.maximumf %225, %226 : vector<16x128xf32>
    %c0_110 = arith.constant 0 : index
    %c0_111 = arith.constant 0 : index
    %228 = vector.load %arg28[%c0_110, %c0_111] : memref<16x128xf32, #tpu.memory_space<vmem>>, vector<16x128xf32>
    tpu.vector_store %arg28[%c0_110, %c0_111], %227 {strides = array<i32>} : memref<16x128xf32, #tpu.memory_space<vmem>>, vector<16x128xf32>,
    return
  }
}

</mosaic_0001>

<bundles_post_ra>
// kernel: damisl_fusion2_forward.1
= control target key start
LH: loop header
LB: loop body
LE: loop exit
PB: predicated region body
PF: predicated region fallthrough
CT: control target
= control target key end

     0   :  { %s17833_s0 = inlined_call_operand.hbm [shape: f32[16,128], index: 0, kind: input, shape index: {}]   ;;  %s17834_s1 = inlined_call_operand.hbm [shape: f32[16,128], index: 1, kind: input, shape index: {}]   ;;  %s17835_s2 = inlined_call_operand.hbm [shape: bf16[128,128], index: 2, kind: input, shape index: {}]   ;;  %s17836_s3 = inlined_call_operand.hbm [shape: f32[1,128], index: 3, kind: input, shape index: {}]   ;;  %s17837_s4 = inlined_call_operand.hbm [shape: bf16[128,256], index: 4, kind: input, shape index: {}]   ;;  %s17838_s5 = inlined_call_operand.hbm [shape: f32[1,256], index: 5, kind: input, shape index: {}]   ;;  %s17839_s6 = inlined_call_operand.hbm [shape: bf16[128,128], index: 6, kind: input, shape index: {}]   ;;  %s17840_s7 = inlined_call_operand.hbm [shape: f32[1,128], index: 7, kind: input, shape index: {}]   ;;  %s17841_s8 = inlined_call_operand.hbm [shape: f32[1,128], index: 8, kind: input, shape index: {}]   ;;  %s17842_s9 = inlined_call_operand.hbm [shape: f32[1,128], index: 9, kind: input, shape index: {}]   ;;  %s17843_s10 = inlined_call_operand.hbm [shape: bf16[128,512], index: 10, kind: input, shape index: {}]   ;;  %s17844_s11 = inlined_call_operand.hbm [shape: f32[1,512], index: 11, kind: input, shape index: {}]   ;;  %s17845_s12 = inlined_call_operand.hbm [shape: bf16[512,128], index: 12, kind: input, shape index: {}]   ;;  %s17846_s13 = inlined_call_operand.hbm [shape: f32[1,128], index: 13, kind: input, shape index: {}]   ;;  %s17847_s14 = inlined_call_operand.hbm [shape: bf16[128,2048], index: 14, kind: input, shape index: {}]   ;;  %s17848_s15 = inlined_call_operand.hbm [shape: f32[1,2048], index: 15, kind: input, shape index: {}]   ;;  %s17849_s16 = inlined_call_operand.hbm [shape: bf16[4,512,512], index: 16, kind: input, shape index: {}]   ;;  %s17850_s17 = inlined_call_operand.hbm [shape: f32[4,1,512], index: 17, kind: input, shape index: {}]   ;;  %s17851_s18 = inlined_call_operand.hbm [shape: bf16[512,512], index: 18, kind: input, shape index: {}]   ;;  %s17852_s19 = inlined_call_operand.hbm [shape: f32[1,512], index: 19, kind: input, shape index: {}]   ;;  %s17853_s20 = inlined_call_operand.hbm [shape: bf16[512,256], index: 20, kind: input, shape index: {}]   ;;  %s17854_s21 = inlined_call_operand.hbm [shape: f32[1,256], index: 21, kind: input, shape index: {}]   ;;  %s17855_s22 = inlined_call_operand.hbm [shape: bf16[512,256], index: 22, kind: input, shape index: {}]   ;;  %s17856_s23 = inlined_call_operand.hbm [shape: f32[1,256], index: 23, kind: input, shape index: {}]   ;;  %s17857_s24 = inlined_call_operand.hbm [shape: f32[1,256], index: 24, kind: input, shape index: {}]   ;;  %s17858_s25 = inlined_call_operand.<no memory space> [shape: f32[1,1], index: 25, kind: input, shape index: {}]   ;;  %s17859_s26 = inlined_call_operand.hbm [shape: bf16[512,128], index: 26, kind: input, shape index: {}]   ;;  %s17860_s27 = inlined_call_operand.hbm [shape: f32[1,128], index: 27, kind: input, shape index: {}]   ;;  %s17861_s28 = inlined_call_operand.hbm [shape: f32[16,128], index: 28, kind: output, shape index: {}]  }
   0x1   :  { %17913 = sst [smem:[#allocation87_spill]] %s17833_s0  ;;  %v33_v0 = vstv %s17858_s25 }
   0x2   :  { %17914 = sst [smem:[#allocation88_spill]] %s17834_s1  ;;  %34 = vst [vmem:[#allocation7] sm:$0x1] %v33_v0 }
   0x3   :  { %17915 = sst [smem:[#allocation89_spill]] %s17835_s2 }
   0x4   :  { %17916 = sst [smem:[#allocation90_spill]] %s17836_s3 }
   0x5   :  { %17917 = sst [smem:[#allocation91_spill]] %s17837_s4 }
   0x6   :  { %17918 = sst [smem:[#allocation92_spill]] %s17838_s5 }
   0x7   :  { %17919 = sst [smem:[#allocation93_spill]] %s17839_s6 }
   0x8   :  { %17920 = sst [smem:[#allocation94_spill]] %s17840_s7 }
   0x9   :  { %17921 = sst [smem:[#allocation95_spill]] %s17841_s8 }
   0xa   :  { %17922 = sst [smem:[#allocation96_spill]] %s17842_s9 }
   0xb   :  { %17923 = sst [smem:[#allocation97_spill]] %s17843_s10 }
   0xc   :  { %17924 = sst [smem:[#allocation98_spill]] %s17844_s11 }
   0xd   :  { %17925 = sst [smem:[#allocation99_spill]] %s17845_s12 }
   0xe   :  { %17926 = sst [smem:[#allocation100_spill]] %s17855_s22 }
   0xf   :  { %17927 = sst [smem:[#allocation101_spill]] %s17861_s28 }
  0x10   :  { %35 = vsyncpa [#allocation9], 0 }
  0x11   :  { %36 = vsyncpa [#allocation12], 0 }
  0x12   :  { %37 = vsyncpa [#allocation15], 0 }
  0x13   :  { %38 = vsyncpa [#allocation18], 0 }
  0x14   :  { %39 = vsyncpa [#allocation21], 0 }
  0x15   :  { %40 = vsyncpa [#allocation24], 0 }
  0x16   :  { %41 = vsyncpa [#allocation27], 0 }
  0x17   :  { %42 = vsyncpa [#allocation30], 0 }
  0x18   :  { %43 = vsyncpa [#allocation33], 0 }
  0x19   :  { %44 = vsyncpa [#allocation36], 0 }
  0x1a   :  { %45 = vsyncpa [#allocation39], 0 }
  0x1b   :  { %46 = vsyncpa [#allocation42], 0 }
  0x1c   :  { %47 = vsyncpa [#allocation10], 0  ;;  %s17928_s3 = sld [smem:[#allocation88_spill]]  ;;  %s16192_s25 = smov [#allocation11]  }
  0x1d   :  { %s67_s10 = sshll.u32 %s16192_s25, 4  ;;  %s17929_s29 = sld [smem:[#allocation90_spill]]  ;;  %s68_s10 = int_to_ptr.vmem [resolvable:$true] %s67_s10 }
  0x1e   :  { %s17862_s7 = smov 128   ;;  %s17864_s12 = smov 8  }
  0x1f   :  { %s16195_s1 = smov [#allocation14]   ;;  %s17930_s9 = sld [smem:[#allocation92_spill]] }
  0x20   :  { %s94_s4 = sshll.u32 %s16195_s1, 4  ;;  %s17931_s0 = sld [smem:[#allocation94_spill]]  ;;  %s95_s4 = int_to_ptr.vmem [resolvable:$true] %s94_s4 }
  0x21   :  { %s16199_s25 = smov [#allocation26]   ;;  %s16201_s1 = smov [#allocation32]  }
  0x22   :  { %s65_s6 = sshll.u32 %s17928_s3, 4  ;;  %s66_s6 = int_to_ptr.hbm [resolvable:$true] %s65_s6 }
  0x23   :  { %s92_s2 = sshll.u32 %s17929_s29, 4  ;;  %s16196_s29 = smov [#allocation17]   ;;  %s93_s2 = int_to_ptr.hbm [resolvable:$true] %s92_s2 }
  0x24   :  { %73 = dma.hbm_to_vmem [thread:$0]  %s66_s6, 256, %s68_s10, [#allocation12], %s17862_s7, %s17862_s7, %s17864_s12  }
  0x25   :  { %s116_s30 = sshll.u32 %s17930_s9, 4  ;;  %s118_s28 = sshll.u32 %s16196_s29, 4  ;;  %s117_s30 = int_to_ptr.hbm [resolvable:$true] %s116_s30  ;;  %s119_s28 = int_to_ptr.vmem [resolvable:$true] %s118_s28 }
  0x26   :  { %97 = dma.hbm_to_vmem [thread:$0]  %s93_s2, 16, %s95_s4, [#allocation15]  }
  0x27   :  { %s140_s11 = sshll.u32 %s17931_s0, 4  ;;  %s16197_s6 = smov [#allocation20]   ;;  %s141_s11 = int_to_ptr.hbm [resolvable:$true] %s140_s11 }
  0x28   :  { %121 = dma.hbm_to_vmem [thread:$0]  %s117_s30, 32, %s119_s28, [#allocation18]  }
  0x29   :  { %s142_s10 = sshll.u32 %s16197_s6, 4  ;;  %s17932_s12 = sld [smem:[#allocation96_spill]]  ;;  %s143_s10 = int_to_ptr.vmem [resolvable:$true] %s142_s10 }
  0x2a   :  { %145 = dma.hbm_to_vmem [thread:$0]  %s141_s11, 16, %s143_s10, [#allocation21]  }
  0x2b   :  { %s17933_s4 = sld [smem:[#allocation98_spill]]  ;;  %s16198_s9 = smov [#allocation23]  }
  0x2c   :  { %s164_s3 = sshll.u32 %s16198_s9, 4  ;;  %s188_s28 = sshll.u32 %s16199_s25, 4  ;;  %s165_s3 = int_to_ptr.vmem [resolvable:$true] %s164_s3  ;;  %s189_s28 = int_to_ptr.vmem [resolvable:$true] %s188_s28 }
  0x2d   :  { %s210_s29 = sshll.u32 %s17846_s13, 4  ;;  %s234_s11 = sshll.u32 %s17848_s15, 4  ;;  %s211_s29 = int_to_ptr.hbm [resolvable:$true] %s210_s29  ;;  %s235_s11 = int_to_ptr.hbm [resolvable:$true] %s234_s11 }
  0x2e   :  { %s16200_s6 = smov [#allocation29]   ;;  %s280_s9 = sshll.u32 %s17856_s23, 4  ;;  %s281_s9 = int_to_ptr.hbm [resolvable:$true] %s280_s9 }
  0x2f   :  { %s162_s22 = sshll.u32 %s17932_s12, 4  ;;  %s212_s10 = sshll.u32 %s16200_s6, 4  ;;  %s163_s22 = int_to_ptr.hbm [resolvable:$true] %s162_s22  ;;  %s213_s10 = int_to_ptr.vmem [resolvable:$true] %s212_s10 }
  0x30   :  { %167 = dma.hbm_to_vmem [thread:$0]  %s163_s22, 16, %s165_s3, [#allocation24]  }
  0x31   :  { %s186_s5 = sshll.u32 %s17933_s4, 4  ;;  %s236_s22 = sshll.u32 %s16201_s1, 4  ;;  %s187_s5 = int_to_ptr.hbm [resolvable:$true] %s186_s5  ;;  %s237_s22 = int_to_ptr.vmem [resolvable:$true] %s236_s22 }
  0x32   :  { %191 = dma.hbm_to_vmem [thread:$0]  %s187_s5, 64, %s189_s28, [#allocation27]  }
  0x33   :  { %215 = dma.hbm_to_vmem [thread:$0]  %s211_s29, 16, %s213_s10, [#allocation30]  }
  0x34   :  { %s258_s4 = sshll.u32 %s17852_s19, 4  ;;  %s16202_s3 = smov [#allocation35]   ;;  %s259_s4 = int_to_ptr.hbm [resolvable:$true] %s258_s4 }
  0x35   :  { %239 = dma.hbm_to_vmem [thread:$0]  %s235_s11, 256, %s237_s22, [#allocation33]  }
  0x36   :  { %s260_s15 = sshll.u32 %s16202_s3, 4  ;;  %s16203_s25 = smov [#allocation38]   ;;  %s261_s15 = int_to_ptr.vmem [resolvable:$true] %s260_s15 }
  0x37   :  { %263 = dma.hbm_to_vmem [thread:$0]  %s259_s4, 64, %s261_s15, [#allocation36]  }
  0x38   :  { %s282_s28 = sshll.u32 %s16203_s25, 4  ;;  %s303_s19 = sshll.u32 %s17859_s26, 4  ;;  %s283_s28 = int_to_ptr.vmem [resolvable:$true] %s282_s28  ;;  %s304_s19 = int_to_ptr.hbm [resolvable:$true] %s303_s19 }
  0x39   :  { %285 = dma.hbm_to_vmem [thread:$0]  %s281_s9, 32, %s283_s28, [#allocation39]  }
  0x3a   :  { %s16204_s29 = smov [#allocation41]   ;;  %s17934_s23 = sld [smem:[#allocation87_spill]] }
  0x3b   :  { %s305_s7 = sshll.u32 %s16204_s29, 4  ;;  %s16205_s10 = smov 64   ;;  %s306_s7 = int_to_ptr.vmem [resolvable:$true] %s305_s7 }
  0x3c   :  { %s16206_s1 = smov 4   ;;  %s16207_s22 = smov [#allocation8]  }
  0x3d   :  { %311 = dma.hbm_to_vmem [thread:$0]  %s304_s19, 4096, %s306_s7, [#allocation42], %s16205_s10, %s16205_s10, %s16206_s1  }
  0x3e   :  { %s54_s8 = sshll.u32 %s16207_s22, 4  ;;  %s17935_s26 = sld [smem:[#allocation89_spill]]  ;;  %s55_s8 = int_to_ptr.vmem [resolvable:$true] %s54_s8 }
  0x3f   :  { %s17936_s5 = smov 8   ;;  %s17937_s9 = smov 128  }
  0x40   :  { %s52_s6 = sshll.u32 %s17934_s23, 4  ;;  %s17938_s25 = sld [smem:[#allocation91_spill]]  ;;  %s53_s6 = int_to_ptr.hbm [resolvable:$true] %s52_s6 }
  0x41   :  { %60 = dma.hbm_to_vmem [thread:$0]  %s53_s6, 256, %s55_s8, [#allocation9], %s17937_s9, %s17937_s9, %s17936_s5  }
  0x42   :  { %s16208_s30 = smov [#allocation13]   ;;  %s16209_s19 = smov [#allocation16]  }
  0x43   :  { %s80_s0 = sshll.u32 %s16208_s30, 4  ;;  %s104_s29 = sshll.u32 %s16209_s19, 4  ;;  %s81_s0 = int_to_ptr.vmem [resolvable:$true] %s80_s0  ;;  %s105_s29 = int_to_ptr.vmem [resolvable:$true] %s104_s29 }
  0x44   :  { %s78_s13 = sshll.u32 %s17935_s26, 4  ;;  %s17939_s11 = sld [smem:[#allocation93_spill]]  ;;  %s79_s13 = int_to_ptr.hbm [resolvable:$true] %s78_s13 }
  0x45   :  { %86 = dma.hbm_to_vmem [thread:$0]  %s79_s13, 1024, %s81_s0, [#allocation12], %s16205_s10, %s16205_s10, %s16206_s1  }
  0x46   :  { %s102_s28 = sshll.u32 %s17938_s25, 4  ;;  %s17940_s8 = sld [smem:[#allocation95_spill]]  ;;  %s103_s28 = int_to_ptr.hbm [resolvable:$true] %s102_s28 }
  0x47   :  { %110 = dma.hbm_to_vmem [thread:$0]  %s103_s28, 2048, %s105_s29, [#allocation15], %s17937_s9, %s17937_s9, %s17936_s5  }
  0x48   :  { %s16210_s4 = smov [#allocation19]   ;;  %s16211_s13 = smov [#allocation22]  }
  0x49   :  { %s128_s26 = sshll.u32 %s16210_s4, 4  ;;  %s153_s3 = sshll.u32 %s16211_s13, 4  ;;  %s129_s26 = int_to_ptr.vmem [resolvable:$true] %s128_s26  ;;  %s154_s3 = int_to_ptr.vmem [resolvable:$true] %s153_s3 }
  0x4a   :  { %s126_s23 = sshll.u32 %s17939_s11, 4  ;;  %s17941_s30 = sld [smem:[#allocation97_spill]]  ;;  %s127_s23 = int_to_ptr.hbm [resolvable:$true] %s126_s23 }
  0x4b   :  { %134 = dma.hbm_to_vmem [thread:$0]  %s127_s23, 1024, %s129_s26, [#allocation18], %s16205_s10, %s16205_s10, %s16206_s1  }
  0x4c   :  { %s151_s2 = sshll.u32 %s17940_s8, 4  ;;  %s16212_s28 = smov [#allocation25]   ;;  %s152_s2 = int_to_ptr.hbm [resolvable:$true] %s151_s2 }
  0x4d   :  { %156 = dma.hbm_to_vmem [thread:$0]  %s152_s2, 16, %s154_s3, [#allocation21]  }
  0x4e   :  { %s174_s19 = sshll.u32 %s16212_s28, 4  ;;  %s17942_s12 = sld [smem:[#allocation99_spill]]  ;;  %s175_s19 = int_to_ptr.vmem [resolvable:$true] %s174_s19 }
  0x4f   :  { %s16213_s6 = smov 256   ;;  %s16214_s22 = smov 16  }
  0x50   :  { %s172_s0 = sshll.u32 %s17941_s30, 4  ;;  %s16215_s23 = smov [#allocation28]   ;;  %s173_s0 = int_to_ptr.hbm [resolvable:$true] %s172_s0 }
  0x51   :  { %180 = dma.hbm_to_vmem [thread:$0]  %s173_s0, 4096, %s175_s19, [#allocation24], %s16213_s6, %s16213_s6, %s16214_s22  }
  0x52   :  { %s198_s8 = sshll.u32 %s16215_s23, 4  ;;  %s220_s13 = sshll.u32 %s17847_s14, 4  ;;  %s199_s8 = int_to_ptr.vmem [resolvable:$true] %s198_s8  ;;  %s221_s13 = int_to_ptr.hbm [resolvable:$true] %s220_s13 }
  0x53   :  { %s16216_s2 = smov [#allocation31]   ;;  %s244_s30 = sshll.u32 %s17850_s17, 4  ;;  %s245_s30 = int_to_ptr.hbm [resolvable:$true] %s244_s30 }
  0x54   :  { %s196_s11 = sshll.u32 %s17942_s12, 4  ;;  %s222_s3 = sshll.u32 %s16216_s2, 4  ;;  %s197_s11 = int_to_ptr.hbm [resolvable:$true] %s196_s11  ;;  %s223_s3 = int_to_ptr.vmem [resolvable:$true] %s222_s3 }
  0x55   :  { %204 = dma.hbm_to_vmem [thread:$0]  %s197_s11, 4096, %s199_s8, [#allocation27], %s16205_s10, %s16205_s10, %s16206_s1  }
  0x56   :  { %s16217_s0 = smov 1024   ;;  %s269_s14 = sshll.u32 %s17854_s21, 4  ;;  %s270_s14 = int_to_ptr.hbm [resolvable:$true] %s269_s14 }
  0x57   :  { %228 = dma.hbm_to_vmem [thread:$0]  %s221_s13, 16384, %s223_s3, [#allocation30], %s16217_s0, %s16217_s0, %s16205_s10  }
  0x58   :  { %s16218_s29 = smov [#allocation34]   ;;  %s16219_s12 = smov [#allocation37]  }
  0x59   :  { %s246_s7 = sshll.u32 %s16218_s29, 4  ;;  %s271_s11 = sshll.u32 %s16219_s12, 4  ;;  %s247_s7 = int_to_ptr.vmem [resolvable:$true] %s246_s7  ;;  %s272_s11 = int_to_ptr.vmem [resolvable:$true] %s271_s11 }
  0x5a   :  { %252 = dma.hbm_to_vmem [thread:$0]  %s245_s30, 256, %s247_s7, [#allocation33], %s16205_s10, %s16205_s10, %s16206_s1  }
  0x5b   :  { %s291_s22 = sshll.u32 %s17857_s24, 4  ;;  %s317_s21 = sshll.u32 %s17860_s27, 4  ;;  %s292_s22 = int_to_ptr.hbm [resolvable:$true] %s291_s22  ;;  %s318_s21 = int_to_ptr.hbm [resolvable:$true] %s317_s21 }
  0x5c   :  { %274 = dma.hbm_to_vmem [thread:$0]  %s270_s14, 32, %s272_s11, [#allocation36]  }
  0x5d   :  { %s16220_s4 = smov [#allocation40]   ;;  %s16221_s13 = smov [#allocation43]  }
  0x5e   :  { %s293_s26 = sshll.u32 %s16220_s4, 4  ;;  %s319_s10 = sshll.u32 %s16221_s13, 4  ;;  %s294_s26 = int_to_ptr.vmem [resolvable:$true] %s293_s26  ;;  %s320_s10 = int_to_ptr.vmem [resolvable:$true] %s319_s10 }
  0x5f   :  { %296 = dma.hbm_to_vmem [thread:$0]  %s292_s22, 32, %s294_s26, [#allocation39]  }
  0x60   :  { %322 = dma.hbm_to_vmem [thread:$0]  %s318_s21, 16, %s320_s10, [#allocation42]  }
  0x61   :  { %16158 = dma.done.wait [#allocation9], 256  }
  0x62   :  { %16159 = vsyncadd [#allocation9], 4294967040 }
  0x63   :  { %16160 = dma.done.wait [#allocation12], 1280  }
  0x64   :  { %16161 = vsyncadd [#allocation12], 4294966016 }
  0x65   :  { %16162 = dma.done.wait [#allocation15], 2064  }
  0x66   :  { %16163 = vsyncadd [#allocation15], 4294965232 }
  0x67   :  { %16164 = dma.done.wait [#allocation18], 1056  }
  0x68   :  { %16165 = vsyncadd [#allocation18], 4294966240 }
  0x69   :  { %16166 = dma.done.wait [#allocation21], 32  }
  0x6a   :  { %16167 = vsyncadd [#allocation21], 4294967264 }
  0x6b   :  { %16168 = dma.done.wait [#allocation24], 4112  }
  0x6c   :  { %16169 = vsyncadd [#allocation24], 4294963184 }
  0x6d   :  { %16170 = dma.done.wait [#allocation27], 4160  }
  0x6e   :  { %16171 = vsyncadd [#allocation27], 4294963136 }
  0x6f   :  { %16172 = dma.done.wait [#allocation30], 16400  }
  0x70   :  { %16173 = vsyncadd [#allocation30], 4294950896 }
  0x71   :  { %16174 = dma.done.wait [#allocation33], 512  }
  0x72   :  { %16175 = vsyncadd [#allocation33], 4294966784 }
  0x73   :  { %16176 = dma.done.wait [#allocation36], 96  }
  0x74   :  { %16177 = vsyncadd [#allocation36], 4294967200 }
  0x75   :  { %16178 = dma.done.wait [#allocation39], 64  }
  0x76   :  { %16179 = vsyncadd [#allocation39], 4294967232 }
  0x77   :  { %16180 = dma.done.wait [#allocation42], 4112  }
  0x78   :  { %16181 = vsyncadd [#allocation42], 4294963184  ;;  %v14291_v1 = vld [vmem:[#allocation13 + $0x38] sm:$0xff]  ;;  %v10256_v2 = vld [vmem:[#allocation16 + $0x70] sm:$0xf]  ;;  %vm705_vm0 = vcmask 130048  }
  0x79   :  { %v14307_v3 = vld [vmem:[#allocation16 + $0x74] sm:$0xf0]  ;;  %v10248_v5 = vld [vmem:[#allocation16 + $0x60] sm:$0xf]  ;;  %v14305_v6 = vld [vmem:[#allocation16 + $0x64] sm:$0xf0]  ;;  %544 = vmatpush.bf16.msra.mxu0 %v14291_v1 }
  0x7a   :  { %v10257_v4 = vor.u32 %v14307_v3, %v10256_v2  ;;  %v14290_v7 = vld [vmem:[#allocation13 + $0x30] sm:$0xff]  ;;  %v10249_v8 = vor.u32 %v14305_v6, %v10248_v5  ;;  %v14303_v10 = vld [vmem:[#allocation16 + $0x54] sm:$0xf0]  ;;  %v14289_v11 = vld [vmem:[#allocation13 + $0x28] sm:$0xff]  ;;  %s423_s1 = sshll.u32 %s17849_s16, 4  ;;  %s16223_s2 = smov [#allocation2]   ;;  %s424_s1 = int_to_ptr.hbm [resolvable:$true] %s423_s1 }
  0x7b   :  { %v10240_v9 = vld [vmem:[#allocation16 + $0x50] sm:$0xf]  ;;  %v10232_v13 = vld [vmem:[#allocation16 + $0x40] sm:$0xf]  ;;  %v14301_v14 = vld [vmem:[#allocation16 + $0x44] sm:$0xf0] }
  0x7c   :  { %661 = vmatpush.bf16.msra.mxu1 %v10257_v4  ;;  %v10241_v12 = vor.u32 %v14303_v10, %v10240_v9  ;;  %v14288_v15 = vld [vmem:[#allocation13 + $0x20] sm:$0xff]  ;;  %v10233_v16 = vor.u32 %v14301_v14, %v10232_v13  ;;  %v10224_v17 = vld [vmem:[#allocation16 + $0x30] sm:$0xf]  ;;  %v14299_v18 = vld [vmem:[#allocation16 + $0x34] sm:$0xf0]  ;;  %s425_s3 = sshll.u32 %s16223_s2, 4  ;;  %s426_s3 = int_to_ptr.vmem [resolvable:$true] %s425_s3 }
  0x7d   :  { %545 = vmatpush.bf16.msra.mxu0 %v14290_v7  ;;  %v14287_v19 = vld [vmem:[#allocation13 + $0x18] sm:$0xff]  ;;  %v10225_v20 = vor.u32 %v14299_v18, %v10224_v17  ;;  %v10216_v21 = vld [vmem:[#allocation16 + $0x20] sm:$0xf]  ;;  %v14297_v22 = vld [vmem:[#allocation16 + $0x24] sm:$0xf0]  ;;  %s437_s30 = sshll.u32 %s17851_s18, 4  ;;  %s438_s30 = int_to_ptr.hbm [resolvable:$true] %s437_s30 }
  0x7e   :  { %v14286_v23 = vld [vmem:[#allocation13 + $0x10] sm:$0xff]  ;;  %v10217_v24 = vor.u32 %v14297_v22, %v10216_v21  ;;  %v14295_v26 = vld [vmem:[#allocation16 + $0x14] sm:$0xf0]  ;;  %v14285_v27 = vld [vmem:[#allocation13 + $0x8] sm:$0xff]  ;;  %428 = dma.hbm_to_vmem [thread:$0]  %s424_s1, 65536, %s426_s3, [#allocation6] }
  0x7f   :  { %v10208_v25 = vld [vmem:[#allocation16 + $0x10] sm:$0xf]  ;;  %v10200_v29 = vld [vmem:[#allocation16] sm:$0xf]  ;;  %v14293_v30 = vld [vmem:[#allocation16 + $0x4] sm:$0xf0] }
  0x80   :  { %662 = vmatpush.bf16.msra.mxu1 %v10249_v8  ;;  %v10209_v28 = vor.u32 %v14295_v26, %v10208_v25  ;;  %v14284_v31 = vld [vmem:[#allocation13] sm:$0xff]  ;;  %v16473_v33 = vld [vmem:[#allocation8 + $0x8] sm:$0xff]  ;;  %v10201_v34 = vor.u32 %v14293_v30, %v10200_v29  ;;  %v473_v35 = vld [vmem:[#allocation11] sm:$0xff]  ;;  %s16224_s0 = smov [#allocation3]   ;;  %s451_s29 = sshll.u32 %s17853_s20, 4  ;;  %s452_s29 = int_to_ptr.hbm [resolvable:$true] %s451_s29 }
  0x81   :  { %546 = vmatpush.bf16.msra.mxu0 %v14289_v11  ;;  %v16471_v32 = vld [vmem:[#allocation8] sm:$0xff]  ;;  %v474_v36 = vld [vmem:[#allocation11 + $0x8] sm:$0xff]  ;;  %v10250_v56 = vld [vmem:[#allocation16 + $0x68] sm:$0xf0]  ;;  %s439_s28 = sshll.u32 %s16224_s0, 4  ;;  %s16225_s16 = smov [#allocation4]   ;;  %s440_s28 = int_to_ptr.vmem [resolvable:$true] %s439_s28 }
  0x82   :  { %v492_v37 = vpack.c.bf16 %v16473_v33, %v16471_v32  ;;  %v575_v38 = vpack.c.bf16 %v474_v36, %v473_v35  ;;  %v16477_v41 = vld [vmem:[#allocation17] sm:$0x3]  ;;  %v15345_v46 = vld [vmem:[#allocation14] ss:$0 sm:$0xff]  ;;  %v14306_v52 = vld [vmem:[#allocation16 + $0x74] sm:$0xf] }
  0x83   :  { %v577_v42 = vperm.slane %v16477_v41, 0  ;;  %v10258_v53 = vld [vmem:[#allocation16 + $0x78] sm:$0xf0]  ;;  %v14304_v54 = vld [vmem:[#allocation16 + $0x64] sm:$0xf]  ;;  %v14313_v36 = vld [vmem:[#allocation19 + $0x28] sm:$0xff] }
  0x84   :  { %663 = vmatpush.bf16.msra.mxu1 %v10241_v12  ;;  %v10261_v55 = vor.u32 %v14306_v52, %v10258_v53  ;;  %v10253_v57 = vor.u32 %v14304_v54, %v10250_v56  ;;  %v14302_v58 = vld [vmem:[#allocation16 + $0x54] sm:$0xf]  ;;  %v10242_v59 = vld [vmem:[#allocation16 + $0x58] sm:$0xf0]  ;;  %v14300_v61 = vld [vmem:[#allocation16 + $0x44] sm:$0xf] }
  0x85   :  { %547 = vmatpush.bf16.msra.mxu0 %v14288_v15  ;;  %v10245_v60 = vor.u32 %v14302_v58, %v10242_v59  ;;  %v10234_v62 = vld [vmem:[#allocation16 + $0x48] sm:$0xf0]  ;;  %v14298_v0 = vld [vmem:[#allocation16 + $0x34] sm:$0xf]  ;;  %v10226_v1 = vld [vmem:[#allocation16 + $0x38] sm:$0xf0] }
  0x86   :  { %675 = vmatpush.bf16.msra.mxu2 %v10261_v55  ;;  %v10237_v63 = vor.u32 %v14300_v61, %v10234_v62  ;;  %v10229_v2 = vor.u32 %v14298_v0, %v10226_v1  ;;  %v14296_v3 = vld [vmem:[#allocation16 + $0x24] sm:$0xf]  ;;  %v10218_v4 = vld [vmem:[#allocation16 + $0x28] sm:$0xf0]  ;;  %v14294_v6 = vld [vmem:[#allocation16 + $0x14] sm:$0xf] }
  0x87   :  { %v10221_v5 = vor.u32 %v14296_v3, %v10218_v4  ;;  %v10210_v7 = vld [vmem:[#allocation16 + $0x18] sm:$0xf0]  ;;  %v14292_v11 = vld [vmem:[#allocation16 + $0x4] sm:$0xf]  ;;  %v10202_v12 = vld [vmem:[#allocation16 + $0x8] sm:$0xf0] }
  0x88   :  { %664 = vmatpush.bf16.msra.mxu1 %v10233_v16  ;;  %v10213_v10 = vor.u32 %v14294_v6, %v10210_v7  ;;  %v10205_v13 = vor.u32 %v14292_v11, %v10202_v12  ;;  %v14310_v62 = vld [vmem:[#allocation19 + $0x10] sm:$0xff]  ;;  %v14308_v0 = vld [vmem:[#allocation19] sm:$0xff]  ;;  %v16222_v11 = vmov 128.0   ;;  %442 = dma.hbm_to_vmem [thread:$0]  %s438_s30, 16384, %s440_s28, [#allocation6 + $0x1] }
  0x89   :  { %548 = vmatpush.bf16.msra.mxu0 %v14287_v19  ;;  %v15346_v4 = vld [vmem:[#allocation20] ss:$0 sm:$0xff]  ;;  %s453_s7 = sshll.u32 %s16225_s16, 4  ;;  %s17943_s17 = sld [smem:[#allocation100_spill]]  ;;  %s454_s7 = int_to_ptr.vmem [resolvable:$true] %s453_s7 }
  0x8a   :  { %676 = vmatpush.bf16.msra.mxu2 %v10253_v57  ;;  %456 = dma.hbm_to_vmem [thread:$0]  %s452_s29, 8192, %s454_s7, [#allocation6 + $0x2] }
  0x8b   :  { %s16226_s18 = smov [#allocation5]  }
  0x8c   :  { %665 = vmatpush.bf16.msra.mxu1 %v10225_v20  ;;  %s467_s22 = sshll.u32 %s16226_s18, 4  ;;  %s468_s22 = int_to_ptr.vmem [resolvable:$true] %s467_s22 }
  0x8d   :  { %549 = vmatpush.bf16.msra.mxu0 %v14286_v23 }
  0x8e   :  { %677 = vmatpush.bf16.msra.mxu2 %v10245_v60 }
  0x8f   :  { %s465_s6 = sshll.u32 %s17943_s17, 4  ;;  %s466_s6 = int_to_ptr.hbm [resolvable:$true] %s465_s6 }
  0x90   :  { %666 = vmatpush.bf16.msra.mxu1 %v10217_v24  ;;  %470 = dma.hbm_to_vmem [thread:$0]  %s466_s6, 8192, %s468_s22, [#allocation6 + $0x3] }
  0x91   :  { %550 = vmatpush.bf16.msra.mxu0 %v14285_v27  ;;  %v578_v27 = vperm.slane %v16477_v41, 1  ;;  %v14311_v41 = vld [vmem:[#allocation19 + $0x18] sm:$0xff] }
  0x92   :  { %678 = vmatpush.bf16.msra.mxu2 %v10237_v63  ;;  %v14309_v63 = vld [vmem:[#allocation19 + $0x8] sm:$0xff] }
  0x94   :  { %667 = vmatpush.bf16.msra.mxu1 %v10209_v28 }
  0x95   :  { %551 = vmatpush.bf16.msra.mxu0 %v14284_v31  ;;  %v14315_v31 = vld [vmem:[#allocation19 + $0x38] sm:$0xff] }
  0x96   :  { %679 = vmatpush.bf16.msra.mxu2 %v10229_v2 }
  0x98   :  { %668 = vmatpush.bf16.msra.mxu1 %v10201_v34  ;;  %552 = vmatmul.bf16.vlgmr.msra.gmra.mxu0 %v492_v37  ;;  %v14314_v34 = vld [vmem:[#allocation19 + $0x30] sm:$0xff]  ;;  %v14312_v37 = vld [vmem:[#allocation19 + $0x20] sm:$0xff] }
  0x9a   :  { %680 = vmatpush.bf16.msra.mxu2 %v10221_v5 }
  0x9b   :  { %669 = vmatmul.bf16.vlgmr.msra.gmra.mxu1 %v575_v38 }
  0x9e   :  { %681 = vmatpush.bf16.msra.mxu2 %v10213_v10 }
  0xa2   :  { %682 = vmatpush.bf16.msra.mxu2 %v10205_v13 }
  0xa5   :  { %683 = vmatmul.bf16.vlgmr.msra.gmra.mxu2 %v575_v38 }
 0x115   :  { %v553_v40 = vpop.f32.mrf.mxu0 }
 0x116   :  { %v554_v49 = vadd.f32 %v15345_v46, %v553_v40 }
 0x118   :  { %v670_v39 = vpop.f32.mrf.mxu1 }
 0x119   :  { %v671_v44 = vadd.f32 %v670_v39, %v577_v42 }
 0x11d   :  { %v555_v47 = vpop.f32.mrf.mxu0 }
 0x11e   :  { %v556_v50 = vadd.f32 %v15345_v46, %v555_v47 }
 0x120   :  { %v672_v43 = vpop.f32.mrf.mxu1  ;;  %v689_v51 = vpack.c.bf16 %v556_v50, %v554_v49 }
 0x121   :  { %v673_v45 = vadd.f32 %v672_v43, %v577_v42 }
 0x123   :  { %v690_v48 = vpack.c.bf16 %v673_v45, %v671_v44 }
 0x125   :  { %698 = vmatpush.bf16.xpose.msrb.mxu0 %v690_v48 }
 0x128   :  { %v684_v26 = vpop.f32.mrf.mxu2 }
 0x129   :  { %v685_v29 = vadd.f32 %v684_v26, %v578_v27  ;;  %v14344_v26 = vld [vmem:[#allocation25 + $0xe4] sm:$0xf] }
 0x12c   :  { %699 = vmatmul.bf16.vlgmr.msrb.gmra.mxu0 %v689_v51 }
 0x130   :  { %v686_v28 = vpop.f32.mrf.mxu2 }
 0x131   :  { %v687_v30 = vadd.f32 %v686_v28, %v578_v27  ;;  %v10412_v28 = vld [vmem:[#allocation25 + $0xf0] sm:$0xf0] }
 0x133   :  { %774 = vmatpush.msra.mxu3 %v687_v30  ;;  %v14347_v30 = vld [vmem:[#allocation25 + $0xf4] sm:$0xf0] }
 0x135   :  { %775 = vmatpush.msra.mxu3 %v685_v29  ;;  %v10418_v29 = vld [vmem:[#allocation25 + $0xe8] sm:$0xf] }
 0x137   :  { %852 = vmatpush.bf16.msrb.mxu3 %v14315_v31  ;;  %v10415_v31 = vor.u32 %v14344_v26, %v10412_v28  ;;  %v10338_v28 = vld [vmem:[#allocation25 + $0x48] sm:$0xf] }
 0x139   :  { %1144 = vmatpush.bf16.msrb.mxu1 %v10415_v31 }
 0x13b   :  { %853 = vmatpush.bf16.msrb.mxu3 %v14314_v34  ;;  %v10419_v34 = vor.u32 %v14347_v30, %v10418_v29  ;;  %v14327_v29 = vld [vmem:[#allocation25 + $0x54] sm:$0xf0] }
 0x13c   :  { %v10339_v31 = vor.u32 %v14327_v29, %v10338_v28 }
 0x13d   :  { %1158 = vmatpush.bf16.msrb.mxu2 %v10419_v34  ;;  %v14325_v34 = vld [vmem:[#allocation25 + $0x4c] sm:$0xf] }
 0x13f   :  { %854 = vmatpush.bf16.msrb.mxu3 %v14313_v36  ;;  %v10420_v36 = vld [vmem:[#allocation25 + $0xf8] sm:$0xf0] }
 0x143   :  { %855 = vmatpush.bf16.msrb.mxu3 %v14312_v37 }
 0x147   :  { %856 = vmatpush.bf16.msrb.mxu3 %v14311_v41  ;;  %v10396_v41 = vld [vmem:[#allocation25 + $0xd0] sm:$0xf0] }
 0x14b   :  { %857 = vmatpush.bf16.msrb.mxu3 %v14310_v62  ;;  %v10362_v62 = vld [vmem:[#allocation25 + $0x80] sm:$0xf] }
 0x14f   :  { %858 = vmatpush.bf16.msrb.mxu3 %v14309_v63  ;;  %v14334_v63 = vld [vmem:[#allocation25 + $0x8c] sm:$0xf0] }
 0x153   :  { %859 = vmatpush.bf16.msrb.mxu3 %v14308_v0  ;;  %v14332_v0 = vld [vmem:[#allocation25 + $0x84] sm:$0xf] }
 0x1a9   :  { %v700_v8 = vpop.f32.mrf.mxu0 }
 0x1aa   :  { %v706_v9 = vsel %vm705_vm0, %v700_v8, -inf }
 0x1ab   :  { %707 = vmax.xlane.f32.xlu0 %v706_v9 }
 0x1b1   :  { %v702_v14 = vpop.f32.mrf.mxu0 }
 0x1b2   :  { %v709_v15 = vsel %vm705_vm0, %v702_v14, -inf }
 0x1b3   :  { %710 = vmax.xlane.f32.xlu0 %v709_v15 }
 0x21e   :  { %v708_v16 = vpop.xlane.xlu0 %707 }
 0x21f   :  { %v712_v17 = vsub.f32 %v700_v8, %v708_v16 }
 0x221   :  { %v714_v18 = vmul.f32 1.442695, %v712_v17 }
 0x223   :  { %15350 = vpow2.f32 %v714_v18 }
 0x226   :  { %v711_v19 = vpop.xlane.xlu0 %710 }
 0x227   :  { %v713_v20 = vsub.f32 %v702_v14, %v711_v19 }
 0x229   :  { %v15351_v21 = vpop.eup %15350  ;;  %v716_v22 = vmul.f32 1.442695, %v713_v20 }
 0x22a   :  { %v718_v23 = vsel %vm705_vm0, %v15351_v21, 0.0 }
 0x22b   :  { %15352 = vpow2.f32 %v716_v22  ;;  %719 = vadd.xlane.f32.xlu1 %v718_v23 }
 0x231   :  { %v15353_v24 = vpop.eup %15352 }
 0x232   :  { %v721_v25 = vsel %vm705_vm0, %v15353_v24, 0.0 }
 0x233   :  { %722 = vadd.xlane.f32.xlu1 %v721_v25  ;;  %v14346_v25 = vld [vmem:[#allocation25 + $0xec] sm:$0xf0] }
 0x29e   :  { %v720_v35 = vpop.xlane.xlu1 %719 }
 0x29f   :  { %15354 = vrcp.f32 %v720_v35  ;;  %v735_v43 = vand.u32 2147483648, %v720_v35  ;;  %v733_v45 = vand.u32 2147483647, %v720_v35  ;;  %vm729_vm2 = vweird.f32 %v720_v35 }
 0x2a1   :  { %v736_v48 = vor.u32 1.1754944e-38, %v735_v43  ;;  %vm734_vm4 = vcmp.eq.f32.partialorder %v733_v45, 8.507059e+37  ;;  %v10402_v43 = vld [vmem:[#allocation25 + $0xc8] sm:$0xf] }
 0x2a5   :  { %v15355_v38 = vpop.eup %15354 }
 0x2a6   :  { %v725_v39 = vmul.f32 %v15355_v38, %v720_v35  ;;  %v723_v40 = vpop.xlane.xlu1 %722  ;;  %vm730_vm1 = vweird.f32 %v15355_v38  ;;  %v14345_v35 = vld [vmem:[#allocation25 + $0xec] sm:$0xf] }
 0x2a7   :  { %15356 = vrcp.f32 %v723_v40  ;;  %vm731_vm3 = vmor %vm729_vm2, %vm730_vm1  ;;  %v750_v54 = vand.u32 2147483648, %v723_v40  ;;  %v748_v56 = vand.u32 2147483647, %v723_v40  ;;  %vm744_vm6 = vweird.f32 %v723_v40 }
 0x2a8   :  { %v726_v42 = vsub.f32 1.0, %v725_v39  ;;  %15358 = vrcp.f32 %v16222_v11  ;;  %v10423_v37 = vor.u32 %v14345_v35, %v10420_v36  ;;  %v14342_v39 = vld [vmem:[#allocation25 + $0xcc] sm:$0xf0]  ;;  %v10340_v35 = vld [vmem:[#allocation25 + $0x58] sm:$0xf0] }
 0x2a9   :  { %v751_v58 = vor.u32 1.1754944e-38, %v750_v54  ;;  %vm749_vm8 = vcmp.eq.f32.partialorder %v748_v56, 8.507059e+37  ;;  %v10380_v54 = vld [vmem:[#allocation25 + $0xb0] sm:$0xf0]  ;;  %v14339_v56 = vld [vmem:[#allocation25 + $0xb4] sm:$0xf0]  ;;  %v10343_v36 = vor.u32 %v14325_v34, %v10340_v35 }
 0x2aa   :  { %v727_v44 = vmul.f32 %v15355_v38, %v726_v42  ;;  %v14330_v11 = vld [vmem:[#allocation25 + $0x6c] sm:$0xf0] }
 0x2ac   :  { %v728_v46 = vadd.f32 %v15355_v38, %v727_v44  ;;  %v14343_v44 = vld [vmem:[#allocation25 + $0xd4] sm:$0xf0] }
 0x2ad   :  { %v15357_v47 = vpop.eup %15356 }
 0x2ae   :  { %v740_v49 = vmul.f32 %v15357_v47, %v723_v40  ;;  %v732_v50 = vsel %vm731_vm3, %v15355_v38, %v728_v46  ;;  %vm745_vm5 = vweird.f32 %v15357_v47  ;;  %v15359_v12 = vpop.eup %15358  ;;  %v10394_v38 = vld [vmem:[#allocation25 + $0xc0] sm:$0xf]  ;;  %v14340_v40 = vld [vmem:[#allocation25 + $0xc4] sm:$0xf]  ;;  %v10403_v46 = vor.u32 %v14343_v44, %v10402_v43  ;;  %v14323_v43 = vld [vmem:[#allocation25 + $0x34] sm:$0xf0] }
 0x2af   :  { %v737_v51 = vsel %vm734_vm4, %v736_v48, %v732_v50  ;;  %vm746_vm7 = vmor %vm744_vm6, %vm745_vm5  ;;  %v873_v13 = vmul.f32 128.0, %v15359_v12  ;;  %vm877_vm9 = vweird.f32 %v15359_v12  ;;  %v10395_v42 = vor.u32 %v14342_v39, %v10394_v38  ;;  %v10404_v48 = vld [vmem:[#allocation25 + $0xd8] sm:$0xf0]  ;;  %v10378_v50 = vld [vmem:[#allocation25 + $0xa0] sm:$0xf] }
 0x2b0   :  { %v741_v52 = vsub.f32 1.0, %v740_v49  ;;  %v738_v53 = vmul.f32 %v15351_v21, %v737_v51  ;;  %v10399_v45 = vor.u32 %v14340_v40, %v10396_v41  ;;  %1159 = vmatpush.bf16.msrb.mxu2 %v10403_v46  ;;  %v14338_v51 = vld [vmem:[#allocation25 + $0xac] sm:$0xf0]  ;;  %v14320_v39 = vld [vmem:[#allocation25 + $0x24] sm:$0xf] }
 0x2b1   :  { %v874_v14 = vsub.f32 1.0, %v873_v13  ;;  %v14322_v38 = vld [vmem:[#allocation25 + $0x2c] sm:$0xf0]  ;;  %v10322_v41 = vld [vmem:[#allocation25 + $0x28] sm:$0xf] }
 0x2b2   :  { %v742_v55 = vmul.f32 %v15357_v47, %v741_v52  ;;  %10262 = vmatmul.msk.f32.vlgmr.msra.gmra.mxu3 %vm705_vm0, %v738_v53  ;;  %1145 = vmatpush.bf16.msrb.mxu1 %v10399_v45  ;;  %v14336_v52 = vld [vmem:[#allocation25 + $0xa4] sm:$0xf]  ;;  %v10379_v53 = vor.u32 %v14338_v51, %v10378_v50  ;;  %v10323_v45 = vor.u32 %v14323_v43, %v10322_v41  ;;  %v14321_v46 = vld [vmem:[#allocation25 + $0x2c] sm:$0xf]  ;;  %v14318_v51 = vld [vmem:[#allocation25 + $0xc] sm:$0xf0] }
 0x2b3   :  { %v875_v15 = vmul.f32 %v15359_v12, %v874_v14  ;;  %1172 = vmatpush.bf16.msra.mxu3 %v10423_v37  ;;  %v10348_v14 = vld [vmem:[#allocation25 + $0x70] sm:$0xf0]  ;;  %v10314_v37 = vld [vmem:[#allocation25 + $0x20] sm:$0xf]  ;;  %v14368_v43 = vld [vmem:[#allocation28 + $0xa0] sm:$0xff] }
 0x2b4   :  { %v743_v57 = vadd.f32 %v15357_v47, %v742_v55  ;;  %v10386_v55 = vld [vmem:[#allocation25 + $0xa8] sm:$0xf]  ;;  %v10315_v40 = vor.u32 %v14322_v38, %v10314_v37  ;;  %v15348_v37 = vld [vmem:[#allocation23] ss:$0 sm:$0xff] }
 0x2b5   :  { %v876_v16 = vadd.f32 %v15359_v12, %v875_v15  ;;  %v10354_v15 = vld [vmem:[#allocation25 + $0x68] sm:$0xf]  ;;  %v14359_v41 = vld [vmem:[#allocation28 + $0x58] sm:$0xff] }
 0x2b6   :  { %v747_v59 = vsel %vm746_vm7, %v15357_v47, %v743_v57  ;;  %v14341_v47 = vld [vmem:[#allocation25 + $0xcc] sm:$0xf]  ;;  %v10383_v57 = vor.u32 %v14336_v52, %v10380_v54  ;;  %v14316_v52 = vld [vmem:[#allocation25 + $0x4] sm:$0xf] }
 0x2b7   :  { %v752_v60 = vsel %vm749_vm8, %v751_v58, %v747_v59  ;;  %v16489_v17 = vsel %vm877_vm9, %v15359_v12, %v876_v16  ;;  %v10407_v49 = vor.u32 %v14341_v47, %v10404_v48  ;;  %v10387_v58 = vor.u32 %v14339_v56, %v10386_v55  ;;  %v14337_v59 = vld [vmem:[#allocation25 + $0xac] sm:$0xf]  ;;  %v14328_v12 = vld [vmem:[#allocation25 + $0x64] sm:$0xf]  ;;  %v14331_v16 = vld [vmem:[#allocation25 + $0x74] sm:$0xf0] }
 0x2b8   :  { %v753_v61 = vmul.f32 %v15353_v24, %v752_v60  ;;  %v10410_v24 = vld [vmem:[#allocation25 + $0xe0] sm:$0xf]  ;;  %v10388_v60 = vld [vmem:[#allocation25 + $0xb8] sm:$0xf0]  ;;  %1146 = vmatpush.bf16.msrb.mxu1 %v10383_v57  ;;  %v10306_v57 = vld [vmem:[#allocation25 + $0x8] sm:$0xf] }
 0x2b9   :  { %v10411_v27 = vor.u32 %v14346_v25, %v10410_v24  ;;  %1173 = vmatpush.bf16.msra.mxu3 %v10407_v49  ;;  %1160 = vmatpush.bf16.msrb.mxu2 %v10387_v58  ;;  %v14326_v24 = vld [vmem:[#allocation25 + $0x4c] sm:$0xf0]  ;;  %v14324_v25 = vld [vmem:[#allocation25 + $0x44] sm:$0xf]  ;;  %v10324_v47 = vld [vmem:[#allocation25 + $0x38] sm:$0xf0] }
 0x2ba   :  { %10263 = vmatmul.msk.f32.gmra.mxu3 %vm705_vm0, %v753_v61  ;;  %v10391_v61 = vor.u32 %v14337_v59, %v10388_v60  ;;  %v10298_v48 = vld [vmem:[#allocation25] sm:$0xf]  ;;  %v10327_v50 = vor.u32 %v14321_v46, %v10324_v47  ;;  %v14319_v58 = vld [vmem:[#allocation25 + $0x14] sm:$0xf0]  ;;  %v14317_v59 = vld [vmem:[#allocation25 + $0xc] sm:$0xf] }
 0x2bb   :  { %1130 = vmatpush.bf16.msra.mxu0 %v10411_v27  ;;  %v10332_v27 = vld [vmem:[#allocation25 + $0x50] sm:$0xf0]  ;;  %v10299_v55 = vor.u32 %v14318_v51, %v10298_v48  ;;  %v10307_v60 = vor.u32 %v14319_v58, %v10306_v57  ;;  %v14367_v46 = vld [vmem:[#allocation28 + $0x98] sm:$0xff]  ;;  %v14349_v48 = vld [vmem:[#allocation28 + $0x8] sm:$0xff] }
 0x2bc   :  { %v10335_v30 = vor.u32 %v14324_v25, %v10332_v27  ;;  %v14375_v47 = vld [vmem:[#allocation28 + $0xd8] sm:$0xff]  ;;  %v14374_v51 = vld [vmem:[#allocation28 + $0xd0] sm:$0xff]  ;;  %v14372_v57 = vld [vmem:[#allocation28 + $0xc0] sm:$0xff] }
 0x2bd   :  { %1174 = vmatpush.bf16.msra.mxu3 %v10391_v61  ;;  %v10308_v61 = vld [vmem:[#allocation25 + $0x18] sm:$0xf0]  ;;  %v11002_v58 = vld [vmem:[#allocation31 + $0x380] sm:$0xf] }
 0x2bf   :  { %1131 = vmatpush.bf16.msra.mxu0 %v10395_v42  ;;  %v10316_v42 = vld [vmem:[#allocation25 + $0x30] sm:$0xf0] }
 0x2c0   :  { %v10319_v44 = vor.u32 %v14320_v39, %v10316_v42 }
 0x2c3   :  { %1132 = vmatpush.bf16.msra.mxu0 %v10379_v53  ;;  %v10300_v53 = vld [vmem:[#allocation25 + $0x10] sm:$0xf0] }
 0x2c4   :  { %v10303_v56 = vor.u32 %v14316_v52, %v10300_v53  ;;  %v14348_v52 = vld [vmem:[#allocation28] sm:$0xff] }
 0x2c5   :  { %v14356_v53 = vld [vmem:[#allocation28 + $0x40] sm:$0xff] }
 0x335   :  { %v777_v1 = vpop.f32.mrf.mxu3 }
 0x33d   :  { %v780_v2 = vpop.f32.mrf.mxu3 }
 0x33e   :  { %v800_v3 = vpack.c.bf16 %v780_v2, %v777_v1  ;;  %v10363_v1 = vor.u32 %v14334_v63, %v10362_v62  ;;  %v10364_v2 = vld [vmem:[#allocation25 + $0x90] sm:$0xf0]  ;;  %v10311_v63 = vor.u32 %v14317_v59, %v10308_v61  ;;  %v14500_v59 = vld [vmem:[#allocation31 + $0x3bc] sm:$0xf0] }
 0x33f   :  { %v11003_v61 = vor.u32 %v14500_v59, %v11002_v58  ;;  %v10756_v58 = vld [vmem:[#allocation31 + $0x1c8] sm:$0xf0] }
 0x340   :  { %860 = vmatmul.bf16.vlgmr.msrb.gmra.mxu3 %v800_v3  ;;  %v10370_v3 = vld [vmem:[#allocation25 + $0x88] sm:$0xf]  ;;  %1133 = vmatpush.bf16.msra.mxu0 %v10363_v1  ;;  %v14355_v1 = vld [vmem:[#allocation28 + $0x38] sm:$0xff] }
 0x3c3   :  { %v861_v5 = vpop.f32.mrf.mxu3 }
 0x3c4   :  { %v862_v6 = vadd.f32 %v15346_v4, %v861_v5  ;;  %v10367_v5 = vor.u32 %v14332_v0, %v10364_v2  ;;  %v14363_v2 = vld [vmem:[#allocation28 + $0x78] sm:$0xff] }
 0x3c6   :  { %v866_v7 = vadd.f32 %v862_v6, %v16471_v32  ;;  %1147 = vmatpush.bf16.msrb.mxu1 %v10367_v5  ;;  %v14379_v5 = vld [vmem:[#allocation28 + $0xf8] sm:$0xff] }
 0x3c8   :  { %868 = vadd.xlane.f32.xlu2 %v866_v7 }
 0x3cb   :  { %v863_v8 = vpop.f32.mrf.mxu3 }
 0x3cc   :  { %v864_v9 = vadd.f32 %v15346_v4, %v863_v8  ;;  %v14335_v4 = vld [vmem:[#allocation25 + $0x94] sm:$0xf0]  ;;  %v10372_v8 = vld [vmem:[#allocation25 + $0x98] sm:$0xf0] }
 0x3cd   :  { %v10371_v6 = vor.u32 %v14335_v4, %v10370_v3  ;;  %v14371_v4 = vld [vmem:[#allocation28 + $0xb8] sm:$0xff] }
 0x3ce   :  { %v867_v10 = vadd.f32 %v864_v9, %v16473_v33 }
 0x3cf   :  { %1161 = vmatpush.bf16.msrb.mxu2 %v10371_v6  ;;  %v14354_v6 = vld [vmem:[#allocation28 + $0x30] sm:$0xff] }
 0x3d0   :  { %870 = vadd.xlane.f32.xlu2 %v867_v10 }
 0x43b   :  { %v869_v18 = vpop.xlane.xlu2 %868 }
 0x43c   :  { %v879_v19 = vmul.f32 %v16489_v17, %v869_v18  ;;  %v10351_v18 = vor.u32 %v14328_v12, %v10348_v14  ;;  %v14353_v14 = vld [vmem:[#allocation28 + $0x28] sm:$0xff] }
 0x43e   :  { %v16492_v32 = vsub.f32 %v866_v7, %v879_v19  ;;  %v14333_v7 = vld [vmem:[#allocation25 + $0x8c] sm:$0xf]  ;;  %v10355_v19 = vor.u32 %v14331_v16, %v10354_v15  ;;  %1148 = vmatpush.bf16.msrb.mxu1 %v10351_v18 }
 0x43f   :  { %v10375_v9 = vor.u32 %v14333_v7, %v10372_v8  ;;  %v14362_v7 = vld [vmem:[#allocation28 + $0x70] sm:$0xff]  ;;  %v14361_v15 = vld [vmem:[#allocation28 + $0x68] sm:$0xff] }
 0x440   :  { %v883_v20 = vmul.f32 %v16492_v32, %v16492_v32  ;;  %1162 = vmatpush.bf16.msrb.mxu2 %v10355_v19  ;;  %v14377_v16 = vld [vmem:[#allocation28 + $0xe8] sm:$0xff] }
 0x441   :  { %1175 = vmatpush.bf16.msra.mxu3 %v10375_v9 }
 0x442   :  { %885 = vadd.xlane.f32.xlu0 %v883_v20  ;;  %v14329_v20 = vld [vmem:[#allocation25 + $0x6c] sm:$0xf]  ;;  %1149 = vmatpush.bf16.msrb.mxu1 %v10335_v30  ;;  %v15347_v30 = vld [vmem:[#allocation22] ss:$0 sm:$0xff] }
 0x443   :  { %v871_v33 = vpop.xlane.xlu2 %870 }
 0x444   :  { %v880_v21 = vmul.f32 %v16489_v17, %v871_v33  ;;  %v10356_v33 = vld [vmem:[#allocation25 + $0x78] sm:$0xf0]  ;;  %1163 = vmatpush.bf16.msrb.mxu2 %v10339_v31 }
 0x446   :  { %v16497_v22 = vsub.f32 %v867_v10, %v880_v21  ;;  %v10346_v10 = vld [vmem:[#allocation25 + $0x60] sm:$0xf]  ;;  %v10359_v21 = vor.u32 %v14329_v20, %v10356_v33  ;;  %1150 = vmatpush.bf16.msrb.mxu1 %v10319_v44  ;;  %v14352_v20 = vld [vmem:[#allocation28 + $0x20] sm:$0xff]  ;;  %v14350_v44 = vld [vmem:[#allocation28 + $0x10] sm:$0xff] }
 0x447   :  { %v10347_v13 = vor.u32 %v14330_v11, %v10346_v10  ;;  %v14370_v10 = vld [vmem:[#allocation28 + $0xb0] sm:$0xff]  ;;  %v14360_v33 = vld [vmem:[#allocation28 + $0x60] sm:$0xff] }
 0x448   :  { %v884_v23 = vmul.f32 %v16497_v22, %v16497_v22  ;;  %1176 = vmatpush.bf16.msra.mxu3 %v10359_v21  ;;  %1164 = vmatpush.bf16.msrb.mxu2 %v10323_v45  ;;  %v14378_v11 = vld [vmem:[#allocation28 + $0xf0] sm:$0xff] }
 0x449   :  { %1134 = vmatpush.bf16.msra.mxu0 %v10347_v13  ;;  %v14358_v45 = vld [vmem:[#allocation28 + $0x50] sm:$0xff] }
 0x44a   :  { %887 = vadd.xlane.f32.xlu1 %v884_v23  ;;  %v10330_v23 = vld [vmem:[#allocation25 + $0x40] sm:$0xf]  ;;  %1151 = vmatpush.bf16.msrb.mxu1 %v10303_v56  ;;  %v14364_v56 = vld [vmem:[#allocation28 + $0x80] sm:$0xff] }
 0x44b   :  { %v10331_v26 = vor.u32 %v14326_v24, %v10330_v23 }
 0x44c   :  { %1177 = vmatpush.bf16.msra.mxu3 %v10343_v36  ;;  %1165 = vmatpush.bf16.msrb.mxu2 %v10307_v60  ;;  %v14492_v60 = vld [vmem:[#allocation31 + $0x384] sm:$0xf] }
 0x44d   :  { %1135 = vmatpush.bf16.msra.mxu0 %v10331_v26 }
 0x44e   :  { %1472 = vmatpush.bf16.msra.mxu1 %v14363_v2 }
 0x450   :  { %1178 = vmatpush.bf16.msra.mxu3 %v10327_v50  ;;  %1486 = vmatpush.bf16.msra.mxu2 %v14371_v4  ;;  %v14366_v50 = vld [vmem:[#allocation28 + $0x90] sm:$0xff] }
 0x451   :  { %1136 = vmatpush.bf16.msra.mxu0 %v10315_v40  ;;  %v11012_v4 = vld [vmem:[#allocation31 + $0x3c8] sm:$0xf0] }
 0x452   :  { %1473 = vmatpush.bf16.msra.mxu1 %v14362_v7  ;;  %v14484_v7 = vld [vmem:[#allocation31 + $0x33c] sm:$0xf0] }
 0x454   :  { %1179 = vmatpush.bf16.msra.mxu3 %v10311_v63  ;;  %1487 = vmatpush.bf16.msra.mxu2 %v14370_v10  ;;  %v11010_v63 = vld [vmem:[#allocation31 + $0x388] sm:$0xf] }
 0x455   :  { %1137 = vmatpush.bf16.msra.mxu0 %v10299_v55  ;;  %v14373_v55 = vld [vmem:[#allocation28 + $0xc8] sm:$0xff] }
 0x456   :  { %1474 = vmatpush.bf16.msra.mxu1 %v14361_v15  ;;  %v16511_v15 = vld [vmem:[#allocation26] sm:$0xf] }
 0x458   :  { %1500 = vmatpush.bf16.msrb.mxu3 %v14379_v5  ;;  %v10938_v5 = vld [vmem:[#allocation31 + $0x300] sm:$0xf] }
 0x459   :  { %1458 = vmatpush.bf16.msrb.mxu0 %v14355_v1  ;;  %v10939_v10 = vor.u32 %v14484_v7, %v10938_v5  ;;  %v10690_v5 = vld [vmem:[#allocation31 + $0x108] sm:$0xf] }
 0x45a   :  { %1475 = vmatpush.bf16.msra.mxu1 %v14360_v33  ;;  %v14460_v33 = vld [vmem:[#allocation31 + $0x284] sm:$0xf] }
 0x45c   :  { %1501 = vmatpush.bf16.msrb.mxu3 %v14378_v11 }
 0x45d   :  { %1459 = vmatpush.bf16.msrb.mxu0 %v14354_v6 }
 0x45e   :  { %1476 = vmatpush.bf16.msra.mxu1 %v14359_v41  ;;  %v963_v41 = vperm.slane %v16511_v15, 1 }
 0x460   :  { %1502 = vmatpush.bf16.msrb.mxu3 %v14377_v16  ;;  %v10948_v16 = vld [vmem:[#allocation31 + $0x348] sm:$0xf0] }
 0x461   :  { %1460 = vmatpush.bf16.msrb.mxu0 %v14353_v14  ;;  %v14477_v14 = vld [vmem:[#allocation31 + $0x30c] sm:$0xf] }
 0x462   :  { %1477 = vmatpush.bf16.msra.mxu1 %v14358_v45 }
 0x465   :  { %1461 = vmatpush.bf16.msrb.mxu0 %v14352_v20  ;;  %v10951_v20 = vor.u32 %v14477_v14, %v10948_v16  ;;  %v14413_v16 = vld [vmem:[#allocation31 + $0x10c] sm:$0xf] }
 0x4b5   :  { %v886_v49 = vpop.xlane.xlu0 %885 }
 0x4b6   :  { %v889_v54 = vmul.f32 %v886_v49, %v16489_v17  ;;  %v14357_v49 = vld [vmem:[#allocation28 + $0x48] sm:$0xff] }
 0x4b7   :  { %1478 = vmatpush.bf16.msra.mxu1 %v14357_v49  ;;  %v14436_v49 = vld [vmem:[#allocation31 + $0x1bc] sm:$0xf0] }
 0x4b8   :  { %v891_v62 = vadd.f32 1e-05, %v889_v54  ;;  %v14365_v54 = vld [vmem:[#allocation28 + $0x88] sm:$0xff] }
 0x4ba   :  { %15360 = vrsqrt.f32 %v891_v62  ;;  %vm899_vm11 = vweird.f32 %v891_v62 }
 0x4bb   :  { %1479 = vmatpush.bf16.msra.mxu1 %v14356_v53  ;;  %v10754_v53 = vld [vmem:[#allocation31 + $0x188] sm:$0xf] }
 0x4bd   :  { %v888_v0 = vpop.xlane.xlu1 %887 }
 0x4be   :  { %v890_v3 = vmul.f32 %v888_v0, %v16489_v17  ;;  %v14369_v17 = vld [vmem:[#allocation28 + $0xa8] sm:$0xff] }
 0x4bf   :  { %1488 = vmatpush.bf16.msra.mxu2 %v14369_v17  ;;  %v14501_v0 = vld [vmem:[#allocation31 + $0x3c4] sm:$0xf0] }
 0x4c0   :  { %v15361_v8 = vpop.eup %15360  ;;  %v892_v9 = vadd.f32 1e-05, %v890_v3  ;;  %v11011_v2 = vor.u32 %v14501_v0, %v11010_v63  ;;  %v14493_v3 = vld [vmem:[#allocation31 + $0x38c] sm:$0xf]  ;;  %v14420_v63 = vld [vmem:[#allocation31 + $0x13c] sm:$0xf0] }
 0x4c1   :  { %v894_v12 = vmul.f32 %v15361_v8, %v891_v62  ;;  %vm900_vm10 = vweird.f32 %v15361_v8  ;;  %v11004_v62 = vld [vmem:[#allocation31 + $0x3c0] sm:$0xf0]  ;;  %v11015_v6 = vor.u32 %v14493_v3, %v11012_v4 }
 0x4c2   :  { %15362 = vrsqrt.f32 %v892_v9  ;;  %vm901_vm12 = vmor %vm899_vm11, %vm900_vm10  ;;  %vm909_vm14 = vweird.f32 %v892_v9  ;;  %v11007_v1 = vor.u32 %v14492_v60, %v11004_v62  ;;  %v10682_v62 = vld [vmem:[#allocation31 + $0x100] sm:$0xf]  ;;  %v14412_v0 = vld [vmem:[#allocation31 + $0x104] sm:$0xf] }
 0x4c3   :  { %v895_v13 = vmul.f32 %v15361_v8, %v894_v12  ;;  %1489 = vmatpush.bf16.msra.mxu2 %v14368_v43  ;;  %v10946_v12 = vld [vmem:[#allocation31 + $0x308] sm:$0xf]  ;;  %v10684_v4 = vld [vmem:[#allocation31 + $0x140] sm:$0xf0] }
 0x4c5   :  { %v896_v18 = vmul.f32 0.5, %v895_v13  ;;  %v14485_v13 = vld [vmem:[#allocation31 + $0x344] sm:$0xf0] }
 0x4c6   :  { %v10947_v17 = vor.u32 %v14485_v13, %v10946_v12 }
 0x4c7   :  { %v897_v19 = vsub.f32 1.5, %v896_v18  ;;  %1490 = vmatpush.bf16.msra.mxu2 %v14367_v46  ;;  %v10874_v18 = vld [vmem:[#allocation31 + $0x280] sm:$0xf] }
 0x4c8   :  { %v15363_v21 = vpop.eup %15362 }
 0x4c9   :  { %v898_v23 = vmul.f32 %v15361_v8, %v897_v19  ;;  %v904_v24 = vmul.f32 %v15363_v21, %v892_v9  ;;  %vm910_vm13 = vweird.f32 %v15363_v21  ;;  %v10940_v9 = vld [vmem:[#allocation31 + $0x340] sm:$0xf0]  ;;  %v14468_v19 = vld [vmem:[#allocation31 + $0x2bc] sm:$0xf0] }
 0x4ca   :  { %vm911_vm15 = vmor %vm909_vm14, %vm910_vm13 }
 0x4cb   :  { %v905_v25 = vmul.f32 %v15363_v21, %v904_v24  ;;  %v902_v26 = vsel %vm901_vm12, %v15361_v8, %v898_v23  ;;  %1491 = vmatpush.bf16.msra.mxu2 %v14366_v50  ;;  %v14476_v8 = vld [vmem:[#allocation31 + $0x304] sm:$0xf]  ;;  %v10882_v23 = vld [vmem:[#allocation31 + $0x288] sm:$0xf]  ;;  %v10875_v24 = vor.u32 %v14468_v19, %v10874_v18  ;;  %v10692_v18 = vld [vmem:[#allocation31 + $0x148] sm:$0xf0] }
 0x4cc   :  { %v913_v29 = vmul.f32 %v902_v26, %v16492_v32  ;;  %v14351_v32 = vld [vmem:[#allocation28 + $0x18] sm:$0xff]  ;;  %v10943_v11 = vor.u32 %v14476_v8, %v10940_v9  ;;  %v14461_v26 = vld [vmem:[#allocation31 + $0x28c] sm:$0xf]  ;;  %v14428_v50 = vld [vmem:[#allocation31 + $0x184] sm:$0xf]  ;;  %v964_v9 = vperm.slane %v16511_v15, 2 }
 0x4cd   :  { %v906_v27 = vmul.f32 0.5, %v905_v25  ;;  %1462 = vmatpush.bf16.msrb.mxu0 %v14351_v32  ;;  %v14469_v25 = vld [vmem:[#allocation31 + $0x2c4] sm:$0xf0]  ;;  %v10618_v19 = vld [vmem:[#allocation31 + $0x80] sm:$0xf] }
 0x4ce   :  { %v919_v36 = vmul.f32 %v15347_v30, %v913_v29  ;;  %v10883_v29 = vor.u32 %v14469_v25, %v10882_v23  ;;  %v14396_v23 = vld [vmem:[#allocation31 + $0x84] sm:$0xf] }
 0x4cf   :  { %v907_v28 = vsub.f32 1.5, %v906_v27  ;;  %1492 = vmatpush.bf16.msra.mxu2 %v14365_v54  ;;  %v10884_v27 = vld [vmem:[#allocation31 + $0x2c8] sm:$0xf0]  ;;  %v14437_v54 = vld [vmem:[#allocation31 + $0x1c4] sm:$0xf0] }
 0x4d0   :  { %v16505_v39 = vadd.f32 %v15348_v37, %v919_v36  ;;  %v10812_v36 = vld [vmem:[#allocation31 + $0x240] sm:$0xf0] }
 0x4d1   :  { %v908_v31 = vmul.f32 %v15363_v21, %v907_v28  ;;  %1463 = vmatpush.bf16.msrb.mxu0 %v14350_v44  ;;  %v10820_v44 = vld [vmem:[#allocation31 + $0x248] sm:$0xf0] }
 0x4d3   :  { %v912_v34 = vsel %vm911_vm15, %v15363_v21, %v908_v31  ;;  %1493 = vmatpush.bf16.msra.mxu2 %v14364_v56  ;;  %v10876_v21 = vld [vmem:[#allocation31 + $0x2c0] sm:$0xf0]  ;;  %v14452_v31 = vld [vmem:[#allocation31 + $0x23c] sm:$0xf0] }
 0x4d4   :  { %v914_v35 = vmul.f32 %v912_v34, %v16497_v22  ;;  %v14376_v22 = vld [vmem:[#allocation28 + $0xe0] sm:$0xff]  ;;  %v10879_v28 = vor.u32 %v14460_v33, %v10876_v21 }
 0x4d5   :  { %1503 = vmatpush.bf16.msrb.mxu3 %v14376_v22  ;;  %1464 = vmatpush.bf16.msrb.mxu0 %v14349_v48  ;;  %v14444_v34 = vld [vmem:[#allocation31 + $0x204] sm:$0xf]  ;;  %v14445_v22 = vld [vmem:[#allocation31 + $0x20c] sm:$0xf]  ;;  %v10746_v48 = vld [vmem:[#allocation31 + $0x180] sm:$0xf] }
 0x4d6   :  { %v920_v38 = vmul.f32 %v15347_v30, %v914_v35  ;;  %v10810_v30 = vld [vmem:[#allocation31 + $0x200] sm:$0xf]  ;;  %v10887_v35 = vor.u32 %v14461_v26, %v10884_v27  ;;  %v10815_v46 = vor.u32 %v14444_v34, %v10812_v36  ;;  %v10747_v59 = vor.u32 %v14436_v49, %v10746_v48  ;;  %v14405_v27 = vld [vmem:[#allocation31 + $0xc4] sm:$0xf0]  ;;  %v10628_v36 = vld [vmem:[#allocation31 + $0xc8] sm:$0xf0] }
 0x4d7   :  { %v10811_v45 = vor.u32 %v14452_v31, %v10810_v30  ;;  %v14404_v21 = vld [vmem:[#allocation31 + $0xbc] sm:$0xf0]  ;;  %v10556_v48 = vld [vmem:[#allocation31 + $0x40] sm:$0xf0]  ;;  %v10562_v49 = vld [vmem:[#allocation31 + $0x8] sm:$0xf] }
 0x4d8   :  { %v16507_v40 = vadd.f32 %v15348_v37, %v920_v38  ;;  %v10818_v37 = vld [vmem:[#allocation31 + $0x208] sm:$0xf]  ;;  %v10619_v34 = vor.u32 %v14404_v21, %v10618_v19  ;;  %v10964_v21 = vld [vmem:[#allocation31 + $0x358] sm:$0xf0] }
 0x4d9   :  { %1504 = vmatpush.bf16.msrb.mxu3 %v14375_v47  ;;  %1465 = vmatpush.bf16.msrb.mxu0 %v14348_v52  ;;  %v14453_v38 = vld [vmem:[#allocation31 + $0x244] sm:$0xf0]  ;;  %v10748_v52 = vld [vmem:[#allocation31 + $0x1c0] sm:$0xf0] }
 0x4da   :  { %v960_v42 = vpack.c.bf16 %v16507_v40, %v16505_v39  ;;  %v10819_v47 = vor.u32 %v14453_v38, %v10818_v37  ;;  %v10751_v60 = vor.u32 %v14428_v50, %v10748_v52  ;;  %v14389_v50 = vld [vmem:[#allocation31 + $0x44] sm:$0xf0]  ;;  %v14381_v52 = vld [vmem:[#allocation31 + $0xc] sm:$0xf] }
 0x4dc   :  { %1138 = vmatmul.bf16.vlgmr.msra.gmra.mxu0 %v960_v42  ;;  %1152 = vmatmul.bf16.vlgmr.msrb.gmra.mxu1 %v960_v42 }
 0x4dd   :  { %1166 = vmatmul.bf16.vlgmr.msrb.gmra.mxu2 %v960_v42  ;;  %1180 = vmatmul.bf16.vlgmr.msra.gmra.mxu3 %v960_v42  ;;  %v962_v42 = vperm.slane %v16511_v15, 0 }
 0x4de   :  { %1505 = vmatpush.bf16.msrb.mxu3 %v14374_v51  ;;  %2321 = vmatpush.bf16.msra.mxu0 %v11003_v61  ;;  %v10823_v51 = vor.u32 %v14445_v22, %v10820_v44  ;;  %v10755_v61 = vor.u32 %v14437_v54, %v10754_v53  ;;  %v14380_v44 = vld [vmem:[#allocation31 + $0x4] sm:$0xf]  ;;  %v10564_v53 = vld [vmem:[#allocation31 + $0x48] sm:$0xf0] }
 0x4df   :  { %2335 = vmatpush.bf16.msrb.mxu1 %v11007_v1  ;;  %2349 = vmatpush.bf16.msrb.mxu2 %v11011_v2 }
 0x4e2   :  { %1506 = vmatpush.bf16.msrb.mxu3 %v14373_v55  ;;  %2322 = vmatpush.bf16.msra.mxu0 %v10939_v10  ;;  %v965_v10 = vperm.slane %v16511_v15, 3  ;;  %v10626_v15 = vld [vmem:[#allocation31 + $0x88] sm:$0xf] }
 0x4e3   :  { %2336 = vmatpush.bf16.msrb.mxu1 %v10943_v11  ;;  %2350 = vmatpush.bf16.msrb.mxu2 %v10947_v17  ;;  %v10683_v17 = vor.u32 %v14420_v63, %v10682_v62  ;;  %v10567_v62 = vor.u32 %v14381_v52, %v10564_v53  ;;  %v11018_v63 = vld [vmem:[#allocation31 + $0x390] sm:$0xf]  ;;  %v10764_v53 = vld [vmem:[#allocation31 + $0x1d0] sm:$0xf0] }
 0x4e6   :  { %1507 = vmatpush.bf16.msrb.mxu3 %v14372_v57  ;;  %2323 = vmatpush.bf16.msra.mxu0 %v10875_v24  ;;  %v14429_v57 = vld [vmem:[#allocation31 + $0x18c] sm:$0xf]  ;;  %v10620_v24 = vld [vmem:[#allocation31 + $0xc0] sm:$0xf0] }
 0x4e7   :  { %2337 = vmatpush.bf16.msrb.mxu1 %v10879_v28  ;;  %2351 = vmatpush.bf16.msrb.mxu2 %v10883_v29  ;;  %v10759_v3 = vor.u32 %v14429_v57, %v10756_v58  ;;  %v10695_v28 = vor.u32 %v14413_v16, %v10692_v18  ;;  %v10623_v38 = vor.u32 %v14396_v23, %v10620_v24  ;;  %v10962_v16 = vld [vmem:[#allocation31 + $0x318] sm:$0xf]  ;;  %v10890_v24 = vld [vmem:[#allocation31 + $0x290] sm:$0xf] }
 0x4e8   :  { %v10559_v58 = vor.u32 %v14380_v44, %v10556_v48  ;;  %v14487_v18 = vld [vmem:[#allocation31 + $0x354] sm:$0xf0] }
 0x4ea   :  { %2363 = vmatpush.bf16.msra.mxu3 %v11015_v6  ;;  %2324 = vmatpush.bf16.msra.mxu0 %v10811_v45  ;;  %v14421_v6 = vld [vmem:[#allocation31 + $0x144] sm:$0xf0] }
 0x4eb   :  { %2338 = vmatpush.bf16.msrb.mxu1 %v10815_v46  ;;  %2352 = vmatpush.bf16.msrb.mxu2 %v10819_v47  ;;  %v10691_v33 = vor.u32 %v14421_v6, %v10690_v5  ;;  %v14503_v5 = vld [vmem:[#allocation31 + $0x3d4] sm:$0xf0] }
 0x4ee   :  { %2364 = vmatpush.bf16.msra.mxu3 %v10951_v20  ;;  %2325 = vmatpush.bf16.msra.mxu0 %v10747_v59  ;;  %v10687_v20 = vor.u32 %v14412_v0, %v10684_v4  ;;  %v10563_v59 = vor.u32 %v14389_v50, %v10562_v49  ;;  %v14502_v0 = vld [vmem:[#allocation31 + $0x3cc] sm:$0xf0]  ;;  %v11026_v4 = vld [vmem:[#allocation31 + $0x398] sm:$0xf] }
 0x4ef   :  { %2339 = vmatpush.bf16.msrb.mxu1 %v10751_v60  ;;  %2353 = vmatpush.bf16.msrb.mxu2 %v10755_v61  ;;  %v10762_v49 = vld [vmem:[#allocation31 + $0x190] sm:$0xf] }
 0x4f0   :  { %v14438_v50 = vld [vmem:[#allocation31 + $0x1cc] sm:$0xf0] }
 0x4f1   :  { %v10763_v52 = vor.u32 %v14438_v50, %v10762_v49 }
 0x4f2   :  { %2365 = vmatpush.bf16.msra.mxu3 %v10887_v35  ;;  %2326 = vmatpush.bf16.msra.mxu0 %v10683_v17  ;;  %v14397_v35 = vld [vmem:[#allocation31 + $0x8c] sm:$0xf]  ;;  %v10956_v17 = vld [vmem:[#allocation31 + $0x350] sm:$0xf0] }
 0x4f3   :  { %2340 = vmatpush.bf16.msrb.mxu1 %v10687_v20  ;;  %2354 = vmatpush.bf16.msrb.mxu2 %v10691_v33  ;;  %v10631_v47 = vor.u32 %v14397_v35, %v10628_v36  ;;  %v10963_v20 = vor.u32 %v14487_v18, %v10962_v16  ;;  %v14479_v33 = vld [vmem:[#allocation31 + $0x31c] sm:$0xf] }
 0x4f4   :  { %v10967_v23 = vor.u32 %v14479_v33, %v10964_v21  ;;  %v10900_v35 = vld [vmem:[#allocation31 + $0x2d8] sm:$0xf0]  ;;  %v10570_v21 = vld [vmem:[#allocation31 + $0x10] sm:$0xf] }
 0x4f6   :  { %2366 = vmatpush.bf16.msra.mxu3 %v10823_v51  ;;  %2327 = vmatpush.bf16.msra.mxu0 %v10619_v34  ;;  %v14463_v34 = vld [vmem:[#allocation31 + $0x29c] sm:$0xf] }
 0x4f7   :  { %2341 = vmatpush.bf16.msrb.mxu1 %v10623_v38  ;;  %v10903_v36 = vor.u32 %v14463_v34, %v10900_v35  ;;  %v14454_v38 = vld [vmem:[#allocation31 + $0x24c] sm:$0xf0] }
 0x4fa   :  { %2367 = vmatpush.bf16.msra.mxu3 %v10759_v3  ;;  %v11020_v3 = vld [vmem:[#allocation31 + $0x3d0] sm:$0xf0] }
 0x4fb   :  { %2342 = vmatpush.bf16.msrb.mxu1 %v10559_v58  ;;  %v14431_v58 = vld [vmem:[#allocation31 + $0x19c] sm:$0xf] }
 0x4fe   :  { %2368 = vmatpush.bf16.msra.mxu3 %v10695_v28  ;;  %v10898_v28 = vld [vmem:[#allocation31 + $0x298] sm:$0xf] }
 0x502   :  { %2369 = vmatpush.bf16.msra.mxu3 %v10631_v47  ;;  %v10836_v47 = vld [vmem:[#allocation31 + $0x258] sm:$0xf0] }
 0x506   :  { %2370 = vmatpush.bf16.msra.mxu3 %v10567_v62  ;;  %v14422_v62 = vld [vmem:[#allocation31 + $0x14c] sm:$0xf0] }
 0x559   :  { %v1139_v32 = vpop.f32.mrf.mxu0  ;;  %v1153_v43 = vpop.f32.mrf.mxu1 }
 0x55a   :  { %v1140_v55 = vadd.f32 %v1139_v32, %v962_v42  ;;  %v1154_v56 = vadd.f32 %v1153_v43, %v963_v41  ;;  %v10554_v32 = vld [vmem:[#allocation31] sm:$0xf] }
 0x55c   :  { %v1186_v7 = vmax.f32 %v1140_v55, 0.0  ;;  %v1187_v8 = vmax.f32 %v1154_v56, 0.0 }
 0x560   :  { %v1167_v1 = vpop.f32.mrf.mxu2  ;;  %v1181_v2 = vpop.f32.mrf.mxu3 }
 0x561   :  { %v1141_v11 = vpop.f32.mrf.mxu0  ;;  %v1155_v12 = vpop.f32.mrf.mxu1  ;;  %v1168_v29 = vadd.f32 %v1167_v1, %v964_v9  ;;  %v1182_v37 = vadd.f32 %v1181_v2, %v965_v10  ;;  %v14494_v1 = vld [vmem:[#allocation31 + $0x394] sm:$0xf]  ;;  %v11019_v2 = vor.u32 %v14502_v0, %v11018_v63 }
 0x562   :  { %v1142_v13 = vadd.f32 %v1141_v11, %v962_v42  ;;  %v1156_v14 = vadd.f32 %v1155_v12, %v963_v41  ;;  %v10627_v42 = vor.u32 %v14405_v27, %v10626_v15  ;;  %v14388_v41 = vld [vmem:[#allocation31 + $0x3c] sm:$0xf0]  ;;  %v11023_v6 = vor.u32 %v14494_v1, %v11020_v3  ;;  %v10954_v11 = vld [vmem:[#allocation31 + $0x310] sm:$0xf]  ;;  %v10892_v27 = vld [vmem:[#allocation31 + $0x2d0] sm:$0xf0] }
 0x563   :  { %v10555_v51 = vor.u32 %v14388_v41, %v10554_v32  ;;  %v1188_v54 = vmax.f32 %v1168_v29, 0.0  ;;  %v1189_v55 = vmax.f32 %v1182_v37, 0.0  ;;  %v14486_v12 = vld [vmem:[#allocation31 + $0x34c] sm:$0xf0]  ;;  %v14471_v29 = vld [vmem:[#allocation31 + $0x2d4] sm:$0xf0] }
 0x564   :  { %v1190_v25 = vmax.f32 %v1142_v13, 0.0  ;;  %v1191_v26 = vmax.f32 %v1156_v14, 0.0  ;;  %2355 = vmatpush.bf16.msrb.mxu2 %v10627_v42  ;;  %v14478_v13 = vld [vmem:[#allocation31 + $0x314] sm:$0xf]  ;;  %v10955_v14 = vor.u32 %v14486_v12, %v10954_v11  ;;  %v10826_v37 = vld [vmem:[#allocation31 + $0x210] sm:$0xf] }
 0x565   :  { %2328 = vmatpush.bf16.msra.mxu0 %v10555_v51  ;;  %v10959_v19 = vor.u32 %v14478_v13, %v10956_v17  ;;  %v14446_v42 = vld [vmem:[#allocation31 + $0x214] sm:$0xf]  ;;  %v10827_v32 = vor.u32 %v14454_v38, %v10826_v37  ;;  %v14423_v3 = vld [vmem:[#allocation31 + $0x154] sm:$0xf0] }
 0x566   :  { %v1259_v30 = vpack.c.bf16 %v1190_v25, %v1186_v7  ;;  %v1260_v31 = vpack.c.bf16 %v1191_v26, %v1187_v8  ;;  %v11027_v7 = vor.u32 %v14503_v5, %v11026_v4  ;;  %v14495_v8 = vld [vmem:[#allocation31 + $0x39c] sm:$0xf]  ;;  %v14470_v25 = vld [vmem:[#allocation31 + $0x2cc] sm:$0xf0]  ;;  %v14462_v26 = vld [vmem:[#allocation31 + $0x294] sm:$0xf] }
 0x567   :  { %v10891_v15 = vor.u32 %v14470_v25, %v10890_v24  ;;  %v10828_v41 = vld [vmem:[#allocation31 + $0x250] sm:$0xf0]  ;;  %v14407_v17 = vld [vmem:[#allocation31 + $0xd4] sm:$0xf0] }
 0x568   :  { %v1169_v43 = vpop.f32.mrf.mxu2  ;;  %v1183_v22 = vpop.f32.mrf.mxu3  ;;  %1466 = vmatmul.bf16.vlgmr.msrb.gmra.mxu0 %v1259_v30  ;;  %1480 = vmatmul.bf16.vlgmr.msra.gmra.mxu1 %v1260_v31  ;;  %v10895_v30 = vor.u32 %v14462_v26, %v10892_v27  ;;  %v10899_v31 = vor.u32 %v14471_v29, %v10898_v28  ;;  %v10831_v44 = vor.u32 %v14446_v42, %v10828_v41  ;;  %v14430_v51 = vld [vmem:[#allocation31 + $0x194] sm:$0xf]  ;;  %v14391_v27 = vld [vmem:[#allocation31 + $0x54] sm:$0xf0] }
 0x569   :  { %v1170_v45 = vadd.f32 %v1169_v43, %v964_v9  ;;  %v1184_v46 = vadd.f32 %v1183_v22, %v965_v10  ;;  %2356 = vmatpush.bf16.msrb.mxu2 %v10563_v59  ;;  %v11028_v9 = vld [vmem:[#allocation31 + $0x3d8] sm:$0xf0]  ;;  %2377 = vmatpush.bf16.msrb.mxu0 %v11019_v2  ;;  %v10834_v43 = vld [vmem:[#allocation31 + $0x218] sm:$0xf]  ;;  %v14414_v63 = vld [vmem:[#allocation31 + $0x114] sm:$0xf] }
 0x56a   :  { %v11031_v10 = vor.u32 %v14495_v8, %v11028_v9  ;;  %2391 = vmatpush.bf16.msra.mxu1 %v11023_v6  ;;  %v14455_v22 = vld [vmem:[#allocation31 + $0x254] sm:$0xf0]  ;;  %v10772_v59 = vld [vmem:[#allocation31 + $0x1d8] sm:$0xf0]  ;;  %v10700_v1 = vld [vmem:[#allocation31 + $0x150] sm:$0xf0] }
 0x56b   :  { %v1192_v56 = vmax.f32 %v1170_v45, 0.0  ;;  %v1193_v57 = vmax.f32 %v1184_v46, 0.0  ;;  %v10835_v45 = vor.u32 %v14455_v22, %v10834_v43  ;;  %v14447_v46 = vld [vmem:[#allocation31 + $0x21c] sm:$0xf]  ;;  %v10706_v2 = vld [vmem:[#allocation31 + $0x118] sm:$0xf]  ;;  %v10703_v4 = vor.u32 %v14414_v63, %v10700_v1 }
 0x56c   :  { %v10839_v48 = vor.u32 %v14447_v46, %v10836_v47  ;;  %v10707_v5 = vor.u32 %v14423_v3, %v10706_v2  ;;  %v14415_v6 = vld [vmem:[#allocation31 + $0x11c] sm:$0xf]  ;;  %v10634_v9 = vld [vmem:[#allocation31 + $0x90] sm:$0xf]  ;;  %v14398_v11 = vld [vmem:[#allocation31 + $0x94] sm:$0xf] }
 0x56d   :  { %v1261_v60 = vpack.c.bf16 %v1192_v56, %v1188_v54  ;;  %v1262_v61 = vpack.c.bf16 %v1193_v57, %v1189_v55  ;;  %2378 = vmatpush.bf16.msrb.mxu0 %v10955_v14  ;;  %v10770_v54 = vld [vmem:[#allocation31 + $0x198] sm:$0xf]  ;;  %v10767_v56 = vor.u32 %v14430_v51, %v10764_v53  ;;  %v10636_v13 = vld [vmem:[#allocation31 + $0xd0] sm:$0xf0]  ;;  %v14504_v53 = vld [vmem:[#allocation31 + $0x3dc] sm:$0xf0] }
 0x56e   :  { %2392 = vmatpush.bf16.msra.mxu1 %v10959_v19  ;;  %v14439_v55 = vld [vmem:[#allocation31 + $0x1d4] sm:$0xf0]  ;;  %v10639_v16 = vor.u32 %v14398_v11, %v10636_v13  ;;  %v14399_v19 = vld [vmem:[#allocation31 + $0x9c] sm:$0xf]  ;;  %v14382_v24 = vld [vmem:[#allocation31 + $0x14] sm:$0xf] }
 0x56f   :  { %1494 = vmatmul.bf16.vlgmr.msra.gmra.mxu2 %v1261_v60  ;;  %1508 = vmatmul.bf16.vlgmr.msrb.gmra.mxu3 %v1262_v61  ;;  %v10771_v57 = vor.u32 %v14439_v55, %v10770_v54  ;;  %v10775_v60 = vor.u32 %v14431_v58, %v10772_v59  ;;  %v10698_v61 = vld [vmem:[#allocation31 + $0x110] sm:$0xf]  ;;  %v10642_v14 = vld [vmem:[#allocation31 + $0x98] sm:$0xf]  ;;  %v10572_v26 = vld [vmem:[#allocation31 + $0x50] sm:$0xf0] }
 0x570   :  { %2405 = vmatpush.bf16.msra.mxu2 %v11027_v7  ;;  %2419 = vmatpush.bf16.msrb.mxu3 %v11031_v10  ;;  %v10699_v0 = vor.u32 %v14422_v62, %v10698_v61  ;;  %v10708_v7 = vld [vmem:[#allocation31 + $0x158] sm:$0xf0]  ;;  %v14406_v10 = vld [vmem:[#allocation31 + $0xcc] sm:$0xf0]  ;;  %v10643_v18 = vor.u32 %v14407_v17, %v10642_v14  ;;  %v10575_v28 = vor.u32 %v14382_v24, %v10572_v26  ;;  %v14496_v54 = vld [vmem:[#allocation31 + $0x3a4] sm:$0xf] }
 0x571   :  { %2379 = vmatpush.bf16.msrb.mxu0 %v10891_v15  ;;  %v10711_v8 = vor.u32 %v14415_v6, %v10708_v7  ;;  %v10635_v12 = vor.u32 %v14406_v10, %v10634_v9  ;;  %v10578_v15 = vld [vmem:[#allocation31 + $0x18] sm:$0xf]  ;;  %v11036_v55 = vld [vmem:[#allocation31 + $0x3e0] sm:$0xf0]  ;;  %v14505_v59 = vld [vmem:[#allocation31 + $0x3e4] sm:$0xf0] }
 0x572   :  { %2393 = vmatpush.bf16.msra.mxu1 %v10895_v30  ;;  %v10579_v29 = vor.u32 %v14391_v27, %v10578_v15  ;;  %v14383_v30 = vld [vmem:[#allocation31 + $0x1c] sm:$0xf]  ;;  %v11044_v61 = vld [vmem:[#allocation31 + $0x3e8] sm:$0xf0]  ;;  %v10970_v1 = vld [vmem:[#allocation31 + $0x320] sm:$0xf] }
 0x573   :  { %v14488_v2 = vld [vmem:[#allocation31 + $0x35c] sm:$0xf0]  ;;  %v10972_v6 = vld [vmem:[#allocation31 + $0x360] sm:$0xf0]  ;;  %v10978_v7 = vld [vmem:[#allocation31 + $0x328] sm:$0xf] }
 0x574   :  { %2406 = vmatpush.bf16.msra.mxu2 %v10963_v20  ;;  %2420 = vmatpush.bf16.msrb.mxu3 %v10967_v23  ;;  %v10644_v20 = vld [vmem:[#allocation31 + $0xd8] sm:$0xf0]  ;;  %v14390_v23 = vld [vmem:[#allocation31 + $0x4c] sm:$0xf0]  ;;  %v10971_v9 = vor.u32 %v14488_v2, %v10970_v1  ;;  %v10906_v11 = vld [vmem:[#allocation31 + $0x2a0] sm:$0xf] }
 0x575   :  { %2380 = vmatpush.bf16.msrb.mxu0 %v10827_v32  ;;  %v10647_v33 = vor.u32 %v14399_v19, %v10644_v20  ;;  %v10571_v25 = vor.u32 %v14390_v23, %v10570_v21  ;;  %v14464_v17 = vld [vmem:[#allocation31 + $0x2a4] sm:$0xf]  ;;  %v14473_v19 = vld [vmem:[#allocation31 + $0x2e4] sm:$0xf0]  ;;  %v14465_v20 = vld [vmem:[#allocation31 + $0x2ac] sm:$0xf] }
 0x576   :  { %2394 = vmatpush.bf16.msra.mxu1 %v10831_v44  ;;  %v10842_v24 = vld [vmem:[#allocation31 + $0x220] sm:$0xf]  ;;  %v14448_v27 = vld [vmem:[#allocation31 + $0x224] sm:$0xf] }
 0x577   :  { %v14400_v2 = vld [vmem:[#allocation31 + $0xa4] sm:$0xf] }
 0x578   :  { %2407 = vmatpush.bf16.msra.mxu2 %v10899_v31  ;;  %2421 = vmatpush.bf16.msrb.mxu3 %v10903_v36  ;;  %v10580_v31 = vld [vmem:[#allocation31 + $0x58] sm:$0xf0] }
 0x579   :  { %2381 = vmatpush.bf16.msrb.mxu0 %v10763_v52  ;;  %v10583_v34 = vor.u32 %v14383_v30, %v10580_v31  ;;  %v15349_v36 = vld [vmem:[#allocation29] ss:$0 sm:$0xff]  ;;  %v11034_v52 = vld [vmem:[#allocation31 + $0x3a0] sm:$0xf]  ;;  %v14457_v30 = vld [vmem:[#allocation31 + $0x264] sm:$0xf0] }
 0x57a   :  { %2395 = vmatpush.bf16.msra.mxu1 %v10767_v56  ;;  %v11042_v56 = vld [vmem:[#allocation31 + $0x3a8] sm:$0xf]  ;;  %v11035_v63 = vor.u32 %v14504_v53, %v11034_v52  ;;  %v14449_v31 = vld [vmem:[#allocation31 + $0x22c] sm:$0xf]  ;;  %v14416_v53 = vld [vmem:[#allocation31 + $0x124] sm:$0xf] }
 0x57b   :  { %v11043_v3 = vor.u32 %v14505_v59, %v11042_v56  ;;  %v14425_v56 = vld [vmem:[#allocation31 + $0x164] sm:$0xf0] }
 0x57c   :  { %2408 = vmatpush.bf16.msra.mxu2 %v10835_v45  ;;  %2422 = vmatpush.bf16.msrb.mxu3 %v10839_v48 }
 0x57d   :  { %2382 = vmatpush.bf16.msrb.mxu0 %v10699_v0  ;;  %v11039_v0 = vor.u32 %v14496_v54, %v11036_v55  ;;  %v10716_v54 = vld [vmem:[#allocation31 + $0x160] sm:$0xf0]  ;;  %v10722_v55 = vld [vmem:[#allocation31 + $0x128] sm:$0xf] }
 0x57e   :  { %2396 = vmatpush.bf16.msra.mxu1 %v10703_v4 }
 0x580   :  { %2409 = vmatpush.bf16.msra.mxu2 %v10771_v57  ;;  %2423 = vmatpush.bf16.msrb.mxu3 %v10775_v60  ;;  %v14497_v60 = vld [vmem:[#allocation31 + $0x3ac] sm:$0xf] }
 0x581   :  { %2383 = vmatpush.bf16.msrb.mxu0 %v10635_v12  ;;  %v11047_v4 = vor.u32 %v14497_v60, %v11044_v61  ;;  %v14472_v12 = vld [vmem:[#allocation31 + $0x2dc] sm:$0xf0]  ;;  %v10719_v60 = vor.u32 %v14416_v53, %v10716_v54  ;;  %v14475_v53 = vld [vmem:[#allocation31 + $0x2f4] sm:$0xf0]  ;;  %v14467_v54 = vld [vmem:[#allocation31 + $0x2bc] sm:$0xf] }
 0x582   :  { %2397 = vmatpush.bf16.msra.mxu1 %v10639_v16  ;;  %v10908_v16 = vld [vmem:[#allocation31 + $0x2e0] sm:$0xf0]  ;;  %v10907_v21 = vor.u32 %v14472_v12, %v10906_v11  ;;  %v10650_v61 = vld [vmem:[#allocation31 + $0xa0] sm:$0xf] }
 0x583   :  { %v10911_v23 = vor.u32 %v14464_v17, %v10908_v16  ;;  %v10588_v11 = vld [vmem:[#allocation31 + $0x60] sm:$0xf0]  ;;  %v14393_v17 = vld [vmem:[#allocation31 + $0x64] sm:$0xf0]  ;;  %v14385_v16 = vld [vmem:[#allocation31 + $0x2c] sm:$0xf] }
 0x584   :  { %2410 = vmatpush.bf16.msra.mxu2 %v10707_v5  ;;  %2424 = vmatpush.bf16.msrb.mxu3 %v10711_v8  ;;  %v14480_v5 = vld [vmem:[#allocation31 + $0x324] sm:$0xf]  ;;  %v10980_v8 = vld [vmem:[#allocation31 + $0x368] sm:$0xf0] }
 0x585   :  { %2384 = vmatpush.bf16.msrb.mxu0 %v10571_v25  ;;  %v10975_v10 = vor.u32 %v14480_v5, %v10972_v6  ;;  %v14456_v25 = vld [vmem:[#allocation31 + $0x25c] sm:$0xf0]  ;;  %v14409_v5 = vld [vmem:[#allocation31 + $0xe4] sm:$0xf0]  ;;  %v14401_v6 = vld [vmem:[#allocation31 + $0xac] sm:$0xf] }
 0x586   :  { %2398 = vmatpush.bf16.msra.mxu1 %v10575_v28  ;;  %v10844_v28 = vld [vmem:[#allocation31 + $0x260] sm:$0xf0] }
 0x588   :  { %2411 = vmatpush.bf16.msra.mxu2 %v10643_v18  ;;  %2425 = vmatpush.bf16.msrb.mxu3 %v10647_v33  ;;  %v10914_v18 = vld [vmem:[#allocation31 + $0x2a8] sm:$0xf]  ;;  %v10916_v33 = vld [vmem:[#allocation31 + $0x2e8] sm:$0xf0] }
 0x589   :  { %v10915_v26 = vor.u32 %v14473_v19, %v10914_v18  ;;  %v10919_v15 = vor.u32 %v14465_v20, %v10916_v33  ;;  %v10596_v18 = vld [vmem:[#allocation31 + $0x68] sm:$0xf0]  ;;  %v11050_v19 = vld [vmem:[#allocation31 + $0x3b0] sm:$0xf]  ;;  %v14498_v33 = vld [vmem:[#allocation31 + $0x3b4] sm:$0xf] }
 0x58a   :  { %v14506_v20 = vld [vmem:[#allocation31 + $0x3ec] sm:$0xf0] }
 0x58c   :  { %2412 = vmatpush.bf16.msra.mxu2 %v10579_v29  ;;  %2426 = vmatpush.bf16.msrb.mxu3 %v10583_v34  ;;  %v10850_v29 = vld [vmem:[#allocation31 + $0x228] sm:$0xf]  ;;  %v10852_v34 = vld [vmem:[#allocation31 + $0x268] sm:$0xf0] }
 0x5e5   :  { %v1467_v35 = vpop.f32.mrf.mxu0  ;;  %v1481_v37 = vpop.f32.mrf.mxu1 }
 0x5e6   :  { %v1468_v38 = vadd.f32 %v15349_v36, %v1467_v35  ;;  %v10843_v35 = vor.u32 %v14456_v25, %v10842_v24 }
 0x5e8   :  { %v1482_v43 = vadd.f32 %v1481_v37, %v1468_v38  ;;  %v10778_v37 = vld [vmem:[#allocation31 + $0x1a0] sm:$0xf] }
 0x5e9   :  { %v14440_v38 = vld [vmem:[#allocation31 + $0x1dc] sm:$0xf0] }
 0x5ed   :  { %v1469_v42 = vpop.f32.mrf.mxu0  ;;  %v1483_v45 = vpop.f32.mrf.mxu1 }
 0x5ee   :  { %v1470_v22 = vadd.f32 %v15349_v36, %v1469_v42  ;;  %v10847_v36 = vor.u32 %v14448_v27, %v10844_v28  ;;  %v10851_v42 = vor.u32 %v14457_v30, %v10850_v29  ;;  %v11060_v27 = vld [vmem:[#allocation31 + $0x3f8] sm:$0xf0]  ;;  %v10599_v29 = vor.u32 %v14385_v16, %v10596_v18  ;;  %v10730_v18 = vld [vmem:[#allocation31 + $0x130] sm:$0xf] }
 0x5ef   :  { %v11051_v30 = vor.u32 %v14506_v20, %v11050_v19  ;;  %v14426_v19 = vld [vmem:[#allocation31 + $0x16c] sm:$0xf0] }
 0x5f0   :  { %v1484_v46 = vadd.f32 %v1483_v45, %v1470_v22  ;;  %v10786_v22 = vld [vmem:[#allocation31 + $0x1a8] sm:$0xf]  ;;  %v14433_v45 = vld [vmem:[#allocation31 + $0x1ac] sm:$0xf] }
 0x5f2   :  { %v1495_v32 = vpop.f32.mrf.mxu2  ;;  %v1509_v41 = vpop.f32.mrf.mxu3 }
 0x5f3   :  { %v1496_v44 = vadd.f32 %v1495_v32, %v1482_v43  ;;  %v10855_v32 = vor.u32 %v14449_v31, %v10852_v34  ;;  %v10780_v43 = vld [vmem:[#allocation31 + $0x1e0] sm:$0xf0]  ;;  %v10986_v34 = vld [vmem:[#allocation31 + $0x330] sm:$0xf] }
 0x5f5   :  { %v1510_v48 = vadd.f32 %v1509_v41, %v1496_v44  ;;  %v14432_v41 = vld [vmem:[#allocation31 + $0x1a4] sm:$0xf]  ;;  %v14441_v44 = vld [vmem:[#allocation31 + $0x1e4] sm:$0xf0] }
 0x5f7   :  { %v1514_v57 = vadd.f32 %v1510_v48, %v16505_v39  ;;  %v14489_v39 = vld [vmem:[#allocation31 + $0x364] sm:$0xf0]  ;;  %v10783_v48 = vor.u32 %v14432_v41, %v10780_v43  ;;  %v14491_v41 = vld [vmem:[#allocation31 + $0x374] sm:$0xf0]  ;;  %v14483_v43 = vld [vmem:[#allocation31 + $0x33c] sm:$0xf] }
 0x5f8   :  { %v10979_v13 = vor.u32 %v14489_v39, %v10978_v7  ;;  %v10660_v7 = vld [vmem:[#allocation31 + $0xe8] sm:$0xf0]  ;;  %v10586_v39 = vld [vmem:[#allocation31 + $0x20] sm:$0xf] }
 0x5fa   :  { %v1497_v47 = vpop.f32.mrf.mxu2  ;;  %v1511_v50 = vpop.f32.mrf.mxu3 }
 0x5fb   :  { %v1498_v49 = vadd.f32 %v1497_v47, %v1484_v46  ;;  %v10788_v46 = vld [vmem:[#allocation31 + $0x1e8] sm:$0xf0]  ;;  %v10779_v47 = vor.u32 %v14440_v38, %v10778_v37  ;;  %v14482_v38 = vld [vmem:[#allocation31 + $0x334] sm:$0xf] }
 0x5fc   :  { %v10791_v52 = vor.u32 %v14433_v45, %v10788_v46  ;;  %v10922_v46 = vld [vmem:[#allocation31 + $0x2b0] sm:$0xf] }
 0x5fd   :  { %v1512_v51 = vadd.f32 %v1511_v50, %v1498_v49  ;;  %v10714_v49 = vld [vmem:[#allocation31 + $0x120] sm:$0xf] }
 0x5fe   :  { %v14424_v50 = vld [vmem:[#allocation31 + $0x15c] sm:$0xf0] }
 0x5ff   :  { %v1515_v58 = vadd.f32 %v1512_v51, %v16507_v40  ;;  %v14481_v40 = vld [vmem:[#allocation31 + $0x32c] sm:$0xf]  ;;  %v10787_v51 = vor.u32 %v14441_v44, %v10786_v22  ;;  %v10715_v59 = vor.u32 %v14424_v50, %v10714_v49  ;;  %v10996_v22 = vld [vmem:[#allocation31 + $0x378] sm:$0xf0]  ;;  %v14466_v50 = vld [vmem:[#allocation31 + $0x2b4] sm:$0xf] }
 0x600   :  { %v10983_v14 = vor.u32 %v14481_v40, %v10980_v8  ;;  %v10999_v49 = vor.u32 %v14483_v43, %v10996_v22  ;;  %v10602_v22 = vld [vmem:[#allocation31 + $0x30] sm:$0xf] }
 0x601   :  { %v16519_v62 = vpack.c.bf16 %v1515_v58, %v1514_v57  ;;  %v14417_v57 = vld [vmem:[#allocation31 + $0x12c] sm:$0xf] }
 0x602   :  { %v10724_v58 = vld [vmem:[#allocation31 + $0x168] sm:$0xf0] }
 0x603   :  { %2329 = vmatmul.bf16.vlgmr.msra.gmra.mxu0 %v16519_v62  ;;  %2343 = vmatmul.bf16.vlgmr.msrb.gmra.mxu1 %v16519_v62  ;;  %v10727_v1 = vor.u32 %v14417_v57, %v10724_v58  ;;  %v10858_v58 = vld [vmem:[#allocation31 + $0x230] sm:$0xf] }
 0x604   :  { %2357 = vmatmul.bf16.vlgmr.msrb.gmra.mxu2 %v16519_v62  ;;  %2371 = vmatmul.bf16.vlgmr.msra.gmra.mxu3 %v16519_v62 }
 0x605   :  { %2433 = vmatpush.bf16.msra.mxu0 %v11035_v63  ;;  %2447 = vmatpush.bf16.msrb.mxu1 %v11039_v0  ;;  %v14408_v63 = vld [vmem:[#allocation31 + $0xdc] sm:$0xf0]  ;;  %v10723_v0 = vor.u32 %v14425_v56, %v10722_v55  ;;  %v10932_v55 = vld [vmem:[#allocation31 + $0x2f8] sm:$0xf0] }
 0x606   :  { %2461 = vmatpush.bf16.msrb.mxu2 %v11043_v3  ;;  %2475 = vmatpush.bf16.msra.mxu3 %v11047_v4  ;;  %v10652_v3 = vld [vmem:[#allocation31 + $0xe0] sm:$0xf0]  ;;  %v10658_v4 = vld [vmem:[#allocation31 + $0xa8] sm:$0xf]  ;;  %v10651_v40 = vor.u32 %v14408_v63, %v10650_v61  ;;  %v10935_v61 = vor.u32 %v14467_v54, %v10932_v55  ;;  %v14450_v63 = vld [vmem:[#allocation31 + $0x234] sm:$0xf] }
 0x607   :  { %v10655_v8 = vor.u32 %v14400_v2, %v10652_v3  ;;  %v10659_v12 = vor.u32 %v14409_v5, %v10658_v4  ;;  %v14459_v2 = vld [vmem:[#allocation31 + $0x274] sm:$0xf0]  ;;  %v14451_v3 = vld [vmem:[#allocation31 + $0x23c] sm:$0xf] }
 0x608   :  { %v10868_v4 = vld [vmem:[#allocation31 + $0x278] sm:$0xf0] }
 0x609   :  { %2434 = vmatpush.bf16.msra.mxu0 %v10971_v9  ;;  %2448 = vmatpush.bf16.msrb.mxu1 %v10975_v10  ;;  %v14392_v9 = vld [vmem:[#allocation31 + $0x5c] sm:$0xf0]  ;;  %v14384_v10 = vld [vmem:[#allocation31 + $0x24] sm:$0xf] }
 0x60a   :  { %2462 = vmatpush.bf16.msrb.mxu2 %v10979_v13  ;;  %2476 = vmatpush.bf16.msra.mxu3 %v10983_v14  ;;  %v10663_v13 = vor.u32 %v14401_v6, %v10660_v7  ;;  %v10594_v14 = vld [vmem:[#allocation31 + $0x28] sm:$0xf]  ;;  %v10587_v24 = vor.u32 %v14392_v9, %v10586_v39  ;;  %v10591_v25 = vor.u32 %v14384_v10, %v10588_v11  ;;  %v10794_v7 = vld [vmem:[#allocation31 + $0x1b0] sm:$0xf]  ;;  %v14434_v9 = vld [vmem:[#allocation31 + $0x1b4] sm:$0xf] }
 0x60b   :  { %v10595_v28 = vor.u32 %v14393_v17, %v10594_v14  ;;  %v14442_v39 = vld [vmem:[#allocation31 + $0x1ec] sm:$0xf0]  ;;  %v10796_v10 = vld [vmem:[#allocation31 + $0x1f0] sm:$0xf0]  ;;  %v10802_v11 = vld [vmem:[#allocation31 + $0x1b8] sm:$0xf] }
 0x60c   :  { %v10804_v14 = vld [vmem:[#allocation31 + $0x1f8] sm:$0xf0]  ;;  %v10795_v17 = vor.u32 %v14442_v39, %v10794_v7  ;;  %v10799_v16 = vor.u32 %v14434_v9, %v10796_v10 }
 0x60d   :  { %2435 = vmatpush.bf16.msra.mxu0 %v10907_v21  ;;  %2449 = vmatpush.bf16.msrb.mxu1 %v10911_v23  ;;  %v11052_v21 = vld [vmem:[#allocation31 + $0x3f0] sm:$0xf0]  ;;  %v11058_v23 = vld [vmem:[#allocation31 + $0x3b8] sm:$0xf] }
 0x60e   :  { %2463 = vmatpush.bf16.msrb.mxu2 %v10915_v26  ;;  %2477 = vmatpush.bf16.msra.mxu3 %v10919_v15  ;;  %v14507_v26 = vld [vmem:[#allocation31 + $0x3f4] sm:$0xf0]  ;;  %v14499_v15 = vld [vmem:[#allocation31 + $0x3bc] sm:$0xf]  ;;  %v11055_v31 = vor.u32 %v14498_v33, %v11052_v21  ;;  %v14418_v21 = vld [vmem:[#allocation31 + $0x134] sm:$0xf] }
 0x60f   :  { %v11063_v37 = vor.u32 %v14499_v15, %v11060_v27  ;;  %v10740_v15 = vld [vmem:[#allocation31 + $0x178] sm:$0xf0]  ;;  %v10731_v27 = vor.u32 %v14426_v19, %v10730_v18 }
 0x611   :  { %2436 = vmatpush.bf16.msra.mxu0 %v10843_v35  ;;  %2450 = vmatpush.bf16.msrb.mxu1 %v10847_v36  ;;  %v14490_v35 = vld [vmem:[#allocation31 + $0x36c] sm:$0xf0]  ;;  %v11059_v36 = vor.u32 %v14507_v26, %v11058_v23  ;;  %v10732_v23 = vld [vmem:[#allocation31 + $0x170] sm:$0xf0]  ;;  %v14419_v26 = vld [vmem:[#allocation31 + $0x13c] sm:$0xf] }
 0x612   :  { %2464 = vmatpush.bf16.msrb.mxu2 %v10851_v42  ;;  %2478 = vmatpush.bf16.msra.mxu3 %v10855_v32  ;;  %v10988_v42 = vld [vmem:[#allocation31 + $0x370] sm:$0xf0]  ;;  %v10994_v32 = vld [vmem:[#allocation31 + $0x338] sm:$0xf]  ;;  %v10987_v44 = vor.u32 %v14490_v35, %v10986_v34  ;;  %v10743_v34 = vor.u32 %v14419_v26, %v10740_v15 }
 0x613   :  { %2385 = vmatmul.bf16.vlgmr.msrb.gmra.mxu0 %v16519_v62  ;;  %2399 = vmatmul.bf16.vlgmr.msra.gmra.mxu1 %v16519_v62  ;;  %v10991_v45 = vor.u32 %v14482_v38, %v10988_v42  ;;  %v14402_v35 = vld [vmem:[#allocation31 + $0xb4] sm:$0xf]  ;;  %v14411_v38 = vld [vmem:[#allocation31 + $0xf4] sm:$0xf0]  ;;  %v14403_v42 = vld [vmem:[#allocation31 + $0xbc] sm:$0xf] }
 0x614   :  { %2413 = vmatmul.bf16.vlgmr.msra.gmra.mxu2 %v16519_v62  ;;  %2427 = vmatmul.bf16.vlgmr.msrb.gmra.mxu3 %v16519_v62 }
 0x615   :  { %2437 = vmatpush.bf16.msra.mxu0 %v10779_v47  ;;  %2451 = vmatpush.bf16.msrb.mxu1 %v10783_v48  ;;  %v14474_v47 = vld [vmem:[#allocation31 + $0x2ec] sm:$0xf0]  ;;  %v10995_v48 = vor.u32 %v14491_v41, %v10994_v32  ;;  %v10676_v32 = vld [vmem:[#allocation31 + $0xf8] sm:$0xf0] }
 0x616   :  { %2465 = vmatpush.bf16.msrb.mxu2 %v10787_v51  ;;  %2479 = vmatpush.bf16.msra.mxu3 %v10791_v52  ;;  %v10924_v51 = vld [vmem:[#allocation31 + $0x2f0] sm:$0xf0]  ;;  %v10930_v52 = vld [vmem:[#allocation31 + $0x2b8] sm:$0xf]  ;;  %v10923_v56 = vor.u32 %v14474_v47, %v10922_v46  ;;  %v10679_v46 = vor.u32 %v14403_v42, %v10676_v32 }
 0x617   :  { %v10927_v57 = vor.u32 %v14466_v50, %v10924_v51  ;;  %v14386_v47 = vld [vmem:[#allocation31 + $0x34] sm:$0xf]  ;;  %v14395_v50 = vld [vmem:[#allocation31 + $0x74] sm:$0xf0]  ;;  %v14387_v51 = vld [vmem:[#allocation31 + $0x3c] sm:$0xf] }
 0x619   :  { %2438 = vmatpush.bf16.msra.mxu0 %v10715_v59  ;;  %2452 = vmatpush.bf16.msrb.mxu1 %v10719_v60  ;;  %v14458_v59 = vld [vmem:[#allocation31 + $0x26c] sm:$0xf0]  ;;  %v10931_v60 = vor.u32 %v14475_v53, %v10930_v52  ;;  %v10612_v52 = vld [vmem:[#allocation31 + $0x78] sm:$0xf0] }
 0x61a   :  { %2466 = vmatpush.bf16.msrb.mxu2 %v10723_v0  ;;  %2480 = vmatpush.bf16.msra.mxu3 %v10727_v1  ;;  %v10860_v0 = vld [vmem:[#allocation31 + $0x270] sm:$0xf0]  ;;  %v10866_v1 = vld [vmem:[#allocation31 + $0x238] sm:$0xf]  ;;  %v10859_v5 = vor.u32 %v14458_v59, %v10858_v58 }
 0x61b   :  { %v10863_v6 = vor.u32 %v14450_v63, %v10860_v0 }
 0x61d   :  { %2439 = vmatpush.bf16.msra.mxu0 %v10651_v40  ;;  %2453 = vmatpush.bf16.msrb.mxu1 %v10655_v8  ;;  %v10867_v40 = vor.u32 %v14459_v2, %v10866_v1  ;;  %v10871_v8 = vor.u32 %v14451_v3, %v10868_v4 }
 0x61e   :  { %2467 = vmatpush.bf16.msrb.mxu2 %v10659_v12  ;;  %2481 = vmatpush.bf16.msra.mxu3 %v10663_v13  ;;  %v14443_v12 = vld [vmem:[#allocation31 + $0x1f4] sm:$0xf0]  ;;  %v14435_v13 = vld [vmem:[#allocation31 + $0x1bc] sm:$0xf] }
 0x61f   :  { %v10803_v20 = vor.u32 %v14443_v12, %v10802_v11  ;;  %v10807_v33 = vor.u32 %v14435_v13, %v10804_v14 }
 0x621   :  { %2440 = vmatpush.bf16.msra.mxu0 %v10587_v24  ;;  %2454 = vmatpush.bf16.msrb.mxu1 %v10591_v25  ;;  %v10738_v24 = vld [vmem:[#allocation31 + $0x138] sm:$0xf] }
 0x622   :  { %2468 = vmatpush.bf16.msrb.mxu2 %v10595_v28  ;;  %2482 = vmatpush.bf16.msra.mxu3 %v10599_v29  ;;  %v14427_v25 = vld [vmem:[#allocation31 + $0x174] sm:$0xf0]  ;;  %v10735_v28 = vor.u32 %v14418_v21, %v10732_v23  ;;  %v10666_v29 = vld [vmem:[#allocation31 + $0xb0] sm:$0xf] }
 0x624   :  { %2441 = vmatmul.bf16.vlgmr.msra.gmra.mxu0 %v16519_v62  ;;  %2455 = vmatmul.bf16.vlgmr.msrb.gmra.mxu1 %v16519_v62 }
 0x625   :  { %2489 = vmatpush.bf16.msrb.mxu0 %v11051_v30  ;;  %2503 = vmatpush.bf16.msra.mxu1 %v11055_v31  ;;  %v14410_v30 = vld [vmem:[#allocation31 + $0xec] sm:$0xf0]  ;;  %v10739_v31 = vor.u32 %v14427_v25, %v10738_v24 }
 0x626   :  { %2517 = vmatpush.bf16.msra.mxu2 %v11059_v36  ;;  %2531 = vmatpush.bf16.msrb.mxu3 %v11063_v37  ;;  %v10668_v36 = vld [vmem:[#allocation31 + $0xf0] sm:$0xf0]  ;;  %v10674_v37 = vld [vmem:[#allocation31 + $0xb8] sm:$0xf]  ;;  %v10667_v41 = vor.u32 %v14410_v30, %v10666_v29 }
 0x627   :  { %2469 = vmatmul.bf16.vlgmr.msrb.gmra.mxu2 %v16519_v62  ;;  %2483 = vmatmul.bf16.vlgmr.msra.gmra.mxu3 %v16519_v62  ;;  %v10671_v43 = vor.u32 %v14402_v35, %v10668_v36 }
 0x629   :  { %2490 = vmatpush.bf16.msrb.mxu0 %v10987_v44  ;;  %2504 = vmatpush.bf16.msra.mxu1 %v10991_v45  ;;  %v14394_v44 = vld [vmem:[#allocation31 + $0x6c] sm:$0xf0]  ;;  %v10675_v45 = vor.u32 %v14411_v38, %v10674_v37 }
 0x62a   :  { %2518 = vmatpush.bf16.msra.mxu2 %v10995_v48  ;;  %2532 = vmatpush.bf16.msrb.mxu3 %v10999_v49  ;;  %v10604_v48 = vld [vmem:[#allocation31 + $0x70] sm:$0xf0]  ;;  %v10610_v49 = vld [vmem:[#allocation31 + $0x38] sm:$0xf]  ;;  %v10603_v53 = vor.u32 %v14394_v44, %v10602_v22  ;;  %v1645_v44 = vld [vmem:[#allocation32 + $0x8] sm:$0xff] }
 0x62b   :  { %v10607_v54 = vor.u32 %v14386_v47, %v10604_v48  ;;  %v10611_v55 = vor.u32 %v14395_v50, %v10610_v49  ;;  %v1657_v47 = vperm.slane %v1645_v44, 0  ;;  %v1658_v48 = vperm.slane %v1645_v44, 1 }
 0x62d   :  { %2491 = vmatpush.bf16.msrb.mxu0 %v10923_v56  ;;  %2505 = vmatpush.bf16.msra.mxu1 %v10927_v57  ;;  %v10615_v56 = vor.u32 %v14387_v51, %v10612_v52 }
 0x62e   :  { %2519 = vmatpush.bf16.msra.mxu2 %v10931_v60  ;;  %2533 = vmatpush.bf16.msrb.mxu3 %v10935_v61 }
 0x631   :  { %2492 = vmatpush.bf16.msrb.mxu0 %v10859_v5  ;;  %2506 = vmatpush.bf16.msra.mxu1 %v10863_v6 }
 0x632   :  { %2520 = vmatpush.bf16.msra.mxu2 %v10867_v40  ;;  %2534 = vmatpush.bf16.msrb.mxu3 %v10871_v8 }
 0x635   :  { %2493 = vmatpush.bf16.msrb.mxu0 %v10795_v17  ;;  %2507 = vmatpush.bf16.msra.mxu1 %v10799_v16 }
 0x636   :  { %2521 = vmatpush.bf16.msra.mxu2 %v10803_v20  ;;  %2535 = vmatpush.bf16.msrb.mxu3 %v10807_v33 }
 0x639   :  { %2494 = vmatpush.bf16.msrb.mxu0 %v10731_v27  ;;  %2508 = vmatpush.bf16.msra.mxu1 %v10735_v28 }
 0x63a   :  { %2522 = vmatpush.bf16.msra.mxu2 %v10739_v31  ;;  %2536 = vmatpush.bf16.msrb.mxu3 %v10743_v34 }
 0x63d   :  { %2495 = vmatpush.bf16.msrb.mxu0 %v10667_v41  ;;  %2509 = vmatpush.bf16.msra.mxu1 %v10671_v43 }
 0x63e   :  { %2523 = vmatpush.bf16.msra.mxu2 %v10675_v45  ;;  %2537 = vmatpush.bf16.msrb.mxu3 %v10679_v46 }
 0x641   :  { %2496 = vmatpush.bf16.msrb.mxu0 %v10603_v53  ;;  %2510 = vmatpush.bf16.msra.mxu1 %v10607_v54 }
 0x642   :  { %2524 = vmatpush.bf16.msra.mxu2 %v10611_v55  ;;  %2538 = vmatpush.bf16.msrb.mxu3 %v10615_v56 }
 0x644   :  { %2497 = vmatmul.bf16.vlgmr.msrb.gmra.mxu0 %v16519_v62  ;;  %2511 = vmatmul.bf16.vlgmr.msra.gmra.mxu1 %v16519_v62 }
 0x645   :  { %2525 = vmatmul.bf16.vlgmr.msra.gmra.mxu2 %v16519_v62  ;;  %2539 = vmatmul.bf16.vlgmr.msrb.gmra.mxu3 %v16519_v62  ;;  %v1644_v62 = vld [vmem:[#allocation32] sm:$0xff] }
 0x646   :  { %v1649_v57 = vperm.slane %v1644_v62, 0  ;;  %v1650_v58 = vperm.slane %v1644_v62, 1  ;;  %v1651_v2 = vperm.slane %v1644_v62, 2  ;;  %v1652_v3 = vperm.slane %v1644_v62, 3 }
 0x647   :  { %v1653_v14 = vperm.slane %v1644_v62, 4  ;;  %v1654_v17 = vperm.slane %v1644_v62, 5  ;;  %v1655_v28 = vperm.slane %v1644_v62, 6  ;;  %v1656_v29 = vperm.slane %v1644_v62, 7 }
 0x680   :  { %v2330_v59 = vpop.f32.mrf.mxu0  ;;  %v2344_v60 = vpop.f32.mrf.mxu1 }
 0x681   :  { %v16549_v61 = vadd.f32 %v2330_v59, %v1649_v57  ;;  %v16551_v63 = vadd.f32 %v2344_v60, %v1650_v58  ;;  %v1660_v59 = vperm.slane %v1645_v44, 3 }
 0x687   :  { %v2358_v4 = vpop.f32.mrf.mxu2  ;;  %v2372_v5 = vpop.f32.mrf.mxu3 }
 0x688   :  { %v16555_v6 = vadd.f32 %v2358_v4, %v1651_v2  ;;  %v16557_v7 = vadd.f32 %v2372_v5, %v1652_v3  ;;  %v2332_v39 = vpop.f32.mrf.mxu0  ;;  %v2346_v40 = vpop.f32.mrf.mxu1 }
 0x689   :  { %v16559_v8 = vadd.f32 %v2332_v39, %v1649_v57  ;;  %v16561_v9 = vadd.f32 %v2346_v40, %v1650_v58  ;;  %v1659_v58 = vperm.slane %v1645_v44, 2 }
 0x68a   :  { %v2547_v10 = vmax.f32 %v16555_v6, 0.0 }
 0x68f   :  { %v2360_v16 = vpop.f32.mrf.mxu2  ;;  %v2374_v18 = vpop.f32.mrf.mxu3 }
 0x690   :  { %v16567_v19 = vadd.f32 %v2360_v16, %v1651_v2  ;;  %v16569_v20 = vadd.f32 %v2374_v18, %v1652_v3  ;;  %v2386_v33 = vpop.f32.mrf.mxu0  ;;  %v2400_v21 = vpop.f32.mrf.mxu1 }
 0x691   :  { %v16571_v23 = vadd.f32 %v2386_v33, %v1653_v14  ;;  %v16573_v24 = vadd.f32 %v2400_v21, %v1654_v17 }
 0x697   :  { %v2414_v30 = vpop.f32.mrf.mxu2  ;;  %v2428_v31 = vpop.f32.mrf.mxu3 }
 0x698   :  { %v16579_v34 = vadd.f32 %v2414_v30, %v1655_v28  ;;  %v16581_v35 = vadd.f32 %v2428_v31, %v1656_v29  ;;  %v2388_v36 = vpop.f32.mrf.mxu0  ;;  %v2402_v37 = vpop.f32.mrf.mxu1 }
 0x699   :  { %v16583_v38 = vadd.f32 %v2388_v36, %v1653_v14  ;;  %v16585_v42 = vadd.f32 %v2402_v37, %v1654_v17  ;;  %v1661_v37 = vperm.slane %v1645_v44, 4 }
 0x69f   :  { %v2416_v45 = vpop.f32.mrf.mxu2  ;;  %v2430_v46 = vpop.f32.mrf.mxu3 }
 0x6a0   :  { %v16591_v49 = vadd.f32 %v2416_v45, %v1655_v28  ;;  %v16593_v50 = vadd.f32 %v2430_v46, %v1656_v29  ;;  %v1662_v45 = vperm.slane %v1645_v44, 5 }
 0x6a1   :  { %v2442_v53 = vpop.f32.mrf.mxu0  ;;  %v2456_v54 = vpop.f32.mrf.mxu1 }
 0x6a2   :  { %v16597_v55 = vadd.f32 %v2442_v53, %v1657_v47  ;;  %v16599_v56 = vadd.f32 %v2456_v54, %v1658_v48 }
 0x6a9   :  { %v2444_v5 = vpop.f32.mrf.mxu0  ;;  %v2458_v39 = vpop.f32.mrf.mxu1 }
 0x6aa   :  { %v2470_v60 = vpop.f32.mrf.mxu2  ;;  %v2484_v2 = vpop.f32.mrf.mxu3  ;;  %v16607_v40 = vadd.f32 %v2444_v5, %v1657_v47  ;;  %v16609_v14 = vadd.f32 %v2458_v39, %v1658_v48 }
 0x6ab   :  { %v16603_v3 = vadd.f32 %v2470_v60, %v1659_v58  ;;  %v16605_v4 = vadd.f32 %v2484_v2, %v1660_v59  ;;  %v1664_v2 = vperm.slane %v1645_v44, 7 }
 0x6b2   :  { %v2472_v21 = vpop.f32.mrf.mxu2  ;;  %v2486_v28 = vpop.f32.mrf.mxu3 }
 0x6b3   :  { %v16615_v29 = vadd.f32 %v2472_v21, %v1659_v58  ;;  %v16617_v30 = vadd.f32 %v2486_v28, %v1660_v59  ;;  %v1663_v58 = vperm.slane %v1645_v44, 6 }
 0x6c1   :  { %v2498_v46 = vpop.f32.mrf.mxu0  ;;  %v2512_v47 = vpop.f32.mrf.mxu1 }
 0x6c2   :  { %v16621_v48 = vadd.f32 %v2498_v46, %v1661_v37  ;;  %v16623_v53 = vadd.f32 %v2512_v47, %v1662_v45 }
 0x6c8   :  { %v2526_v59 = vpop.f32.mrf.mxu2  ;;  %v2540_v5 = vpop.f32.mrf.mxu3 }
 0x6c9   :  { %v16627_v39 = vadd.f32 %v2526_v59, %v1663_v58  ;;  %v16629_v21 = vadd.f32 %v2540_v5, %v1664_v2  ;;  %v2500_v28 = vpop.f32.mrf.mxu0  ;;  %v2514_v33 = vpop.f32.mrf.mxu1 }
 0x6ca   :  { %v16631_v57 = vadd.f32 %v2500_v28, %v1661_v37  ;;  %v16633_v46 = vadd.f32 %v2514_v33, %v1662_v45 }
 0x6d0   :  { %v2528_v36 = vpop.f32.mrf.mxu2  ;;  %v2542_v16 = vpop.f32.mrf.mxu3 }
 0x6d1   :  { %v16639_v59 = vadd.f32 %v2528_v36, %v1663_v58  ;;  %v16641_v5 = vadd.f32 %v2542_v16, %v1664_v2 }
 0x6d2   :  { %16182 = dma.done.wait [#allocation6], 65536 }
 0x6d3   :  { %16183 = vsyncadd [#allocation6], 4294901760  ;;  %v11178_v33 = vld [vmem:[#allocation2 + $0xe0] sm:$0xf]  ;;  %v14538_v45 = vld [vmem:[#allocation2 + $0xec] sm:$0xf0] }
 0x6d4   :  { %v11306_v28 = vld [vmem:[#allocation2 + $0x1e0] sm:$0xf]  ;;  %v11179_v54 = vor.u32 %v14538_v45, %v11178_v33  ;;  %v14570_v47 = vld [vmem:[#allocation2 + $0x1ec] sm:$0xf0]  ;;  %v11436_v11 = vld [vmem:[#allocation2 + $0x2f0] sm:$0xf0] }
 0x6d5   :  { %v11434_v60 = vld [vmem:[#allocation2 + $0x2e0] sm:$0xf]  ;;  %v14602_v62 = vld [vmem:[#allocation2 + $0x2ec] sm:$0xf0]  ;;  %v11307_v44 = vor.u32 %v14570_v47, %v11306_v28  ;;  %v11164_v12 = vld [vmem:[#allocation2 + $0xd0] sm:$0xf0] }
 0x6d6   :  { %v11435_v31 = vor.u32 %v14602_v62, %v11434_v60  ;;  %v11562_v17 = vld [vmem:[#allocation2 + $0x3e0] sm:$0xf]  ;;  %v14634_v36 = vld [vmem:[#allocation2 + $0x3ec] sm:$0xf0]  ;;  %3364 = vmatpush.bf16.msra.mxu0 %v11179_v54  ;;  %v14564_v0 = vld [vmem:[#allocation2 + $0x1c4] sm:$0xf] }
 0x6d7   :  { %v11162_v58 = vld [vmem:[#allocation2 + $0xc0] sm:$0xf]  ;;  %v11563_v16 = vor.u32 %v14634_v36, %v11562_v17  ;;  %v14534_v2 = vld [vmem:[#allocation2 + $0xcc] sm:$0xf0]  ;;  %3378 = vmatpush.bf16.msrb.mxu1 %v11307_v44  ;;  %v11420_v25 = vld [vmem:[#allocation2 + $0x2d0] sm:$0xf0] }
 0x6d8   :  { %v11290_v18 = vld [vmem:[#allocation2 + $0x1c0] sm:$0xf]  ;;  %v14566_v22 = vld [vmem:[#allocation2 + $0x1cc] sm:$0xf0]  ;;  %3392 = vmatpush.bf16.msrb.mxu2 %v11435_v31  ;;  %v11163_v37 = vor.u32 %v14534_v2, %v11162_v58 }
 0x6d9   :  { %v11291_v27 = vor.u32 %v14566_v22, %v11290_v18  ;;  %v11418_v52 = vld [vmem:[#allocation2 + $0x2c0] sm:$0xf]  ;;  %v14598_v41 = vld [vmem:[#allocation2 + $0x2cc] sm:$0xf0]  ;;  %3406 = vmatpush.bf16.msra.mxu3 %v11563_v16 }
 0x6da   :  { %v11546_v33 = vld [vmem:[#allocation2 + $0x3c0] sm:$0xf]  ;;  %v11419_v45 = vor.u32 %v14598_v41, %v11418_v52  ;;  %v14630_v43 = vld [vmem:[#allocation2 + $0x3cc] sm:$0xf0]  ;;  %3365 = vmatpush.bf16.msra.mxu0 %v11163_v37 }
 0x6db   :  { %v11146_v47 = vld [vmem:[#allocation2 + $0xa0] sm:$0xf]  ;;  %v14530_v62 = vld [vmem:[#allocation2 + $0xac] sm:$0xf0]  ;;  %v11547_v60 = vor.u32 %v14630_v43, %v11546_v33  ;;  %3379 = vmatpush.bf16.msrb.mxu1 %v11291_v27 }
 0x6dc   :  { %v11274_v28 = vld [vmem:[#allocation2 + $0x1a0] sm:$0xf]  ;;  %v14562_v15 = vld [vmem:[#allocation2 + $0x1ac] sm:$0xf0]  ;;  %v11147_v17 = vor.u32 %v14530_v62, %v11146_v47  ;;  %3393 = vmatpush.bf16.msrb.mxu2 %v11419_v45 }
 0x6dd   :  { %v11402_v54 = vld [vmem:[#allocation2 + $0x2a0] sm:$0xf]  ;;  %v14594_v36 = vld [vmem:[#allocation2 + $0x2ac] sm:$0xf0]  ;;  %v11275_v22 = vor.u32 %v14562_v15, %v11274_v28  ;;  %3407 = vmatpush.bf16.msra.mxu3 %v11547_v60 }
 0x6de   :  { %v11530_v51 = vld [vmem:[#allocation2 + $0x3a0] sm:$0xf]  ;;  %v14626_v44 = vld [vmem:[#allocation2 + $0x3ac] sm:$0xf0]  ;;  %v11403_v18 = vor.u32 %v14594_v36, %v11402_v54  ;;  %3366 = vmatpush.bf16.msra.mxu0 %v11147_v17 }
 0x6df   :  { %v11130_v31 = vld [vmem:[#allocation2 + $0x80] sm:$0xf]  ;;  %v14526_v58 = vld [vmem:[#allocation2 + $0x8c] sm:$0xf0]  ;;  %v11531_v41 = vor.u32 %v14626_v44, %v11530_v51  ;;  %3380 = vmatpush.bf16.msrb.mxu1 %v11275_v22 }
 0x6e0   :  { %v11258_v16 = vld [vmem:[#allocation2 + $0x180] sm:$0xf]  ;;  %v14558_v52 = vld [vmem:[#allocation2 + $0x18c] sm:$0xf0]  ;;  %v11131_v37 = vor.u32 %v14526_v58, %v11130_v31  ;;  %3394 = vmatpush.bf16.msrb.mxu2 %v11403_v18 }
 0x6e1   :  { %v11386_v2 = vld [vmem:[#allocation2 + $0x280] sm:$0xf]  ;;  %v14590_v43 = vld [vmem:[#allocation2 + $0x28c] sm:$0xf0]  ;;  %v11259_v47 = vor.u32 %v14558_v52, %v11258_v16  ;;  %3408 = vmatpush.bf16.msra.mxu3 %v11531_v41 }
 0x6e2   :  { %v11514_v33 = vld [vmem:[#allocation2 + $0x380] sm:$0xf]  ;;  %v14622_v32 = vld [vmem:[#allocation2 + $0x38c] sm:$0xf0]  ;;  %v11387_v62 = vor.u32 %v14590_v43, %v11386_v2  ;;  %3367 = vmatpush.bf16.msra.mxu0 %v11131_v37 }
 0x6e3   :  { %v11114_v27 = vld [vmem:[#allocation2 + $0x60] sm:$0xf]  ;;  %v14522_v45 = vld [vmem:[#allocation2 + $0x6c] sm:$0xf0]  ;;  %v11515_v28 = vor.u32 %v14622_v32, %v11514_v33  ;;  %3381 = vmatpush.bf16.msrb.mxu1 %v11259_v47 }
 0x6e4   :  { %v11242_v15 = vld [vmem:[#allocation2 + $0x160] sm:$0xf]  ;;  %v14554_v54 = vld [vmem:[#allocation2 + $0x16c] sm:$0xf0]  ;;  %v11115_v13 = vor.u32 %v14522_v45, %v11114_v27  ;;  %3395 = vmatpush.bf16.msrb.mxu2 %v11387_v62 }
 0x6e5   :  { %v11370_v36 = vld [vmem:[#allocation2 + $0x260] sm:$0xf]  ;;  %v14586_v60 = vld [vmem:[#allocation2 + $0x26c] sm:$0xf0]  ;;  %v11243_v17 = vor.u32 %v14554_v54, %v11242_v15  ;;  %3409 = vmatpush.bf16.msra.mxu3 %v11515_v28 }
 0x6e6   :  { %v11498_v51 = vld [vmem:[#allocation2 + $0x360] sm:$0xf]  ;;  %v14618_v44 = vld [vmem:[#allocation2 + $0x36c] sm:$0xf0]  ;;  %v11371_v31 = vor.u32 %v14586_v60, %v11370_v36  ;;  %3368 = vmatpush.bf16.msra.mxu0 %v11115_v13 }
 0x6e7   :  { %v11098_v22 = vld [vmem:[#allocation2 + $0x40] sm:$0xf]  ;;  %v14518_v18 = vld [vmem:[#allocation2 + $0x4c] sm:$0xf0]  ;;  %v11499_v16 = vor.u32 %v14618_v44, %v11498_v51  ;;  %3382 = vmatpush.bf16.msrb.mxu1 %v11243_v17 }
 0x6e8   :  { %v11226_v58 = vld [vmem:[#allocation2 + $0x140] sm:$0xf]  ;;  %v14550_v52 = vld [vmem:[#allocation2 + $0x14c] sm:$0xf0]  ;;  %v11099_v33 = vor.u32 %v14518_v18, %v11098_v22  ;;  %3396 = vmatpush.bf16.msrb.mxu2 %v11371_v31 }
 0x6e9   :  { %v11354_v2 = vld [vmem:[#allocation2 + $0x240] sm:$0xf]  ;;  %v14582_v41 = vld [vmem:[#allocation2 + $0x24c] sm:$0xf0]  ;;  %v11227_v37 = vor.u32 %v14550_v52, %v11226_v58  ;;  %3410 = vmatpush.bf16.msra.mxu3 %v11499_v16 }
 0x6ea   :  { %v11482_v32 = vld [vmem:[#allocation2 + $0x340] sm:$0xf]  ;;  %v14614_v43 = vld [vmem:[#allocation2 + $0x34c] sm:$0xf0]  ;;  %v11355_v27 = vor.u32 %v14582_v41, %v11354_v2  ;;  %3369 = vmatpush.bf16.msra.mxu0 %v11099_v33  ;;  %v14536_v41 = vld [vmem:[#allocation2 + $0xe4] sm:$0xf] }
 0x6eb   :  { %v11082_v47 = vld [vmem:[#allocation2 + $0x20] sm:$0xf]  ;;  %v14514_v62 = vld [vmem:[#allocation2 + $0x2c] sm:$0xf0]  ;;  %v11483_v15 = vor.u32 %v14614_v43, %v11482_v32  ;;  %3383 = vmatpush.bf16.msrb.mxu1 %v11227_v37  ;;  %v11180_v32 = vld [vmem:[#allocation2 + $0xf0] sm:$0xf0] }
 0x6ec   :  { %v11210_v45 = vld [vmem:[#allocation2 + $0x120] sm:$0xf]  ;;  %v14546_v54 = vld [vmem:[#allocation2 + $0x12c] sm:$0xf0]  ;;  %v11083_v44 = vor.u32 %v14514_v62, %v11082_v47  ;;  %3397 = vmatpush.bf16.msrb.mxu2 %v11355_v27  ;;  %v14568_v43 = vld [vmem:[#allocation2 + $0x1e4] sm:$0xf] }
 0x6ed   :  { %v11338_v36 = vld [vmem:[#allocation2 + $0x220] sm:$0xf]  ;;  %v14578_v28 = vld [vmem:[#allocation2 + $0x22c] sm:$0xf0]  ;;  %v11211_v13 = vor.u32 %v14546_v54, %v11210_v45  ;;  %3411 = vmatpush.bf16.msra.mxu3 %v11483_v15  ;;  %v11308_v47 = vld [vmem:[#allocation2 + $0x1f0] sm:$0xf0] }
 0x6ee   :  { %v11466_v60 = vld [vmem:[#allocation2 + $0x320] sm:$0xf]  ;;  %v14610_v51 = vld [vmem:[#allocation2 + $0x32c] sm:$0xf0]  ;;  %v11339_v17 = vor.u32 %v14578_v28, %v11338_v36  ;;  %3370 = vmatpush.bf16.msra.mxu0 %v11083_v44  ;;  %v14600_v62 = vld [vmem:[#allocation2 + $0x2e4] sm:$0xf]  ;;  %v11183_v36 = vor.u32 %v14536_v41, %v11180_v32  ;;  %v11311_v28 = vor.u32 %v14568_v43, %v11308_v47 }
 0x6ef   :  { %v11066_v1 = vld [vmem:[#allocation2] sm:$0xf]  ;;  %v14510_v26 = vld [vmem:[#allocation2 + $0xc] sm:$0xf0]  ;;  %v11467_v58 = vor.u32 %v14610_v51, %v11466_v60  ;;  %3384 = vmatpush.bf16.msrb.mxu1 %v11211_v13  ;;  %v14632_v45 = vld [vmem:[#allocation2 + $0x3e4] sm:$0xf]  ;;  %v11439_v60 = vor.u32 %v14600_v62, %v11436_v11 }
 0x6f0   :  { %v11194_v31 = vld [vmem:[#allocation2 + $0x100] sm:$0xf]  ;;  %v14542_v22 = vld [vmem:[#allocation2 + $0x10c] sm:$0xf0]  ;;  %v11067_v33 = vor.u32 %v14510_v26, %v11066_v1  ;;  %3398 = vmatpush.bf16.msrb.mxu2 %v11339_v17  ;;  %v11564_v54 = vld [vmem:[#allocation2 + $0x3f0] sm:$0xf0] }
 0x6f1   :  { %v11322_v18 = vld [vmem:[#allocation2 + $0x200] sm:$0xf]  ;;  %v14574_v16 = vld [vmem:[#allocation2 + $0x20c] sm:$0xf0]  ;;  %v11195_v37 = vor.u32 %v14542_v22, %v11194_v31  ;;  %3412 = vmatpush.bf16.msra.mxu3 %v11467_v58  ;;  %v14532_v51 = vld [vmem:[#allocation2 + $0xc4] sm:$0xf]  ;;  %v11567_v44 = vor.u32 %v14632_v45, %v11564_v54 }
 0x6f2   :  { %v11450_v52 = vld [vmem:[#allocation2 + $0x300] sm:$0xf]  ;;  %v14606_v2 = vld [vmem:[#allocation2 + $0x30c] sm:$0xf0]  ;;  %v11323_v27 = vor.u32 %v14574_v16, %v11322_v18  ;;  %3371 = vmatpush.bf16.msra.mxu0 %v11067_v33  ;;  %v11292_v1 = vld [vmem:[#allocation2 + $0x1d0] sm:$0xf0]  ;;  %v11167_v6 = vor.u32 %v14532_v51, %v11164_v12 }
 0x6f3   :  { %v11451_v15 = vor.u32 %v14606_v2, %v11450_v52  ;;  %v14596_v26 = vld [vmem:[#allocation2 + $0x2c4] sm:$0xf]  ;;  %v17944_v13 = vmax.f32 %v16567_v19, 0.0  ;;  %3385 = vmatpush.bf16.msrb.mxu1 %v11195_v37  ;;  %v11548_v22 = vld [vmem:[#allocation2 + $0x3d0] sm:$0xf0]  ;;  %v17945_v11 = vmax.f32 %v16549_v61, 0.0  ;;  %v11295_v61 = vor.u32 %v14564_v0, %v11292_v1 }
 0x6f4   :  { %3399 = vmatpush.bf16.msrb.mxu2 %v11323_v27  ;;  %v14628_v31 = vld [vmem:[#allocation2 + $0x3c4] sm:$0xf]  ;;  %v17946_v18 = vmax.f32 %v16559_v8, 0.0  ;;  %v17947_v16 = vmax.f32 %v16557_v7, 0.0  ;;  %v17948_v52 = vmax.f32 %v16569_v20, 0.0  ;;  %v17950_v19 = vmax.f32 %v16561_v9, 0.0 }
 0x6f5   :  { %v16649_v17 = vpack.c.bf16 %v17944_v13, %v2547_v10  ;;  %3413 = vmatpush.bf16.msra.mxu3 %v11451_v15  ;;  %v17949_v10 = vmax.f32 %v16551_v63, 0.0  ;;  %v11423_v8 = vor.u32 %v14596_v26, %v11420_v25  ;;  %v14528_v32 = vld [vmem:[#allocation2 + $0xa4] sm:$0xf]  ;;  %v11148_v43 = vld [vmem:[#allocation2 + $0xb0] sm:$0xf0]  ;;  %v11551_v20 = vor.u32 %v14628_v31, %v11548_v22 }
 0x6f6   :  { %v16655_v58 = vpack.c.bf16 %v17946_v18, %v17945_v11  ;;  %v16661_v2 = vpack.c.bf16 %v17948_v52, %v17947_v16  ;;  %3420 = vmatpush.bf16.msrb.mxu0 %v11183_v36  ;;  %v14560_v7 = vld [vmem:[#allocation2 + $0x1a4] sm:$0xf]  ;;  %v11276_v33 = vld [vmem:[#allocation2 + $0x1b0] sm:$0xf0]  ;;  %v11151_v9 = vor.u32 %v14528_v32, %v11148_v43 }
 0x6f7   :  { %v16667_v41 = vpack.c.bf16 %v17950_v19, %v17949_v10  ;;  %3434 = vmatpush.bf16.msra.mxu1 %v11311_v28  ;;  %v14592_v47 = vld [vmem:[#allocation2 + $0x2a4] sm:$0xf]  ;;  %v11404_v62 = vld [vmem:[#allocation2 + $0x2b0] sm:$0xf0]  ;;  %3400 = vmatmul.bf16.vlgmr.msrb.gmra.mxu2 %v16649_v17  ;;  %v11279_v0 = vor.u32 %v14560_v7, %v11276_v33 }
 0x6f8   :  { %3448 = vmatpush.bf16.msra.mxu2 %v11439_v60  ;;  %v14624_v12 = vld [vmem:[#allocation2 + $0x3a4] sm:$0xf]  ;;  %v11532_v63 = vld [vmem:[#allocation2 + $0x3b0] sm:$0xf0]  ;;  %3372 = vmatmul.bf16.vlgmr.msra.gmra.mxu0 %v16655_v58  ;;  %v11407_v25 = vor.u32 %v14592_v47, %v11404_v62 }
 0x6f9   :  { %3462 = vmatpush.bf16.msrb.mxu3 %v11567_v44  ;;  %3386 = vmatmul.bf16.vlgmr.msrb.gmra.mxu1 %v16667_v41  ;;  %v14524_v37 = vld [vmem:[#allocation2 + $0x84] sm:$0xf]  ;;  %v11132_v27 = vld [vmem:[#allocation2 + $0x90] sm:$0xf0]  ;;  %v11535_v54 = vor.u32 %v14624_v12, %v11532_v63 }
 0x6fa   :  { %3414 = vmatmul.bf16.vlgmr.msra.gmra.mxu3 %v16661_v2  ;;  %3421 = vmatpush.bf16.msrb.mxu0 %v11167_v6  ;;  %v14556_v45 = vld [vmem:[#allocation2 + $0x184] sm:$0xf]  ;;  %v11260_v15 = vld [vmem:[#allocation2 + $0x190] sm:$0xf0]  ;;  %v11135_v44 = vor.u32 %v14524_v37, %v11132_v27 }
 0x6fb   :  { %3435 = vmatpush.bf16.msra.mxu1 %v11295_v61  ;;  %v14588_v36 = vld [vmem:[#allocation2 + $0x284] sm:$0xf]  ;;  %v11388_v28 = vld [vmem:[#allocation2 + $0x290] sm:$0xf0]  ;;  %v11263_v1 = vor.u32 %v14556_v45, %v11260_v15 }
 0x6fc   :  { %3449 = vmatpush.bf16.msra.mxu2 %v11423_v8  ;;  %v14620_v60 = vld [vmem:[#allocation2 + $0x384] sm:$0xf]  ;;  %v11516_v51 = vld [vmem:[#allocation2 + $0x390] sm:$0xf0]  ;;  %v11391_v26 = vor.u32 %v14588_v36, %v11388_v28 }
 0x6fd   :  { %3463 = vmatpush.bf16.msrb.mxu3 %v11551_v20  ;;  %v14520_v13 = vld [vmem:[#allocation2 + $0x64] sm:$0xf]  ;;  %v11116_v31 = vld [vmem:[#allocation2 + $0x70] sm:$0xf0]  ;;  %v11519_v11 = vor.u32 %v14620_v60, %v11516_v51 }
 0x6fe   :  { %3422 = vmatpush.bf16.msrb.mxu0 %v11151_v9  ;;  %v14552_v22 = vld [vmem:[#allocation2 + $0x164] sm:$0xf]  ;;  %v11244_v18 = vld [vmem:[#allocation2 + $0x170] sm:$0xf0]  ;;  %v11119_v19 = vor.u32 %v14520_v13, %v11116_v31 }
 0x6ff   :  { %3436 = vmatpush.bf16.msra.mxu1 %v11279_v0  ;;  %v14584_v16 = vld [vmem:[#allocation2 + $0x264] sm:$0xf]  ;;  %v11372_v52 = vld [vmem:[#allocation2 + $0x270] sm:$0xf0]  ;;  %v11247_v61 = vor.u32 %v14552_v22, %v11244_v18 }
 0x700   :  { %3450 = vmatpush.bf16.msra.mxu2 %v11407_v25  ;;  %v14616_v6 = vld [vmem:[#allocation2 + $0x364] sm:$0xf]  ;;  %v11500_v10 = vld [vmem:[#allocation2 + $0x370] sm:$0xf0]  ;;  %v11375_v8 = vor.u32 %v14584_v16, %v11372_v52 }
 0x701   :  { %3464 = vmatpush.bf16.msrb.mxu3 %v11535_v54  ;;  %v14516_v32 = vld [vmem:[#allocation2 + $0x44] sm:$0xf]  ;;  %v11100_v43 = vld [vmem:[#allocation2 + $0x50] sm:$0xf0]  ;;  %v11503_v20 = vor.u32 %v14616_v6, %v11500_v10 }
 0x702   :  { %3423 = vmatpush.bf16.msrb.mxu0 %v11135_v44  ;;  %v14548_v7 = vld [vmem:[#allocation2 + $0x144] sm:$0xf]  ;;  %v11228_v33 = vld [vmem:[#allocation2 + $0x150] sm:$0xf0]  ;;  %v11103_v9 = vor.u32 %v14516_v32, %v11100_v43  ;;  %v14571_v43 = vld [vmem:[#allocation2 + $0x1f4] sm:$0xf0] }
 0x703   :  { %3437 = vmatpush.bf16.msra.mxu1 %v11263_v1  ;;  %v14580_v47 = vld [vmem:[#allocation2 + $0x244] sm:$0xf]  ;;  %v11356_v62 = vld [vmem:[#allocation2 + $0x250] sm:$0xf0]  ;;  %v11231_v0 = vor.u32 %v14548_v7, %v11228_v33  ;;  %v11442_v7 = vld [vmem:[#allocation2 + $0x2e8] sm:$0xf] }
 0x704   :  { %3451 = vmatpush.bf16.msra.mxu2 %v11391_v26  ;;  %v14612_v12 = vld [vmem:[#allocation2 + $0x344] sm:$0xf]  ;;  %v11484_v63 = vld [vmem:[#allocation2 + $0x350] sm:$0xf0]  ;;  %v11359_v25 = vor.u32 %v14580_v47, %v11356_v62  ;;  %v11570_v62 = vld [vmem:[#allocation2 + $0x3e8] sm:$0xf] }
 0x705   :  { %3465 = vmatpush.bf16.msrb.mxu3 %v11519_v11  ;;  %v14512_v37 = vld [vmem:[#allocation2 + $0x24] sm:$0xf]  ;;  %v11084_v27 = vld [vmem:[#allocation2 + $0x30] sm:$0xf0]  ;;  %v11487_v54 = vor.u32 %v14612_v12, %v11484_v63  ;;  %v14635_v12 = vld [vmem:[#allocation2 + $0x3f4] sm:$0xf0] }
 0x706   :  { %3424 = vmatpush.bf16.msrb.mxu0 %v11119_v19  ;;  %v14544_v45 = vld [vmem:[#allocation2 + $0x124] sm:$0xf]  ;;  %v11212_v15 = vld [vmem:[#allocation2 + $0x130] sm:$0xf0]  ;;  %v11087_v44 = vor.u32 %v14512_v37, %v11084_v27  ;;  %v11186_v19 = vld [vmem:[#allocation2 + $0xe8] sm:$0xf] }
 0x707   :  { %3438 = vmatpush.bf16.msra.mxu1 %v11247_v61  ;;  %v14576_v36 = vld [vmem:[#allocation2 + $0x224] sm:$0xf]  ;;  %v11340_v28 = vld [vmem:[#allocation2 + $0x230] sm:$0xf0]  ;;  %v11215_v13 = vor.u32 %v14544_v45, %v11212_v15  ;;  %v14539_v61 = vld [vmem:[#allocation2 + $0xf4] sm:$0xf0] }
 0x708   :  { %3452 = vmatpush.bf16.msra.mxu2 %v11375_v8  ;;  %v14608_v60 = vld [vmem:[#allocation2 + $0x324] sm:$0xf]  ;;  %v11468_v51 = vld [vmem:[#allocation2 + $0x330] sm:$0xf0]  ;;  %v11343_v31 = vor.u32 %v14576_v36, %v11340_v28  ;;  %v11314_v8 = vld [vmem:[#allocation2 + $0x1e8] sm:$0xf] }
 0x709   :  { %3466 = vmatpush.bf16.msrb.mxu3 %v11503_v20  ;;  %v14508_v1 = vld [vmem:[#allocation2 + $0x4] sm:$0xf]  ;;  %v11068_v26 = vld [vmem:[#allocation2 + $0x10] sm:$0xf0]  ;;  %v11471_v16 = vor.u32 %v14608_v60, %v11468_v51  ;;  %v14603_v20 = vld [vmem:[#allocation2 + $0x2f4] sm:$0xf0] }
 0x70a   :  { %3425 = vmatpush.bf16.msrb.mxu0 %v11103_v9  ;;  %v14540_v22 = vld [vmem:[#allocation2 + $0x104] sm:$0xf]  ;;  %v11196_v11 = vld [vmem:[#allocation2 + $0x110] sm:$0xf0]  ;;  %v11071_v32 = vor.u32 %v14508_v1, %v11068_v26  ;;  %v11187_v9 = vor.u32 %v14539_v61, %v11186_v19  ;;  %v11170_v37 = vld [vmem:[#allocation2 + $0xc8] sm:$0xf] }
 0x70b   :  { %3439 = vmatpush.bf16.msra.mxu1 %v11231_v0  ;;  %v14572_v18 = vld [vmem:[#allocation2 + $0x204] sm:$0xf]  ;;  %v11324_v52 = vld [vmem:[#allocation2 + $0x210] sm:$0xf0]  ;;  %v11199_v33 = vor.u32 %v14540_v22, %v11196_v11  ;;  %v11315_v0 = vor.u32 %v14571_v43, %v11314_v8  ;;  %v14535_v27 = vld [vmem:[#allocation2 + $0xd4] sm:$0xf0] }
 0x70c   :  { %3453 = vmatpush.bf16.msra.mxu2 %v11359_v25  ;;  %v14604_v6 = vld [vmem:[#allocation2 + $0x304] sm:$0xf]  ;;  %v11452_v10 = vld [vmem:[#allocation2 + $0x310] sm:$0xf0]  ;;  %v11327_v47 = vor.u32 %v14572_v18, %v11324_v52  ;;  %v11443_v25 = vor.u32 %v14603_v20, %v11442_v7  ;;  %v11298_v45 = vld [vmem:[#allocation2 + $0x1c8] sm:$0xf] }
 0x70d   :  { %3467 = vmatpush.bf16.msrb.mxu3 %v11487_v54  ;;  %v11455_v63 = vor.u32 %v14604_v6, %v11452_v10  ;;  %v11571_v54 = vor.u32 %v14635_v12, %v11570_v62  ;;  %v14567_v15 = vld [vmem:[#allocation2 + $0x1d4] sm:$0xf0]  ;;  %v11426_v36 = vld [vmem:[#allocation2 + $0x2c8] sm:$0xf] }
 0x70e   :  { %3426 = vmatpush.bf16.msrb.mxu0 %v11087_v44  ;;  %v14599_v28 = vld [vmem:[#allocation2 + $0x2d4] sm:$0xf0]  ;;  %v11554_v60 = vld [vmem:[#allocation2 + $0x3c8] sm:$0xf]  ;;  %v11171_v44 = vor.u32 %v14535_v27, %v11170_v37  ;;  %v11299_v1 = vor.u32 %v14567_v15, %v11298_v45 }
 0x70f   :  { %3440 = vmatpush.bf16.msra.mxu1 %v11215_v13  ;;  %v14631_v51 = vld [vmem:[#allocation2 + $0x3d4] sm:$0xf0]  ;;  %v11427_v26 = vor.u32 %v14599_v28, %v11426_v36  ;;  %v11154_v13 = vld [vmem:[#allocation2 + $0xa8] sm:$0xf] }
 0x710   :  { %3454 = vmatpush.bf16.msra.mxu2 %v11343_v31  ;;  %v14531_v31 = vld [vmem:[#allocation2 + $0xb4] sm:$0xf0]  ;;  %v11282_v22 = vld [vmem:[#allocation2 + $0x1a8] sm:$0xf]  ;;  %v11555_v11 = vor.u32 %v14631_v51, %v11554_v60 }
 0x711   :  { %3468 = vmatpush.bf16.msrb.mxu3 %v11471_v16  ;;  %v14563_v18 = vld [vmem:[#allocation2 + $0x1b4] sm:$0xf0]  ;;  %v11410_v16 = vld [vmem:[#allocation2 + $0x2a8] sm:$0xf]  ;;  %v11155_v19 = vor.u32 %v14531_v31, %v11154_v13 }
 0x712   :  { %3427 = vmatpush.bf16.msrb.mxu0 %v11071_v32  ;;  %v14595_v52 = vld [vmem:[#allocation2 + $0x2b4] sm:$0xf0]  ;;  %v11538_v6 = vld [vmem:[#allocation2 + $0x3a8] sm:$0xf]  ;;  %v11283_v61 = vor.u32 %v14563_v18, %v11282_v22 }
 0x713   :  { %3441 = vmatpush.bf16.msra.mxu1 %v11199_v33  ;;  %v14627_v10 = vld [vmem:[#allocation2 + $0x3b4] sm:$0xf0]  ;;  %v11411_v8 = vor.u32 %v14595_v52, %v11410_v16  ;;  %v11138_v32 = vld [vmem:[#allocation2 + $0x88] sm:$0xf] }
 0x714   :  { %3455 = vmatpush.bf16.msra.mxu2 %v11327_v47  ;;  %v14527_v43 = vld [vmem:[#allocation2 + $0x94] sm:$0xf0]  ;;  %v11266_v7 = vld [vmem:[#allocation2 + $0x188] sm:$0xf]  ;;  %v11539_v20 = vor.u32 %v14627_v10, %v11538_v6 }
 0x715   :  { %3469 = vmatpush.bf16.msrb.mxu3 %v11455_v63  ;;  %3428 = vmatmul.bf16.vlgmr.msrb.gmra.mxu0 %v16655_v58  ;;  %v14559_v33 = vld [vmem:[#allocation2 + $0x194] sm:$0xf0]  ;;  %v11394_v47 = vld [vmem:[#allocation2 + $0x288] sm:$0xf] }
 0x716   :  { %3476 = vmatpush.bf16.msra.mxu0 %v11187_v9  ;;  %3442 = vmatmul.bf16.vlgmr.msra.gmra.mxu1 %v16667_v41  ;;  %v14591_v62 = vld [vmem:[#allocation2 + $0x294] sm:$0xf0]  ;;  %v11522_v12 = vld [vmem:[#allocation2 + $0x388] sm:$0xf]  ;;  %v11139_v9 = vor.u32 %v14527_v43, %v11138_v32 }
 0x717   :  { %3490 = vmatpush.bf16.msrb.mxu1 %v11315_v0  ;;  %3456 = vmatmul.bf16.vlgmr.msra.gmra.mxu2 %v16649_v17  ;;  %v14623_v63 = vld [vmem:[#allocation2 + $0x394] sm:$0xf0]  ;;  %v11267_v0 = vor.u32 %v14559_v33, %v11266_v7  ;;  %v11122_v37 = vld [vmem:[#allocation2 + $0x68] sm:$0xf] }
 0x718   :  { %3504 = vmatpush.bf16.msrb.mxu2 %v11443_v25  ;;  %3470 = vmatmul.bf16.vlgmr.msrb.gmra.mxu3 %v16661_v2  ;;  %v11395_v25 = vor.u32 %v14591_v62, %v11394_v47  ;;  %v14523_v27 = vld [vmem:[#allocation2 + $0x74] sm:$0xf0]  ;;  %v11250_v45 = vld [vmem:[#allocation2 + $0x168] sm:$0xf] }
 0x719   :  { %3518 = vmatpush.bf16.msra.mxu3 %v11571_v54  ;;  %v11523_v54 = vor.u32 %v14623_v63, %v11522_v12  ;;  %v14555_v15 = vld [vmem:[#allocation2 + $0x174] sm:$0xf0]  ;;  %v11378_v36 = vld [vmem:[#allocation2 + $0x268] sm:$0xf] }
 0x71a   :  { %3477 = vmatpush.bf16.msra.mxu0 %v11171_v44  ;;  %v14587_v28 = vld [vmem:[#allocation2 + $0x274] sm:$0xf0]  ;;  %v11506_v60 = vld [vmem:[#allocation2 + $0x368] sm:$0xf]  ;;  %v11123_v44 = vor.u32 %v14523_v27, %v11122_v37 }
 0x71b   :  { %3491 = vmatpush.bf16.msrb.mxu1 %v11299_v1  ;;  %v14619_v51 = vld [vmem:[#allocation2 + $0x374] sm:$0xf0]  ;;  %v11251_v1 = vor.u32 %v14555_v15, %v11250_v45  ;;  %v11106_v13 = vld [vmem:[#allocation2 + $0x48] sm:$0xf] }
 0x71c   :  { %3505 = vmatpush.bf16.msrb.mxu2 %v11427_v26  ;;  %v11379_v26 = vor.u32 %v14587_v28, %v11378_v36  ;;  %v14519_v31 = vld [vmem:[#allocation2 + $0x54] sm:$0xf0]  ;;  %v11234_v22 = vld [vmem:[#allocation2 + $0x148] sm:$0xf] }
 0x71d   :  { %3519 = vmatpush.bf16.msra.mxu3 %v11555_v11  ;;  %v11507_v11 = vor.u32 %v14619_v51, %v11506_v60  ;;  %v14551_v18 = vld [vmem:[#allocation2 + $0x154] sm:$0xf0]  ;;  %v11362_v16 = vld [vmem:[#allocation2 + $0x248] sm:$0xf] }
 0x71e   :  { %3478 = vmatpush.bf16.msra.mxu0 %v11155_v19  ;;  %v14583_v52 = vld [vmem:[#allocation2 + $0x254] sm:$0xf0]  ;;  %v11490_v6 = vld [vmem:[#allocation2 + $0x348] sm:$0xf]  ;;  %v11107_v19 = vor.u32 %v14519_v31, %v11106_v13  ;;  %v11316_v31 = vld [vmem:[#allocation2 + $0x1f8] sm:$0xf0] }
 0x71f   :  { %3492 = vmatpush.bf16.msrb.mxu1 %v11283_v61  ;;  %v14615_v10 = vld [vmem:[#allocation2 + $0x354] sm:$0xf0]  ;;  %v11235_v61 = vor.u32 %v14551_v18, %v11234_v22  ;;  %v11090_v32 = vld [vmem:[#allocation2 + $0x28] sm:$0xf]  ;;  %v14601_v22 = vld [vmem:[#allocation2 + $0x2ec] sm:$0xf] }
 0x720   :  { %3506 = vmatpush.bf16.msrb.mxu2 %v11411_v8  ;;  %v11363_v8 = vor.u32 %v14583_v52, %v11362_v16  ;;  %v14515_v43 = vld [vmem:[#allocation2 + $0x34] sm:$0xf0]  ;;  %v11218_v7 = vld [vmem:[#allocation2 + $0x128] sm:$0xf]  ;;  %v14633_v52 = vld [vmem:[#allocation2 + $0x3ec] sm:$0xf] }
 0x721   :  { %3520 = vmatpush.bf16.msra.mxu3 %v11539_v20  ;;  %v11491_v20 = vor.u32 %v14615_v10, %v11490_v6  ;;  %v14547_v33 = vld [vmem:[#allocation2 + $0x134] sm:$0xf0]  ;;  %v11346_v47 = vld [vmem:[#allocation2 + $0x228] sm:$0xf]  ;;  %v11572_v6 = vld [vmem:[#allocation2 + $0x3f8] sm:$0xf0] }
 0x722   :  { %3479 = vmatpush.bf16.msra.mxu0 %v11139_v9  ;;  %v14579_v62 = vld [vmem:[#allocation2 + $0x234] sm:$0xf0]  ;;  %v11474_v12 = vld [vmem:[#allocation2 + $0x328] sm:$0xf]  ;;  %v11091_v9 = vor.u32 %v14515_v43, %v11090_v32  ;;  %v11219_v37 = vor.u32 %v14547_v33, %v11218_v7  ;;  %v14533_v32 = vld [vmem:[#allocation2 + $0xcc] sm:$0xf] }
 0x723   :  { %3493 = vmatpush.bf16.msrb.mxu1 %v11267_v0  ;;  %v14611_v63 = vld [vmem:[#allocation2 + $0x334] sm:$0xf0]  ;;  %v11074_v0 = vld [vmem:[#allocation2 + $0x8] sm:$0xf]  ;;  %v11347_v27 = vor.u32 %v14579_v62, %v11346_v47  ;;  %v11172_v43 = vld [vmem:[#allocation2 + $0xd8] sm:$0xf0] }
 0x724   :  { %3507 = vmatpush.bf16.msrb.mxu2 %v11395_v25  ;;  %v14511_v25 = vld [vmem:[#allocation2 + $0x14] sm:$0xf0]  ;;  %v11202_v45 = vld [vmem:[#allocation2 + $0x108] sm:$0xf]  ;;  %v11475_v36 = vor.u32 %v14611_v63, %v11474_v12  ;;  %v14565_v7 = vld [vmem:[#allocation2 + $0x1cc] sm:$0xf] }
 0x725   :  { %3521 = vmatpush.bf16.msra.mxu3 %v11523_v54  ;;  %v14543_v54 = vld [vmem:[#allocation2 + $0x114] sm:$0xf0]  ;;  %v11330_v15 = vld [vmem:[#allocation2 + $0x208] sm:$0xf]  ;;  %v11075_v13 = vor.u32 %v14511_v25, %v11074_v0  ;;  %v11300_v33 = vld [vmem:[#allocation2 + $0x1d8] sm:$0xf0] }
 0x726   :  { %3480 = vmatpush.bf16.msra.mxu0 %v11123_v44  ;;  %v14575_v28 = vld [vmem:[#allocation2 + $0x214] sm:$0xf0]  ;;  %v11458_v60 = vld [vmem:[#allocation2 + $0x308] sm:$0xf]  ;;  %v14537_v44 = vld [vmem:[#allocation2 + $0xec] sm:$0xf]  ;;  %v11203_v18 = vor.u32 %v14543_v54, %v11202_v45  ;;  %v11303_v0 = vor.u32 %v14565_v7, %v11300_v33 }
 0x727   :  { %3494 = vmatpush.bf16.msrb.mxu1 %v11251_v1  ;;  %v14607_v51 = vld [vmem:[#allocation2 + $0x314] sm:$0xf0]  ;;  %v11188_v1 = vld [vmem:[#allocation2 + $0xf8] sm:$0xf0]  ;;  %v11331_v16 = vor.u32 %v14575_v28, %v11330_v15  ;;  %v14597_v47 = vld [vmem:[#allocation2 + $0x2cc] sm:$0xf] }
 0x728   :  { %3508 = vmatpush.bf16.msrb.mxu2 %v11379_v26  ;;  %v14569_v26 = vld [vmem:[#allocation2 + $0x1ec] sm:$0xf]  ;;  %v11459_v10 = vor.u32 %v14607_v51, %v11458_v60  ;;  %v11428_v62 = vld [vmem:[#allocation2 + $0x2d8] sm:$0xf0] }
 0x729   :  { %3522 = vmatpush.bf16.msra.mxu3 %v11507_v11  ;;  %v11444_v11 = vld [vmem:[#allocation2 + $0x2f8] sm:$0xf0]  ;;  %v14629_v12 = vld [vmem:[#allocation2 + $0x3cc] sm:$0xf]  ;;  %v11431_v25 = vor.u32 %v14597_v47, %v11428_v62 }
 0x72a   :  { %3481 = vmatpush.bf16.msra.mxu0 %v11107_v19  ;;  %v11191_v19 = vor.u32 %v14537_v44, %v11188_v1  ;;  %v11556_v63 = vld [vmem:[#allocation2 + $0x3d8] sm:$0xf0]  ;;  %v14561_v45 = vld [vmem:[#allocation2 + $0x1ac] sm:$0xf] }
 0x72b   :  { %3495 = vmatpush.bf16.msrb.mxu1 %v11235_v61  ;;  %v11319_v61 = vor.u32 %v14569_v26, %v11316_v31  ;;  %v11559_v54 = vor.u32 %v14629_v12, %v11556_v63  ;;  %v11284_v15 = vld [vmem:[#allocation2 + $0x1b8] sm:$0xf0]  ;;  %v14625_v60 = vld [vmem:[#allocation2 + $0x3ac] sm:$0xf] }
 0x72c   :  { %3509 = vmatpush.bf16.msrb.mxu2 %v11363_v8  ;;  %v11447_v8 = vor.u32 %v14601_v22, %v11444_v11  ;;  %v11412_v28 = vld [vmem:[#allocation2 + $0x2b8] sm:$0xf0]  ;;  %v11287_v1 = vor.u32 %v14561_v45, %v11284_v15  ;;  %v14557_v22 = vld [vmem:[#allocation2 + $0x18c] sm:$0xf] }
 0x72d   :  { %3523 = vmatpush.bf16.msra.mxu3 %v11491_v20  ;;  %v11575_v20 = vor.u32 %v14633_v52, %v11572_v6  ;;  %v11540_v51 = vld [vmem:[#allocation2 + $0x3b8] sm:$0xf0]  ;;  %v14621_v6 = vld [vmem:[#allocation2 + $0x38c] sm:$0xf] }
 0x72e   :  { %3482 = vmatpush.bf16.msra.mxu0 %v11091_v9  ;;  %v11175_v9 = vor.u32 %v14533_v32, %v11172_v43  ;;  %v11140_v31 = vld [vmem:[#allocation2 + $0x98] sm:$0xf0]  ;;  %v11543_v11 = vor.u32 %v14625_v60, %v11540_v51  ;;  %v14521_v32 = vld [vmem:[#allocation2 + $0x6c] sm:$0xf] }
 0x72f   :  { %3496 = vmatpush.bf16.msrb.mxu1 %v11219_v37  ;;  %v14529_v37 = vld [vmem:[#allocation2 + $0xac] sm:$0xf]  ;;  %v11396_v52 = vld [vmem:[#allocation2 + $0x298] sm:$0xf0] }
 0x730   :  { %3510 = vmatpush.bf16.msrb.mxu2 %v11347_v27  ;;  %v11156_v27 = vld [vmem:[#allocation2 + $0xb8] sm:$0xf0]  ;;  %v14553_v7 = vld [vmem:[#allocation2 + $0x16c] sm:$0xf] }
 0x731   :  { %3524 = vmatpush.bf16.msra.mxu3 %v11475_v36  ;;  %v14593_v36 = vld [vmem:[#allocation2 + $0x2ac] sm:$0xf]  ;;  %v11159_v44 = vor.u32 %v14529_v37, %v11156_v27  ;;  %v11124_v43 = vld [vmem:[#allocation2 + $0x78] sm:$0xf0] }
 0x732   :  { %3483 = vmatpush.bf16.msra.mxu0 %v11075_v13  ;;  %v11415_v26 = vor.u32 %v14593_v36, %v11412_v28  ;;  %v14525_v13 = vld [vmem:[#allocation2 + $0x8c] sm:$0xf]  ;;  %v11252_v33 = vld [vmem:[#allocation2 + $0x178] sm:$0xf0] }
 0x733   :  { %3497 = vmatpush.bf16.msrb.mxu1 %v11203_v18  ;;  %v11268_v18 = vld [vmem:[#allocation2 + $0x198] sm:$0xf0]  ;;  %v14585_v47 = vld [vmem:[#allocation2 + $0x26c] sm:$0xf] }
 0x734   :  { %3511 = vmatpush.bf16.msrb.mxu2 %v11331_v16  ;;  %v14589_v16 = vld [vmem:[#allocation2 + $0x28c] sm:$0xf]  ;;  %v11380_v62 = vld [vmem:[#allocation2 + $0x278] sm:$0xf0] }
 0x735   :  { %3525 = vmatpush.bf16.msra.mxu3 %v11459_v10  ;;  %3484 = vmatmul.bf16.vlgmr.msra.gmra.mxu0 %v16655_v58  ;;  %v11524_v10 = vld [vmem:[#allocation2 + $0x398] sm:$0xf0]  ;;  %v14617_v12 = vld [vmem:[#allocation2 + $0x36c] sm:$0xf] }
 0x736   :  { %3532 = vmatpush.bf16.msrb.mxu0 %v11191_v19  ;;  %3498 = vmatmul.bf16.vlgmr.msrb.gmra.mxu1 %v16667_v41  ;;  %v11143_v19 = vor.u32 %v14525_v13, %v11140_v31  ;;  %v11508_v63 = vld [vmem:[#allocation2 + $0x378] sm:$0xf0]  ;;  %v14517_v37 = vld [vmem:[#allocation2 + $0x4c] sm:$0xf] }
 0x737   :  { %3546 = vmatpush.bf16.msra.mxu1 %v11319_v61  ;;  %3512 = vmatmul.bf16.vlgmr.msrb.gmra.mxu2 %v16649_v17  ;;  %v11271_v61 = vor.u32 %v14557_v22, %v11268_v18  ;;  %v11108_v27 = vld [vmem:[#allocation2 + $0x58] sm:$0xf0]  ;;  %v14549_v45 = vld [vmem:[#allocation2 + $0x14c] sm:$0xf] }
 0x738   :  { %3560 = vmatpush.bf16.msra.mxu2 %v11447_v8  ;;  %3526 = vmatmul.bf16.vlgmr.msra.gmra.mxu3 %v16661_v2  ;;  %v11399_v8 = vor.u32 %v14589_v16, %v11396_v52  ;;  %v11236_v15 = vld [vmem:[#allocation2 + $0x158] sm:$0xf0]  ;;  %v14581_v36 = vld [vmem:[#allocation2 + $0x24c] sm:$0xf] }
 0x739   :  { %3574 = vmatpush.bf16.msrb.mxu3 %v11575_v20  ;;  %v11527_v20 = vor.u32 %v14621_v6, %v11524_v10  ;;  %v11364_v28 = vld [vmem:[#allocation2 + $0x258] sm:$0xf0]  ;;  %v14613_v60 = vld [vmem:[#allocation2 + $0x34c] sm:$0xf] }
 0x73a   :  { %3533 = vmatpush.bf16.msrb.mxu0 %v11175_v9  ;;  %v11127_v9 = vor.u32 %v14521_v32, %v11124_v43  ;;  %v11492_v51 = vld [vmem:[#allocation2 + $0x358] sm:$0xf0]  ;;  %v14513_v13 = vld [vmem:[#allocation2 + $0x2c] sm:$0xf] }
 0x73b   :  { %3547 = vmatpush.bf16.msra.mxu1 %v11303_v0  ;;  %v11255_v0 = vor.u32 %v14553_v7, %v11252_v33  ;;  %v11092_v31 = vld [vmem:[#allocation2 + $0x38] sm:$0xf0]  ;;  %v14545_v22 = vld [vmem:[#allocation2 + $0x12c] sm:$0xf] }
 0x73c   :  { %3561 = vmatpush.bf16.msra.mxu2 %v11431_v25  ;;  %v11383_v25 = vor.u32 %v14585_v47, %v11380_v62  ;;  %v11220_v18 = vld [vmem:[#allocation2 + $0x138] sm:$0xf0]  ;;  %v14577_v16 = vld [vmem:[#allocation2 + $0x22c] sm:$0xf] }
 0x73d   :  { %3575 = vmatpush.bf16.msrb.mxu3 %v11559_v54  ;;  %v11511_v54 = vor.u32 %v14617_v12, %v11508_v63  ;;  %v11348_v52 = vld [vmem:[#allocation2 + $0x238] sm:$0xf0]  ;;  %v14609_v6 = vld [vmem:[#allocation2 + $0x32c] sm:$0xf]  ;;  %v11223_v32 = vor.u32 %v14545_v22, %v11220_v18  ;;  %v11802_v22 = vld [vmem:[#allocation2 + $0x5c0] sm:$0xf] }
 0x73e   :  { %3534 = vmatpush.bf16.msrb.mxu0 %v11159_v44  ;;  %v11111_v44 = vor.u32 %v14517_v37, %v11108_v27  ;;  %v11476_v10 = vld [vmem:[#allocation2 + $0x338] sm:$0xf0]  ;;  %v11351_v43 = vor.u32 %v14577_v16, %v11348_v52  ;;  %v14541_v7 = vld [vmem:[#allocation2 + $0x10c] sm:$0xf]  ;;  %v14698_v27 = vld [vmem:[#allocation2 + $0x5ec] sm:$0xf0] }
 0x73f   :  { %3548 = vmatpush.bf16.msra.mxu1 %v11287_v1  ;;  %v11239_v1 = vor.u32 %v14549_v45, %v11236_v15  ;;  %v14573_v33 = vld [vmem:[#allocation2 + $0x20c] sm:$0xf]  ;;  %v11479_v47 = vor.u32 %v14609_v6, %v11476_v10  ;;  %v11332_v62 = vld [vmem:[#allocation2 + $0x218] sm:$0xf0]  ;;  %v11946_v45 = vld [vmem:[#allocation2 + $0x6e0] sm:$0xf] }
 0x740   :  { %3562 = vmatpush.bf16.msra.mxu2 %v11415_v26  ;;  %v11367_v26 = vor.u32 %v14581_v36, %v11364_v28  ;;  %v14605_v12 = vld [vmem:[#allocation2 + $0x30c] sm:$0xf]  ;;  %v11460_v63 = vld [vmem:[#allocation2 + $0x318] sm:$0xf0]  ;;  %v11335_v36 = vor.u32 %v14573_v33, %v11332_v62  ;;  %v12074_v28 = vld [vmem:[#allocation2 + $0x7e0] sm:$0xf] }
 0x741   :  { %3576 = vmatpush.bf16.msrb.mxu3 %v11543_v11  ;;  %v11495_v11 = vor.u32 %v14613_v60, %v11492_v51  ;;  %v14762_v60 = vld [vmem:[#allocation2 + $0x7ec] sm:$0xf0]  ;;  %v11463_v51 = vor.u32 %v14605_v12, %v11460_v63  ;;  %v11930_v16 = vld [vmem:[#allocation2 + $0x6c0] sm:$0xf] }
 0x742   :  { %3535 = vmatpush.bf16.msrb.mxu0 %v11143_v19  ;;  %v11095_v19 = vor.u32 %v14513_v13, %v11092_v31  ;;  %v11674_v13 = vld [vmem:[#allocation2 + $0x4c0] sm:$0xf]  ;;  %v14662_v31 = vld [vmem:[#allocation2 + $0x4cc] sm:$0xf0] }
 0x743   :  { %3549 = vmatpush.bf16.msra.mxu1 %v11271_v61  ;;  %v14509_v61 = vld [vmem:[#allocation2 + $0xc] sm:$0xf]  ;;  %v14694_v18 = vld [vmem:[#allocation2 + $0x5cc] sm:$0xf0]  ;;  %v12058_v6 = vld [vmem:[#allocation2 + $0x7c0] sm:$0xf] }
 0x744   :  { %3563 = vmatpush.bf16.msra.mxu2 %v11399_v8  ;;  %v11076_v8 = vld [vmem:[#allocation2 + $0x18] sm:$0xf0]  ;;  %v14726_v52 = vld [vmem:[#allocation2 + $0x6cc] sm:$0xf0]  ;;  %v12042_v12 = vld [vmem:[#allocation2 + $0x7a0] sm:$0xf] }
 0x745   :  { %3577 = vmatpush.bf16.msrb.mxu3 %v11527_v20  ;;  %v11204_v20 = vld [vmem:[#allocation2 + $0x118] sm:$0xf0]  ;;  %v11079_v37 = vor.u32 %v14509_v61, %v11076_v8  ;;  %v14758_v10 = vld [vmem:[#allocation2 + $0x7cc] sm:$0xf0]  ;;  %v11803_v61 = vor.u32 %v14694_v18, %v11802_v22  ;;  %v11931_v8 = vor.u32 %v14726_v52, %v11930_v16 }
 0x746   :  { %3536 = vmatpush.bf16.msrb.mxu0 %v11127_v9  ;;  %v11690_v9 = vld [vmem:[#allocation2 + $0x4e0] sm:$0xf]  ;;  %v11207_v15 = vor.u32 %v14541_v7, %v11204_v20  ;;  %v12059_v20 = vor.u32 %v14758_v10, %v12058_v6  ;;  %v14690_v33 = vld [vmem:[#allocation2 + $0x5ac] sm:$0xf0] }
 0x747   :  { %3550 = vmatpush.bf16.msra.mxu1 %v11255_v0  ;;  %v14666_v0 = vld [vmem:[#allocation2 + $0x4ec] sm:$0xf0]  ;;  %v11786_v7 = vld [vmem:[#allocation2 + $0x5a0] sm:$0xf] }
 0x748   :  { %3564 = vmatpush.bf16.msra.mxu2 %v11383_v25  ;;  %v11818_v25 = vld [vmem:[#allocation2 + $0x5e0] sm:$0xf]  ;;  %v14722_v62 = vld [vmem:[#allocation2 + $0x6ac] sm:$0xf0] }
 0x749   :  { %3578 = vmatpush.bf16.msrb.mxu3 %v11511_v54  ;;  %v14730_v54 = vld [vmem:[#allocation2 + $0x6ec] sm:$0xf0]  ;;  %v11610_v10 = vld [vmem:[#allocation2 + $0x440] sm:$0xf] }
 0x74a   :  { %3537 = vmatpush.bf16.msrb.mxu0 %v11111_v44  ;;  %v11691_v44 = vor.u32 %v14666_v0, %v11690_v9  ;;  %v14754_v63 = vld [vmem:[#allocation2 + $0x7ac] sm:$0xf0]  ;;  %v11787_v0 = vor.u32 %v14690_v33, %v11786_v7 }
 0x74b   :  { %3551 = vmatpush.bf16.msra.mxu1 %v11239_v1  ;;  %v11819_v1 = vor.u32 %v14698_v27, %v11818_v25  ;;  %v14654_v27 = vld [vmem:[#allocation2 + $0x48c] sm:$0xf0] }
 0x74c   :  { %3565 = vmatpush.bf16.msra.mxu2 %v11367_v26  ;;  %v11947_v26 = vor.u32 %v14730_v54, %v11946_v45  ;;  %v11770_v45 = vld [vmem:[#allocation2 + $0x580] sm:$0xf]  ;;  %v12043_v54 = vor.u32 %v14754_v63, %v12042_v12  ;;  %v14714_v22 = vld [vmem:[#allocation2 + $0x66c] sm:$0xf0] }
 0x74d   :  { %3579 = vmatpush.bf16.msrb.mxu3 %v11495_v11  ;;  %v12075_v11 = vor.u32 %v14762_v60, %v12074_v28  ;;  %v12026_v28 = vld [vmem:[#allocation2 + $0x780] sm:$0xf]  ;;  %v14746_v18 = vld [vmem:[#allocation2 + $0x76c] sm:$0xf0] }
 0x74e   :  { %3538 = vmatpush.bf16.msrb.mxu0 %v11095_v19  ;;  %v11675_v19 = vor.u32 %v14662_v31, %v11674_v13  ;;  %v14682_v13 = vld [vmem:[#allocation2 + $0x56c] sm:$0xf0]  ;;  %v11882_v31 = vld [vmem:[#allocation2 + $0x660] sm:$0xf] }
 0x74f   :  { %3552 = vmatpush.bf16.msra.mxu1 %v11223_v32  ;;  %v11658_v32 = vld [vmem:[#allocation2 + $0x4a0] sm:$0xf]  ;;  %v11883_v6 = vor.u32 %v14714_v22, %v11882_v31  ;;  %v14710_v7 = vld [vmem:[#allocation2 + $0x64c] sm:$0xf0]  ;;  %v14664_v31 = vld [vmem:[#allocation2 + $0x4e4] sm:$0xf] }
 0x750   :  { %3566 = vmatpush.bf16.msra.mxu2 %v11351_v43  ;;  %v14658_v43 = vld [vmem:[#allocation2 + $0x4ac] sm:$0xf0]  ;;  %v11594_v63 = vld [vmem:[#allocation2 + $0x420] sm:$0xf]  ;;  %v11692_v22 = vld [vmem:[#allocation2 + $0x4f0] sm:$0xf0] }
 0x751   :  { %3580 = vmatpush.bf16.msrb.mxu3 %v11479_v47  ;;  %v11914_v47 = vld [vmem:[#allocation2 + $0x6a0] sm:$0xf]  ;;  %v11659_v9 = vor.u32 %v14658_v43, %v11658_v32  ;;  %v14678_v32 = vld [vmem:[#allocation2 + $0x54c] sm:$0xf0] }
 0x752   :  { %3539 = vmatpush.bf16.msrb.mxu0 %v11079_v37  ;;  %v11915_v25 = vor.u32 %v14722_v62, %v11914_v47  ;;  %v11642_v37 = vld [vmem:[#allocation2 + $0x480] sm:$0xf]  ;;  %v14742_v33 = vld [vmem:[#allocation2 + $0x74c] sm:$0xf0] }
 0x753   :  { %3553 = vmatpush.bf16.msra.mxu1 %v11207_v15  ;;  %v11898_v15 = vld [vmem:[#allocation2 + $0x680] sm:$0xf] }
 0x754   :  { %3567 = vmatpush.bf16.msra.mxu2 %v11335_v36  ;;  %v14718_v36 = vld [vmem:[#allocation2 + $0x68c] sm:$0xf0]  ;;  %v11866_v43 = vld [vmem:[#allocation2 + $0x640] sm:$0xf] }
 0x755   :  { %3581 = vmatpush.bf16.msrb.mxu3 %v11463_v51  ;;  %3540 = vmatmul.bf16.vlgmr.msrb.gmra.mxu0 %v16655_v58  ;;  %v14750_v58 = vld [vmem:[#allocation2 + $0x78c] sm:$0xf0]  ;;  %v11626_v51 = vld [vmem:[#allocation2 + $0x460] sm:$0xf]  ;;  %v11867_v12 = vor.u32 %v14710_v7, %v11866_v43  ;;  %v11695_v43 = vor.u32 %v14664_v31, %v11692_v22  ;;  %v12044_v22 = vld [vmem:[#allocation2 + $0x7b0] sm:$0xf0] }
 0x756   :  { %4380 = vmatpush.bf16.msra.mxu0 %v11691_v44  ;;  %3554 = vmatmul.bf16.vlgmr.msra.gmra.mxu1 %v16667_v41  ;;  %v11899_v41 = vor.u32 %v14718_v36, %v11898_v15  ;;  %v14650_v44 = vld [vmem:[#allocation2 + $0x46c] sm:$0xf0]  ;;  %v11578_v36 = vld [vmem:[#allocation2 + $0x400] sm:$0xf] }
 0x757   :  { %4394 = vmatpush.bf16.msrb.mxu1 %v11819_v1  ;;  %3568 = vmatmul.bf16.vlgmr.msra.gmra.mxu2 %v16649_v17  ;;  %v14686_v17 = vld [vmem:[#allocation2 + $0x58c] sm:$0xf0]  ;;  %v11754_v1 = vld [vmem:[#allocation2 + $0x560] sm:$0xf]  ;;  %v11627_v16 = vor.u32 %v14650_v44, %v11626_v51 }
 0x758   :  { %4408 = vmatpush.bf16.msrb.mxu2 %v11947_v26  ;;  %3582 = vmatmul.bf16.vlgmr.msrb.gmra.mxu3 %v16661_v2  ;;  %v11643_v2 = vor.u32 %v14654_v27, %v11642_v37  ;;  %v11771_v60 = vor.u32 %v14686_v17, %v11770_v45  ;;  %v12027_v26 = vor.u32 %v14750_v58, %v12026_v28  ;;  %v14674_v37 = vld [vmem:[#allocation2 + $0x52c] sm:$0xf0]  ;;  %v11850_v27 = vld [vmem:[#allocation2 + $0x620] sm:$0xf] }
 0x759   :  { %4422 = vmatpush.bf16.msra.mxu3 %v12075_v11  ;;  %v12010_v11 = vld [vmem:[#allocation2 + $0x760] sm:$0xf]  ;;  %v11755_v52 = vor.u32 %v14682_v13, %v11754_v1  ;;  %v14706_v45 = vld [vmem:[#allocation2 + $0x62c] sm:$0xf0] }
 0x75a   :  { %4381 = vmatpush.bf16.msra.mxu0 %v11675_v19  ;;  %v14646_v19 = vld [vmem:[#allocation2 + $0x44c] sm:$0xf0]  ;;  %v11834_v51 = vld [vmem:[#allocation2 + $0x600] sm:$0xf] }
 0x75b   :  { %4395 = vmatpush.bf16.msrb.mxu1 %v11803_v61  ;;  %v11738_v61 = vld [vmem:[#allocation2 + $0x540] sm:$0xf]  ;;  %v11611_v47 = vor.u32 %v14646_v19, %v11610_v10  ;;  %v14738_v17 = vld [vmem:[#allocation2 + $0x72c] sm:$0xf0] }
 0x75c   :  { %4409 = vmatpush.bf16.msrb.mxu2 %v11931_v8  ;;  %v12011_v8 = vor.u32 %v14746_v18, %v12010_v11  ;;  %v11739_v62 = vor.u32 %v14678_v32, %v11738_v61  ;;  %v14638_v28 = vld [vmem:[#allocation2 + $0x40c] sm:$0xf0]  ;;  %v14696_v11 = vld [vmem:[#allocation2 + $0x5e4] sm:$0xf] }
 0x75d   :  { %4423 = vmatpush.bf16.msra.mxu3 %v12059_v20  ;;  %v11994_v20 = vld [vmem:[#allocation2 + $0x740] sm:$0xf]  ;;  %v14702_v1 = vld [vmem:[#allocation2 + $0x60c] sm:$0xf0]  ;;  %v11579_v18 = vor.u32 %v14638_v28, %v11578_v36  ;;  %v14760_v61 = vld [vmem:[#allocation2 + $0x7e4] sm:$0xf] }
 0x75e   :  { %4382 = vmatpush.bf16.msra.mxu0 %v11659_v9  ;;  %v14642_v9 = vld [vmem:[#allocation2 + $0x42c] sm:$0xf0]  ;;  %v11835_v19 = vor.u32 %v14702_v1, %v11834_v51  ;;  %v17955_v28 = vmax.f32 %v16581_v35, 0.0  ;;  %v14688_v35 = vld [vmem:[#allocation2 + $0x5a4] sm:$0xf] }
 0x75f   :  { %4396 = vmatpush.bf16.msrb.mxu1 %v11787_v0  ;;  %v11722_v0 = vld [vmem:[#allocation2 + $0x520] sm:$0xf]  ;;  %v11595_v15 = vor.u32 %v14642_v9, %v11594_v63  ;;  %v14734_v13 = vld [vmem:[#allocation2 + $0x70c] sm:$0xf0]  ;;  %v11804_v63 = vld [vmem:[#allocation2 + $0x5d0] sm:$0xf0] }
 0x760   :  { %4410 = vmatpush.bf16.msrb.mxu2 %v11915_v25  ;;  %v11995_v25 = vor.u32 %v14742_v33, %v11994_v20  ;;  %v11723_v58 = vor.u32 %v14674_v37, %v11722_v0  ;;  %v14660_v33 = vld [vmem:[#allocation2 + $0x4c4] sm:$0xf]  ;;  %v11932_v0 = vld [vmem:[#allocation2 + $0x6d0] sm:$0xf0]  ;;  %v17952_v37 = vmax.f32 %v16591_v49, 0.0 }
 0x761   :  { %4424 = vmatpush.bf16.msra.mxu3 %v12043_v54  ;;  %v11978_v54 = vld [vmem:[#allocation2 + $0x720] sm:$0xf]  ;;  %v14724_v9 = vld [vmem:[#allocation2 + $0x6c4] sm:$0xf]  ;;  %v11788_v1 = vld [vmem:[#allocation2 + $0x5b0] sm:$0xf0] }
 0x762   :  { %4383 = vmatpush.bf16.msra.mxu0 %v11643_v2  ;;  %v11851_v2 = vor.u32 %v14706_v45, %v11850_v27  ;;  %v11979_v44 = vor.u32 %v14738_v17, %v11978_v54  ;;  %v14756_v45 = vld [vmem:[#allocation2 + $0x7c4] sm:$0xf]  ;;  %v12060_v54 = vld [vmem:[#allocation2 + $0x7d0] sm:$0xf0]  ;;  %v17953_v17 = vmax.f32 %v16571_v23, 0.0 }
 0x763   :  { %4397 = vmatpush.bf16.msrb.mxu1 %v11771_v60  ;;  %v11706_v60 = vld [vmem:[#allocation2 + $0x500] sm:$0xf]  ;;  %v14656_v49 = vld [vmem:[#allocation2 + $0x4a4] sm:$0xf] }
 0x764   :  { %4411 = vmatpush.bf16.msrb.mxu2 %v11899_v41  ;;  %v14670_v41 = vld [vmem:[#allocation2 + $0x50c] sm:$0xf0]  ;;  %v16710_v31 = vld [vmem:[#allocation34] sm:$0xf] }
 0x765   :  { %4425 = vmatpush.bf16.msra.mxu3 %v12027_v26  ;;  %v11962_v26 = vld [vmem:[#allocation2 + $0x700] sm:$0xf]  ;;  %v11707_v10 = vor.u32 %v14670_v41, %v11706_v60  ;;  %v17957_v60 = vmax.f32 %v16573_v24, 0.0  ;;  %v17958_v41 = vmax.f32 %v16585_v42, 0.0  ;;  %v14752_v24 = vld [vmem:[#allocation2 + $0x7a4] sm:$0xf] }
 0x766   :  { %4384 = vmatpush.bf16.msra.mxu0 %v11627_v16  ;;  %v11820_v16 = vld [vmem:[#allocation2 + $0x5f0] sm:$0xf0]  ;;  %v11963_v32 = vor.u32 %v14734_v13, %v11962_v26  ;;  %v14720_v26 = vld [vmem:[#allocation2 + $0x6a4] sm:$0xf] }
 0x767   :  { %4398 = vmatpush.bf16.msrb.mxu1 %v11755_v52  ;;  %v14728_v52 = vld [vmem:[#allocation2 + $0x6e4] sm:$0xf]  ;;  %v11823_v7 = vor.u32 %v14696_v11, %v11820_v16  ;;  %v16707_v51 = vpack.c.bf16 %v17958_v41, %v17957_v60  ;;  %v11916_v13 = vld [vmem:[#allocation2 + $0x6b0] sm:$0xf0] }
 0x768   :  { %4412 = vmatpush.bf16.msrb.mxu2 %v11883_v6  ;;  %v11948_v6 = vld [vmem:[#allocation2 + $0x6f0] sm:$0xf0]  ;;  %v14652_v11 = vld [vmem:[#allocation2 + $0x484] sm:$0xf]  ;;  %v11919_v16 = vor.u32 %v14720_v26, %v11916_v13 }
 0x769   :  { %4426 = vmatpush.bf16.msra.mxu3 %v12011_v8  ;;  %v12076_v8 = vld [vmem:[#allocation2 + $0x7f0] sm:$0xf0]  ;;  %v11951_v20 = vor.u32 %v14728_v52, %v11948_v6  ;;  %v14684_v6 = vld [vmem:[#allocation2 + $0x584] sm:$0xf] }
 0x76a   :  { %4385 = vmatpush.bf16.msra.mxu0 %v11611_v47  ;;  %v11676_v47 = vld [vmem:[#allocation2 + $0x4d0] sm:$0xf0]  ;;  %v14644_v41 = vld [vmem:[#allocation2 + $0x444] sm:$0xf] }
 0x76b   :  { %4399 = vmatpush.bf16.msrb.mxu1 %v11739_v62  ;;  %v14692_v62 = vld [vmem:[#allocation2 + $0x5c4] sm:$0xf]  ;;  %v11644_v52 = vld [vmem:[#allocation2 + $0x490] sm:$0xf0] }
 0x76c   :  { %4413 = vmatpush.bf16.msrb.mxu2 %v11867_v12  ;;  %v12079_v12 = vor.u32 %v14760_v61, %v12076_v8  ;;  %v11807_v23 = vor.u32 %v14692_v62, %v11804_v63  ;;  %v11772_v61 = vld [vmem:[#allocation2 + $0x590] sm:$0xf0]  ;;  %v14716_v8 = vld [vmem:[#allocation2 + $0x684] sm:$0xf] }
 0x76d   :  { %4427 = vmatpush.bf16.msra.mxu3 %v11995_v25  ;;  %v17951_v25 = vmax.f32 %v16579_v34, 0.0  ;;  %v11679_v34 = vor.u32 %v14660_v33, %v11676_v47  ;;  %v11775_v47 = vor.u32 %v14684_v6, %v11772_v61  ;;  %v11628_v63 = vld [vmem:[#allocation2 + $0x470] sm:$0xf0] }
 0x76e   :  { %4386 = vmatpush.bf16.msra.mxu0 %v11595_v15  ;;  %v17954_v15 = vmax.f32 %v16583_v38, 0.0  ;;  %v11935_v38 = vor.u32 %v14724_v9, %v11932_v0  ;;  %v14680_v9 = vld [vmem:[#allocation2 + $0x564] sm:$0xf]  ;;  %v11868_v26 = vld [vmem:[#allocation2 + $0x650] sm:$0xf0] }
 0x76f   :  { %4400 = vmatpush.bf16.msrb.mxu1 %v11723_v58  ;;  %v16689_v27 = vpack.c.bf16 %v17952_v37, %v17951_v25  ;;  %v17956_v58 = vmax.f32 %v16593_v50, 0.0  ;;  %v12063_v50 = vor.u32 %v14756_v45, %v12060_v54  ;;  %v11756_v45 = vld [vmem:[#allocation2 + $0x570] sm:$0xf0]  ;;  %v14712_v54 = vld [vmem:[#allocation2 + $0x664] sm:$0xf] }
 0x770   :  { %4414 = vmatpush.bf16.msrb.mxu2 %v11851_v2  ;;  %v16695_v36 = vpack.c.bf16 %v17954_v15, %v17953_v17  ;;  %v11884_v17 = vld [vmem:[#allocation2 + $0x670] sm:$0xf0]  ;;  %v14744_v15 = vld [vmem:[#allocation2 + $0x764] sm:$0xf] }
 0x771   :  { %4428 = vmatpush.bf16.msra.mxu3 %v11979_v44  ;;  %v16701_v2 = vpack.c.bf16 %v17956_v58, %v17955_v28  ;;  %v11660_v44 = vld [vmem:[#allocation2 + $0x4b0] sm:$0xf0]  ;;  %v11887_v60 = vor.u32 %v14712_v54, %v11884_v17  ;;  %v14668_v17 = vld [vmem:[#allocation2 + $0x504] sm:$0xf] }
 0x772   :  { %4387 = vmatpush.bf16.msra.mxu0 %v11579_v18  ;;  %v11663_v42 = vor.u32 %v14656_v49, %v11660_v44  ;;  %v11791_v18 = vor.u32 %v14688_v35, %v11788_v1  ;;  %v12012_v28 = vld [vmem:[#allocation2 + $0x770] sm:$0xf0]  ;;  %v11759_v49 = vor.u32 %v14680_v9, %v11756_v45 }
 0x773   :  { %4401 = vmatpush.bf16.msrb.mxu1 %v11707_v10  ;;  %v2716_v10 = vperm.slane %v16710_v31, 0  ;;  %v12015_v35 = vor.u32 %v14744_v15, %v12012_v28  ;;  %v11740_v1 = vld [vmem:[#allocation2 + $0x550] sm:$0xf0]  ;;  %v14700_v15 = vld [vmem:[#allocation2 + $0x604] sm:$0xf] }
 0x774   :  { %4415 = vmatpush.bf16.msrb.mxu2 %v11835_v19  ;;  %v12047_v19 = vor.u32 %v14752_v24, %v12044_v22  ;;  %v14740_v22 = vld [vmem:[#allocation2 + $0x744] sm:$0xf]  ;;  %v11596_v61 = vld [vmem:[#allocation2 + $0x430] sm:$0xf0] }
 0x775   :  { %4429 = vmatpush.bf16.msra.mxu3 %v11963_v32  ;;  %4388 = vmatmul.bf16.vlgmr.msra.gmra.mxu0 %v16695_v36  ;;  %v11900_v32 = vld [vmem:[#allocation2 + $0x690] sm:$0xf0]  ;;  %v3373_v33 = vpop.f32.mrf.mxu0 }
 0x776   :  { %4436 = vmatpush.bf16.msrb.mxu0 %v11695_v43  ;;  %4402 = vmatmul.bf16.vlgmr.msrb.gmra.mxu1 %v16707_v51  ;;  %v14748_v43 = vld [vmem:[#allocation2 + $0x784] sm:$0xf]  ;;  %v11903_v62 = vor.u32 %v14716_v8, %v11900_v32  ;;  %v3374_v0 = vadd.f32 %v3373_v33, %v2716_v10  ;;  %v3387_v25 = vpop.f32.mrf.mxu1  ;;  %v11724_v32 = vld [vmem:[#allocation2 + $0x530] sm:$0xf0] }
 0x777   :  { %4450 = vmatpush.bf16.msra.mxu1 %v11823_v7  ;;  %4416 = vmatmul.bf16.vlgmr.msrb.gmra.mxu2 %v16689_v27  ;;  %v12028_v7 = vld [vmem:[#allocation2 + $0x790] sm:$0xf0]  ;;  %v14672_v8 = vld [vmem:[#allocation2 + $0x524] sm:$0xf] }
 0x778   :  { %4464 = vmatpush.bf16.msra.mxu2 %v11951_v20  ;;  %4430 = vmatmul.bf16.vlgmr.msra.gmra.mxu3 %v16701_v2  ;;  %v11647_v20 = vor.u32 %v14652_v11, %v11644_v52  ;;  %v12031_v37 = vor.u32 %v14748_v43, %v12028_v7  ;;  %v3388_v58 = vadd.f32 %v3387_v25, %v3374_v0  ;;  %v14704_v33 = vld [vmem:[#allocation2 + $0x624] sm:$0xf] }
 0x779   :  { %4478 = vmatpush.bf16.msrb.mxu3 %v12079_v12  ;;  %v14648_v12 = vld [vmem:[#allocation2 + $0x464] sm:$0xf]  ;;  %v11727_v45 = vor.u32 %v14672_v8, %v11724_v32  ;;  %v11682_v32 = vld [vmem:[#allocation2 + $0x4c8] sm:$0xf] }
 0x77a   :  { %4437 = vmatpush.bf16.msrb.mxu0 %v11679_v34  ;;  %v11631_v34 = vor.u32 %v14648_v12, %v11628_v63  ;;  %v3401_v44 = vpop.f32.mrf.mxu2  ;;  %v14736_v12 = vld [vmem:[#allocation2 + $0x724] sm:$0xf]  ;;  %v11980_v63 = vld [vmem:[#allocation2 + $0x730] sm:$0xf0] }
 0x77b   :  { %4451 = vmatpush.bf16.msra.mxu1 %v11807_v23  ;;  %v11612_v23 = vld [vmem:[#allocation2 + $0x450] sm:$0xf0]  ;;  %v3402_v13 = vadd.f32 %v3401_v44, %v3388_v58  ;;  %v14636_v25 = vld [vmem:[#allocation2 + $0x404] sm:$0xf]  ;;  %v11983_v58 = vor.u32 %v14736_v12, %v11980_v63  ;;  %v14667_v44 = vld [vmem:[#allocation2 + $0x4f4] sm:$0xf0] }
 0x77c   :  { %4465 = vmatpush.bf16.msra.mxu2 %v11935_v38  ;;  %v14676_v38 = vld [vmem:[#allocation2 + $0x544] sm:$0xf]  ;;  %v11615_v11 = vor.u32 %v14644_v41, %v11612_v23  ;;  %v14727_v12 = vld [vmem:[#allocation2 + $0x6d4] sm:$0xf0]  ;;  %v12066_v63 = vld [vmem:[#allocation2 + $0x7c8] sm:$0xf] }
 0x77d   :  { %4479 = vmatpush.bf16.msrb.mxu3 %v12063_v50  ;;  %v14708_v50 = vld [vmem:[#allocation2 + $0x644] sm:$0xf]  ;;  %v3415_v24 = vpop.f32.mrf.mxu3  ;;  %v3375_v52 = vpop.f32.mrf.mxu0  ;;  %v11743_v6 = vor.u32 %v14676_v38, %v11740_v1  ;;  %v11698_v38 = vld [vmem:[#allocation2 + $0x4e8] sm:$0xf] }
 0x77e   :  { %4438 = vmatpush.bf16.msrb.mxu0 %v11663_v42  ;;  %v11996_v42 = vld [vmem:[#allocation2 + $0x750] sm:$0xf0]  ;;  %v3376_v43 = vadd.f32 %v3375_v52, %v2716_v10  ;;  %v3389_v7 = vpop.f32.mrf.mxu1 }
 0x77f   :  { %4452 = vmatpush.bf16.msra.mxu1 %v11791_v18  ;;  %v14640_v18 = vld [vmem:[#allocation2 + $0x424] sm:$0xf]  ;;  %v11708_v10 = vld [vmem:[#allocation2 + $0x510] sm:$0xf0] }
 0x780   :  { %4466 = vmatpush.bf16.msra.mxu2 %v11919_v16  ;;  %v16716_v16 = vadd.f32 %v3415_v24, %v3402_v13  ;;  %v3390_v9 = vadd.f32 %v3389_v7, %v3376_v43  ;;  %v11599_v0 = vor.u32 %v14640_v18, %v11596_v61  ;;  %v14731_v13 = vld [vmem:[#allocation2 + $0x6f4] sm:$0xf0]  ;;  %v11810_v7 = vld [vmem:[#allocation2 + $0x5c8] sm:$0xf] }
 0x781   :  { %4480 = vmatpush.bf16.msrb.mxu3 %v12047_v19  ;;  %v11871_v19 = vor.u32 %v14708_v50, %v11868_v26  ;;  %v14699_v50 = vld [vmem:[#allocation2 + $0x5f4] sm:$0xf0]  ;;  %v11954_v26 = vld [vmem:[#allocation2 + $0x6e8] sm:$0xf] }
 0x782   :  { %4439 = vmatpush.bf16.msrb.mxu0 %v11647_v20  ;;  %v11999_v20 = vor.u32 %v14740_v22, %v11996_v42  ;;  %v3403_v28 = vpop.f32.mrf.mxu2  ;;  %v11711_v22 = vor.u32 %v14668_v17, %v11708_v10  ;;  %v14763_v18 = vld [vmem:[#allocation2 + $0x7f4] sm:$0xf0]  ;;  %v11955_v8 = vor.u32 %v14731_v13, %v11954_v26  ;;  %v11794_v17 = vld [vmem:[#allocation2 + $0x5a8] sm:$0xf] }
 0x783   :  { %4453 = vmatpush.bf16.msra.mxu1 %v11775_v47  ;;  %v11852_v47 = vld [vmem:[#allocation2 + $0x630] sm:$0xf0]  ;;  %v3404_v41 = vadd.f32 %v3403_v28, %v3390_v9  ;;  %v14663_v43 = vld [vmem:[#allocation2 + $0x4d4] sm:$0xf0]  ;;  %v11922_v28 = vld [vmem:[#allocation2 + $0x6a8] sm:$0xf] }
 0x784   :  { %4467 = vmatpush.bf16.msra.mxu2 %v11903_v62  ;;  %v3588_v62 = vmax.f32 %v16716_v16, 0.0  ;;  %v11855_v54 = vor.u32 %v14704_v33, %v11852_v47  ;;  %v14695_v33 = vld [vmem:[#allocation2 + $0x5d4] sm:$0xf0]  ;;  %v11938_v47 = vld [vmem:[#allocation2 + $0x6c8] sm:$0xf] }
 0x785   :  { %4481 = vmatpush.bf16.msrb.mxu3 %v12031_v37  ;;  %v11580_v37 = vld [vmem:[#allocation2 + $0x410] sm:$0xf0]  ;;  %v3417_v23 = vpop.f32.mrf.mxu3  ;;  %v14759_v9 = vld [vmem:[#allocation2 + $0x7d4] sm:$0xf0]  ;;  %v11906_v13 = vld [vmem:[#allocation2 + $0x688] sm:$0xf] }
 0x786   :  { %4440 = vmatpush.bf16.msrb.mxu0 %v11631_v34  ;;  %v11836_v34 = vld [vmem:[#allocation2 + $0x610] sm:$0xf0]  ;;  %v11583_v1 = vor.u32 %v14636_v25, %v11580_v37  ;;  %v16719_v24 = vadd.f32 %v3417_v23, %v3404_v41  ;;  %v11811_v25 = vor.u32 %v14695_v33, %v11810_v7  ;;  %v11939_v37 = vor.u32 %v14727_v12, %v11938_v47  ;;  %v11650_v41 = vld [vmem:[#allocation2 + $0x488] sm:$0xf]  ;;  %v14687_v26 = vld [vmem:[#allocation2 + $0x594] sm:$0xf0] }
 0x787   :  { %4454 = vmatpush.bf16.msra.mxu1 %v11759_v49  ;;  %v14732_v49 = vld [vmem:[#allocation2 + $0x704] sm:$0xf]  ;;  %v11839_v42 = vor.u32 %v14700_v15, %v11836_v34  ;;  %v12067_v10 = vor.u32 %v14759_v9, %v12066_v63  ;;  %v14691_v15 = vld [vmem:[#allocation2 + $0x5b4] sm:$0xf0]  ;;  %v12050_v34 = vld [vmem:[#allocation2 + $0x7a8] sm:$0xf] }
 0x788   :  { %4468 = vmatpush.bf16.msra.mxu2 %v11887_v60  ;;  %v11964_v60 = vld [vmem:[#allocation2 + $0x710] sm:$0xf0]  ;;  %v11795_v23 = vor.u32 %v14691_v15, %v11794_v17  ;;  %v14683_v47 = vld [vmem:[#allocation2 + $0x574] sm:$0xf0]  ;;  %v11890_v12 = vld [vmem:[#allocation2 + $0x668] sm:$0xf] }
 0x789   :  { %4482 = vmatpush.bf16.msrb.mxu3 %v12015_v35  ;;  %v11826_v35 = vld [vmem:[#allocation2 + $0x5e8] sm:$0xf]  ;;  %v11967_v52 = vor.u32 %v14732_v49, %v11964_v60  ;;  %v14755_v49 = vld [vmem:[#allocation2 + $0x7b4] sm:$0xf0] }
 0x78a   :  { %4441 = vmatpush.bf16.msrb.mxu0 %v11615_v11  ;;  %v12082_v11 = vld [vmem:[#allocation2 + $0x7e8] sm:$0xf]  ;;  %v11827_v61 = vor.u32 %v14699_v50, %v11826_v35  ;;  %v12051_v50 = vor.u32 %v14755_v49, %v12050_v34  ;;  %v14715_v63 = vld [vmem:[#allocation2 + $0x674] sm:$0xf0] }
 0x78b   :  { %4455 = vmatpush.bf16.msra.mxu1 %v11743_v6  ;;  %v11699_v6 = vor.u32 %v14667_v44, %v11698_v38  ;;  %v14655_v44 = vld [vmem:[#allocation2 + $0x494] sm:$0xf0]  ;;  %v11778_v35 = vld [vmem:[#allocation2 + $0x588] sm:$0xf] }
 0x78c   :  { %4469 = vmatpush.bf16.msra.mxu2 %v11871_v19  ;;  %v3592_v19 = vmax.f32 %v16719_v24, 0.0  ;;  %v12018_v9 = vld [vmem:[#allocation2 + $0x768] sm:$0xf]  ;;  %v14679_v34 = vld [vmem:[#allocation2 + $0x554] sm:$0xf0] }
 0x78d   :  { %4483 = vmatpush.bf16.msrb.mxu3 %v11999_v20  ;;  %v12083_v20 = vor.u32 %v14763_v18, %v12082_v11  ;;  %v14751_v11 = vld [vmem:[#allocation2 + $0x794] sm:$0xf0]  ;;  %v11651_v18 = vor.u32 %v14655_v44, %v11650_v41  ;;  %v11618_v17 = vld [vmem:[#allocation2 + $0x448] sm:$0xf] }
 0x78e   :  { %4442 = vmatpush.bf16.msrb.mxu0 %v11599_v0  ;;  %v11683_v0 = vor.u32 %v14663_v43, %v11682_v32  ;;  %v14651_v32 = vld [vmem:[#allocation2 + $0x474] sm:$0xf0]  ;;  %v11762_v43 = vld [vmem:[#allocation2 + $0x568] sm:$0xf] }
 0x78f   :  { %4456 = vmatpush.bf16.msra.mxu1 %v11727_v45  ;;  %v11666_v45 = vld [vmem:[#allocation2 + $0x4a8] sm:$0xf]  ;;  %v14743_v44 = vld [vmem:[#allocation2 + $0x754] sm:$0xf0] }
 0x790   :  { %4470 = vmatpush.bf16.msra.mxu2 %v11855_v54  ;;  %v14659_v54 = vld [vmem:[#allocation2 + $0x4b4] sm:$0xf0]  ;;  %v11746_v15 = vld [vmem:[#allocation2 + $0x548] sm:$0xf] }
 0x791   :  { %4484 = vmatpush.bf16.msrb.mxu3 %v11983_v58  ;;  %v14723_v58 = vld [vmem:[#allocation2 + $0x6b4] sm:$0xf0]  ;;  %v11667_v60 = vor.u32 %v14659_v54, %v11666_v45  ;;  %v11763_v45 = vor.u32 %v14683_v47, %v11762_v43  ;;  %v11891_v54 = vor.u32 %v14715_v63, %v11890_v12  ;;  %v11874_v49 = vld [vmem:[#allocation2 + $0x648] sm:$0xf] }
 0x792   :  { %4443 = vmatpush.bf16.msrb.mxu0 %v11583_v1  ;;  %v11923_v38 = vor.u32 %v14723_v58, %v11922_v28  ;;  %v2717_v1 = vperm.slane %v16710_v31, 1  ;;  %v14707_v43 = vld [vmem:[#allocation2 + $0x634] sm:$0xf0]  ;;  %v11586_v63 = vld [vmem:[#allocation2 + $0x408] sm:$0xf] }
 0x793   :  { %4457 = vmatpush.bf16.msra.mxu1 %v11711_v22  ;;  %v14719_v22 = vld [vmem:[#allocation2 + $0x694] sm:$0xf0] }
 0x794   :  { %4471 = vmatpush.bf16.msra.mxu2 %v11839_v42  ;;  %v12034_v42 = vld [vmem:[#allocation2 + $0x788] sm:$0xf] }
 0x795   :  { %4485 = vmatpush.bf16.msrb.mxu3 %v11967_v52  ;;  %4444 = vmatmul.bf16.vlgmr.msrb.gmra.mxu0 %v16695_v36  ;;  %v3429_v52 = vpop.f32.mrf.mxu0  ;;  %v12035_v33 = vor.u32 %v14751_v11, %v12034_v42  ;;  %v14643_v11 = vld [vmem:[#allocation2 + $0x434] sm:$0xf0] }
 0x796   :  { %4492 = vmatpush.bf16.msra.mxu0 %v11699_v6  ;;  %4458 = vmatmul.bf16.vlgmr.msra.gmra.mxu1 %v16707_v51  ;;  %v11779_v6 = vor.u32 %v14687_v26, %v11778_v35  ;;  %v3430_v7 = vadd.f32 %v3429_v52, %v2717_v1  ;;  %v14675_v52 = vld [vmem:[#allocation2 + $0x534] sm:$0xf0] }
 0x797   :  { %4506 = vmatpush.bf16.msrb.mxu1 %v11827_v61  ;;  %4472 = vmatmul.bf16.vlgmr.msra.gmra.mxu2 %v16689_v27  ;;  %v11907_v61 = vor.u32 %v14719_v22, %v11906_v13  ;;  %v11747_v22 = vor.u32 %v14679_v34, %v11746_v15  ;;  %v11970_v15 = vld [vmem:[#allocation2 + $0x708] sm:$0xf] }
 0x798   :  { %4520 = vmatpush.bf16.msrb.mxu2 %v11955_v8  ;;  %4486 = vmatmul.bf16.vlgmr.msrb.gmra.mxu3 %v16701_v2  ;;  %v11634_v8 = vld [vmem:[#allocation2 + $0x468] sm:$0xf] }
 0x799   :  { %4534 = vmatpush.bf16.msra.mxu3 %v12083_v20  ;;  %v3443_v20 = vpop.f32.mrf.mxu1 }
 0x79a   :  { %4493 = vmatpush.bf16.msra.mxu0 %v11683_v0  ;;  %v14747_v0 = vld [vmem:[#allocation2 + $0x774] sm:$0xf0]  ;;  %v3457_v28 = vpop.f32.mrf.mxu2 }
 0x79b   :  { %4507 = vmatpush.bf16.msrb.mxu1 %v11811_v25  ;;  %v3444_v25 = vadd.f32 %v3443_v20, %v3430_v7  ;;  %v12019_v58 = vor.u32 %v14747_v0, %v12018_v9  ;;  %v11986_v20 = vld [vmem:[#allocation2 + $0x728] sm:$0xf]  ;;  %v14639_v9 = vld [vmem:[#allocation2 + $0x414] sm:$0xf0] }
 0x79c   :  { %4521 = vmatpush.bf16.msrb.mxu2 %v11939_v37  ;;  %v11635_v37 = vor.u32 %v14651_v32, %v11634_v8  ;;  %v11858_v32 = vld [vmem:[#allocation2 + $0x628] sm:$0xf] }
 0x79d   :  { %4535 = vmatpush.bf16.msra.mxu3 %v12067_v10  ;;  %v14647_v10 = vld [vmem:[#allocation2 + $0x454] sm:$0xf0]  ;;  %v3458_v41 = vadd.f32 %v3457_v28, %v3444_v25  ;;  %v3431_v13 = vpop.f32.mrf.mxu0  ;;  %v11859_v25 = vor.u32 %v14707_v43, %v11858_v32  ;;  %v14661_v32 = vld [vmem:[#allocation2 + $0x4cc] sm:$0xf]  ;;  %v11684_v43 = vld [vmem:[#allocation2 + $0x4d8] sm:$0xf0] }
 0x79e   :  { %4494 = vmatpush.bf16.msra.mxu0 %v11667_v60  ;;  %v14711_v60 = vld [vmem:[#allocation2 + $0x654] sm:$0xf0]  ;;  %v11619_v35 = vor.u32 %v14647_v10, %v11618_v17 }
 0x79f   :  { %4508 = vmatpush.bf16.msrb.mxu1 %v11795_v23  ;;  %v3471_v23 = vpop.f32.mrf.mxu3  ;;  %v11875_v42 = vor.u32 %v14711_v60, %v11874_v49  ;;  %v14703_v10 = vld [vmem:[#allocation2 + $0x614] sm:$0xf0]  ;;  %v14665_v49 = vld [vmem:[#allocation2 + $0x4ec] sm:$0xf]  ;;  %v11700_v60 = vld [vmem:[#allocation2 + $0x4f8] sm:$0xf0] }
 0x7a0   :  { %4522 = vmatpush.bf16.msrb.mxu2 %v11923_v38  ;;  %v12002_v38 = vld [vmem:[#allocation2 + $0x748] sm:$0xf]  ;;  %v16727_v26 = vadd.f32 %v3471_v23, %v3458_v41  ;;  %v14735_v28 = vld [vmem:[#allocation2 + $0x714] sm:$0xf0]  ;;  %v14697_v41 = vld [vmem:[#allocation2 + $0x5ec] sm:$0xf]  ;;  %v11587_v23 = vor.u32 %v14639_v9, %v11586_v63 }
 0x7a1   :  { %4536 = vmatpush.bf16.msra.mxu3 %v12051_v50  ;;  %v11602_v50 = vld [vmem:[#allocation2 + $0x428] sm:$0xf]  ;;  %v12003_v8 = vor.u32 %v14743_v44, %v12002_v38  ;;  %v11828_v38 = vld [vmem:[#allocation2 + $0x5f8] sm:$0xf0]  ;;  %v14729_v44 = vld [vmem:[#allocation2 + $0x6ec] sm:$0xf] }
 0x7a2   :  { %4495 = vmatpush.bf16.msra.mxu0 %v11651_v18  ;;  %v11730_v18 = vld [vmem:[#allocation2 + $0x528] sm:$0xf]  ;;  %v3589_v7 = vmax.f32 %v16727_v26, 0.0  ;;  %v11603_v12 = vor.u32 %v14643_v11, %v11602_v50  ;;  %v12084_v11 = vld [vmem:[#allocation2 + $0x7f8] sm:$0xf0] }
 0x7a3   :  { %4509 = vmatpush.bf16.msrb.mxu1 %v11779_v6  ;;  %v3432_v6 = vadd.f32 %v3431_v13, %v2717_v1  ;;  %v11731_v0 = vor.u32 %v14675_v52, %v11730_v18  ;;  %v14671_v1 = vld [vmem:[#allocation2 + $0x514] sm:$0xf0]  ;;  %v11971_v18 = vor.u32 %v14735_v28, %v11970_v15  ;;  %v11703_v52 = vor.u32 %v14665_v49, %v11700_v60  ;;  %v11940_v63 = vld [vmem:[#allocation2 + $0x6d8] sm:$0xf0]  ;;  %v14757_v9 = vld [vmem:[#allocation2 + $0x7cc] sm:$0xf] }
 0x7a4   :  { %4523 = vmatpush.bf16.msrb.mxu2 %v11907_v61  ;;  %v3445_v61 = vpop.f32.mrf.mxu1  ;;  %v11796_v15 = vld [vmem:[#allocation2 + $0x5b8] sm:$0xf0]  ;;  %v14721_v28 = vld [vmem:[#allocation2 + $0x6ac] sm:$0xf] }
 0x7a5   :  { %4537 = vmatpush.bf16.msra.mxu3 %v12035_v33  ;;  %v14739_v33 = vld [vmem:[#allocation2 + $0x734] sm:$0xf0]  ;;  %v3446_v47 = vadd.f32 %v3445_v61, %v3432_v6  ;;  %v11831_v61 = vor.u32 %v14697_v41, %v11828_v38  ;;  %v12052_v49 = vld [vmem:[#allocation2 + $0x7b8] sm:$0xf0]  ;;  %v14653_v41 = vld [vmem:[#allocation2 + $0x48c] sm:$0xf] }
 0x7a6   :  { %4496 = vmatpush.bf16.msra.mxu0 %v11635_v37  ;;  %v11714_v37 = vld [vmem:[#allocation2 + $0x508] sm:$0xf]  ;;  %v11987_v17 = vor.u32 %v14739_v33, %v11986_v20  ;;  %v14693_v20 = vld [vmem:[#allocation2 + $0x5cc] sm:$0xf] }
 0x7a7   :  { %4510 = vmatpush.bf16.msrb.mxu1 %v11763_v45  ;;  %v11842_v45 = vld [vmem:[#allocation2 + $0x608] sm:$0xf]  ;;  %v3473_v34 = vpop.f32.mrf.mxu3  ;;  %v11715_v13 = vor.u32 %v14671_v1, %v11714_v37 }
 0x7a8   :  { %4524 = vmatpush.bf16.msrb.mxu2 %v11891_v54  ;;  %v3459_v54 = vpop.f32.mrf.mxu2 }
 0x7a9   :  { %4538 = vmatpush.bf16.msra.mxu3 %v12019_v58  ;;  %v3460_v58 = vadd.f32 %v3459_v54, %v3446_v47  ;;  %v11812_v47 = vld [vmem:[#allocation2 + $0x5d8] sm:$0xf0] }
 0x7aa   :  { %4497 = vmatpush.bf16.msra.mxu0 %v11619_v35  ;;  %v11956_v35 = vld [vmem:[#allocation2 + $0x6f8] sm:$0xf0]  ;;  %v11815_v37 = vor.u32 %v14693_v20, %v11812_v47 }
 0x7ab   :  { %4511 = vmatpush.bf16.msrb.mxu1 %v11747_v22  ;;  %v16730_v50 = vadd.f32 %v3473_v34, %v3460_v58  ;;  %v11843_v22 = vor.u32 %v14703_v10, %v11842_v45  ;;  %v14657_v45 = vld [vmem:[#allocation2 + $0x4ac] sm:$0xf]  ;;  %v11668_v54 = vld [vmem:[#allocation2 + $0x4b8] sm:$0xf0] }
 0x7ac   :  { %4525 = vmatpush.bf16.msrb.mxu2 %v11875_v42  ;;  %v14761_v42 = vld [vmem:[#allocation2 + $0x7ec] sm:$0xf]  ;;  %v11924_v58 = vld [vmem:[#allocation2 + $0x6b8] sm:$0xf0]  ;;  %v11671_v60 = vor.u32 %v14657_v45, %v11668_v54 }
 0x7ad   :  { %4539 = vmatpush.bf16.msra.mxu3 %v12003_v8  ;;  %v3593_v6 = vmax.f32 %v16730_v50, 0.0  ;;  %v11959_v8 = vor.u32 %v14729_v44, %v11956_v35  ;;  %v12087_v33 = vor.u32 %v14761_v42, %v12084_v11  ;;  %v14753_v34 = vld [vmem:[#allocation2 + $0x7ac] sm:$0xf]  ;;  %v11927_v38 = vor.u32 %v14721_v28, %v11924_v58  ;;  %v11652_v44 = vld [vmem:[#allocation2 + $0x498] sm:$0xf0] }
 0x7ae   :  { %4498 = vmatpush.bf16.msra.mxu0 %v11603_v12  ;;  %v14725_v12 = vld [vmem:[#allocation2 + $0x6cc] sm:$0xf]  ;;  %v11780_v42 = vld [vmem:[#allocation2 + $0x598] sm:$0xf0] }
 0x7af   :  { %4512 = vmatpush.bf16.msrb.mxu1 %v11731_v0  ;;  %v12068_v0 = vld [vmem:[#allocation2 + $0x7d8] sm:$0xf0]  ;;  %v11943_v1 = vor.u32 %v14725_v12, %v11940_v63  ;;  %v14685_v35 = vld [vmem:[#allocation2 + $0x58c] sm:$0xf] }
 0x7b0   :  { %4526 = vmatpush.bf16.msrb.mxu2 %v11859_v25  ;;  %v11687_v25 = vor.u32 %v14661_v32, %v11684_v43  ;;  %v12071_v10 = vor.u32 %v14757_v9, %v12068_v0  ;;  %v14717_v11 = vld [vmem:[#allocation2 + $0x68c] sm:$0xf]  ;;  %v11783_v43 = vor.u32 %v14685_v35, %v11780_v42  ;;  %v11636_v47 = vld [vmem:[#allocation2 + $0x478] sm:$0xf0] }
 0x7b1   :  { %4540 = vmatpush.bf16.msra.mxu3 %v11987_v17  ;;  %v14689_v17 = vld [vmem:[#allocation2 + $0x5ac] sm:$0xf]  ;;  %v12020_v54 = vld [vmem:[#allocation2 + $0x778] sm:$0xf0] }
 0x7b2   :  { %4499 = vmatpush.bf16.msra.mxu0 %v11587_v23  ;;  %v11799_v23 = vor.u32 %v14689_v17, %v11796_v15  ;;  %v3485_v32 = vpop.f32.mrf.mxu0  ;;  %v14681_v12 = vld [vmem:[#allocation2 + $0x56c] sm:$0xf] }
 0x7b3   :  { %4513 = vmatpush.bf16.msrb.mxu1 %v11715_v13  ;;  %v2718_v13 = vperm.slane %v16710_v31, 2  ;;  %v3499_v9 = vpop.f32.mrf.mxu1  ;;  %v14745_v45 = vld [vmem:[#allocation2 + $0x76c] sm:$0xf] }
 0x7b4   :  { %4527 = vmatpush.bf16.msrb.mxu2 %v11843_v22  ;;  %v12055_v22 = vor.u32 %v14753_v34, %v12052_v49  ;;  %v14645_v58 = vld [vmem:[#allocation2 + $0x44c] sm:$0xf]  ;;  %v11620_v34 = vld [vmem:[#allocation2 + $0x458] sm:$0xf0] }
 0x7b5   :  { %4541 = vmatpush.bf16.msra.mxu3 %v11971_v18  ;;  %4500 = vmatmul.bf16.vlgmr.msra.gmra.mxu0 %v16695_v36  ;;  %v11908_v18 = vld [vmem:[#allocation2 + $0x698] sm:$0xf0]  ;;  %v3486_v63 = vadd.f32 %v3485_v32, %v2718_v13  ;;  %v14677_v49 = vld [vmem:[#allocation2 + $0x54c] sm:$0xf] }
 0x7b6   :  { %4548 = vmatpush.bf16.msrb.mxu0 %v11703_v52  ;;  %4514 = vmatmul.bf16.vlgmr.msrb.gmra.mxu1 %v16707_v51  ;;  %v14749_v52 = vld [vmem:[#allocation2 + $0x78c] sm:$0xf]  ;;  %v11911_v20 = vor.u32 %v14717_v11, %v11908_v18  ;;  %v12004_v11 = vld [vmem:[#allocation2 + $0x758] sm:$0xf0]  ;;  %v11623_v18 = vor.u32 %v14645_v58, %v11620_v34 }
 0x7b7   :  { %4562 = vmatpush.bf16.msra.mxu1 %v11831_v61  ;;  %4528 = vmatmul.bf16.vlgmr.msrb.gmra.mxu2 %v16689_v27  ;;  %v12036_v61 = vld [vmem:[#allocation2 + $0x798] sm:$0xf0]  ;;  %v3500_v17 = vadd.f32 %v3499_v9, %v3486_v63  ;;  %v14741_v42 = vld [vmem:[#allocation2 + $0x74c] sm:$0xf] }
 0x7b8   :  { %4576 = vmatpush.bf16.msra.mxu2 %v11959_v8  ;;  %4542 = vmatmul.bf16.vlgmr.msra.gmra.mxu3 %v16701_v2  ;;  %v11655_v8 = vor.u32 %v14653_v41, %v11652_v44  ;;  %v12039_v0 = vor.u32 %v14749_v52, %v12036_v61  ;;  %v12023_v41 = vor.u32 %v14745_v45, %v12020_v54  ;;  %v11876_v44 = vld [vmem:[#allocation2 + $0x658] sm:$0xf0]  ;;  %v14641_v52 = vld [vmem:[#allocation2 + $0x42c] sm:$0xf] }
 0x7b9   :  { %4590 = vmatpush.bf16.msrb.mxu3 %v12087_v33  ;;  %v14649_v33 = vld [vmem:[#allocation2 + $0x46c] sm:$0xf]  ;;  %v12007_v9 = vor.u32 %v14741_v42, %v12004_v11  ;;  %v11988_v45 = vld [vmem:[#allocation2 + $0x738] sm:$0xf0]  ;;  %v12202_v42 = vld [vmem:[#allocation2 + $0x8e0] sm:$0xf] }
 0x7ba   :  { %4549 = vmatpush.bf16.msrb.mxu0 %v11687_v25  ;;  %v11764_v25 = vld [vmem:[#allocation2 + $0x578] sm:$0xf0]  ;;  %v14669_v34 = vld [vmem:[#allocation2 + $0x50c] sm:$0xf]  ;;  %v14794_v11 = vld [vmem:[#allocation2 + $0x8ec] sm:$0xf0] }
 0x7bb   :  { %4563 = vmatpush.bf16.msra.mxu1 %v11815_v37  ;;  %v14713_v37 = vld [vmem:[#allocation2 + $0x66c] sm:$0xf]  ;;  %v11767_v15 = vor.u32 %v14681_v12, %v11764_v25  ;;  %v3501_v63 = vpop.f32.mrf.mxu1  ;;  %v11860_v25 = vld [vmem:[#allocation2 + $0x638] sm:$0xf0] }
 0x7bc   :  { %4577 = vmatpush.bf16.msra.mxu2 %v11943_v1  ;;  %v11892_v1 = vld [vmem:[#allocation2 + $0x678] sm:$0xf0] }
 0x7bd   :  { %4591 = vmatpush.bf16.msrb.mxu3 %v12071_v10  ;;  %v11639_v10 = vor.u32 %v14649_v33, %v11636_v47  ;;  %v11895_v28 = vor.u32 %v14713_v37, %v11892_v1  ;;  %v14673_v33 = vld [vmem:[#allocation2 + $0x52c] sm:$0xf]  ;;  %v11732_v47 = vld [vmem:[#allocation2 + $0x538] sm:$0xf0] }
 0x7be   :  { %4550 = vmatpush.bf16.msrb.mxu0 %v11671_v60  ;;  %v3513_v60 = vpop.f32.mrf.mxu2  ;;  %v14737_v1 = vld [vmem:[#allocation2 + $0x72c] sm:$0xf] }
 0x7bf   :  { %4564 = vmatpush.bf16.msra.mxu1 %v11799_v23  ;;  %v11748_v23 = vld [vmem:[#allocation2 + $0x558] sm:$0xf0]  ;;  %v3514_v35 = vadd.f32 %v3513_v60, %v3500_v17 }
 0x7c0   :  { %4578 = vmatpush.bf16.msra.mxu2 %v11927_v38  ;;  %v14709_v38 = vld [vmem:[#allocation2 + $0x64c] sm:$0xf]  ;;  %v11751_v32 = vor.u32 %v14677_v49, %v11748_v23  ;;  %v11844_v23 = vld [vmem:[#allocation2 + $0x618] sm:$0xf0] }
 0x7c1   :  { %4592 = vmatpush.bf16.msrb.mxu3 %v12055_v22  ;;  %v3527_v22 = vpop.f32.mrf.mxu3  ;;  %v14701_v49 = vld [vmem:[#allocation2 + $0x60c] sm:$0xf] }
 0x7c2   :  { %4551 = vmatpush.bf16.msrb.mxu0 %v11655_v8  ;;  %v16738_v61 = vadd.f32 %v3527_v22, %v3514_v35  ;;  %v3487_v8 = vpop.f32.mrf.mxu0 }
 0x7c3   :  { %4565 = vmatpush.bf16.msra.mxu1 %v11783_v43  ;;  %v11879_v43 = vor.u32 %v14709_v38, %v11876_v44  ;;  %v3488_v12 = vadd.f32 %v3487_v8, %v2718_v13  ;;  %v11716_v13 = vld [vmem:[#allocation2 + $0x518] sm:$0xf0]  ;;  %v14733_v38 = vld [vmem:[#allocation2 + $0x70c] sm:$0xf]  ;;  %v14826_v8 = vld [vmem:[#allocation2 + $0x9ec] sm:$0xf0] }
 0x7c4   :  { %4579 = vmatpush.bf16.msra.mxu2 %v11911_v20  ;;  %v11604_v20 = vld [vmem:[#allocation2 + $0x438] sm:$0xf0]  ;;  %v3590_v37 = vmax.f32 %v16738_v61, 0.0 }
 0x7c5   :  { %4593 = vmatpush.bf16.msrb.mxu3 %v12039_v0  ;;  %v14705_v0 = vld [vmem:[#allocation2 + $0x62c] sm:$0xf]  ;;  %v3502_v54 = vadd.f32 %v3501_v63, %v3488_v12  ;;  %v11607_v17 = vor.u32 %v14641_v52, %v11604_v20  ;;  %v11972_v44 = vld [vmem:[#allocation2 + $0x718] sm:$0xf0]  ;;  %v12586_v12 = vld [vmem:[#allocation2 + $0xbe0] sm:$0xf] }
 0x7c6   :  { %4552 = vmatpush.bf16.msrb.mxu0 %v11639_v10  ;;  %v14637_v10 = vld [vmem:[#allocation2 + $0x40c] sm:$0xf]  ;;  %v11863_v58 = vor.u32 %v14705_v0, %v11860_v25  ;;  %v3515_v60 = vpop.f32.mrf.mxu2  ;;  %v14890_v63 = vld [vmem:[#allocation2 + $0xbec] sm:$0xf0]  ;;  %v12203_v0 = vor.u32 %v14794_v11, %v12202_v42  ;;  %v12426_v11 = vld [vmem:[#allocation2 + $0xaa0] sm:$0xf] }
 0x7c7   :  { %4566 = vmatpush.bf16.msra.mxu1 %v11767_v15  ;;  %v11588_v15 = vld [vmem:[#allocation2 + $0x418] sm:$0xf0]  ;;  %v3516_v35 = vadd.f32 %v3515_v60, %v3502_v54  ;;  %v12186_v54 = vld [vmem:[#allocation2 + $0x8c0] sm:$0xf]  ;;  %v14822_v60 = vld [vmem:[#allocation2 + $0x9cc] sm:$0xf0] }
 0x7c8   :  { %4580 = vmatpush.bf16.msra.mxu2 %v11895_v28  ;;  %v11735_v28 = vor.u32 %v14673_v33, %v11732_v47  ;;  %v11591_v52 = vor.u32 %v14637_v10, %v11588_v15  ;;  %v11719_v33 = vor.u32 %v14669_v34, %v11716_v13  ;;  %v11847_v47 = vor.u32 %v14701_v49, %v11844_v23  ;;  %v12314_v10 = vld [vmem:[#allocation2 + $0x9c0] sm:$0xf]  ;;  %v14886_v34 = vld [vmem:[#allocation2 + $0xbcc] sm:$0xf0] }
 0x7c9   :  { %4594 = vmatpush.bf16.msrb.mxu3 %v12023_v41  ;;  %v11991_v41 = vor.u32 %v14737_v1, %v11988_v45  ;;  %v3529_v22 = vpop.f32.mrf.mxu3  ;;  %v12587_v15 = vor.u32 %v14890_v63, %v12586_v12  ;;  %v12315_v49 = vor.u32 %v14822_v60, %v12314_v10  ;;  %v12170_v23 = vld [vmem:[#allocation2 + $0x8a0] sm:$0xf]  ;;  %v14818_v42 = vld [vmem:[#allocation2 + $0x9ac] sm:$0xf0] }
 0x7ca   :  { %4553 = vmatpush.bf16.msrb.mxu0 %v11623_v18  ;;  %v12330_v18 = vld [vmem:[#allocation2 + $0x9e0] sm:$0xf]  ;;  %v16741_v20 = vadd.f32 %v3529_v22, %v3516_v35  ;;  %v14782_v12 = vld [vmem:[#allocation2 + $0x88c] sm:$0xf0] }
 0x7cb   :  { %4567 = vmatpush.bf16.msra.mxu1 %v11751_v32  ;;  %v12458_v32 = vld [vmem:[#allocation2 + $0xae0] sm:$0xf]  ;;  %v12331_v1 = vor.u32 %v14826_v8, %v12330_v18  ;;  %v14850_v18 = vld [vmem:[#allocation2 + $0xaac] sm:$0xf0] }
 0x7cc   :  { %4581 = vmatpush.bf16.msra.mxu2 %v11879_v43  ;;  %v14858_v43 = vld [vmem:[#allocation2 + $0xaec] sm:$0xf0]  ;;  %v12442_v35 = vld [vmem:[#allocation2 + $0xac0] sm:$0xf] }
 0x7cd   :  { %4595 = vmatpush.bf16.msrb.mxu3 %v12007_v9  ;;  %v11975_v9 = vor.u32 %v14733_v38, %v11972_v44  ;;  %v12459_v45 = vor.u32 %v14858_v43, %v12458_v32  ;;  %v14786_v38 = vld [vmem:[#allocation2 + $0x8ac] sm:$0xf0]  ;;  %v12298_v44 = vld [vmem:[#allocation2 + $0x9a0] sm:$0xf] }
 0x7ce   :  { %4554 = vmatpush.bf16.msrb.mxu0 %v11607_v17  ;;  %v14790_v17 = vld [vmem:[#allocation2 + $0x8cc] sm:$0xf0]  ;;  %v12171_v32 = vor.u32 %v14786_v38, %v12170_v23  ;;  %v12154_v43 = vld [vmem:[#allocation2 + $0x880] sm:$0xf] }
 0x7cf   :  { %4568 = vmatpush.bf16.msra.mxu1 %v11735_v28  ;;  %v14854_v28 = vld [vmem:[#allocation2 + $0xacc] sm:$0xf0]  ;;  %v12187_v13 = vor.u32 %v14790_v17, %v12186_v54  ;;  %v12282_v63 = vld [vmem:[#allocation2 + $0x980] sm:$0xf]  ;;  %v12155_v54 = vor.u32 %v14782_v12, %v12154_v43 }
 0x7d0   :  { %4582 = vmatpush.bf16.msra.mxu2 %v11863_v58  ;;  %v12570_v58 = vld [vmem:[#allocation2 + $0xbc0] sm:$0xf]  ;;  %v14882_v8 = vld [vmem:[#allocation2 + $0xbac] sm:$0xf0] }
 0x7d1   :  { %4596 = vmatpush.bf16.msrb.mxu3 %v11991_v41  ;;  %v12443_v41 = vor.u32 %v14854_v28, %v12442_v35  ;;  %v12571_v22 = vor.u32 %v14886_v34, %v12570_v58  ;;  %v14778_v60 = vld [vmem:[#allocation2 + $0x86c] sm:$0xf0]  ;;  %v12266_v35 = vld [vmem:[#allocation2 + $0x960] sm:$0xf] }
 0x7d2   :  { %4555 = vmatpush.bf16.msrb.mxu0 %v11591_v52  ;;  %v12554_v52 = vld [vmem:[#allocation2 + $0xba0] sm:$0xf]  ;;  %v3541_v17 = vpop.f32.mrf.mxu0  ;;  %v14810_v34 = vld [vmem:[#allocation2 + $0x96c] sm:$0xf0] }
 0x7d3   :  { %4569 = vmatpush.bf16.msra.mxu1 %v11719_v33  ;;  %v12299_v33 = vor.u32 %v14818_v42, %v12298_v44  ;;  %v3555_v58 = vpop.f32.mrf.mxu1  ;;  %v14874_v23 = vld [vmem:[#allocation2 + $0xb6c] sm:$0xf0] }
 0x7d4   :  { %4583 = vmatpush.bf16.msra.mxu2 %v11847_v47  ;;  %v12427_v47 = vor.u32 %v14850_v18, %v12426_v11  ;;  %v12122_v11 = vld [vmem:[#allocation2 + $0x840] sm:$0xf]  ;;  %v14774_v18 = vld [vmem:[#allocation2 + $0x84c] sm:$0xf0] }
 0x7d5   :  { %4597 = vmatpush.bf16.msrb.mxu3 %v11975_v9  ;;  %4556 = vmatmul.bf16.vlgmr.msrb.gmra.mxu0 %v16695_v36  ;;  %v2719_v9 = vperm.slane %v16710_v31, 3  ;;  %v14846_v36 = vld [vmem:[#allocation2 + $0xa8c] sm:$0xf0] }
 0x7d6   :  { %5396 = vmatpush.bf16.msra.mxu0 %v12203_v0  ;;  %4570 = vmatmul.bf16.vlgmr.msra.gmra.mxu1 %v16707_v51  ;;  %v14814_v0 = vld [vmem:[#allocation2 + $0x98c] sm:$0xf0] }
 0x7d7   :  { %5410 = vmatpush.bf16.msrb.mxu1 %v12331_v1  ;;  %4584 = vmatmul.bf16.vlgmr.msra.gmra.mxu2 %v16689_v27  ;;  %v12555_v27 = vor.u32 %v14882_v8, %v12554_v52  ;;  %v12410_v1 = vld [vmem:[#allocation2 + $0xa80] sm:$0xf]  ;;  %v12283_v51 = vor.u32 %v14814_v0, %v12282_v63  ;;  %v3542_v28 = vadd.f32 %v3541_v17, %v2719_v9  ;;  %v14806_v43 = vld [vmem:[#allocation2 + $0x94c] sm:$0xf0] }
 0x7d8   :  { %5424 = vmatpush.bf16.msrb.mxu2 %v12459_v45  ;;  %4598 = vmatmul.bf16.vlgmr.msrb.gmra.mxu3 %v16701_v2  ;;  %v12538_v45 = vld [vmem:[#allocation2 + $0xb80] sm:$0xf]  ;;  %v14878_v2 = vld [vmem:[#allocation2 + $0xb8c] sm:$0xf0]  ;;  %v12411_v10 = vor.u32 %v14846_v36, %v12410_v1  ;;  %v12123_v1 = vor.u32 %v14774_v18, %v12122_v11 }
 0x7d9   :  { %5438 = vmatpush.bf16.msra.mxu3 %v12587_v15  ;;  %v12138_v15 = vld [vmem:[#allocation2 + $0x860] sm:$0xf]  ;;  %v12539_v31 = vor.u32 %v14878_v2, %v12538_v45  ;;  %v3556_v38 = vadd.f32 %v3555_v58, %v3542_v28  ;;  %v14870_v0 = vld [vmem:[#allocation2 + $0xb4c] sm:$0xf0] }
 0x7da   :  { %5397 = vmatpush.bf16.msra.mxu0 %v12187_v13  ;;  %v12394_v13 = vld [vmem:[#allocation2 + $0xa60] sm:$0xf]  ;;  %v12139_v44 = vor.u32 %v14778_v60, %v12138_v15  ;;  %v3569_v8 = vpop.f32.mrf.mxu2  ;;  %v3543_v2 = vpop.f32.mrf.mxu0  ;;  %v14802_v15 = vld [vmem:[#allocation2 + $0x92c] sm:$0xf0] }
 0x7db   :  { %5411 = vmatpush.bf16.msrb.mxu1 %v12315_v49  ;;  %v14842_v49 = vld [vmem:[#allocation2 + $0xa6c] sm:$0xf0]  ;;  %v12250_v52 = vld [vmem:[#allocation2 + $0x940] sm:$0xf]  ;;  %v3570_v12 = vadd.f32 %v3569_v8, %v3556_v38  ;;  %v3583_v63 = vpop.f32.mrf.mxu3  ;;  %v3544_v60 = vadd.f32 %v3543_v2, %v2719_v9  ;;  %v14856_v2 = vld [vmem:[#allocation2 + $0xae4] sm:$0xf] }
 0x7dc   :  { %5425 = vmatpush.bf16.msrb.mxu2 %v12443_v41  ;;  %v12522_v41 = vld [vmem:[#allocation2 + $0xb60] sm:$0xf]  ;;  %v12395_v42 = vor.u32 %v14842_v49, %v12394_v13  ;;  %v14866_v49 = vld [vmem:[#allocation2 + $0xb2c] sm:$0xf0] }
 0x7dd   :  { %5439 = vmatpush.bf16.msra.mxu3 %v12571_v22  ;;  %v12267_v22 = vor.u32 %v14810_v34, %v12266_v35  ;;  %v12106_v36 = vld [vmem:[#allocation2 + $0x820] sm:$0xf]  ;;  %v16749_v45 = vadd.f32 %v3583_v63, %v3570_v12  ;;  %v3557_v35 = vpop.f32.mrf.mxu1  ;;  %v14798_v9 = vld [vmem:[#allocation2 + $0x90c] sm:$0xf0]  ;;  %v14792_v63 = vld [vmem:[#allocation2 + $0x8e4] sm:$0xf] }
 0x7de   :  { %5398 = vmatpush.bf16.msra.mxu0 %v12171_v32  ;;  %v12523_v32 = vor.u32 %v14874_v23, %v12522_v41  ;;  %v12362_v58 = vld [vmem:[#allocation2 + $0xa20] sm:$0xf]  ;;  %v3558_v41 = vadd.f32 %v3557_v35, %v3544_v60  ;;  %v12588_v60 = vld [vmem:[#allocation2 + $0xbf0] sm:$0xf0] }
 0x7df   :  { %5412 = vmatpush.bf16.msrb.mxu1 %v12299_v33  ;;  %v12378_v33 = vld [vmem:[#allocation2 + $0xa40] sm:$0xf] }
 0x7e0   :  { %5426 = vmatpush.bf16.msrb.mxu2 %v12427_v47  ;;  %v14838_v47 = vld [vmem:[#allocation2 + $0xa4c] sm:$0xf0]  ;;  %v12490_v13 = vld [vmem:[#allocation2 + $0xb20] sm:$0xf] }
 0x7e1   :  { %5440 = vmatpush.bf16.msra.mxu3 %v12555_v27  ;;  %v12506_v27 = vld [vmem:[#allocation2 + $0xb40] sm:$0xf]  ;;  %v12379_v17 = vor.u32 %v14838_v47, %v12378_v33  ;;  %v12491_v8 = vor.u32 %v14866_v49, %v12490_v13  ;;  %v14862_v33 = vld [vmem:[#allocation2 + $0xb0c] sm:$0xf0]  ;;  %v14788_v49 = vld [vmem:[#allocation2 + $0x8c4] sm:$0xf] }
 0x7e2   :  { %5399 = vmatpush.bf16.msra.mxu0 %v12155_v54  ;;  %v12251_v54 = vor.u32 %v14806_v43, %v12250_v52  ;;  %v12507_v28 = vor.u32 %v14870_v0, %v12506_v27  ;;  %v12090_v38 = vld [vmem:[#allocation2 + $0x800] sm:$0xf]  ;;  %v3571_v52 = vpop.f32.mrf.mxu2  ;;  %v12204_v27 = vld [vmem:[#allocation2 + $0x8f0] sm:$0xf0]  ;;  %v14824_v0 = vld [vmem:[#allocation2 + $0x9e4] sm:$0xf] }
 0x7e3   :  { %5413 = vmatpush.bf16.msrb.mxu1 %v12283_v51  ;;  %v14770_v51 = vld [vmem:[#allocation2 + $0x82c] sm:$0xf0]  ;;  %v12218_v11 = vld [vmem:[#allocation2 + $0x900] sm:$0xf]  ;;  %v3572_v47 = vadd.f32 %v3571_v52, %v3558_v41  ;;  %v3585_v12 = vpop.f32.mrf.mxu3  ;;  %v12188_v41 = vld [vmem:[#allocation2 + $0x8d0] sm:$0xf0] }
 0x7e4   :  { %5427 = vmatpush.bf16.msrb.mxu2 %v12411_v10  ;;  %v12234_v10 = vld [vmem:[#allocation2 + $0x920] sm:$0xf]  ;;  %v12107_v23 = vor.u32 %v14770_v51, %v12106_v36  ;;  %v12332_v36 = vld [vmem:[#allocation2 + $0x9f0] sm:$0xf0]  ;;  %v12219_v51 = vor.u32 %v14798_v9, %v12218_v11  ;;  %v14852_v52 = vld [vmem:[#allocation2 + $0xac4] sm:$0xf] }
 0x7e5   :  { %5441 = vmatpush.bf16.msra.mxu3 %v12539_v31  ;;  %v14834_v31 = vld [vmem:[#allocation2 + $0xa2c] sm:$0xf0]  ;;  %v12346_v18 = vld [vmem:[#allocation2 + $0xa00] sm:$0xf]  ;;  %v17960_v11 = vmax.f32 %v16615_v29, 0.0 }
 0x7e6   :  { %5400 = vmatpush.bf16.msra.mxu0 %v12139_v44  ;;  %v14766_v44 = vld [vmem:[#allocation2 + $0x80c] sm:$0xf0]  ;;  %v12474_v43 = vld [vmem:[#allocation2 + $0xb00] sm:$0xf]  ;;  %v14784_v29 = vld [vmem:[#allocation2 + $0x8a4] sm:$0xf] }
 0x7e7   :  { %5414 = vmatpush.bf16.msrb.mxu1 %v12267_v22  ;;  %v12235_v22 = vor.u32 %v14802_v15, %v12234_v10  ;;  %v14888_v15 = vld [vmem:[#allocation2 + $0xbe4] sm:$0xf]  ;;  %v12475_v35 = vor.u32 %v14862_v33, %v12474_v43  ;;  %v17962_v43 = vmax.f32 %v16607_v40, 0.0 }
 0x7e8   :  { %5428 = vmatpush.bf16.msrb.mxu2 %v12395_v42  ;;  %v12363_v42 = vor.u32 %v14834_v31, %v12362_v58  ;;  %v12335_v31 = vor.u32 %v14824_v0, %v12332_v36  ;;  %v17966_v0 = vmax.f32 %v16609_v14, 0.0  ;;  %v12172_v36 = vld [vmem:[#allocation2 + $0x8b0] sm:$0xf0] }
 0x7e9   :  { %5442 = vmatpush.bf16.msra.mxu3 %v12523_v32  ;;  %v14830_v32 = vld [vmem:[#allocation2 + $0xa0c] sm:$0xf0]  ;;  %v12175_v14 = vor.u32 %v14784_v29, %v12172_v36  ;;  %v12524_v36 = vld [vmem:[#allocation2 + $0xb70] sm:$0xf0] }
 0x7ea   :  { %5401 = vmatpush.bf16.msra.mxu0 %v12123_v1  ;;  %v12091_v1 = vor.u32 %v14766_v44, %v12090_v38  ;;  %v12347_v10 = vor.u32 %v14830_v32, %v12346_v18  ;;  %v12591_v38 = vor.u32 %v14888_v15, %v12588_v60  ;;  %v12316_v44 = vld [vmem:[#allocation2 + $0x9d0] sm:$0xf0]  ;;  %v14884_v18 = vld [vmem:[#allocation2 + $0xbc4] sm:$0xf]  ;;  %v17961_v32 = vmax.f32 %v16597_v55, 0.0 }
 0x7eb   :  { %5415 = vmatpush.bf16.msrb.mxu1 %v12251_v54  ;;  %v12460_v54 = vld [vmem:[#allocation2 + $0xaf0] sm:$0xf0]  ;;  %v14780_v60 = vld [vmem:[#allocation2 + $0x884] sm:$0xf] }
 0x7ec   :  { %5429 = vmatpush.bf16.msrb.mxu2 %v12379_v17  ;;  %v16752_v17 = vadd.f32 %v3585_v12, %v3572_v47  ;;  %v12463_v13 = vor.u32 %v14856_v2, %v12460_v54  ;;  %v16765_v33 = vpack.c.bf16 %v17962_v43, %v17961_v32  ;;  %v17963_v47 = vmax.f32 %v16605_v4, 0.0  ;;  %v14816_v4 = vld [vmem:[#allocation2 + $0x9a4] sm:$0xf]  ;;  %v12300_v2 = vld [vmem:[#allocation2 + $0x9b0] sm:$0xf0] }
 0x7ed   :  { %5443 = vmatpush.bf16.msra.mxu3 %v12507_v28  ;;  %v12207_v28 = vor.u32 %v14792_v63, %v12204_v27  ;;  %v17964_v12 = vmax.f32 %v16617_v30, 0.0  ;;  %v17965_v27 = vmax.f32 %v16599_v56, 0.0  ;;  %v14848_v54 = vld [vmem:[#allocation2 + $0xaa4] sm:$0xf]  ;;  %v12556_v15 = vld [vmem:[#allocation2 + $0xbb0] sm:$0xf0] }
 0x7ee   :  { %5402 = vmatpush.bf16.msra.mxu0 %v12107_v23  ;;  %v14820_v23 = vld [vmem:[#allocation2 + $0x9c4] sm:$0xf]  ;;  %v12140_v43 = vld [vmem:[#allocation2 + $0x870] sm:$0xf0] }
 0x7ef   :  { %5416 = vmatpush.bf16.msrb.mxu1 %v12235_v22  ;;  %v12444_v22 = vld [vmem:[#allocation2 + $0xad0] sm:$0xf0]  ;;  %v16771_v63 = vpack.c.bf16 %v17964_v12, %v17963_v47  ;;  %v12319_v55 = vor.u32 %v14820_v23, %v12316_v44  ;;  %v14880_v56 = vld [vmem:[#allocation2 + $0xba4] sm:$0xf] }
 0x7f0   :  { %5430 = vmatpush.bf16.msrb.mxu2 %v12363_v42  ;;  %v17959_v42 = vmax.f32 %v16603_v3, 0.0  ;;  %v12191_v3 = vor.u32 %v14788_v49, %v12188_v41  ;;  %v12447_v40 = vor.u32 %v14852_v52, %v12444_v22  ;;  %v12559_v41 = vor.u32 %v14880_v56, %v12556_v15  ;;  %v12284_v23 = vld [vmem:[#allocation2 + $0x990] sm:$0xf0]  ;;  %v14876_v52 = vld [vmem:[#allocation2 + $0xb84] sm:$0xf] }
 0x7f1   :  { %5444 = vmatpush.bf16.msra.mxu3 %v12491_v8  ;;  %v12572_v8 = vld [vmem:[#allocation2 + $0xbd0] sm:$0xf0]  ;;  %v14776_v32 = vld [vmem:[#allocation2 + $0x864] sm:$0xf] }
 0x7f2   :  { %5403 = vmatpush.bf16.msra.mxu0 %v12091_v1  ;;  %v16759_v9 = vpack.c.bf16 %v17960_v11, %v17959_v42  ;;  %v16777_v1 = vpack.c.bf16 %v17966_v0, %v17965_v27  ;;  %v12575_v30 = vor.u32 %v14884_v18, %v12572_v8  ;;  %v12412_v44 = vld [vmem:[#allocation2 + $0xa90] sm:$0xf0]  ;;  %v4389_v11 = vpop.f32.mrf.mxu0  ;;  %v14808_v47 = vld [vmem:[#allocation2 + $0x964] sm:$0xf] }
 0x7f3   :  { %5417 = vmatpush.bf16.msrb.mxu1 %v12219_v51  ;;  %v12428_v51 = vld [vmem:[#allocation2 + $0xab0] sm:$0xf0]  ;;  %v14840_v0 = vld [vmem:[#allocation2 + $0xa64] sm:$0xf] }
 0x7f4   :  { %5431 = vmatpush.bf16.msrb.mxu2 %v12347_v10  ;;  %v16780_v10 = vld [vmem:[#allocation34 + $0x4] sm:$0xf]  ;;  %v12540_v22 = vld [vmem:[#allocation2 + $0xb90] sm:$0xf0] }
 0x7f5   :  { %5445 = vmatpush.bf16.msra.mxu3 %v12475_v35  ;;  %5404 = vmatmul.bf16.vlgmr.msra.gmra.mxu0 %v16765_v33  ;;  %v12303_v35 = vor.u32 %v14816_v4, %v12300_v2  ;;  %v3732_v49 = vperm.slane %v16780_v10, 0  ;;  %v12543_v29 = vor.u32 %v14876_v52, %v12540_v22  ;;  %v12268_v27 = vld [vmem:[#allocation2 + $0x970] sm:$0xf0]  ;;  %v12143_v2 = vor.u32 %v14776_v32, %v12140_v43  ;;  %v14804_v15 = vld [vmem:[#allocation2 + $0x944] sm:$0xf] }
 0x7f6   :  { %5452 = vmatpush.bf16.msrb.mxu0 %v12207_v28  ;;  %5418 = vmatmul.bf16.vlgmr.msrb.gmra.mxu1 %v16777_v1  ;;  %v12431_v28 = vor.u32 %v14848_v54, %v12428_v51  ;;  %v14772_v51 = vld [vmem:[#allocation2 + $0x844] sm:$0xf]  ;;  %v12124_v56 = vld [vmem:[#allocation2 + $0x850] sm:$0xf0] }
 0x7f7   :  { %5466 = vmatpush.bf16.msra.mxu1 %v12335_v31  ;;  %5432 = vmatmul.bf16.vlgmr.msrb.gmra.mxu2 %v16759_v9  ;;  %v12156_v31 = vld [vmem:[#allocation2 + $0x890] sm:$0xf0]  ;;  %v4390_v12 = vadd.f32 %v4389_v11, %v3732_v49  ;;  %v14768_v52 = vld [vmem:[#allocation2 + $0x824] sm:$0xf] }
 0x7f8   :  { %5480 = vmatpush.bf16.msra.mxu2 %v12463_v13  ;;  %5446 = vmatmul.bf16.vlgmr.msra.gmra.mxu3 %v16771_v63  ;;  %v14812_v13 = vld [vmem:[#allocation2 + $0x984] sm:$0xf]  ;;  %v12159_v42 = vor.u32 %v14780_v60, %v12156_v31  ;;  %v12380_v31 = vld [vmem:[#allocation2 + $0xa50] sm:$0xf0] }
 0x7f9   :  { %5494 = vmatpush.bf16.msrb.mxu3 %v12591_v38  ;;  %v14844_v38 = vld [vmem:[#allocation2 + $0xa84] sm:$0xf]  ;;  %v12287_v18 = vor.u32 %v14812_v13, %v12284_v23  ;;  %v12236_v43 = vld [vmem:[#allocation2 + $0x930] sm:$0xf0] }
 0x7fa   :  { %5453 = vmatpush.bf16.msrb.mxu0 %v12191_v3  ;;  %v12415_v8 = vor.u32 %v14844_v38, %v12412_v44  ;;  %v4403_v3 = vpop.f32.mrf.mxu1  ;;  %v14868_v23 = vld [vmem:[#allocation2 + $0xb44] sm:$0xf]  ;;  %v12508_v38 = vld [vmem:[#allocation2 + $0xb50] sm:$0xf0]  ;;  %v12127_v44 = vor.u32 %v14772_v51, %v12124_v56 }
 0x7fb   :  { %5467 = vmatpush.bf16.msra.mxu1 %v12319_v55  ;;  %v12396_v55 = vld [vmem:[#allocation2 + $0xa70] sm:$0xf0]  ;;  %v4404_v4 = vadd.f32 %v4403_v3, %v4390_v12  ;;  %v14800_v32 = vld [vmem:[#allocation2 + $0x924] sm:$0xf]  ;;  %v12511_v3 = vor.u32 %v14868_v23, %v12508_v38  ;;  %v12210_v23 = vld [vmem:[#allocation2 + $0x8e8] sm:$0xf] }
 0x7fc   :  { %5481 = vmatpush.bf16.msra.mxu2 %v12447_v40  ;;  %v14872_v40 = vld [vmem:[#allocation2 + $0xb64] sm:$0xf]  ;;  %v12399_v54 = vor.u32 %v14840_v0, %v12396_v55  ;;  %v14795_v38 = vld [vmem:[#allocation2 + $0x8f4] sm:$0xf0] }
 0x7fd   :  { %5495 = vmatpush.bf16.msrb.mxu3 %v12575_v30  ;;  %v12271_v30 = vor.u32 %v14808_v47, %v12268_v27  ;;  %v12527_v60 = vor.u32 %v14872_v40, %v12524_v36  ;;  %v12364_v27 = vld [vmem:[#allocation2 + $0xa30] sm:$0xf0]  ;;  %v14864_v55 = vld [vmem:[#allocation2 + $0xb24] sm:$0xf] }
 0x7fe   :  { %5454 = vmatpush.bf16.msrb.mxu0 %v12175_v14  ;;  %v4417_v14 = vpop.f32.mrf.mxu2  ;;  %v12492_v40 = vld [vmem:[#allocation2 + $0xb30] sm:$0xf0]  ;;  %v14796_v56 = vld [vmem:[#allocation2 + $0x904] sm:$0xf] }
 0x7ff   :  { %5468 = vmatpush.bf16.msra.mxu1 %v12303_v35  ;;  %v12252_v35 = vld [vmem:[#allocation2 + $0x950] sm:$0xf0]  ;;  %v4418_v13 = vadd.f32 %v4417_v14, %v4404_v4 }
 0x800   :  { %5482 = vmatpush.bf16.msra.mxu2 %v12431_v28  ;;  %v14836_v28 = vld [vmem:[#allocation2 + $0xa44] sm:$0xf]  ;;  %v12255_v11 = vor.u32 %v14804_v15, %v12252_v35  ;;  %v12348_v35 = vld [vmem:[#allocation2 + $0xa10] sm:$0xf0] }
 0x801   :  { %5496 = vmatpush.bf16.msrb.mxu3 %v12559_v41  ;;  %v4431_v41 = vpop.f32.mrf.mxu3  ;;  %v14828_v15 = vld [vmem:[#allocation2 + $0xa04] sm:$0xf] }
 0x802   :  { %5455 = vmatpush.bf16.msrb.mxu0 %v12159_v42  ;;  %v16786_v22 = vadd.f32 %v4431_v41, %v4418_v13  ;;  %v4391_v42 = vpop.f32.mrf.mxu0  ;;  %v4405_v12 = vpop.f32.mrf.mxu1 }
 0x803   :  { %5469 = vmatpush.bf16.msra.mxu1 %v12287_v18  ;;  %v12383_v18 = vor.u32 %v14836_v28, %v12380_v31  ;;  %v4392_v47 = vadd.f32 %v4391_v42, %v3732_v49  ;;  %v12220_v49 = vld [vmem:[#allocation2 + $0x910] sm:$0xf0]  ;;  %v14860_v28 = vld [vmem:[#allocation2 + $0xb04] sm:$0xf]  ;;  %v14827_v42 = vld [vmem:[#allocation2 + $0x9f4] sm:$0xf0] }
 0x804   :  { %5483 = vmatpush.bf16.msra.mxu2 %v12415_v8  ;;  %v12108_v8 = vld [vmem:[#allocation2 + $0x830] sm:$0xf0] }
 0x805   :  { %5497 = vmatpush.bf16.msrb.mxu3 %v12543_v29  ;;  %v14832_v29 = vld [vmem:[#allocation2 + $0xa24] sm:$0xf]  ;;  %v4406_v36 = vadd.f32 %v4405_v12, %v4392_v47  ;;  %v12111_v4 = vor.u32 %v14768_v52, %v12108_v8  ;;  %v12476_v31 = vld [vmem:[#allocation2 + $0xb10] sm:$0xf0]  ;;  %v12594_v47 = vld [vmem:[#allocation2 + $0xbe8] sm:$0xf] }
 0x806   :  { %5456 = vmatpush.bf16.msrb.mxu0 %v12143_v2  ;;  %v14764_v2 = vld [vmem:[#allocation2 + $0x804] sm:$0xf]  ;;  %v12367_v51 = vor.u32 %v14832_v29, %v12364_v27  ;;  %v4419_v14 = vpop.f32.mrf.mxu2  ;;  %v14891_v12 = vld [vmem:[#allocation2 + $0xbf4] sm:$0xf0]  ;;  %v12211_v29 = vor.u32 %v14795_v38, %v12210_v23  ;;  %v12434_v38 = vld [vmem:[#allocation2 + $0xaa8] sm:$0xf] }
 0x807   :  { %5470 = vmatpush.bf16.msra.mxu1 %v12271_v30  ;;  %v12092_v30 = vld [vmem:[#allocation2 + $0x810] sm:$0xf0]  ;;  %v4420_v13 = vadd.f32 %v4419_v14, %v4406_v36  ;;  %v12194_v36 = vld [vmem:[#allocation2 + $0x8c8] sm:$0xf]  ;;  %v14823_v14 = vld [vmem:[#allocation2 + $0x9d4] sm:$0xf0] }
 0x808   :  { %5484 = vmatpush.bf16.msra.mxu2 %v12399_v54  ;;  %v12239_v54 = vor.u32 %v14800_v32, %v12236_v43  ;;  %v12095_v52 = vor.u32 %v14764_v2, %v12092_v30  ;;  %v12223_v32 = vor.u32 %v14796_v56, %v12220_v49  ;;  %v12351_v43 = vor.u32 %v14828_v15, %v12348_v35  ;;  %v12322_v2 = vld [vmem:[#allocation2 + $0x9c8] sm:$0xf]  ;;  %v14887_v56 = vld [vmem:[#allocation2 + $0xbd4] sm:$0xf0] }
 0x809   :  { %5498 = vmatpush.bf16.msrb.mxu3 %v12527_v60  ;;  %v12495_v60 = vor.u32 %v14864_v55, %v12492_v40  ;;  %v4433_v41 = vpop.f32.mrf.mxu3  ;;  %v12595_v30 = vor.u32 %v14891_v12, %v12594_v47  ;;  %v12323_v15 = vor.u32 %v14823_v14, %v12322_v2  ;;  %v12178_v35 = vld [vmem:[#allocation2 + $0x8a8] sm:$0xf]  ;;  %v14819_v23 = vld [vmem:[#allocation2 + $0x9b4] sm:$0xf0] }
 0x80a   :  { %5457 = vmatpush.bf16.msrb.mxu0 %v12127_v44  ;;  %v12338_v44 = vld [vmem:[#allocation2 + $0x9e8] sm:$0xf]  ;;  %v16789_v8 = vadd.f32 %v4433_v41, %v4420_v13  ;;  %v14783_v47 = vld [vmem:[#allocation2 + $0x894] sm:$0xf0] }
 0x80b   :  { %5471 = vmatpush.bf16.msra.mxu1 %v12255_v11  ;;  %v12466_v11 = vld [vmem:[#allocation2 + $0xae8] sm:$0xf]  ;;  %v12339_v55 = vor.u32 %v14827_v42, %v12338_v44  ;;  %v14851_v44 = vld [vmem:[#allocation2 + $0xab4] sm:$0xf0] }
 0x80c   :  { %5485 = vmatpush.bf16.msra.mxu2 %v12383_v18  ;;  %v14859_v18 = vld [vmem:[#allocation2 + $0xaf4] sm:$0xf0]  ;;  %v12450_v13 = vld [vmem:[#allocation2 + $0xac8] sm:$0xf] }
 0x80d   :  { %5499 = vmatpush.bf16.msrb.mxu3 %v12511_v3  ;;  %v12479_v3 = vor.u32 %v14860_v28, %v12476_v31  ;;  %v12467_v40 = vor.u32 %v14859_v18, %v12466_v11  ;;  %v14787_v28 = vld [vmem:[#allocation2 + $0x8b4] sm:$0xf0]  ;;  %v12306_v31 = vld [vmem:[#allocation2 + $0x9a8] sm:$0xf] }
 0x80e   :  { %5458 = vmatpush.bf16.msrb.mxu0 %v12111_v4  ;;  %v14791_v4 = vld [vmem:[#allocation2 + $0x8d4] sm:$0xf0]  ;;  %v12179_v11 = vor.u32 %v14787_v28, %v12178_v35  ;;  %v12162_v18 = vld [vmem:[#allocation2 + $0x888] sm:$0xf] }
 0x80f   :  { %5472 = vmatpush.bf16.msra.mxu1 %v12239_v54  ;;  %v14855_v54 = vld [vmem:[#allocation2 + $0xad4] sm:$0xf0]  ;;  %v12195_v49 = vor.u32 %v14791_v4, %v12194_v36  ;;  %v12290_v12 = vld [vmem:[#allocation2 + $0x988] sm:$0xf] }
 0x810   :  { %5486 = vmatpush.bf16.msra.mxu2 %v12367_v51  ;;  %v12578_v51 = vld [vmem:[#allocation2 + $0xbc8] sm:$0xf]  ;;  %v14883_v42 = vld [vmem:[#allocation2 + $0xbb4] sm:$0xf0] }
 0x811   :  { %5500 = vmatpush.bf16.msrb.mxu3 %v12495_v60  ;;  %v12451_v60 = vor.u32 %v14855_v54, %v12450_v13  ;;  %v12579_v41 = vor.u32 %v14887_v56, %v12578_v51  ;;  %v14847_v36 = vld [vmem:[#allocation2 + $0xa94] sm:$0xf0]  ;;  %v12546_v4 = vld [vmem:[#allocation2 + $0xb88] sm:$0xf] }
 0x812   :  { %5459 = vmatpush.bf16.msrb.mxu0 %v12095_v52  ;;  %v12562_v52 = vld [vmem:[#allocation2 + $0xba8] sm:$0xf]  ;;  %v14879_v2 = vld [vmem:[#allocation2 + $0xb94] sm:$0xf0]  ;;  %v4445_v14 = vpop.f32.mrf.mxu0 }
 0x813   :  { %5473 = vmatpush.bf16.msra.mxu1 %v12223_v32  ;;  %v12307_v32 = vor.u32 %v14819_v23, %v12306_v31  ;;  %v12146_v51 = vld [vmem:[#allocation2 + $0x868] sm:$0xf]  ;;  %v14779_v56 = vld [vmem:[#allocation2 + $0x874] sm:$0xf0]  ;;  %v12547_v35 = vor.u32 %v14879_v2, %v12546_v4 }
 0x814   :  { %5487 = vmatpush.bf16.msra.mxu2 %v12351_v43  ;;  %v12435_v43 = vor.u32 %v14851_v44, %v12434_v38  ;;  %v14811_v28 = vld [vmem:[#allocation2 + $0x974] sm:$0xf0]  ;;  %v12402_v31 = vld [vmem:[#allocation2 + $0xa68] sm:$0xf] }
 0x815   :  { %5501 = vmatpush.bf16.msrb.mxu3 %v12479_v3  ;;  %5460 = vmatmul.bf16.vlgmr.msrb.gmra.mxu0 %v16765_v33  ;;  %v3733_v3 = vperm.slane %v16780_v10, 1  ;;  %v12530_v23 = vld [vmem:[#allocation2 + $0xb68] sm:$0xf]  ;;  %v14875_v38 = vld [vmem:[#allocation2 + $0xb74] sm:$0xf0] }
 0x816   :  { %5508 = vmatpush.bf16.msra.mxu0 %v12211_v29  ;;  %5474 = vmatmul.bf16.vlgmr.msra.gmra.mxu1 %v16777_v1  ;;  %v12563_v29 = vor.u32 %v14883_v42, %v12562_v52  ;;  %v12147_v52 = vor.u32 %v14779_v56, %v12146_v51  ;;  %v12514_v2 = vld [vmem:[#allocation2 + $0xb48] sm:$0xf] }
 0x817   :  { %5522 = vmatpush.bf16.msrb.mxu1 %v12339_v55  ;;  %5488 = vmatmul.bf16.vlgmr.msra.gmra.mxu2 %v16759_v9  ;;  %v14815_v55 = vld [vmem:[#allocation2 + $0x994] sm:$0xf0]  ;;  %v12114_v51 = vld [vmem:[#allocation2 + $0x828] sm:$0xf] }
 0x818   :  { %5536 = vmatpush.bf16.msrb.mxu2 %v12467_v40  ;;  %5502 = vmatmul.bf16.vlgmr.msrb.gmra.mxu3 %v16771_v63  ;;  %v12418_v40 = vld [vmem:[#allocation2 + $0xa88] sm:$0xf]  ;;  %v12291_v13 = vor.u32 %v14815_v55, %v12290_v12  ;;  %v12531_v12 = vor.u32 %v14875_v38, %v12530_v23  ;;  %v14835_v38 = vld [vmem:[#allocation2 + $0xa34] sm:$0xf0] }
 0x819   :  { %5550 = vmatpush.bf16.msra.mxu3 %v12595_v30  ;;  %v12163_v30 = vor.u32 %v14783_v47, %v12162_v18  ;;  %v12419_v54 = vor.u32 %v14847_v36, %v12418_v40  ;;  %v12130_v18 = vld [vmem:[#allocation2 + $0x848] sm:$0xf]  ;;  %v14839_v40 = vld [vmem:[#allocation2 + $0xa54] sm:$0xf0] }
 0x81a   :  { %5509 = vmatpush.bf16.msra.mxu0 %v12195_v49  ;;  %v12274_v49 = vld [vmem:[#allocation2 + $0x968] sm:$0xf]  ;;  %v4473_v47 = vpop.f32.mrf.mxu2 }
 0x81b   :  { %5523 = vmatpush.bf16.msrb.mxu1 %v12323_v15  ;;  %v4446_v15 = vadd.f32 %v4445_v14, %v3733_v3  ;;  %v12275_v42 = vor.u32 %v14811_v28, %v12274_v49  ;;  %v12386_v55 = vld [vmem:[#allocation2 + $0xa48] sm:$0xf]  ;;  %v4487_v4 = vpop.f32.mrf.mxu3  ;;  %v14871_v14 = vld [vmem:[#allocation2 + $0xb54] sm:$0xf0] }
 0x81c   :  { %5537 = vmatpush.bf16.msrb.mxu2 %v12451_v60  ;;  %v4459_v60 = vpop.f32.mrf.mxu1  ;;  %v12387_v49 = vor.u32 %v14839_v40, %v12386_v55  ;;  %v12370_v23 = vld [vmem:[#allocation2 + $0xa28] sm:$0xf] }
 0x81d   :  { %5551 = vmatpush.bf16.msra.mxu3 %v12579_v41  ;;  %v14843_v41 = vld [vmem:[#allocation2 + $0xa74] sm:$0xf0]  ;;  %v4460_v44 = vadd.f32 %v4459_v60, %v4446_v15  ;;  %v12242_v60 = vld [vmem:[#allocation2 + $0x928] sm:$0xf] }
 0x81e   :  { %5510 = vmatpush.bf16.msra.mxu0 %v12179_v11  ;;  %v12403_v11 = vor.u32 %v14843_v41, %v12402_v31  ;;  %v14771_v15 = vld [vmem:[#allocation2 + $0x834] sm:$0xf0]  ;;  %v12515_v41 = vor.u32 %v14871_v14, %v12514_v2  ;;  %v12226_v55 = vld [vmem:[#allocation2 + $0x908] sm:$0xf] }
 0x81f   :  { %5524 = vmatpush.bf16.msrb.mxu1 %v12307_v32  ;;  %v14775_v32 = vld [vmem:[#allocation2 + $0x854] sm:$0xf0]  ;;  %v4474_v36 = vadd.f32 %v4473_v47, %v4460_v44  ;;  %v12115_v47 = vor.u32 %v14771_v15, %v12114_v51  ;;  %v12354_v40 = vld [vmem:[#allocation2 + $0xa08] sm:$0xf]  ;;  %v14825_v51 = vld [vmem:[#allocation2 + $0x9ec] sm:$0xf] }
 0x820   :  { %5538 = vmatpush.bf16.msrb.mxu2 %v12435_v43  ;;  %v12258_v43 = vld [vmem:[#allocation2 + $0x948] sm:$0xf]  ;;  %v14863_v14 = vld [vmem:[#allocation2 + $0xb14] sm:$0xf0] }
 0x821   :  { %5552 = vmatpush.bf16.msra.mxu3 %v12563_v29  ;;  %v14807_v29 = vld [vmem:[#allocation2 + $0x954] sm:$0xf0]  ;;  %v12482_v2 = vld [vmem:[#allocation2 + $0xb08] sm:$0xf] }
 0x822   :  { %5511 = vmatpush.bf16.msra.mxu0 %v12163_v30  ;;  %v12131_v30 = vor.u32 %v14775_v32, %v12130_v18  ;;  %v12259_v56 = vor.u32 %v14807_v29, %v12258_v43  ;;  %v14867_v18 = vld [vmem:[#allocation2 + $0xb34] sm:$0xf0]  ;;  %v12371_v29 = vor.u32 %v14835_v38, %v12370_v23  ;;  %v14889_v23 = vld [vmem:[#allocation2 + $0xbec] sm:$0xf]  ;;  %v12596_v38 = vld [vmem:[#allocation2 + $0xbf8] sm:$0xf0] }
 0x823   :  { %5525 = vmatpush.bf16.msrb.mxu1 %v12291_v13  ;;  %v16797_v13 = vadd.f32 %v4487_v4, %v4474_v36  ;;  %v14831_v4 = vld [vmem:[#allocation2 + $0xa14] sm:$0xf0]  ;;  %v4489_v44 = vpop.f32.mrf.mxu3  ;;  %v12599_v0 = vor.u32 %v14889_v23, %v12596_v38  ;;  %v14813_v23 = vld [vmem:[#allocation2 + $0x98c] sm:$0xf]  ;;  %v3734_v38 = vperm.slane %v16780_v10, 2 }
 0x824   :  { %5539 = vmatpush.bf16.msrb.mxu2 %v12419_v54  ;;  %v4447_v54 = vpop.f32.mrf.mxu0  ;;  %v4461_v31 = vpop.f32.mrf.mxu1 }
 0x825   :  { %5553 = vmatpush.bf16.msra.mxu3 %v12547_v35  ;;  %v14803_v35 = vld [vmem:[#allocation2 + $0x934] sm:$0xf0]  ;;  %v4448_v28 = vadd.f32 %v4447_v54, %v3733_v3 }
 0x826   :  { %5512 = vmatpush.bf16.msra.mxu0 %v12147_v52  ;;  %v12498_v52 = vld [vmem:[#allocation2 + $0xb28] sm:$0xf]  ;;  %v12243_v43 = vor.u32 %v14803_v35, %v12242_v60  ;;  %v14799_v3 = vld [vmem:[#allocation2 + $0x914] sm:$0xf0]  ;;  %v12468_v60 = vld [vmem:[#allocation2 + $0xaf8] sm:$0xf0] }
 0x827   :  { %5526 = vmatpush.bf16.msrb.mxu1 %v12275_v42  ;;  %v4462_v32 = vadd.f32 %v4461_v31, %v4448_v28  ;;  %v12098_v42 = vld [vmem:[#allocation2 + $0x808] sm:$0xf]  ;;  %v12499_v36 = vor.u32 %v14867_v18, %v12498_v52  ;;  %v14793_v28 = vld [vmem:[#allocation2 + $0x8ec] sm:$0xf]  ;;  %v12227_v31 = vor.u32 %v14799_v3, %v12226_v55  ;;  %v12483_v52 = vor.u32 %v14863_v14, %v12482_v2  ;;  %v12580_v55 = vld [vmem:[#allocation2 + $0xbd8] sm:$0xf0] }
 0x828   :  { %5540 = vmatpush.bf16.msrb.mxu2 %v12403_v11  ;;  %v14767_v11 = vld [vmem:[#allocation2 + $0x814] sm:$0xf0]  ;;  %v12180_v2 = vld [vmem:[#allocation2 + $0x8b8] sm:$0xf0]  ;;  %v14817_v14 = vld [vmem:[#allocation2 + $0x9ac] sm:$0xf] }
 0x829   :  { %5554 = vmatpush.bf16.msra.mxu3 %v12531_v12  ;;  %v4475_v12 = vpop.f32.mrf.mxu2  ;;  %v12099_v15 = vor.u32 %v14767_v11, %v12098_v42  ;;  %v12196_v42 = vld [vmem:[#allocation2 + $0x8d8] sm:$0xf0]  ;;  %v14821_v11 = vld [vmem:[#allocation2 + $0x9cc] sm:$0xf] }
 0x82a   :  { %5513 = vmatpush.bf16.msra.mxu0 %v12131_v30  ;;  %v4476_v54 = vadd.f32 %v4475_v12, %v4462_v32  ;;  %v12212_v30 = vld [vmem:[#allocation2 + $0x8f8] sm:$0xf0] }
 0x82b   :  { %5527 = vmatpush.bf16.msrb.mxu1 %v12259_v56  ;;  %v12340_v56 = vld [vmem:[#allocation2 + $0x9f8] sm:$0xf0]  ;;  %v12215_v18 = vor.u32 %v14793_v28, %v12212_v30 }
 0x82c   :  { %5541 = vmatpush.bf16.msrb.mxu2 %v12387_v49  ;;  %v14857_v49 = vld [vmem:[#allocation2 + $0xaec] sm:$0xf]  ;;  %v16800_v35 = vadd.f32 %v4489_v44, %v4476_v54  ;;  %v12343_v12 = vor.u32 %v14825_v51, %v12340_v56  ;;  %v12324_v44 = vld [vmem:[#allocation2 + $0x9d8] sm:$0xf0] }
 0x82d   :  { %5555 = vmatpush.bf16.msra.mxu3 %v12515_v41  ;;  %v12355_v41 = vor.u32 %v14831_v4, %v12354_v40  ;;  %v12471_v27 = vor.u32 %v14857_v49, %v12468_v60  ;;  %v14853_v54 = vld [vmem:[#allocation2 + $0xacc] sm:$0xf]  ;;  %v12327_v40 = vor.u32 %v14821_v11, %v12324_v44  ;;  %v12308_v30 = vld [vmem:[#allocation2 + $0x9b8] sm:$0xf0] }
 0x82e   :  { %5514 = vmatpush.bf16.msra.mxu0 %v12115_v47  ;;  %v14789_v47 = vld [vmem:[#allocation2 + $0x8cc] sm:$0xf]  ;;  %v12564_v49 = vld [vmem:[#allocation2 + $0xbb8] sm:$0xf0] }
 0x82f   :  { %5528 = vmatpush.bf16.msrb.mxu1 %v12243_v43  ;;  %v12452_v43 = vld [vmem:[#allocation2 + $0xad8] sm:$0xf0]  ;;  %v12199_v3 = vor.u32 %v14789_v47, %v12196_v42  ;;  %v14785_v4 = vld [vmem:[#allocation2 + $0x8ac] sm:$0xf] }
 0x830   :  { %5542 = vmatpush.bf16.msrb.mxu2 %v12371_v29  ;;  %v14885_v29 = vld [vmem:[#allocation2 + $0xbcc] sm:$0xf]  ;;  %v12420_v47 = vld [vmem:[#allocation2 + $0xa98] sm:$0xf0] }
 0x831   :  { %5556 = vmatpush.bf16.msra.mxu3 %v12499_v36  ;;  %v12455_v36 = vor.u32 %v14853_v54, %v12452_v43  ;;  %v12583_v28 = vor.u32 %v14885_v29, %v12580_v55  ;;  %v14849_v51 = vld [vmem:[#allocation2 + $0xaac] sm:$0xf]  ;;  %v12548_v11 = vld [vmem:[#allocation2 + $0xb98] sm:$0xf0] }
 0x832   :  { %5515 = vmatpush.bf16.msra.mxu0 %v12099_v15  ;;  %v12436_v15 = vld [vmem:[#allocation2 + $0xab8] sm:$0xf0]  ;;  %v14881_v56 = vld [vmem:[#allocation2 + $0xbac] sm:$0xf]  ;;  %v4501_v54 = vpop.f32.mrf.mxu0 }
 0x833   :  { %5529 = vmatpush.bf16.msrb.mxu1 %v12227_v31  ;;  %v14781_v60 = vld [vmem:[#allocation2 + $0x88c] sm:$0xf]  ;;  %v12439_v31 = vor.u32 %v14849_v51, %v12436_v15  ;;  %v12532_v15 = vld [vmem:[#allocation2 + $0xb78] sm:$0xf0] }
 0x834   :  { %5543 = vmatpush.bf16.msrb.mxu2 %v12355_v41  ;;  %v12164_v41 = vld [vmem:[#allocation2 + $0x898] sm:$0xf0]  ;;  %v14877_v42 = vld [vmem:[#allocation2 + $0xb8c] sm:$0xf] }
 0x835   :  { %5557 = vmatpush.bf16.msra.mxu3 %v12483_v52  ;;  %5516 = vmatmul.bf16.vlgmr.msra.gmra.mxu0 %v16765_v33  ;;  %v12567_v52 = vor.u32 %v14881_v56, %v12564_v49  ;;  %v12167_v44 = vor.u32 %v14781_v60, %v12164_v41  ;;  %v14777_v55 = vld [vmem:[#allocation2 + $0x86c] sm:$0xf]  ;;  %v12516_v32 = vld [vmem:[#allocation2 + $0xb58] sm:$0xf0] }
 0x836   :  { %5564 = vmatpush.bf16.msrb.mxu0 %v12215_v18  ;;  %5530 = vmatmul.bf16.vlgmr.msrb.gmra.mxu1 %v16777_v1  ;;  %v12292_v18 = vld [vmem:[#allocation2 + $0x998] sm:$0xf0]  ;;  %v14873_v51 = vld [vmem:[#allocation2 + $0xb6c] sm:$0xf] }
 0x837   :  { %5578 = vmatpush.bf16.msra.mxu1 %v12343_v12  ;;  %5544 = vmatmul.bf16.vlgmr.msrb.gmra.mxu2 %v16759_v9  ;;  %v14845_v12 = vld [vmem:[#allocation2 + $0xa8c] sm:$0xf]  ;;  %v12295_v43 = vor.u32 %v14813_v23, %v12292_v18  ;;  %v12535_v18 = vor.u32 %v14873_v51, %v12532_v15  ;;  %v12372_v15 = vld [vmem:[#allocation2 + $0xa38] sm:$0xf0] }
 0x838   :  { %5592 = vmatpush.bf16.msra.mxu2 %v12471_v27  ;;  %5558 = vmatmul.bf16.vlgmr.msra.gmra.mxu3 %v16771_v63  ;;  %v12183_v27 = vor.u32 %v14785_v4, %v12180_v2  ;;  %v12423_v29 = vor.u32 %v14845_v12, %v12420_v47  ;;  %v4515_v4 = vpop.f32.mrf.mxu1  ;;  %v12551_v2 = vor.u32 %v14877_v42, %v12548_v11  ;;  %v14805_v41 = vld [vmem:[#allocation2 + $0x94c] sm:$0xf]  ;;  %v12388_v47 = vld [vmem:[#allocation2 + $0xa58] sm:$0xf0] }
 0x839   :  { %5606 = vmatpush.bf16.msrb.mxu3 %v12599_v0  ;;  %v12311_v0 = vor.u32 %v14817_v14, %v12308_v30  ;;  %v12276_v14 = vld [vmem:[#allocation2 + $0x978] sm:$0xf0]  ;;  %v14837_v12 = vld [vmem:[#allocation2 + $0xa4c] sm:$0xf] }
 0x83a   :  { %5565 = vmatpush.bf16.msrb.mxu0 %v12199_v3  ;;  %v12148_v3 = vld [vmem:[#allocation2 + $0x878] sm:$0xf0]  ;;  %v4529_v23 = vpop.f32.mrf.mxu2  ;;  %v14833_v51 = vld [vmem:[#allocation2 + $0xa2c] sm:$0xf] }
 0x83b   :  { %5579 = vmatpush.bf16.msra.mxu1 %v12327_v40  ;;  %v14809_v40 = vld [vmem:[#allocation2 + $0x96c] sm:$0xf]  ;;  %v12404_v30 = vld [vmem:[#allocation2 + $0xa78] sm:$0xf0]  ;;  %v12151_v49 = vor.u32 %v14777_v55, %v12148_v3  ;;  %v4543_v11 = vpop.f32.mrf.mxu3 }
 0x83c   :  { %5593 = vmatpush.bf16.msra.mxu2 %v12455_v36  ;;  %v4502_v36 = vadd.f32 %v4501_v54, %v3734_v38  ;;  %v14869_v54 = vld [vmem:[#allocation2 + $0xb4c] sm:$0xf] }
 0x83d   :  { %5607 = vmatpush.bf16.msrb.mxu3 %v12583_v28  ;;  %v14841_v28 = vld [vmem:[#allocation2 + $0xa6c] sm:$0xf] }
 0x83e   :  { %5566 = vmatpush.bf16.msrb.mxu0 %v12183_v27  ;;  %v4516_v56 = vadd.f32 %v4515_v4, %v4502_v36  ;;  %v12279_v27 = vor.u32 %v14809_v40, %v12276_v14  ;;  %v12407_v60 = vor.u32 %v14841_v28, %v12404_v30  ;;  %v14769_v55 = vld [vmem:[#allocation2 + $0x82c] sm:$0xf]  ;;  %v12391_v40 = vor.u32 %v14837_v12, %v12388_v47  ;;  %v12116_v36 = vld [vmem:[#allocation2 + $0x838] sm:$0xf0] }
 0x83f   :  { %5580 = vmatpush.bf16.msra.mxu1 %v12311_v0  ;;  %v14773_v0 = vld [vmem:[#allocation2 + $0x84c] sm:$0xf]  ;;  %v12519_v30 = vor.u32 %v14869_v54, %v12516_v32  ;;  %v12484_v54 = vld [vmem:[#allocation2 + $0xb18] sm:$0xf0] }
 0x840   :  { %5594 = vmatpush.bf16.msra.mxu2 %v12439_v31  ;;  %v12132_v31 = vld [vmem:[#allocation2 + $0x858] sm:$0xf0]  ;;  %v4530_v42 = vadd.f32 %v4529_v23, %v4516_v56  ;;  %v14801_v4 = vld [vmem:[#allocation2 + $0x92c] sm:$0xf]  ;;  %v4517_v28 = vpop.f32.mrf.mxu1  ;;  %v12119_v23 = vor.u32 %v14769_v55, %v12116_v36  ;;  %v12842_v55 = vld [vmem:[#allocation2 + $0xde0] sm:$0xf] }
 0x841   :  { %5608 = vmatpush.bf16.msrb.mxu3 %v12567_v52  ;;  %v12260_v52 = vld [vmem:[#allocation2 + $0x958] sm:$0xf0]  ;;  %v14797_v12 = vld [vmem:[#allocation2 + $0x90c] sm:$0xf] }
 0x842   :  { %5567 = vmatpush.bf16.msrb.mxu0 %v12167_v44  ;;  %v12135_v44 = vor.u32 %v14773_v0, %v12132_v31  ;;  %v12263_v3 = vor.u32 %v14805_v41, %v12260_v52  ;;  %v12500_v0 = vld [vmem:[#allocation2 + $0xb38] sm:$0xf0]  ;;  %v12375_v52 = vor.u32 %v14833_v51, %v12372_v15  ;;  %v14829_v47 = vld [vmem:[#allocation2 + $0xa0c] sm:$0xf]  ;;  %v13098_v51 = vld [vmem:[#allocation2 + $0xfe0] sm:$0xf] }
 0x843   :  { %5581 = vmatpush.bf16.msra.mxu1 %v12295_v43  ;;  %v16808_v43 = vadd.f32 %v4543_v11, %v4530_v42  ;;  %v12356_v42 = vld [vmem:[#allocation2 + $0xa18] sm:$0xf0]  ;;  %v14861_v11 = vld [vmem:[#allocation2 + $0xb0c] sm:$0xf]  ;;  %v4545_v56 = vpop.f32.mrf.mxu3  ;;  %v15018_v15 = vld [vmem:[#allocation2 + $0xfec] sm:$0xf0] }
 0x844   :  { %5595 = vmatpush.bf16.msra.mxu2 %v12423_v29  ;;  %v4503_v29 = vpop.f32.mrf.mxu0  ;;  %v13099_v34 = vor.u32 %v15018_v15, %v13098_v51  ;;  %v12794_v51 = vld [vmem:[#allocation2 + $0xd80] sm:$0xf]  ;;  %v3735_v15 = vperm.slane %v16780_v10, 3 }
 0x845   :  { %5609 = vmatpush.bf16.msrb.mxu3 %v12551_v2  ;;  %v12244_v2 = vld [vmem:[#allocation2 + $0x938] sm:$0xf0]  ;;  %v4504_v14 = vadd.f32 %v4503_v29, %v3734_v38 }
 0x846   :  { %5568 = vmatpush.bf16.msrb.mxu0 %v12151_v49  ;;  %v14865_v49 = vld [vmem:[#allocation2 + $0xb2c] sm:$0xf]  ;;  %v12247_v41 = vor.u32 %v14801_v4, %v12244_v2  ;;  %v12228_v38 = vld [vmem:[#allocation2 + $0x918] sm:$0xf0]  ;;  %v14986_v4 = vld [vmem:[#allocation2 + $0xeec] sm:$0xf0] }
 0x847   :  { %5582 = vmatpush.bf16.msra.mxu1 %v12279_v27  ;;  %v4518_v31 = vadd.f32 %v4517_v28, %v4504_v14  ;;  %v14765_v27 = vld [vmem:[#allocation2 + $0x80c] sm:$0xf]  ;;  %v12503_v32 = vor.u32 %v14865_v49, %v12500_v0  ;;  %v12714_v14 = vld [vmem:[#allocation2 + $0xce0] sm:$0xf]  ;;  %v12231_v28 = vor.u32 %v14797_v12, %v12228_v38  ;;  %v12487_v49 = vor.u32 %v14861_v11, %v12484_v54  ;;  %v15014_v12 = vld [vmem:[#allocation2 + $0xfcc] sm:$0xf0] }
 0x848   :  { %5596 = vmatpush.bf16.msra.mxu2 %v12407_v60  ;;  %v12100_v60 = vld [vmem:[#allocation2 + $0x818] sm:$0xf0]  ;;  %v14914_v11 = vld [vmem:[#allocation2 + $0xcac] sm:$0xf0]  ;;  %v12810_v54 = vld [vmem:[#allocation2 + $0xda0] sm:$0xf] }
 0x849   :  { %5610 = vmatpush.bf16.msrb.mxu3 %v12535_v18  ;;  %v4531_v18 = vpop.f32.mrf.mxu2  ;;  %v12103_v36 = vor.u32 %v14765_v27, %v12100_v60  ;;  %v14918_v27 = vld [vmem:[#allocation2 + $0xccc] sm:$0xf0]  ;;  %v12826_v60 = vld [vmem:[#allocation2 + $0xdc0] sm:$0xf] }
 0x84a   :  { %5569 = vmatpush.bf16.msrb.mxu0 %v12135_v44  ;;  %v4532_v29 = vadd.f32 %v4531_v18, %v4518_v31  ;;  %v14922_v44 = vld [vmem:[#allocation2 + $0xcec] sm:$0xf0] }
 0x84b   :  { %5583 = vmatpush.bf16.msra.mxu1 %v12263_v3  ;;  %v14954_v3 = vld [vmem:[#allocation2 + $0xdec] sm:$0xf0]  ;;  %v12715_v0 = vor.u32 %v14922_v44, %v12714_v14 }
 0x84c   :  { %5597 = vmatpush.bf16.msra.mxu2 %v12391_v40  ;;  %v12970_v40 = vld [vmem:[#allocation2 + $0xee0] sm:$0xf]  ;;  %v16811_v2 = vadd.f32 %v4545_v56, %v4532_v29  ;;  %v12843_v18 = vor.u32 %v14954_v3, %v12842_v55  ;;  %v14950_v56 = vld [vmem:[#allocation2 + $0xdcc] sm:$0xf0] }
 0x84d   :  { %5611 = vmatpush.bf16.msrb.mxu3 %v12519_v30  ;;  %v12359_v30 = vor.u32 %v14829_v47, %v12356_v42  ;;  %v12971_v58 = vor.u32 %v14986_v4, %v12970_v40  ;;  %v12954_v29 = vld [vmem:[#allocation2 + $0xec0] sm:$0xf]  ;;  %v12827_v47 = vor.u32 %v14950_v56, %v12826_v60  ;;  %v14946_v44 = vld [vmem:[#allocation2 + $0xdac] sm:$0xf0] }
 0x84e   :  { %5570 = vmatpush.bf16.msrb.mxu0 %v12119_v23  ;;  %v12698_v23 = vld [vmem:[#allocation2 + $0xcc0] sm:$0xf]  ;;  %v15010_v40 = vld [vmem:[#allocation2 + $0xfac] sm:$0xf0] }
 0x84f   :  { %5584 = vmatpush.bf16.msra.mxu1 %v12247_v41  ;;  %v14982_v41 = vld [vmem:[#allocation2 + $0xecc] sm:$0xf0]  ;;  %v12699_v38 = vor.u32 %v14918_v27, %v12698_v23  ;;  %v12682_v42 = vld [vmem:[#allocation2 + $0xca0] sm:$0xf] }
 0x850   :  { %5598 = vmatpush.bf16.msra.mxu2 %v12375_v52  ;;  %v13082_v52 = vld [vmem:[#allocation2 + $0xfc0] sm:$0xf] }
 0x851   :  { %5612 = vmatpush.bf16.msrb.mxu3 %v12503_v32  ;;  %v12955_v32 = vor.u32 %v14982_v41, %v12954_v29  ;;  %v13083_v14 = vor.u32 %v15014_v12, %v13082_v52  ;;  %v12938_v55 = vld [vmem:[#allocation2 + $0xea0] sm:$0xf]  ;;  %v14906_v29 = vld [vmem:[#allocation2 + $0xc6c] sm:$0xf0] }
 0x852   :  { %5571 = vmatpush.bf16.msrb.mxu0 %v12103_v36  ;;  %v14978_v36 = vld [vmem:[#allocation2 + $0xeac] sm:$0xf0]  ;;  %v13066_v3 = vld [vmem:[#allocation2 + $0xfa0] sm:$0xf]  ;;  %v4557_v27 = vpop.f32.mrf.mxu0 }
 0x853   :  { %5585 = vmatpush.bf16.msra.mxu1 %v12231_v28  ;;  %v12666_v4 = vld [vmem:[#allocation2 + $0xc80] sm:$0xf]  ;;  %v12939_v28 = vor.u32 %v14978_v36, %v12938_v55  ;;  %v4558_v52 = vadd.f32 %v4557_v27, %v3735_v15  ;;  %v4571_v12 = vpop.f32.mrf.mxu1 }
 0x854   :  { %5599 = vmatpush.bf16.msra.mxu2 %v12359_v30  ;;  %v14910_v30 = vld [vmem:[#allocation2 + $0xc8c] sm:$0xf0]  ;;  %v12650_v56 = vld [vmem:[#allocation2 + $0xc60] sm:$0xf] }
 0x855   :  { %5613 = vmatpush.bf16.msrb.mxu3 %v12487_v49  ;;  %5572 = vmatmul.bf16.vlgmr.msrb.gmra.mxu0 %v16765_v33  ;;  %v14942_v49 = vld [vmem:[#allocation2 + $0xd8c] sm:$0xf0]  ;;  %v12667_v23 = vor.u32 %v14910_v30, %v12666_v4  ;;  %v12778_v41 = vld [vmem:[#allocation2 + $0xd60] sm:$0xf] }
 0x856   :  { %6412 = vmatpush.bf16.msra.mxu0 %v12715_v0  ;;  %5586 = vmatmul.bf16.vlgmr.msra.gmra.mxu1 %v16777_v1  ;;  %v12922_v0 = vld [vmem:[#allocation2 + $0xe80] sm:$0xf]  ;;  %v14974_v33 = vld [vmem:[#allocation2 + $0xe8c] sm:$0xf0]  ;;  %v12795_v1 = vor.u32 %v14942_v49, %v12794_v51 }
 0x857   :  { %6426 = vmatpush.bf16.msrb.mxu1 %v12843_v18  ;;  %5600 = vmatmul.bf16.vlgmr.msra.gmra.mxu2 %v16759_v9  ;;  %v13067_v9 = vor.u32 %v15010_v40, %v13066_v3  ;;  %v13050_v18 = vld [vmem:[#allocation2 + $0xf80] sm:$0xf]  ;;  %v12923_v60 = vor.u32 %v14974_v33, %v12922_v0  ;;  %v14902_v3 = vld [vmem:[#allocation2 + $0xc4c] sm:$0xf0] }
 0x858   :  { %6440 = vmatpush.bf16.msrb.mxu2 %v12971_v58  ;;  %5614 = vmatmul.bf16.vlgmr.msrb.gmra.mxu3 %v16771_v63  ;;  %v12683_v58 = vor.u32 %v14914_v11, %v12682_v42  ;;  %v15006_v63 = vld [vmem:[#allocation2 + $0xf8c] sm:$0xf0]  ;;  %v13034_v42 = vld [vmem:[#allocation2 + $0xf60] sm:$0xf] }
 0x859   :  { %6454 = vmatpush.bf16.msra.mxu3 %v13099_v34  ;;  %v12811_v34 = vor.u32 %v14946_v44, %v12810_v54  ;;  %v13051_v10 = vor.u32 %v15006_v63, %v13050_v18  ;;  %v15002_v11 = vld [vmem:[#allocation2 + $0xf6c] sm:$0xf0]  ;;  %v4572_v54 = vadd.f32 %v4571_v12, %v4558_v52  ;;  %v12634_v36 = vld [vmem:[#allocation2 + $0xc40] sm:$0xf] }
 0x85a   :  { %6413 = vmatpush.bf16.msra.mxu0 %v12699_v38  ;;  %v14938_v38 = vld [vmem:[#allocation2 + $0xd6c] sm:$0xf0]  ;;  %v12762_v40 = vld [vmem:[#allocation2 + $0xd40] sm:$0xf]  ;;  %v13035_v4 = vor.u32 %v15002_v11, %v13034_v42  ;;  %v12635_v33 = vor.u32 %v14902_v3, %v12634_v36 }
 0x85b   :  { %6427 = vmatpush.bf16.msrb.mxu1 %v12827_v47  ;;  %v12906_v47 = vld [vmem:[#allocation2 + $0xe60] sm:$0xf]  ;;  %v12779_v44 = vor.u32 %v14938_v38, %v12778_v41  ;;  %v14966_v30 = vld [vmem:[#allocation2 + $0xe4c] sm:$0xf0]  ;;  %v4573_v52 = vpop.f32.mrf.mxu1 }
 0x85c   :  { %6441 = vmatpush.bf16.msrb.mxu2 %v12955_v32  ;;  %v14970_v32 = vld [vmem:[#allocation2 + $0xe6c] sm:$0xf0]  ;;  %v13018_v49 = vld [vmem:[#allocation2 + $0xf40] sm:$0xf] }
 0x85d   :  { %6455 = vmatpush.bf16.msra.mxu3 %v13083_v14  ;;  %v12651_v14 = vor.u32 %v14906_v29, %v12650_v56  ;;  %v12907_v55 = vor.u32 %v14970_v32, %v12906_v47  ;;  %v14998_v0 = vld [vmem:[#allocation2 + $0xf4c] sm:$0xf0]  ;;  %v12618_v18 = vld [vmem:[#allocation2 + $0xc20] sm:$0xf] }
 0x85e   :  { %6414 = vmatpush.bf16.msra.mxu0 %v12683_v58  ;;  %v4585_v58 = vpop.f32.mrf.mxu2  ;;  %v12746_v56 = vld [vmem:[#allocation2 + $0xd20] sm:$0xf]  ;;  %v14930_v29 = vld [vmem:[#allocation2 + $0xd2c] sm:$0xf0]  ;;  %v13019_v12 = vor.u32 %v14998_v0, %v13018_v49  ;;  %v14920_v49 = vld [vmem:[#allocation2 + $0xce4] sm:$0xf] }
 0x85f   :  { %6428 = vmatpush.bf16.msrb.mxu1 %v12811_v34  ;;  %v14934_v34 = vld [vmem:[#allocation2 + $0xd4c] sm:$0xf0]  ;;  %v4586_v51 = vadd.f32 %v4585_v58, %v4572_v54  ;;  %v13002_v32 = vld [vmem:[#allocation2 + $0xf20] sm:$0xf]  ;;  %v12716_v0 = vld [vmem:[#allocation2 + $0xcf0] sm:$0xf0] }
 0x860   :  { %6442 = vmatpush.bf16.msrb.mxu2 %v12939_v28  ;;  %v12890_v28 = vld [vmem:[#allocation2 + $0xe40] sm:$0xf]  ;;  %v12763_v27 = vor.u32 %v14934_v34, %v12762_v40  ;;  %v14962_v38 = vld [vmem:[#allocation2 + $0xe2c] sm:$0xf0] }
 0x861   :  { %6456 = vmatpush.bf16.msra.mxu3 %v13067_v9  ;;  %v4599_v9 = vpop.f32.mrf.mxu3  ;;  %v14994_v42 = vld [vmem:[#allocation2 + $0xf2c] sm:$0xf0]  ;;  %v12730_v3 = vld [vmem:[#allocation2 + $0xd00] sm:$0xf] }
 0x862   :  { %6415 = vmatpush.bf16.msra.mxu0 %v12667_v23  ;;  %v16819_v63 = vadd.f32 %v4599_v9, %v4586_v51  ;;  %v4559_v23 = vpop.f32.mrf.mxu0  ;;  %v12858_v40 = vld [vmem:[#allocation2 + $0xe00] sm:$0xf]  ;;  %v14958_v34 = vld [vmem:[#allocation2 + $0xe0c] sm:$0xf0] }
 0x863   :  { %6429 = vmatpush.bf16.msrb.mxu1 %v12795_v1  ;;  %v12891_v1 = vor.u32 %v14966_v30, %v12890_v28  ;;  %v4560_v41 = vadd.f32 %v4559_v23, %v3735_v15  ;;  %v14926_v15 = vld [vmem:[#allocation2 + $0xd0c] sm:$0xf0]  ;;  %v12986_v28 = vld [vmem:[#allocation2 + $0xf00] sm:$0xf]  ;;  %v12844_v23 = vld [vmem:[#allocation2 + $0xdf0] sm:$0xf0] }
 0x864   :  { %6443 = vmatpush.bf16.msrb.mxu2 %v12923_v60  ;;  %v14898_v60 = vld [vmem:[#allocation2 + $0xc2c] sm:$0xf0] }
 0x865   :  { %6457 = vmatpush.bf16.msra.mxu3 %v13051_v10  ;;  %v12874_v10 = vld [vmem:[#allocation2 + $0xe20] sm:$0xf]  ;;  %v4574_v11 = vadd.f32 %v4573_v52, %v4560_v41  ;;  %v12619_v54 = vor.u32 %v14898_v60, %v12618_v18  ;;  %v14990_v30 = vld [vmem:[#allocation2 + $0xf0c] sm:$0xf0]  ;;  %v15016_v41 = vld [vmem:[#allocation2 + $0xfe4] sm:$0xf] }
 0x866   :  { %6416 = vmatpush.bf16.msra.mxu0 %v12651_v14  ;;  %v12602_v14 = vld [vmem:[#allocation2 + $0xc00] sm:$0xf]  ;;  %v12875_v36 = vor.u32 %v14962_v38, %v12874_v10  ;;  %v4587_v58 = vpop.f32.mrf.mxu2  ;;  %v13100_v52 = vld [vmem:[#allocation2 + $0xff0] sm:$0xf0]  ;;  %v12719_v10 = vor.u32 %v14920_v49, %v12716_v0  ;;  %v17972_v49 = vmax.f32 %v16641_v5, 0.0 }
 0x867   :  { %6430 = vmatpush.bf16.msrb.mxu1 %v12779_v44  ;;  %v14894_v44 = vld [vmem:[#allocation2 + $0xc0c] sm:$0xf0]  ;;  %v4588_v51 = vadd.f32 %v4587_v58, %v4574_v11  ;;  %v14916_v11 = vld [vmem:[#allocation2 + $0xcc4] sm:$0xf]  ;;  %v12828_v58 = vld [vmem:[#allocation2 + $0xdd0] sm:$0xf0] }
 0x868   :  { %6444 = vmatpush.bf16.msrb.mxu2 %v12907_v55  ;;  %v12747_v55 = vor.u32 %v14930_v29, %v12746_v56  ;;  %v12603_v18 = vor.u32 %v14894_v44, %v12602_v14  ;;  %v12731_v56 = vor.u32 %v14926_v15, %v12730_v3  ;;  %v12859_v29 = vor.u32 %v14958_v34, %v12858_v40  ;;  %v14948_v14 = vld [vmem:[#allocation2 + $0xdc4] sm:$0xf] }
 0x869   :  { %6458 = vmatpush.bf16.msra.mxu3 %v13035_v4  ;;  %v13003_v4 = vor.u32 %v14994_v42, %v13002_v32  ;;  %v4601_v9 = vpop.f32.mrf.mxu3  ;;  %v13103_v44 = vor.u32 %v15016_v41, %v13100_v52  ;;  %v17968_v3 = vmax.f32 %v16639_v59, 0.0  ;;  %v15012_v40 = vld [vmem:[#allocation2 + $0xfc4] sm:$0xf]  ;;  %v17969_v34 = vmax.f32 %v16621_v48, 0.0  ;;  %v16850_v41 = vld [vmem:[#allocation34 + $0x8] sm:$0xf] }
 0x86a   :  { %6417 = vmatpush.bf16.msra.mxu0 %v12635_v33  ;;  %v14952_v33 = vld [vmem:[#allocation2 + $0xde4] sm:$0xf]  ;;  %v16822_v60 = vadd.f32 %v4601_v9, %v4588_v51  ;;  %v17971_v9 = vmax.f32 %v16629_v21, 0.0  ;;  %v13068_v52 = vld [vmem:[#allocation2 + $0xfb0] sm:$0xf0] }
 0x86b   :  { %6431 = vmatpush.bf16.msrb.mxu1 %v12763_v27  ;;  %v14984_v27 = vld [vmem:[#allocation2 + $0xee4] sm:$0xf]  ;;  %v12847_v32 = vor.u32 %v14952_v33, %v12844_v23  ;;  %v17973_v33 = vmax.f32 %v16623_v53, 0.0 }
 0x86c   :  { %6445 = vmatpush.bf16.msrb.mxu2 %v12891_v1  ;;  %v12972_v1 = vld [vmem:[#allocation2 + $0xef0] sm:$0xf0]  ;;  %v14980_v51 = vld [vmem:[#allocation2 + $0xec4] sm:$0xf]  ;;  %v16841_v0 = vpack.c.bf16 %v17972_v49, %v17971_v9 }
 0x86d   :  { %6459 = vmatpush.bf16.msra.mxu3 %v13019_v12  ;;  %v12987_v12 = vor.u32 %v14990_v30, %v12986_v28  ;;  %v12975_v42 = vor.u32 %v14984_v27, %v12972_v1  ;;  %v17970_v28 = vmax.f32 %v16631_v57, 0.0  ;;  %v14912_v59 = vld [vmem:[#allocation2 + $0xca4] sm:$0xf]  ;;  %v12831_v57 = vor.u32 %v14948_v14, %v12828_v58  ;;  %v12684_v27 = vld [vmem:[#allocation2 + $0xcb0] sm:$0xf0] }
 0x86e   :  { %6418 = vmatpush.bf16.msra.mxu0 %v12619_v54  ;;  %v12700_v54 = vld [vmem:[#allocation2 + $0xcd0] sm:$0xf0]  ;;  %v14944_v21 = vld [vmem:[#allocation2 + $0xda4] sm:$0xf] }
 0x86f   :  { %6432 = vmatpush.bf16.msrb.mxu1 %v12747_v55  ;;  %v12956_v55 = vld [vmem:[#allocation2 + $0xed0] sm:$0xf0]  ;;  %v16835_v30 = vpack.c.bf16 %v17970_v28, %v17969_v34  ;;  %v15008_v53 = vld [vmem:[#allocation2 + $0xfa4] sm:$0xf] }
 0x870   :  { %6446 = vmatpush.bf16.msrb.mxu2 %v12875_v36  ;;  %v17967_v36 = vmax.f32 %v16627_v39, 0.0  ;;  %v12703_v39 = vor.u32 %v14916_v11, %v12700_v54  ;;  %v12959_v48 = vor.u32 %v14980_v51, %v12956_v55  ;;  %v12812_v1 = vld [vmem:[#allocation2 + $0xdb0] sm:$0xf0]  ;;  %v14940_v11 = vld [vmem:[#allocation2 + $0xd84] sm:$0xf]  ;;  %v4748_v54 = vperm.slane %v16850_v41, 0 }
 0x871   :  { %6460 = vmatpush.bf16.msra.mxu3 %v13003_v4  ;;  %v13084_v4 = vld [vmem:[#allocation2 + $0xfd0] sm:$0xf0]  ;;  %v13071_v14 = vor.u32 %v15008_v53, %v13068_v52  ;;  %v14972_v58 = vld [vmem:[#allocation2 + $0xe84] sm:$0xf] }
 0x872   :  { %6419 = vmatpush.bf16.msra.mxu0 %v12603_v18  ;;  %v16829_v15 = vpack.c.bf16 %v17968_v3, %v17967_v36  ;;  %v17974_v18 = vmax.f32 %v16633_v46, 0.0  ;;  %v13087_v5 = vor.u32 %v15012_v40, %v13084_v4  ;;  %v12687_v46 = vor.u32 %v14912_v59, %v12684_v27  ;;  %v12924_v51 = vld [vmem:[#allocation2 + $0xe90] sm:$0xf0]  ;;  %v15004_v55 = vld [vmem:[#allocation2 + $0xf84] sm:$0xf]  ;;  %v5405_v40 = vpop.f32.mrf.mxu0 }
 0x873   :  { %6433 = vmatpush.bf16.msrb.mxu1 %v12731_v56  ;;  %v14976_v56 = vld [vmem:[#allocation2 + $0xea4] sm:$0xf]  ;;  %v13052_v36 = vld [vmem:[#allocation2 + $0xf90] sm:$0xf0]  ;;  %v12927_v34 = vor.u32 %v14972_v58, %v12924_v51  ;;  %v5419_v59 = vpop.f32.mrf.mxu1 }
 0x874   :  { %6447 = vmatpush.bf16.msrb.mxu2 %v12859_v29  ;;  %v16847_v23 = vpack.c.bf16 %v17974_v18, %v17973_v33  ;;  %v12940_v29 = vld [vmem:[#allocation2 + $0xeb0] sm:$0xf0]  ;;  %v14904_v28 = vld [vmem:[#allocation2 + $0xc64] sm:$0xf]  ;;  %v13055_v33 = vor.u32 %v15004_v55, %v13052_v36 }
 0x875   :  { %6461 = vmatpush.bf16.msra.mxu3 %v12987_v12  ;;  %6420 = vmatmul.bf16.vlgmr.msra.gmra.mxu0 %v16835_v30  ;;  %v14908_v12 = vld [vmem:[#allocation2 + $0xc84] sm:$0xf]  ;;  %v12652_v9 = vld [vmem:[#allocation2 + $0xc70] sm:$0xf0] }
 0x876   :  { %6468 = vmatpush.bf16.msrb.mxu0 %v12719_v10  ;;  %6434 = vmatmul.bf16.vlgmr.msrb.gmra.mxu1 %v16847_v23  ;;  %v12815_v10 = vor.u32 %v14944_v21, %v12812_v1  ;;  %v14936_v49 = vld [vmem:[#allocation2 + $0xd64] sm:$0xf]  ;;  %v12780_v18 = vld [vmem:[#allocation2 + $0xd70] sm:$0xf0] }
 0x877   :  { %6482 = vmatpush.bf16.msra.mxu1 %v12847_v32  ;;  %6448 = vmatmul.bf16.vlgmr.msrb.gmra.mxu2 %v16829_v15  ;;  %v12943_v32 = vor.u32 %v14976_v56, %v12940_v29  ;;  %v15000_v27 = vld [vmem:[#allocation2 + $0xf64] sm:$0xf]  ;;  %v13036_v21 = vld [vmem:[#allocation2 + $0xf70] sm:$0xf0]  ;;  %v12783_v56 = vor.u32 %v14936_v49, %v12780_v18 }
 0x878   :  { %6496 = vmatpush.bf16.msra.mxu2 %v12975_v42  ;;  %6462 = vmatmul.bf16.vlgmr.msra.gmra.mxu3 %v16841_v0  ;;  %v12668_v42 = vld [vmem:[#allocation2 + $0xc90] sm:$0xf0]  ;;  %v14900_v53 = vld [vmem:[#allocation2 + $0xc44] sm:$0xf] }
 0x879   :  { %6510 = vmatpush.bf16.msrb.mxu3 %v13103_v44  ;;  %v12796_v44 = vld [vmem:[#allocation2 + $0xd90] sm:$0xf0]  ;;  %v12671_v3 = vor.u32 %v14908_v12, %v12668_v42  ;;  %v14964_v42 = vld [vmem:[#allocation2 + $0xe44] sm:$0xf] }
 0x87a   :  { %6469 = vmatpush.bf16.msrb.mxu0 %v12703_v39  ;;  %v12799_v4 = vor.u32 %v14940_v11, %v12796_v44  ;;  %v5406_v39 = vadd.f32 %v5405_v40, %v4748_v54  ;;  %v12636_v52 = vld [vmem:[#allocation2 + $0xc50] sm:$0xf0]  ;;  %v5433_v12 = vpop.f32.mrf.mxu2  ;;  %v14996_v58 = vld [vmem:[#allocation2 + $0xf44] sm:$0xf]  ;;  %v5407_v40 = vpop.f32.mrf.mxu0 }
 0x87b   :  { %6483 = vmatpush.bf16.msra.mxu1 %v12831_v57  ;;  %v14968_v57 = vld [vmem:[#allocation2 + $0xe64] sm:$0xf]  ;;  %v12892_v11 = vld [vmem:[#allocation2 + $0xe50] sm:$0xf0]  ;;  %v5447_v44 = vpop.f32.mrf.mxu3  ;;  %v12639_v55 = vor.u32 %v14900_v53, %v12636_v52 }
 0x87c   :  { %6497 = vmatpush.bf16.msra.mxu2 %v12959_v48  ;;  %v12908_v48 = vld [vmem:[#allocation2 + $0xe70] sm:$0xf0]  ;;  %v5420_v1 = vadd.f32 %v5419_v59, %v5406_v39  ;;  %v14896_v36 = vld [vmem:[#allocation2 + $0xc24] sm:$0xf]  ;;  %v5408_v39 = vadd.f32 %v5407_v40, %v4748_v54  ;;  %v5421_v59 = vpop.f32.mrf.mxu1 }
 0x87d   :  { %6511 = vmatpush.bf16.msrb.mxu3 %v13087_v5  ;;  %v12655_v5 = vor.u32 %v14904_v28, %v12652_v9  ;;  %v12911_v29 = vor.u32 %v14968_v57, %v12908_v48  ;;  %v13020_v51 = vld [vmem:[#allocation2 + $0xf50] sm:$0xf0]  ;;  %v14928_v9 = vld [vmem:[#allocation2 + $0xd24] sm:$0xf] }
 0x87e   :  { %6470 = vmatpush.bf16.msrb.mxu0 %v12687_v46  ;;  %v14932_v46 = vld [vmem:[#allocation2 + $0xd44] sm:$0xf]  ;;  %v12620_v28 = vld [vmem:[#allocation2 + $0xc30] sm:$0xf0] }
 0x87f   :  { %6484 = vmatpush.bf16.msra.mxu1 %v12815_v10  ;;  %v13039_v10 = vor.u32 %v15000_v27, %v13036_v21  ;;  %v12748_v49 = vld [vmem:[#allocation2 + $0xd30] sm:$0xf0]  ;;  %v14960_v18 = vld [vmem:[#allocation2 + $0xe24] sm:$0xf] }
 0x880   :  { %6498 = vmatpush.bf16.msra.mxu2 %v12943_v32  ;;  %v12764_v32 = vld [vmem:[#allocation2 + $0xd50] sm:$0xf0]  ;;  %v14992_v27 = vld [vmem:[#allocation2 + $0xf24] sm:$0xf]  ;;  %v12751_v53 = vor.u32 %v14928_v9, %v12748_v49 }
 0x881   :  { %6512 = vmatpush.bf16.msrb.mxu3 %v13071_v14  ;;  %v5434_v14 = vadd.f32 %v5433_v12, %v5420_v1  ;;  %v12876_v57 = vld [vmem:[#allocation2 + $0xe30] sm:$0xf0]  ;;  %v5422_v1 = vadd.f32 %v5421_v59, %v5408_v39  ;;  %v14956_v12 = vld [vmem:[#allocation2 + $0xe04] sm:$0xf]  ;;  %v13106_v59 = vld [vmem:[#allocation2 + $0xfe8] sm:$0xf] }
 0x882   :  { %6471 = vmatpush.bf16.msrb.mxu0 %v12671_v3  ;;  %v13004_v21 = vld [vmem:[#allocation2 + $0xf30] sm:$0xf0]  ;;  %v12879_v52 = vor.u32 %v14960_v18, %v12876_v57 }
 0x883   :  { %6485 = vmatpush.bf16.msra.mxu1 %v12799_v4  ;;  %v16856_v3 = vadd.f32 %v5447_v44, %v5434_v14  ;;  %v12767_v4 = vor.u32 %v14932_v46, %v12764_v32  ;;  %v14924_v46 = vld [vmem:[#allocation2 + $0xd04] sm:$0xf]  ;;  %v12732_v54 = vld [vmem:[#allocation2 + $0xd10] sm:$0xf0]  ;;  %v13007_v32 = vor.u32 %v14992_v27, %v13004_v21  ;;  %v14999_v27 = vld [vmem:[#allocation2 + $0xf54] sm:$0xf0] }
 0x884   :  { %6499 = vmatpush.bf16.msra.mxu2 %v12927_v34  ;;  %v12895_v34 = vor.u32 %v14964_v42, %v12892_v11  ;;  %v12860_v42 = vld [vmem:[#allocation2 + $0xe10] sm:$0xf0]  ;;  %v14988_v11 = vld [vmem:[#allocation2 + $0xf04] sm:$0xf]  ;;  %v12735_v49 = vor.u32 %v14924_v46, %v12732_v54  ;;  %v15015_v46 = vld [vmem:[#allocation2 + $0xfd4] sm:$0xf0] }
 0x885   :  { %6513 = vmatpush.bf16.msrb.mxu3 %v13055_v33  ;;  %v13023_v33 = vor.u32 %v14996_v58, %v13020_v51  ;;  %v12988_v14 = vld [vmem:[#allocation2 + $0xf10] sm:$0xf0]  ;;  %v5449_v58 = vpop.f32.mrf.mxu3  ;;  %v12722_v51 = vld [vmem:[#allocation2 + $0xce8] sm:$0xf]  ;;  %v12863_v39 = vor.u32 %v14956_v12, %v12860_v42 }
 0x886   :  { %6472 = vmatpush.bf16.msrb.mxu0 %v12655_v5  ;;  %v12623_v5 = vor.u32 %v14896_v36, %v12620_v28  ;;  %v12850_v36 = vld [vmem:[#allocation2 + $0xde8] sm:$0xf]  ;;  %v14987_v28 = vld [vmem:[#allocation2 + $0xef4] sm:$0xf0]  ;;  %v12991_v18 = vor.u32 %v14988_v11, %v12988_v14 }
 0x887   :  { %6486 = vmatpush.bf16.msra.mxu1 %v12783_v56  ;;  %v14892_v56 = vld [vmem:[#allocation2 + $0xc04] sm:$0xf]  ;;  %v12690_v42 = vld [vmem:[#allocation2 + $0xca8] sm:$0xf]  ;;  %v14915_v11 = vld [vmem:[#allocation2 + $0xcb4] sm:$0xf0] }
 0x888   :  { %6500 = vmatpush.bf16.msra.mxu2 %v12911_v29  ;;  %v12604_v29 = vld [vmem:[#allocation2 + $0xc10] sm:$0xf0]  ;;  %v12818_v14 = vld [vmem:[#allocation2 + $0xda8] sm:$0xf] }
 0x889   :  { %6514 = vmatpush.bf16.msrb.mxu3 %v13039_v10  ;;  %v5435_v10 = vpop.f32.mrf.mxu2  ;;  %v12607_v40 = vor.u32 %v14892_v56, %v12604_v29  ;;  %v14919_v56 = vld [vmem:[#allocation2 + $0xcd4] sm:$0xf0]  ;;  %v12834_v29 = vld [vmem:[#allocation2 + $0xdc8] sm:$0xf] }
 0x88a   :  { %6473 = vmatpush.bf16.msrb.mxu0 %v12639_v55  ;;  %v5436_v44 = vadd.f32 %v5435_v10, %v5422_v1  ;;  %v14923_v55 = vld [vmem:[#allocation2 + $0xcf4] sm:$0xf0] }
 0x88b   :  { %6487 = vmatpush.bf16.msra.mxu1 %v12767_v4  ;;  %v14955_v4 = vld [vmem:[#allocation2 + $0xdf4] sm:$0xf0]  ;;  %v12723_v57 = vor.u32 %v14923_v55, %v12722_v51 }
 0x88c   :  { %6501 = vmatpush.bf16.msra.mxu2 %v12895_v34  ;;  %v12978_v34 = vld [vmem:[#allocation2 + $0xee8] sm:$0xf]  ;;  %v16859_v9 = vadd.f32 %v5449_v58, %v5436_v44  ;;  %v12851_v21 = vor.u32 %v14955_v4, %v12850_v36  ;;  %v14951_v44 = vld [vmem:[#allocation2 + $0xdd4] sm:$0xf0] }
 0x88d   :  { %6515 = vmatpush.bf16.msrb.mxu3 %v13023_v33  ;;  %v15019_v33 = vld [vmem:[#allocation2 + $0xff4] sm:$0xf0]  ;;  %v12979_v1 = vor.u32 %v14987_v28, %v12978_v34  ;;  %v12962_v58 = vld [vmem:[#allocation2 + $0xec8] sm:$0xf]  ;;  %v12835_v12 = vor.u32 %v14951_v44, %v12834_v29  ;;  %v12691_v28 = vor.u32 %v14915_v11, %v12690_v42 }
 0x88e   :  { %6474 = vmatpush.bf16.msrb.mxu0 %v12623_v5  ;;  %v12706_v5 = vld [vmem:[#allocation2 + $0xcc8] sm:$0xf]  ;;  %v13107_v10 = vor.u32 %v15019_v33, %v13106_v59  ;;  %v14947_v55 = vld [vmem:[#allocation2 + $0xdb4] sm:$0xf0] }
 0x88f   :  { %6488 = vmatpush.bf16.msra.mxu1 %v12751_v53  ;;  %v14983_v53 = vld [vmem:[#allocation2 + $0xed4] sm:$0xf0]  ;;  %v12707_v54 = vor.u32 %v14919_v56, %v12706_v5  ;;  %v12946_v36 = vld [vmem:[#allocation2 + $0xea8] sm:$0xf] }
 0x890   :  { %6502 = vmatpush.bf16.msra.mxu2 %v12879_v52  ;;  %v13090_v52 = vld [vmem:[#allocation2 + $0xfc8] sm:$0xf]  ;;  %v15011_v34 = vld [vmem:[#allocation2 + $0xfb4] sm:$0xf0] }
 0x891   :  { %6516 = vmatpush.bf16.msrb.mxu3 %v13007_v32  ;;  %v12963_v32 = vor.u32 %v14983_v53, %v12962_v58  ;;  %v13091_v51 = vor.u32 %v15015_v46, %v13090_v52  ;;  %v13074_v4 = vld [vmem:[#allocation2 + $0xfa8] sm:$0xf]  ;;  %v14911_v33 = vld [vmem:[#allocation2 + $0xc94] sm:$0xf0] }
 0x892   :  { %6475 = vmatpush.bf16.msrb.mxu0 %v12607_v40  ;;  %v14979_v40 = vld [vmem:[#allocation2 + $0xeb4] sm:$0xf0]  ;;  %v12930_v5 = vld [vmem:[#allocation2 + $0xe88] sm:$0xf]  ;;  %v5461_v58 = vpop.f32.mrf.mxu0 }
 0x893   :  { %6489 = vmatpush.bf16.msra.mxu1 %v12735_v49  ;;  %v12674_v49 = vld [vmem:[#allocation2 + $0xc88] sm:$0xf]  ;;  %v12947_v59 = vor.u32 %v14979_v40, %v12946_v36  ;;  %v14975_v56 = vld [vmem:[#allocation2 + $0xe94] sm:$0xf0]  ;;  %v5475_v42 = vpop.f32.mrf.mxu1 }
 0x894   :  { %6503 = vmatpush.bf16.msra.mxu2 %v12863_v39  ;;  %v12819_v39 = vor.u32 %v14947_v55, %v12818_v14  ;;  %v13058_v29 = vld [vmem:[#allocation2 + $0xf88] sm:$0xf]  ;;  %v12675_v44 = vor.u32 %v14911_v33, %v12674_v49  ;;  %v12931_v52 = vor.u32 %v14975_v56, %v12930_v5  ;;  %v14939_v14 = vld [vmem:[#allocation2 + $0xd74] sm:$0xf0] }
 0x895   :  { %6517 = vmatpush.bf16.msrb.mxu3 %v12991_v18  ;;  %6476 = vmatmul.bf16.vlgmr.msrb.gmra.mxu0 %v16835_v30  ;;  %v12802_v18 = vld [vmem:[#allocation2 + $0xd88] sm:$0xf]  ;;  %v14971_v55 = vld [vmem:[#allocation2 + $0xe74] sm:$0xf0] }
 0x896   :  { %6524 = vmatpush.bf16.msra.mxu0 %v12723_v57  ;;  %6490 = vmatmul.bf16.vlgmr.msra.gmra.mxu1 %v16847_v23  ;;  %v4749_v57 = vperm.slane %v16850_v41, 1  ;;  %v12658_v46 = vld [vmem:[#allocation2 + $0xc68] sm:$0xf]  ;;  %v15003_v40 = vld [vmem:[#allocation2 + $0xf74] sm:$0xf0] }
 0x897   :  { %6538 = vmatpush.bf16.msrb.mxu1 %v12851_v21  ;;  %6504 = vmatmul.bf16.vlgmr.msra.gmra.mxu2 %v16829_v15  ;;  %v13075_v21 = vor.u32 %v15011_v34, %v13074_v4  ;;  %v13042_v36 = vld [vmem:[#allocation2 + $0xf68] sm:$0xf]  ;;  %v14967_v56 = vld [vmem:[#allocation2 + $0xe54] sm:$0xf0] }
 0x898   :  { %6552 = vmatpush.bf16.msrb.mxu2 %v12979_v1  ;;  %6518 = vmatmul.bf16.vlgmr.msrb.gmra.mxu3 %v16841_v0  ;;  %v14943_v1 = vld [vmem:[#allocation2 + $0xd94] sm:$0xf0]  ;;  %v12770_v33 = vld [vmem:[#allocation2 + $0xd48] sm:$0xf] }
 0x899   :  { %6566 = vmatpush.bf16.msra.mxu3 %v13107_v10  ;;  %v15007_v10 = vld [vmem:[#allocation2 + $0xf94] sm:$0xf0]  ;;  %v12803_v53 = vor.u32 %v14943_v1, %v12802_v18  ;;  %v13043_v1 = vor.u32 %v15003_v40, %v13042_v36  ;;  %v12898_v5 = vld [vmem:[#allocation2 + $0xe48] sm:$0xf] }
 0x89a   :  { %6525 = vmatpush.bf16.msra.mxu0 %v12707_v54  ;;  %v14907_v54 = vld [vmem:[#allocation2 + $0xc74] sm:$0xf0]  ;;  %v13059_v11 = vor.u32 %v15007_v10, %v13058_v29  ;;  %v5489_v18 = vpop.f32.mrf.mxu2  ;;  %v12882_v36 = vld [vmem:[#allocation2 + $0xe28] sm:$0xf] }
 0x89b   :  { %6539 = vmatpush.bf16.msrb.mxu1 %v12835_v12  ;;  %v12786_v12 = vld [vmem:[#allocation2 + $0xd68] sm:$0xf]  ;;  %v12659_v34 = vor.u32 %v14907_v54, %v12658_v46  ;;  %v5503_v10 = vpop.f32.mrf.mxu3  ;;  %v14963_v40 = vld [vmem:[#allocation2 + $0xe34] sm:$0xf0] }
 0x89c   :  { %6553 = vmatpush.bf16.msrb.mxu2 %v12963_v32  ;;  %v5462_v32 = vadd.f32 %v5461_v58, %v4749_v57  ;;  %v13026_v58 = vld [vmem:[#allocation2 + $0xf48] sm:$0xf] }
 0x89d   :  { %6567 = vmatpush.bf16.msra.mxu3 %v13091_v51  ;;  %v12914_v51 = vld [vmem:[#allocation2 + $0xe68] sm:$0xf] }
 0x89e   :  { %6526 = vmatpush.bf16.msra.mxu0 %v12691_v28  ;;  %v5476_v4 = vadd.f32 %v5475_v42, %v5462_v32  ;;  %v12787_v28 = vor.u32 %v14939_v14, %v12786_v12  ;;  %v12915_v49 = vor.u32 %v14971_v55, %v12914_v51  ;;  %v12626_v46 = vld [vmem:[#allocation2 + $0xc28] sm:$0xf]  ;;  %v12899_v12 = vor.u32 %v14967_v56, %v12898_v5  ;;  %v14899_v32 = vld [vmem:[#allocation2 + $0xc34] sm:$0xf0]  ;;  %v5477_v51 = vpop.f32.mrf.mxu1 }
 0x89f   :  { %6540 = vmatpush.bf16.msrb.mxu1 %v12819_v39  ;;  %v12642_v39 = vld [vmem:[#allocation2 + $0xc48] sm:$0xf]  ;;  %v13027_v55 = vor.u32 %v14999_v27, %v13026_v58  ;;  %v14991_v58 = vld [vmem:[#allocation2 + $0xf14] sm:$0xf0] }
 0x8a0   :  { %6554 = vmatpush.bf16.msrb.mxu2 %v12947_v59  ;;  %v14903_v59 = vld [vmem:[#allocation2 + $0xc54] sm:$0xf0]  ;;  %v5490_v29 = vadd.f32 %v5489_v18, %v5476_v4  ;;  %v12754_v42 = vld [vmem:[#allocation2 + $0xd28] sm:$0xf]  ;;  %v12627_v18 = vor.u32 %v14899_v32, %v12626_v46  ;;  %v14953_v46 = vld [vmem:[#allocation2 + $0xdec] sm:$0xf] }
 0x8a1   :  { %6568 = vmatpush.bf16.msra.mxu3 %v13075_v21  ;;  %v14935_v21 = vld [vmem:[#allocation2 + $0xd54] sm:$0xf0]  ;;  %v12738_v5 = vld [vmem:[#allocation2 + $0xd08] sm:$0xf] }
 0x8a2   :  { %6527 = vmatpush.bf16.msra.mxu0 %v12675_v44  ;;  %v12643_v44 = vor.u32 %v14903_v59, %v12642_v39  ;;  %v12771_v54 = vor.u32 %v14935_v21, %v12770_v33  ;;  %v14995_v39 = vld [vmem:[#allocation2 + $0xf34] sm:$0xf0]  ;;  %v12883_v21 = vor.u32 %v14963_v40, %v12882_v36  ;;  %v12866_v56 = vld [vmem:[#allocation2 + $0xe08] sm:$0xf]  ;;  %v15017_v36 = vld [vmem:[#allocation2 + $0xfec] sm:$0xf] }
 0x8a3   :  { %6541 = vmatpush.bf16.msrb.mxu1 %v12803_v53  ;;  %v16867_v53 = vadd.f32 %v5503_v10, %v5490_v29  ;;  %v14959_v29 = vld [vmem:[#allocation2 + $0xe14] sm:$0xf0]  ;;  %v12994_v10 = vld [vmem:[#allocation2 + $0xf08] sm:$0xf]  ;;  %v5505_v4 = vpop.f32.mrf.mxu3  ;;  %v13108_v40 = vld [vmem:[#allocation2 + $0xff8] sm:$0xf0] }
 0x8a4   :  { %6555 = vmatpush.bf16.msrb.mxu2 %v12931_v52  ;;  %v5463_v52 = vpop.f32.mrf.mxu0  ;;  %v13111_v38 = vor.u32 %v15017_v36, %v13108_v40  ;;  %v14941_v36 = vld [vmem:[#allocation2 + $0xd8c] sm:$0xf]  ;;  %v4750_v40 = vperm.slane %v16850_v41, 2 }
 0x8a5   :  { %6569 = vmatpush.bf16.msra.mxu3 %v13059_v11  ;;  %v14931_v11 = vld [vmem:[#allocation2 + $0xd34] sm:$0xf0]  ;;  %v5464_v14 = vadd.f32 %v5463_v52, %v4749_v57 }
 0x8a6   :  { %6528 = vmatpush.bf16.msra.mxu0 %v12659_v34  ;;  %v13010_v34 = vld [vmem:[#allocation2 + $0xf28] sm:$0xf]  ;;  %v12755_v33 = vor.u32 %v14931_v11, %v12754_v42  ;;  %v14927_v57 = vld [vmem:[#allocation2 + $0xd14] sm:$0xf0]  ;;  %v12980_v42 = vld [vmem:[#allocation2 + $0xef8] sm:$0xf0] }
 0x8a7   :  { %6542 = vmatpush.bf16.msrb.mxu1 %v12787_v28  ;;  %v5478_v59 = vadd.f32 %v5477_v51, %v5464_v14  ;;  %v12610_v28 = vld [vmem:[#allocation2 + $0xc08] sm:$0xf]  ;;  %v13011_v27 = vor.u32 %v14995_v39, %v13010_v34  ;;  %v14921_v14 = vld [vmem:[#allocation2 + $0xcec] sm:$0xf]  ;;  %v12739_v51 = vor.u32 %v14927_v57, %v12738_v5  ;;  %v12995_v34 = vor.u32 %v14991_v58, %v12994_v10  ;;  %v13092_v5 = vld [vmem:[#allocation2 + $0xfd8] sm:$0xf0] }
 0x8a8   :  { %6556 = vmatpush.bf16.msrb.mxu2 %v12915_v49  ;;  %v14895_v49 = vld [vmem:[#allocation2 + $0xc14] sm:$0xf0]  ;;  %v12692_v10 = vld [vmem:[#allocation2 + $0xcb8] sm:$0xf0]  ;;  %v14945_v58 = vld [vmem:[#allocation2 + $0xdac] sm:$0xf] }
 0x8a9   :  { %6570 = vmatpush.bf16.msra.mxu3 %v13043_v1  ;;  %v5491_v1 = vpop.f32.mrf.mxu2  ;;  %v12611_v32 = vor.u32 %v14895_v49, %v12610_v28  ;;  %v12708_v28 = vld [vmem:[#allocation2 + $0xcd8] sm:$0xf0]  ;;  %v14949_v49 = vld [vmem:[#allocation2 + $0xdcc] sm:$0xf] }
 0x8aa   :  { %6529 = vmatpush.bf16.msra.mxu0 %v12643_v44  ;;  %v5492_v52 = vadd.f32 %v5491_v1, %v5478_v59  ;;  %v12724_v44 = vld [vmem:[#allocation2 + $0xcf8] sm:$0xf0] }
 0x8ab   :  { %6543 = vmatpush.bf16.msrb.mxu1 %v12771_v54  ;;  %v12852_v54 = vld [vmem:[#allocation2 + $0xdf8] sm:$0xf0]  ;;  %v12727_v39 = vor.u32 %v14921_v14, %v12724_v44 }
 0x8ac   :  { %6557 = vmatpush.bf16.msrb.mxu2 %v12899_v12  ;;  %v14985_v12 = vld [vmem:[#allocation2 + $0xeec] sm:$0xf]  ;;  %v16870_v11 = vadd.f32 %v5505_v4, %v5492_v52  ;;  %v12855_v1 = vor.u32 %v14953_v46, %v12852_v54  ;;  %v12836_v4 = vld [vmem:[#allocation2 + $0xdd8] sm:$0xf0] }
 0x8ad   :  { %6571 = vmatpush.bf16.msra.mxu3 %v13027_v55  ;;  %v12867_v55 = vor.u32 %v14959_v29, %v12866_v56  ;;  %v12983_v48 = vor.u32 %v14985_v12, %v12980_v42  ;;  %v14981_v52 = vld [vmem:[#allocation2 + $0xecc] sm:$0xf]  ;;  %v12839_v56 = vor.u32 %v14949_v49, %v12836_v4  ;;  %v12820_v44 = vld [vmem:[#allocation2 + $0xdb8] sm:$0xf0] }
 0x8ae   :  { %6530 = vmatpush.bf16.msra.mxu0 %v12627_v18  ;;  %v14917_v18 = vld [vmem:[#allocation2 + $0xccc] sm:$0xf]  ;;  %v13076_v12 = vld [vmem:[#allocation2 + $0xfb8] sm:$0xf0] }
 0x8af   :  { %6544 = vmatpush.bf16.msrb.mxu1 %v12755_v33  ;;  %v12964_v33 = vld [vmem:[#allocation2 + $0xed8] sm:$0xf0]  ;;  %v12711_v57 = vor.u32 %v14917_v18, %v12708_v28  ;;  %v14913_v29 = vld [vmem:[#allocation2 + $0xcac] sm:$0xf] }
 0x8b0   :  { %6558 = vmatpush.bf16.msrb.mxu2 %v12883_v21  ;;  %v15013_v21 = vld [vmem:[#allocation2 + $0xfcc] sm:$0xf]  ;;  %v12932_v18 = vld [vmem:[#allocation2 + $0xe98] sm:$0xf0] }
 0x8b1   :  { %6572 = vmatpush.bf16.msra.mxu3 %v13011_v27  ;;  %v12967_v27 = vor.u32 %v14981_v52, %v12964_v33  ;;  %v13095_v14 = vor.u32 %v15013_v21, %v13092_v5  ;;  %v14977_v46 = vld [vmem:[#allocation2 + $0xeac] sm:$0xf]  ;;  %v13060_v49 = vld [vmem:[#allocation2 + $0xf98] sm:$0xf0] }
 0x8b2   :  { %6531 = vmatpush.bf16.msra.mxu0 %v12611_v32  ;;  %v12948_v32 = vld [vmem:[#allocation2 + $0xeb8] sm:$0xf0]  ;;  %v15009_v54 = vld [vmem:[#allocation2 + $0xfac] sm:$0xf]  ;;  %v5517_v52 = vpop.f32.mrf.mxu0 }
 0x8b3   :  { %6545 = vmatpush.bf16.msrb.mxu1 %v12739_v51  ;;  %v14909_v42 = vld [vmem:[#allocation2 + $0xc8c] sm:$0xf]  ;;  %v12951_v51 = vor.u32 %v14977_v46, %v12948_v32  ;;  %v13044_v32 = vld [vmem:[#allocation2 + $0xf78] sm:$0xf0] }
 0x8b4   :  { %6559 = vmatpush.bf16.msrb.mxu2 %v12867_v55  ;;  %v12676_v55 = vld [vmem:[#allocation2 + $0xc98] sm:$0xf0]  ;;  %v15005_v28 = vld [vmem:[#allocation2 + $0xf8c] sm:$0xf] }
 0x8b5   :  { %6573 = vmatpush.bf16.msra.mxu3 %v12995_v34  ;;  %6532 = vmatmul.bf16.vlgmr.msra.gmra.mxu0 %v16835_v30  ;;  %v13079_v34 = vor.u32 %v15009_v54, %v13076_v12  ;;  %v12679_v4 = vor.u32 %v14909_v42, %v12676_v55  ;;  %v14905_v5 = vld [vmem:[#allocation2 + $0xc6c] sm:$0xf]  ;;  %v13028_v59 = vld [vmem:[#allocation2 + $0xf58] sm:$0xf0] }
 0x8b6   :  { %6580 = vmatpush.bf16.msrb.mxu0 %v12727_v39  ;;  %6546 = vmatmul.bf16.vlgmr.msrb.gmra.mxu1 %v16847_v23  ;;  %v12804_v39 = vld [vmem:[#allocation2 + $0xd98] sm:$0xf0]  ;;  %v15001_v46 = vld [vmem:[#allocation2 + $0xf6c] sm:$0xf] }
 0x8b7   :  { %6594 = vmatpush.bf16.msra.mxu1 %v12855_v1  ;;  %6560 = vmatmul.bf16.vlgmr.msrb.gmra.mxu2 %v16829_v15  ;;  %v14973_v1 = vld [vmem:[#allocation2 + $0xe8c] sm:$0xf]  ;;  %v12807_v33 = vor.u32 %v14941_v36, %v12804_v39  ;;  %v13047_v39 = vor.u32 %v15001_v46, %v13044_v32  ;;  %v12884_v32 = vld [vmem:[#allocation2 + $0xe38] sm:$0xf0] }
 0x8b8   :  { %6608 = vmatpush.bf16.msra.mxu2 %v12983_v48  ;;  %6574 = vmatmul.bf16.vlgmr.msra.gmra.mxu3 %v16841_v0  ;;  %v12695_v48 = vor.u32 %v14913_v29, %v12692_v10  ;;  %v12935_v21 = vor.u32 %v14973_v1, %v12932_v18  ;;  %v5531_v29 = vpop.f32.mrf.mxu1  ;;  %v13063_v10 = vor.u32 %v15005_v28, %v13060_v49  ;;  %v14933_v55 = vld [vmem:[#allocation2 + $0xd4c] sm:$0xf]  ;;  %v12900_v18 = vld [vmem:[#allocation2 + $0xe58] sm:$0xf0] }
 0x8b9   :  { %6622 = vmatpush.bf16.msrb.mxu3 %v13111_v38  ;;  %v12823_v38 = vor.u32 %v14945_v58, %v12820_v44  ;;  %v12788_v58 = vld [vmem:[#allocation2 + $0xd78] sm:$0xf0]  ;;  %v14965_v1 = vld [vmem:[#allocation2 + $0xe4c] sm:$0xf] }
 0x8ba   :  { %6581 = vmatpush.bf16.msrb.mxu0 %v12711_v57  ;;  %v12660_v57 = vld [vmem:[#allocation2 + $0xc78] sm:$0xf0]  ;;  %v5545_v36 = vpop.f32.mrf.mxu2  ;;  %v14961_v46 = vld [vmem:[#allocation2 + $0xe2c] sm:$0xf] }
 0x8bb   :  { %6595 = vmatpush.bf16.msra.mxu1 %v12839_v56  ;;  %v14937_v56 = vld [vmem:[#allocation2 + $0xd6c] sm:$0xf]  ;;  %v12916_v44 = vld [vmem:[#allocation2 + $0xe78] sm:$0xf0]  ;;  %v12663_v12 = vor.u32 %v14905_v5, %v12660_v57  ;;  %v5559_v49 = vpop.f32.mrf.mxu3 }
 0x8bc   :  { %6609 = vmatpush.bf16.msra.mxu2 %v12967_v27  ;;  %v5518_v27 = vadd.f32 %v5517_v52, %v4750_v40  ;;  %v14997_v52 = vld [vmem:[#allocation2 + $0xf4c] sm:$0xf] }
 0x8bd   :  { %6623 = vmatpush.bf16.msrb.mxu3 %v13095_v14  ;;  %v14969_v14 = vld [vmem:[#allocation2 + $0xe6c] sm:$0xf] }
 0x8be   :  { %6582 = vmatpush.bf16.msrb.mxu0 %v12695_v48  ;;  %v5532_v54 = vadd.f32 %v5531_v29, %v5518_v27  ;;  %v12791_v48 = vor.u32 %v14937_v56, %v12788_v58  ;;  %v12919_v42 = vor.u32 %v14969_v14, %v12916_v44  ;;  %v14897_v5 = vld [vmem:[#allocation2 + $0xc2c] sm:$0xf]  ;;  %v12903_v56 = vor.u32 %v14965_v1, %v12900_v18  ;;  %v12628_v27 = vld [vmem:[#allocation2 + $0xc38] sm:$0xf0] }
 0x8bf   :  { %6596 = vmatpush.bf16.msra.mxu1 %v12823_v38  ;;  %v14901_v38 = vld [vmem:[#allocation2 + $0xc4c] sm:$0xf]  ;;  %v13031_v44 = vor.u32 %v14997_v52, %v13028_v59  ;;  %v12740_v59 = vld [vmem:[#allocation2 + $0xd18] sm:$0xf0] }
 0x8c0   :  { %6610 = vmatpush.bf16.msra.mxu2 %v12951_v51  ;;  %v12644_v51 = vld [vmem:[#allocation2 + $0xc58] sm:$0xf0]  ;;  %v5546_v28 = vadd.f32 %v5545_v36, %v5532_v54  ;;  %v14929_v29 = vld [vmem:[#allocation2 + $0xd2c] sm:$0xf]  ;;  %v5533_v14 = vpop.f32.mrf.mxu1  ;;  %v12631_v36 = vor.u32 %v14897_v5, %v12628_v27 }
 0x8c1   :  { %6624 = vmatpush.bf16.msrb.mxu3 %v13079_v34  ;;  %v12772_v34 = vld [vmem:[#allocation2 + $0xd58] sm:$0xf0]  ;;  %v14925_v1 = vld [vmem:[#allocation2 + $0xd0c] sm:$0xf] }
 0x8c2   :  { %6583 = vmatpush.bf16.msrb.mxu0 %v12679_v4  ;;  %v12647_v4 = vor.u32 %v14901_v38, %v12644_v51  ;;  %v12775_v57 = vor.u32 %v14933_v55, %v12772_v34  ;;  %v13012_v38 = vld [vmem:[#allocation2 + $0xf38] sm:$0xf0]  ;;  %v14893_v55 = vld [vmem:[#allocation2 + $0xc0c] sm:$0xf] }
 0x8c3   :  { %6597 = vmatpush.bf16.msra.mxu1 %v12807_v33  ;;  %v16878_v33 = vadd.f32 %v5559_v49, %v5546_v28  ;;  %v12612_v34 = vld [vmem:[#allocation2 + $0xc18] sm:$0xf0]  ;;  %v14957_v18 = vld [vmem:[#allocation2 + $0xe0c] sm:$0xf]  ;;  %v5561_v52 = vpop.f32.mrf.mxu3 }
 0x8c4   :  { %6611 = vmatpush.bf16.msra.mxu2 %v12935_v21  ;;  %v5519_v21 = vpop.f32.mrf.mxu0  ;;  %v12868_v28 = vld [vmem:[#allocation2 + $0xe18] sm:$0xf0] }
 0x8c5   :  { %6625 = vmatpush.bf16.msrb.mxu3 %v13063_v10  ;;  %v12756_v10 = vld [vmem:[#allocation2 + $0xd38] sm:$0xf0]  ;;  %v5520_v58 = vadd.f32 %v5519_v21, %v4750_v40  ;;  %v5547_v40 = vpop.f32.mrf.mxu2  ;;  %v14989_v21 = vld [vmem:[#allocation2 + $0xf0c] sm:$0xf] }
 0x8c6   :  { %6584 = vmatpush.bf16.msrb.mxu0 %v12663_v12  ;;  %v14993_v12 = vld [vmem:[#allocation2 + $0xf2c] sm:$0xf]  ;;  %v12996_v54 = vld [vmem:[#allocation2 + $0xf18] sm:$0xf0] }
 0x8c7   :  { %6598 = vmatpush.bf16.msra.mxu1 %v12791_v48  ;;  %v5534_v51 = vadd.f32 %v5533_v14, %v5520_v58  ;;  %v12759_v48 = vor.u32 %v14929_v29, %v12756_v10  ;;  %v12999_v27 = vor.u32 %v14989_v21, %v12996_v54  ;;  %v4751_v10 = vperm.slane %v16850_v41, 3 }
 0x8c8   :  { %6612 = vmatpush.bf16.msra.mxu2 %v12919_v42  ;;  %v12887_v42 = vor.u32 %v14961_v46, %v12884_v32 }
 0x8c9   :  { %6626 = vmatpush.bf16.msrb.mxu3 %v13047_v39  ;;  %v13015_v39 = vor.u32 %v14993_v12, %v13012_v38  ;;  %v5548_v49 = vadd.f32 %v5547_v40, %v5534_v51 }
 0x8ca   :  { %6585 = vmatpush.bf16.msrb.mxu0 %v12647_v4  ;;  %v12615_v4 = vor.u32 %v14893_v55, %v12612_v34  ;;  %v16895_v34 = vld [vmem:[#allocation34 + $0xc] sm:$0xf] }
 0x8cb   :  { %6599 = vmatpush.bf16.msra.mxu1 %v12775_v57  ;;  %v16881_v5 = vadd.f32 %v5561_v52, %v5548_v49  ;;  %v12743_v57 = vor.u32 %v14925_v1, %v12740_v59  ;;  %v5764_v1 = vperm.slane %v16895_v34, 0 }
 0x8cc   :  { %6613 = vmatpush.bf16.msra.mxu2 %v12903_v56  ;;  %v12871_v56 = vor.u32 %v14957_v18, %v12868_v28 }
 0x8cd   :  { %6627 = vmatpush.bf16.msrb.mxu3 %v13031_v44 }
 0x8ce   :  { %6586 = vmatpush.bf16.msrb.mxu0 %v12631_v36 }
 0x8cf   :  { %6600 = vmatpush.bf16.msra.mxu1 %v12759_v48 }
 0x8d0   :  { %6614 = vmatpush.bf16.msra.mxu2 %v12887_v42 }
 0x8d1   :  { %6628 = vmatpush.bf16.msrb.mxu3 %v13015_v39 }
 0x8d2   :  { %6587 = vmatpush.bf16.msrb.mxu0 %v12615_v4  ;;  %v5573_v58 = vpop.f32.mrf.mxu0 }
 0x8d3   :  { %6601 = vmatpush.bf16.msra.mxu1 %v12743_v57  ;;  %v5574_v14 = vadd.f32 %v5573_v58, %v4751_v10  ;;  %v5587_v44 = vpop.f32.mrf.mxu1 }
 0x8d4   :  { %6615 = vmatpush.bf16.msra.mxu2 %v12871_v56 }
 0x8d5   :  { %6629 = vmatpush.bf16.msrb.mxu3 %v12999_v27  ;;  %6588 = vmatmul.bf16.vlgmr.msrb.gmra.mxu0 %v16835_v30  ;;  %v5588_v46 = vadd.f32 %v5587_v44, %v5574_v14 }
 0x8d6   :  { %6602 = vmatmul.bf16.vlgmr.msra.gmra.mxu1 %v16847_v23 }
 0x8d7   :  { %6616 = vmatmul.bf16.vlgmr.msra.gmra.mxu2 %v16829_v15 }
 0x8d8   :  { %6630 = vmatmul.bf16.vlgmr.msrb.gmra.mxu3 %v16841_v0 }
 0x8da   :  { %v5601_v32 = vpop.f32.mrf.mxu2  ;;  %v5575_v51 = vpop.f32.mrf.mxu0 }
 0x8db   :  { %v5602_v54 = vadd.f32 %v5601_v32, %v5588_v46  ;;  %v5615_v12 = vpop.f32.mrf.mxu3  ;;  %v5576_v36 = vadd.f32 %v5575_v51, %v4751_v10  ;;  %v5589_v30 = vpop.f32.mrf.mxu1 }
 0x8dd   :  { %v16889_v38 = vadd.f32 %v5615_v12, %v5602_v54  ;;  %v5590_v48 = vadd.f32 %v5589_v30, %v5576_v36  ;;  %v5765_v54 = vperm.slane %v16895_v34, 1 }
 0x8e2   :  { %v5603_v15 = vpop.f32.mrf.mxu2 }
 0x8e3   :  { %v5604_v42 = vadd.f32 %v5603_v15, %v5590_v48  ;;  %v5617_v0 = vpop.f32.mrf.mxu3 }
 0x8e5   :  { %v16892_v55 = vadd.f32 %v5617_v0, %v5604_v42 }
 0x8f2   :  { %v6421_v40 = vpop.f32.mrf.mxu0 }
 0x8f3   :  { %v6422_v39 = vadd.f32 %v6421_v40, %v5764_v1  ;;  %v6435_v59 = vpop.f32.mrf.mxu1 }
 0x8f5   :  { %v6436_v18 = vadd.f32 %v6435_v59, %v6422_v39 }
 0x8fa   :  { %v6449_v28 = vpop.f32.mrf.mxu2  ;;  %v6423_v4 = vpop.f32.mrf.mxu0 }
 0x8fb   :  { %v6450_v49 = vadd.f32 %v6449_v28, %v6436_v18  ;;  %v6463_v52 = vpop.f32.mrf.mxu3  ;;  %v6424_v57 = vadd.f32 %v6423_v4, %v5764_v1  ;;  %v6437_v56 = vpop.f32.mrf.mxu1 }
 0x8fd   :  { %v16898_v21 = vadd.f32 %v6463_v52, %v6450_v49  ;;  %v6438_v10 = vadd.f32 %v6437_v56, %v6424_v57  ;;  %v5766_v56 = vperm.slane %v16895_v34, 2 }
 0x902   :  { %v6451_v58 = vpop.f32.mrf.mxu2 }
 0x903   :  { %v6452_v14 = vadd.f32 %v6451_v58, %v6438_v10  ;;  %v6465_v44 = vpop.f32.mrf.mxu3 }
 0x905   :  { %v16901_v46 = vadd.f32 %v6465_v44, %v6452_v14 }
 0x912   :  { %v6477_v12 = vpop.f32.mrf.mxu0 }
 0x913   :  { %v6478_v51 = vadd.f32 %v6477_v12, %v5765_v54  ;;  %v6491_v36 = vpop.f32.mrf.mxu1 }
 0x915   :  { %v6492_v30 = vadd.f32 %v6491_v36, %v6478_v51 }
 0x91a   :  { %v6505_v48 = vpop.f32.mrf.mxu2  ;;  %v6479_v1 = vpop.f32.mrf.mxu0 }
 0x91b   :  { %v6506_v15 = vadd.f32 %v6505_v48, %v6492_v30  ;;  %v6519_v42 = vpop.f32.mrf.mxu3  ;;  %v6480_v40 = vadd.f32 %v6479_v1, %v5765_v54  ;;  %v6493_v39 = vpop.f32.mrf.mxu1 }
 0x91d   :  { %v16905_v0 = vadd.f32 %v6519_v42, %v6506_v15  ;;  %v6494_v18 = vadd.f32 %v6493_v39, %v6480_v40 }
 0x922   :  { %v6507_v28 = vpop.f32.mrf.mxu2 }
 0x923   :  { %v6508_v49 = vadd.f32 %v6507_v28, %v6494_v18  ;;  %v6521_v52 = vpop.f32.mrf.mxu3 }
 0x925   :  { %v16908_v4 = vadd.f32 %v6521_v52, %v6508_v49  ;;  %v5767_v52 = vperm.slane %v16895_v34, 3 }
 0x932   :  { %v6533_v10 = vpop.f32.mrf.mxu0 }
 0x933   :  { %v6534_v58 = vadd.f32 %v6533_v10, %v5766_v56  ;;  %v6547_v14 = vpop.f32.mrf.mxu1 }
 0x935   :  { %v6548_v44 = vadd.f32 %v6547_v14, %v6534_v58 }
 0x93a   :  { %v6561_v12 = vpop.f32.mrf.mxu2  ;;  %v6535_v30 = vpop.f32.mrf.mxu0 }
 0x93b   :  { %v6562_v51 = vadd.f32 %v6561_v12, %v6548_v44  ;;  %v6575_v54 = vpop.f32.mrf.mxu3  ;;  %v6536_v48 = vadd.f32 %v6535_v30, %v5766_v56  ;;  %v6549_v15 = vpop.f32.mrf.mxu1 }
 0x93d   :  { %v16912_v36 = vadd.f32 %v6575_v54, %v6562_v51  ;;  %v6550_v1 = vadd.f32 %v6549_v15, %v6536_v48 }
 0x942   :  { %v6563_v40 = vpop.f32.mrf.mxu2 }
 0x943   :  { %v6564_v39 = vadd.f32 %v6563_v40, %v6550_v1  ;;  %v6577_v18 = vpop.f32.mrf.mxu3 }
 0x945   :  { %v16915_v28 = vadd.f32 %v6577_v18, %v6564_v39 }
 0x952   :  { %v6589_v10 = vpop.f32.mrf.mxu0 }
 0x953   :  { %v6590_v58 = vadd.f32 %v6589_v10, %v5767_v52  ;;  %v6603_v14 = vpop.f32.mrf.mxu1 }
 0x955   :  { %v6604_v44 = vadd.f32 %v6603_v14, %v6590_v58 }
 0x95a   :  { %v6617_v12 = vpop.f32.mrf.mxu2  ;;  %v6591_v54 = vpop.f32.mrf.mxu0 }
 0x95b   :  { %v6618_v51 = vadd.f32 %v6617_v12, %v6604_v44  ;;  %v6631_v56 = vpop.f32.mrf.mxu3  ;;  %v6592_v48 = vadd.f32 %v6591_v54, %v5767_v52  ;;  %v6605_v1 = vpop.f32.mrf.mxu1 }
 0x95d   :  { %v16919_v30 = vadd.f32 %v6631_v56, %v6618_v51  ;;  %v6606_v40 = vadd.f32 %v6605_v1, %v6592_v48 }
 0x962   :  { %v6619_v39 = vpop.f32.mrf.mxu2 }
 0x963   :  { %v6620_v18 = vadd.f32 %v6619_v39, %v6606_v40  ;;  %v6633_v49 = vpop.f32.mrf.mxu3 }
 0x965   :  { %v16922_v42 = vadd.f32 %v6633_v49, %v6620_v18 }
 0x966   :  { %16184 = dma.done.wait [#allocation6 + $0x1], 16384 }
 0x967   :  { %16185 = vsyncadd [#allocation6 + $0x1], 4294950912 }
 0x968   :  { %16186 = dma.done.wait [#allocation6 + $0x2], 8192 }
 0x969   :  { %16187 = vsyncadd [#allocation6 + $0x2], 4294959104 }
 0x96a   :  { %16188 = dma.done.wait [#allocation6 + $0x3], 8192 }
 0x96b   :  { %16189 = vsyncadd [#allocation6 + $0x3], 4294959104  ;;  %v13226_v10 = vld [vmem:[#allocation3 + $0xe0] sm:$0xf]  ;;  %v15050_v58 = vld [vmem:[#allocation3 + $0xec] sm:$0xf0] }
 0x96c   :  { %v13354_v52 = vld [vmem:[#allocation3 + $0x1e0] sm:$0xf]  ;;  %v13227_v14 = vor.u32 %v15050_v58, %v13226_v10  ;;  %v15082_v44 = vld [vmem:[#allocation3 + $0x1ec] sm:$0xf0]  ;;  %v15140_v24 = vld [vmem:[#allocation3 + $0x3c4] sm:$0xf] }
 0x96d   :  { %v13482_v12 = vld [vmem:[#allocation3 + $0x2e0] sm:$0xf]  ;;  %v15114_v51 = vld [vmem:[#allocation3 + $0x2ec] sm:$0xf0]  ;;  %v13355_v56 = vor.u32 %v15082_v44, %v13354_v52  ;;  %v13212_v61 = vld [vmem:[#allocation3 + $0xd0] sm:$0xf0] }
 0x96e   :  { %v13483_v54 = vor.u32 %v15114_v51, %v13482_v12  ;;  %v13610_v48 = vld [vmem:[#allocation3 + $0x3e0] sm:$0xf]  ;;  %v15146_v49 = vld [vmem:[#allocation3 + $0x3ec] sm:$0xf0]  ;;  %7447 = vmatpush.bf16.msra.mxu0 %v13227_v14  ;;  %s16228_s20 = smov [#allocation44]   ;;  %s18068_s4 = sld [smem:[#allocation101_spill]] }
 0x96f   :  { %v13210_v1 = vld [vmem:[#allocation3 + $0xc0] sm:$0xf]  ;;  %v13611_v40 = vor.u32 %v15146_v49, %v13610_v48  ;;  %v15046_v39 = vld [vmem:[#allocation3 + $0xcc] sm:$0xf0]  ;;  %7476 = vmatpush.bf16.msrb.mxu1 %v13355_v56  ;;  %s10113_s23 = sshll.u32 %s16228_s20, 4  ;;  %s10114_s23 = int_to_ptr.vmem [resolvable:$true] %s10113_s23 }
 0x970   :  { %v13338_v18 = vld [vmem:[#allocation3 + $0x1c0] sm:$0xf]  ;;  %v15078_v34 = vld [vmem:[#allocation3 + $0x1cc] sm:$0xf0]  ;;  %7505 = vmatpush.bf16.msrb.mxu2 %v13483_v54  ;;  %v13211_v15 = vor.u32 %v15046_v39, %v13210_v1 }
 0x971   :  { %v13339_v57 = vor.u32 %v15078_v34, %v13338_v18  ;;  %v13466_v59 = vld [vmem:[#allocation3 + $0x2c0] sm:$0xf]  ;;  %v15110_v32 = vld [vmem:[#allocation3 + $0x2cc] sm:$0xf0]  ;;  %7534 = vmatpush.bf16.msra.mxu3 %v13611_v40 }
 0x972   :  { %v13594_v10 = vld [vmem:[#allocation3 + $0x3c0] sm:$0xf]  ;;  %v13467_v58 = vor.u32 %v15110_v32, %v13466_v59  ;;  %v15142_v27 = vld [vmem:[#allocation3 + $0x3cc] sm:$0xf0]  ;;  %7448 = vmatpush.bf16.msra.mxu0 %v13211_v15 }
 0x973   :  { %v13194_v52 = vld [vmem:[#allocation3 + $0xa0] sm:$0xf]  ;;  %v15042_v44 = vld [vmem:[#allocation3 + $0xac] sm:$0xf0]  ;;  %v13595_v12 = vor.u32 %v15142_v27, %v13594_v10  ;;  %7477 = vmatpush.bf16.msrb.mxu1 %v13339_v57 }
 0x974   :  { %v13322_v51 = vld [vmem:[#allocation3 + $0x1a0] sm:$0xf]  ;;  %v15074_v41 = vld [vmem:[#allocation3 + $0x1ac] sm:$0xf0]  ;;  %v13195_v48 = vor.u32 %v15042_v44, %v13194_v52  ;;  %7506 = vmatpush.bf16.msrb.mxu2 %v13467_v58  ;;  %s10115_s26 = sshll.u32 %s18068_s4, 4  ;;  %s10116_s26 = int_to_ptr.hbm [resolvable:$true] %s10115_s26 }
 0x975   :  { %v13450_v14 = vld [vmem:[#allocation3 + $0x2a0] sm:$0xf]  ;;  %v15106_v49 = vld [vmem:[#allocation3 + $0x2ac] sm:$0xf0]  ;;  %v13323_v34 = vor.u32 %v15074_v41, %v13322_v51  ;;  %7535 = vmatpush.bf16.msra.mxu3 %v13595_v12 }
 0x976   :  { %v13578_v23 = vld [vmem:[#allocation3 + $0x3a0] sm:$0xf]  ;;  %v15138_v56 = vld [vmem:[#allocation3 + $0x3ac] sm:$0xf0]  ;;  %v13451_v54 = vor.u32 %v15106_v49, %v13450_v14  ;;  %7449 = vmatpush.bf16.msra.mxu0 %v13195_v48 }
 0x977   :  { %v13178_v1 = vld [vmem:[#allocation3 + $0x80] sm:$0xf]  ;;  %v15038_v39 = vld [vmem:[#allocation3 + $0x8c] sm:$0xf0]  ;;  %v13579_v32 = vor.u32 %v15138_v56, %v13578_v23  ;;  %7478 = vmatpush.bf16.msrb.mxu1 %v13323_v34 }
 0x978   :  { %v13306_v40 = vld [vmem:[#allocation3 + $0x180] sm:$0xf]  ;;  %v15070_v59 = vld [vmem:[#allocation3 + $0x18c] sm:$0xf0]  ;;  %v13179_v15 = vor.u32 %v15038_v39, %v13178_v1  ;;  %7507 = vmatpush.bf16.msrb.mxu2 %v13451_v54 }
 0x979   :  { %v13434_v18 = vld [vmem:[#allocation3 + $0x280] sm:$0xf]  ;;  %v15102_v27 = vld [vmem:[#allocation3 + $0x28c] sm:$0xf0]  ;;  %v13307_v52 = vor.u32 %v15070_v59, %v13306_v40  ;;  %7536 = vmatpush.bf16.msra.mxu3 %v13579_v32 }
 0x97a   :  { %v13562_v10 = vld [vmem:[#allocation3 + $0x380] sm:$0xf]  ;;  %v15134_v29 = vld [vmem:[#allocation3 + $0x38c] sm:$0xf0]  ;;  %v13435_v44 = vor.u32 %v15102_v27, %v13434_v18  ;;  %7450 = vmatpush.bf16.msra.mxu0 %v13179_v15 }
 0x97b   :  { %v13162_v57 = vld [vmem:[#allocation3 + $0x60] sm:$0xf]  ;;  %v15034_v58 = vld [vmem:[#allocation3 + $0x6c] sm:$0xf0]  ;;  %v13563_v51 = vor.u32 %v15134_v29, %v13562_v10  ;;  %7479 = vmatpush.bf16.msrb.mxu1 %v13307_v52 }
 0x97c   :  { %v13290_v41 = vld [vmem:[#allocation3 + $0x160] sm:$0xf]  ;;  %v15066_v14 = vld [vmem:[#allocation3 + $0x16c] sm:$0xf0]  ;;  %v13163_v47 = vor.u32 %v15034_v58, %v13162_v57  ;;  %7508 = vmatpush.bf16.msrb.mxu2 %v13435_v44 }
 0x97d   :  { %v13418_v49 = vld [vmem:[#allocation3 + $0x260] sm:$0xf]  ;;  %v15098_v12 = vld [vmem:[#allocation3 + $0x26c] sm:$0xf0]  ;;  %v13291_v48 = vor.u32 %v15066_v14, %v13290_v41  ;;  %7537 = vmatpush.bf16.msra.mxu3 %v13563_v51 }
 0x97e   :  { %v13546_v23 = vld [vmem:[#allocation3 + $0x360] sm:$0xf]  ;;  %v15130_v56 = vld [vmem:[#allocation3 + $0x36c] sm:$0xf0]  ;;  %v13419_v1 = vor.u32 %v15098_v12, %v13418_v49  ;;  %7451 = vmatpush.bf16.msra.mxu0 %v13163_v47 }
 0x97f   :  { %v13146_v34 = vld [vmem:[#allocation3 + $0x40] sm:$0xf]  ;;  %v15030_v54 = vld [vmem:[#allocation3 + $0x4c] sm:$0xf0]  ;;  %v13547_v40 = vor.u32 %v15130_v56, %v13546_v23  ;;  %7480 = vmatpush.bf16.msrb.mxu1 %v13291_v48 }
 0x980   :  { %v13274_v39 = vld [vmem:[#allocation3 + $0x140] sm:$0xf]  ;;  %v15062_v59 = vld [vmem:[#allocation3 + $0x14c] sm:$0xf0]  ;;  %v13147_v10 = vor.u32 %v15030_v54, %v13146_v34  ;;  %7509 = vmatpush.bf16.msrb.mxu2 %v13419_v1 }
 0x981   :  { %v13402_v18 = vld [vmem:[#allocation3 + $0x240] sm:$0xf]  ;;  %v15094_v32 = vld [vmem:[#allocation3 + $0x24c] sm:$0xf0]  ;;  %v13275_v15 = vor.u32 %v15062_v59, %v13274_v39  ;;  %7538 = vmatpush.bf16.msra.mxu3 %v13547_v40 }
 0x982   :  { %v13530_v29 = vld [vmem:[#allocation3 + $0x340] sm:$0xf]  ;;  %v15126_v27 = vld [vmem:[#allocation3 + $0x34c] sm:$0xf0]  ;;  %v13403_v57 = vor.u32 %v15094_v32, %v13402_v18  ;;  %7452 = vmatpush.bf16.msra.mxu0 %v13147_v10  ;;  %v15144_v10 = vld [vmem:[#allocation3 + $0x3e4] sm:$0xf] }
 0x983   :  { %v13130_v52 = vld [vmem:[#allocation3 + $0x20] sm:$0xf]  ;;  %v15026_v44 = vld [vmem:[#allocation3 + $0x2c] sm:$0xf0]  ;;  %v13531_v41 = vor.u32 %v15126_v27, %v13530_v29  ;;  %7481 = vmatpush.bf16.msrb.mxu1 %v13275_v15  ;;  %v15112_v29 = vld [vmem:[#allocation3 + $0x2e4] sm:$0xf] }
 0x984   :  { %v13258_v58 = vld [vmem:[#allocation3 + $0x120] sm:$0xf]  ;;  %v15058_v14 = vld [vmem:[#allocation3 + $0x12c] sm:$0xf0]  ;;  %v13131_v56 = vor.u32 %v15026_v44, %v13130_v52  ;;  %7510 = vmatpush.bf16.msrb.mxu2 %v13403_v57  ;;  %v13484_v27 = vld [vmem:[#allocation3 + $0x2f0] sm:$0xf0] }
 0x985   :  { %v13386_v49 = vld [vmem:[#allocation3 + $0x220] sm:$0xf]  ;;  %v15090_v51 = vld [vmem:[#allocation3 + $0x22c] sm:$0xf0]  ;;  %v13259_v47 = vor.u32 %v15058_v14, %v13258_v58  ;;  %7539 = vmatpush.bf16.msra.mxu3 %v13531_v41  ;;  %v13612_v52 = vld [vmem:[#allocation3 + $0x3f0] sm:$0xf0]  ;;  %v13487_v58 = vor.u32 %v15112_v29, %v13484_v27 }
 0x986   :  { %v13514_v12 = vld [vmem:[#allocation3 + $0x320] sm:$0xf]  ;;  %v15122_v23 = vld [vmem:[#allocation3 + $0x32c] sm:$0xf0]  ;;  %v13387_v48 = vor.u32 %v15090_v51, %v13386_v49  ;;  %7453 = vmatpush.bf16.msra.mxu0 %v13131_v56  ;;  %v15048_v14 = vld [vmem:[#allocation3 + $0xe4] sm:$0xf]  ;;  %v16929_v51 = vpack.c.bf16 %v3592_v19, %v3588_v62 }
 0x987   :  { %v13114_v31 = vld [vmem:[#allocation3] sm:$0xf]  ;;  %v15022_v1 = vld [vmem:[#allocation3 + $0xc] sm:$0xf0]  ;;  %v13515_v39 = vor.u32 %v15122_v23, %v13514_v12  ;;  %7482 = vmatpush.bf16.msrb.mxu1 %v13259_v47  ;;  %v13228_v41 = vld [vmem:[#allocation3 + $0xf0] sm:$0xf0]  ;;  %v13615_v12 = vor.u32 %v15144_v10, %v13612_v52  ;;  %v16935_v47 = vpack.c.bf16 %v3593_v6, %v3589_v7 }
 0x988   :  { %v13242_v34 = vld [vmem:[#allocation3 + $0x100] sm:$0xf]  ;;  %v15054_v54 = vld [vmem:[#allocation3 + $0x10c] sm:$0xf0]  ;;  %v13115_v25 = vor.u32 %v15022_v1, %v13114_v31  ;;  %7511 = vmatpush.bf16.msrb.mxu2 %v13387_v48  ;;  %v15080_v49 = vld [vmem:[#allocation3 + $0x1e4] sm:$0xf]  ;;  %v13231_v26 = vor.u32 %v15048_v14, %v13228_v41 }
 0x989   :  { %v13370_v59 = vld [vmem:[#allocation3 + $0x200] sm:$0xf]  ;;  %v15086_v40 = vld [vmem:[#allocation3 + $0x20c] sm:$0xf0]  ;;  %v13243_v15 = vor.u32 %v15054_v54, %v13242_v34  ;;  %7540 = vmatpush.bf16.msra.mxu3 %v13515_v39  ;;  %v13356_v31 = vld [vmem:[#allocation3 + $0x1f0] sm:$0xf0] }
 0x98a   :  { %v13498_v18 = vld [vmem:[#allocation3 + $0x300] sm:$0xf]  ;;  %v15118_v32 = vld [vmem:[#allocation3 + $0x30c] sm:$0xf0]  ;;  %v13371_v57 = vor.u32 %v15086_v40, %v13370_v59  ;;  %v15108_v23 = vld [vmem:[#allocation3 + $0x2c4] sm:$0xf]  ;;  %7454 = vmatpush.bf16.msra.mxu0 %v13115_v25  ;;  %v13359_v7 = vor.u32 %v15080_v49, %v13356_v31 }
 0x98b   :  { %v13499_v44 = vor.u32 %v15118_v32, %v13498_v18  ;;  %v13468_v56 = vld [vmem:[#allocation3 + $0x2d0] sm:$0xf0]  ;;  %v17975_v48 = vmax.f32 %v16741_v20, 0.0  ;;  %7483 = vmatpush.bf16.msrb.mxu1 %v13243_v15  ;;  %v17976_v19 = vmax.f32 %v16749_v45, 0.0  ;;  %v17977_v25 = vmax.f32 %v16752_v17, 0.0 }
 0x98c   :  { %v13596_v62 = vld [vmem:[#allocation3 + $0x3d0] sm:$0xf0]  ;;  %7512 = vmatpush.bf16.msrb.mxu2 %v13371_v57  ;;  %v13471_v50 = vor.u32 %v15108_v23, %v13468_v56  ;;  %v15044_v6 = vld [vmem:[#allocation3 + $0xc4] sm:$0xf] }
 0x98d   :  { %v16941_v16 = vpack.c.bf16 %v17975_v48, %v3590_v37  ;;  %v16947_v1 = vpack.c.bf16 %v17977_v25, %v17976_v19  ;;  %7541 = vmatpush.bf16.msra.mxu3 %v13499_v44  ;;  %v15076_v20 = vld [vmem:[#allocation3 + $0x1c4] sm:$0xf]  ;;  %7455 = vmatmul.bf16.vlgmr.msra.gmra.mxu0 %v16929_v51  ;;  %v13599_v37 = vor.u32 %v15140_v24, %v13596_v62  ;;  %v13340_v34 = vld [vmem:[#allocation3 + $0x1d0] sm:$0xf0] }
 0x98e   :  { %v15104_v54 = vld [vmem:[#allocation3 + $0x2a4] sm:$0xf]  ;;  %v13452_v39 = vld [vmem:[#allocation3 + $0x2b0] sm:$0xf0]  ;;  %7484 = vmatmul.bf16.vlgmr.msrb.gmra.mxu1 %v16935_v47  ;;  %7563 = vmatpush.bf16.msrb.mxu0 %v13231_v26  ;;  %v13215_v59 = vor.u32 %v15044_v6, %v13212_v61  ;;  %v13343_v40 = vor.u32 %v15076_v20, %v13340_v34  ;;  %v17979_v34 = vmax.f32 %v16789_v8, 0.0 }
 0x98f   :  { %7513 = vmatmul.bf16.vlgmr.msrb.gmra.mxu2 %v16941_v16  ;;  %v15136_v45 = vld [vmem:[#allocation3 + $0x3a4] sm:$0xf]  ;;  %v13580_v17 = vld [vmem:[#allocation3 + $0x3b0] sm:$0xf0]  ;;  %7592 = vmatpush.bf16.msra.mxu1 %v13359_v7  ;;  %v13455_v18 = vor.u32 %v15104_v54, %v13452_v39 }
 0x990   :  { %7621 = vmatpush.bf16.msra.mxu2 %v13487_v58  ;;  %7542 = vmatmul.bf16.vlgmr.msra.gmra.mxu3 %v16947_v1  ;;  %v15040_v32 = vld [vmem:[#allocation3 + $0xa4] sm:$0xf]  ;;  %v13196_v29 = vld [vmem:[#allocation3 + $0xb0] sm:$0xf0]  ;;  %v13583_v10 = vor.u32 %v15136_v45, %v13580_v17 }
 0x991   :  { %7650 = vmatpush.bf16.msrb.mxu3 %v13615_v12  ;;  %v15072_v27 = vld [vmem:[#allocation3 + $0x1a4] sm:$0xf]  ;;  %v13324_v52 = vld [vmem:[#allocation3 + $0x1b0] sm:$0xf0]  ;;  %v13199_v14 = vor.u32 %v15040_v32, %v13196_v29  ;;  %v17982_v29 = vmax.f32 %v16808_v43, 0.0 }
 0x992   :  { %v15100_v15 = vld [vmem:[#allocation3 + $0x284] sm:$0xf]  ;;  %v13436_v57 = vld [vmem:[#allocation3 + $0x290] sm:$0xf0]  ;;  %7564 = vmatpush.bf16.msrb.mxu0 %v13215_v59  ;;  %v13327_v41 = vor.u32 %v15072_v27, %v13324_v52  ;;  %v17983_v27 = vmax.f32 %v16811_v2, 0.0  ;;  %v17984_v52 = vmax.f32 %v16819_v63, 0.0 }
 0x993   :  { %v15132_v44 = vld [vmem:[#allocation3 + $0x384] sm:$0xf]  ;;  %v13564_v58 = vld [vmem:[#allocation3 + $0x390] sm:$0xf0]  ;;  %7593 = vmatpush.bf16.msra.mxu1 %v13343_v40  ;;  %v13439_v49 = vor.u32 %v15100_v15, %v13436_v57  ;;  %v17980_v40 = vmax.f32 %v16797_v13, 0.0  ;;  %v17985_v15 = vmax.f32 %v16822_v60, 0.0 }
 0x994   :  { %7622 = vmatpush.bf16.msra.mxu2 %v13471_v50  ;;  %v15036_v12 = vld [vmem:[#allocation3 + $0x84] sm:$0xf]  ;;  %v13180_v31 = vld [vmem:[#allocation3 + $0x90] sm:$0xf0]  ;;  %v13567_v56 = vor.u32 %v15132_v44, %v13564_v58 }
 0x995   :  { %7651 = vmatpush.bf16.msrb.mxu3 %v13599_v37  ;;  %v15068_v23 = vld [vmem:[#allocation3 + $0x184] sm:$0xf]  ;;  %v13308_v48 = vld [vmem:[#allocation3 + $0x190] sm:$0xf0]  ;;  %v13183_v26 = vor.u32 %v15036_v12, %v13180_v31  ;;  %v17978_v37 = vmax.f32 %v16786_v22, 0.0  ;;  %v16969_v22 = vpack.c.bf16 %v17983_v27, %v17982_v29  ;;  %v16975_v57 = vpack.c.bf16 %v17985_v15, %v17984_v52 }
 0x996   :  { %v15096_v24 = vld [vmem:[#allocation3 + $0x264] sm:$0xf]  ;;  %v13420_v62 = vld [vmem:[#allocation3 + $0x270] sm:$0xf0]  ;;  %7565 = vmatpush.bf16.msrb.mxu0 %v13199_v14  ;;  %v13311_v7 = vor.u32 %v15068_v23, %v13308_v48  ;;  %v17986_v29 = vmax.f32 %v16856_v3, 0.0  ;;  %v17987_v27 = vmax.f32 %v16859_v9, 0.0 }
 0x997   :  { %v15128_v19 = vld [vmem:[#allocation3 + $0x364] sm:$0xf]  ;;  %v13548_v25 = vld [vmem:[#allocation3 + $0x370] sm:$0xf0]  ;;  %7594 = vmatpush.bf16.msra.mxu1 %v13327_v41  ;;  %v13423_v50 = vor.u32 %v15096_v24, %v13420_v62  ;;  %v16957_v54 = vpack.c.bf16 %v17979_v34, %v17978_v37  ;;  %v17989_v52 = vmax.f32 %v16870_v11, 0.0  ;;  %v17993_v3 = vmax.f32 %v16892_v55, 0.0 }
 0x998   :  { %7623 = vmatpush.bf16.msra.mxu2 %v13455_v18  ;;  %v15032_v6 = vld [vmem:[#allocation3 + $0x64] sm:$0xf]  ;;  %v13164_v61 = vld [vmem:[#allocation3 + $0x70] sm:$0xf0]  ;;  %v13551_v39 = vor.u32 %v15128_v19, %v13548_v25  ;;  %v17981_v18 = vmax.f32 %v16800_v35, 0.0 }
 0x999   :  { %7652 = vmatpush.bf16.msrb.mxu3 %v13583_v10  ;;  %v15064_v20 = vld [vmem:[#allocation3 + $0x164] sm:$0xf]  ;;  %v13292_v45 = vld [vmem:[#allocation3 + $0x170] sm:$0xf0]  ;;  %v13167_v13 = vor.u32 %v15032_v6, %v13164_v61  ;;  %v15115_v11 = vld [vmem:[#allocation3 + $0x2f4] sm:$0xf0] }
 0x99a   :  { %v15092_v17 = vld [vmem:[#allocation3 + $0x244] sm:$0xf]  ;;  %v13404_v59 = vld [vmem:[#allocation3 + $0x250] sm:$0xf0]  ;;  %v16963_v32 = vpack.c.bf16 %v17981_v18, %v17980_v40  ;;  %7566 = vmatpush.bf16.msrb.mxu0 %v13183_v26  ;;  %v13295_v35 = vor.u32 %v15064_v20, %v13292_v45 }
 0x99b   :  { %v15124_v8 = vld [vmem:[#allocation3 + $0x344] sm:$0xf]  ;;  %v13532_v10 = vld [vmem:[#allocation3 + $0x350] sm:$0xf0]  ;;  %7595 = vmatpush.bf16.msra.mxu1 %v13311_v7  ;;  %v13407_v44 = vor.u32 %v15092_v17, %v13404_v59 }
 0x99c   :  { %7624 = vmatpush.bf16.msra.mxu2 %v13439_v49  ;;  %v15028_v58 = vld [vmem:[#allocation3 + $0x44] sm:$0xf]  ;;  %v13148_v43 = vld [vmem:[#allocation3 + $0x50] sm:$0xf0]  ;;  %v13535_v2 = vor.u32 %v15124_v8, %v13532_v10  ;;  %v16985_v8 = vpack.c.bf16 %v17987_v27, %v17986_v29  ;;  %v17988_v10 = vmax.f32 %v16867_v53, 0.0 }
 0x99d   :  { %7653 = vmatpush.bf16.msrb.mxu3 %v13567_v56  ;;  %7460 = vmatmul.bf16.gmra.mxu0 %v16957_v54  ;;  %v15060_v14 = vld [vmem:[#allocation3 + $0x144] sm:$0xf]  ;;  %v13276_v41 = vld [vmem:[#allocation3 + $0x150] sm:$0xf0]  ;;  %v13151_v63 = vor.u32 %v15028_v58, %v13148_v43  ;;  %v17992_v58 = vmax.f32 %v16889_v38, 0.0 }
 0x99e   :  { %7489 = vmatmul.bf16.gmra.mxu1 %v16963_v32  ;;  %7567 = vmatpush.bf16.msrb.mxu0 %v13167_v13  ;;  %v15088_v60 = vld [vmem:[#allocation3 + $0x224] sm:$0xf]  ;;  %v13388_v49 = vld [vmem:[#allocation3 + $0x230] sm:$0xf0]  ;;  %v13279_v31 = vor.u32 %v15060_v14, %v13276_v41  ;;  %v16991_v15 = vpack.c.bf16 %v17989_v52, %v17988_v10  ;;  %v17990_v13 = vmax.f32 %v16878_v33, 0.0 }
 0x99f   :  { %7518 = vmatmul.bf16.gmra.mxu2 %v16969_v22  ;;  %v15024_v12 = vld [vmem:[#allocation3 + $0x24] sm:$0xf]  ;;  %7596 = vmatpush.bf16.msra.mxu1 %v13295_v35  ;;  %v13391_v23 = vor.u32 %v15088_v60, %v13388_v49  ;;  %v13132_v56 = vld [vmem:[#allocation3 + $0x30] sm:$0xf0]  ;;  %v17991_v35 = vmax.f32 %v16881_v5, 0.0  ;;  %v17003_v9 = vpack.c.bf16 %v17993_v3, %v17992_v58 }
 0x9a0   :  { %7625 = vmatpush.bf16.msra.mxu2 %v13423_v50  ;;  %7547 = vmatmul.bf16.gmra.mxu3 %v16975_v57  ;;  %v15120_v48 = vld [vmem:[#allocation3 + $0x324] sm:$0xf]  ;;  %v13516_v24 = vld [vmem:[#allocation3 + $0x330] sm:$0xf0]  ;;  %v13135_v50 = vor.u32 %v15024_v12, %v13132_v56  ;;  %v13490_v53 = vld [vmem:[#allocation3 + $0x2e8] sm:$0xf] }
 0x9a1   :  { %7654 = vmatpush.bf16.msrb.mxu3 %v13551_v39  ;;  %v13519_v62 = vor.u32 %v15120_v48, %v13516_v24  ;;  %v15056_v19 = vld [vmem:[#allocation3 + $0x124] sm:$0xf]  ;;  %v13260_v25 = vld [vmem:[#allocation3 + $0x130] sm:$0xf0]  ;;  %v13234_v33 = vld [vmem:[#allocation3 + $0xe8] sm:$0xf]  ;;  %v13491_v5 = vor.u32 %v15115_v11, %v13490_v53 }
 0x9a2   :  { %v15084_v26 = vld [vmem:[#allocation3 + $0x204] sm:$0xf]  ;;  %v13372_v7 = vld [vmem:[#allocation3 + $0x210] sm:$0xf0]  ;;  %7568 = vmatpush.bf16.msrb.mxu0 %v13151_v63  ;;  %v13263_v20 = vor.u32 %v15056_v19, %v13260_v25  ;;  %v15051_v43 = vld [vmem:[#allocation3 + $0xf4] sm:$0xf0] }
 0x9a3   :  { %v15116_v6 = vld [vmem:[#allocation3 + $0x304] sm:$0xf]  ;;  %v13500_v61 = vld [vmem:[#allocation3 + $0x310] sm:$0xf0]  ;;  %7597 = vmatpush.bf16.msra.mxu1 %v13279_v31  ;;  %v13375_v37 = vor.u32 %v15084_v26, %v13372_v7  ;;  %v13618_v38 = vld [vmem:[#allocation3 + $0x3e8] sm:$0xf]  ;;  %v13235_v55 = vor.u32 %v15051_v43, %v13234_v33 }
 0x9a4   :  { %7626 = vmatpush.bf16.msra.mxu2 %v13407_v44  ;;  %v15020_v34 = vld [vmem:[#allocation3 + $0x4] sm:$0xf]  ;;  %v13116_v39 = vld [vmem:[#allocation3 + $0x10] sm:$0xf0]  ;;  %v13503_v45 = vor.u32 %v15116_v6, %v13500_v61  ;;  %v16997_v44 = vpack.c.bf16 %v17991_v35, %v17990_v13  ;;  %v13362_v41 = vld [vmem:[#allocation3 + $0x1e8] sm:$0xf] }
 0x9a5   :  { %7655 = vmatpush.bf16.msrb.mxu3 %v13535_v2  ;;  %v15052_v17 = vld [vmem:[#allocation3 + $0x104] sm:$0xf]  ;;  %v13244_v59 = vld [vmem:[#allocation3 + $0x110] sm:$0xf0]  ;;  %v13119_v40 = vor.u32 %v15020_v34, %v13116_v39  ;;  %v15147_v2 = vld [vmem:[#allocation3 + $0x3f4] sm:$0xf0] }
 0x9a6   :  { %7569 = vmatpush.bf16.msrb.mxu0 %v13135_v50  ;;  %v13247_v18 = vor.u32 %v15052_v17, %v13244_v59  ;;  %v13619_v14 = vor.u32 %v15147_v2, %v13618_v38  ;;  %v15083_v63 = vld [vmem:[#allocation3 + $0x1f4] sm:$0xf0]  ;;  %v13474_v60 = vld [vmem:[#allocation3 + $0x2c8] sm:$0xf]  ;;  %v17994_v50 = vmax.f32 %v16898_v21, 0.0  ;;  %v17995_v6 = vmax.f32 %v16901_v46, 0.0 }
 0x9a7   :  { %7598 = vmatpush.bf16.msra.mxu1 %v13263_v20  ;;  %v13363_v49 = vor.u32 %v15083_v63, %v13362_v41  ;;  %v15111_v12 = vld [vmem:[#allocation3 + $0x2d4] sm:$0xf0]  ;;  %v13218_v31 = vld [vmem:[#allocation3 + $0xc8] sm:$0xf]  ;;  %v17996_v20 = vmax.f32 %v16905_v0, 0.0  ;;  %v17998_v39 = vmax.f32 %v16912_v36, 0.0 }
 0x9a8   :  { %7627 = vmatpush.bf16.msra.mxu2 %v13391_v23  ;;  %v15047_v23 = vld [vmem:[#allocation3 + $0xd4] sm:$0xf0]  ;;  %v13475_v56 = vor.u32 %v15111_v12, %v13474_v60  ;;  %v13602_v24 = vld [vmem:[#allocation3 + $0x3c8] sm:$0xf]  ;;  %v17013_v61 = vpack.c.bf16 %v17995_v6, %v17994_v50  ;;  %v18000_v59 = vmax.f32 %v16919_v30, 0.0  ;;  %v18001_v21 = vmax.f32 %v16922_v42, 0.0 }
 0x9a9   :  { %7656 = vmatpush.bf16.msrb.mxu3 %v13519_v62  ;;  %v13219_v48 = vor.u32 %v15047_v23, %v13218_v31  ;;  %v15143_v62 = vld [vmem:[#allocation3 + $0x3d4] sm:$0xf0]  ;;  %v13346_v19 = vld [vmem:[#allocation3 + $0x1c8] sm:$0xf] }
 0x9aa   :  { %7570 = vmatpush.bf16.msrb.mxu0 %v13119_v40  ;;  %v13603_v25 = vor.u32 %v15143_v62, %v13602_v24  ;;  %v15079_v26 = vld [vmem:[#allocation3 + $0x1d4] sm:$0xf0]  ;;  %v17031_v40 = vpack.c.bf16 %v18001_v21, %v18000_v59  ;;  %v13458_v46 = vld [vmem:[#allocation3 + $0x2a8] sm:$0xf] }
 0x9ab   :  { %7599 = vmatpush.bf16.msra.mxu1 %v13247_v18  ;;  %v13347_v7 = vor.u32 %v15079_v26, %v13346_v19  ;;  %v15107_v0 = vld [vmem:[#allocation3 + $0x2b4] sm:$0xf0]  ;;  %v13586_v18 = vld [vmem:[#allocation3 + $0x3a8] sm:$0xf] }
 0x9ac   :  { %7628 = vmatpush.bf16.msra.mxu2 %v13375_v37  ;;  %v17997_v37 = vmax.f32 %v16908_v4, 0.0  ;;  %v13202_v4 = vld [vmem:[#allocation3 + $0xa8] sm:$0xf]  ;;  %v13459_v36 = vor.u32 %v15107_v0, %v13458_v46  ;;  %v15139_v29 = vld [vmem:[#allocation3 + $0x3b4] sm:$0xf0] }
 0x9ad   :  { %7657 = vmatpush.bf16.msrb.mxu3 %v13503_v45  ;;  %7465 = vmatmul.bf16.gmra.mxu0 %v16985_v8  ;;  %v17999_v45 = vmax.f32 %v16915_v28, 0.0  ;;  %v15043_v28 = vld [vmem:[#allocation3 + $0xb4] sm:$0xf0]  ;;  %v13587_v27 = vor.u32 %v15139_v29, %v13586_v18  ;;  %v13330_v42 = vld [vmem:[#allocation3 + $0x1a8] sm:$0xf] }
 0x9ae   :  { %7494 = vmatmul.bf16.gmra.mxu1 %v16991_v15  ;;  %7679 = vmatpush.bf16.msra.mxu0 %v13235_v55  ;;  %v17019_v34 = vpack.c.bf16 %v17997_v37, %v17996_v20  ;;  %v13203_v30 = vor.u32 %v15043_v28, %v13202_v4  ;;  %v15075_v10 = vld [vmem:[#allocation3 + $0x1b4] sm:$0xf0]  ;;  %v13442_v52 = vld [vmem:[#allocation3 + $0x288] sm:$0xf] }
 0x9af   :  { %7523 = vmatmul.bf16.gmra.mxu2 %v16997_v44  ;;  %7708 = vmatpush.bf16.msrb.mxu1 %v13363_v49  ;;  %v17025_v17 = vpack.c.bf16 %v17999_v45, %v17998_v39  ;;  %v13331_v13 = vor.u32 %v15075_v10, %v13330_v42  ;;  %v15103_v35 = vld [vmem:[#allocation3 + $0x294] sm:$0xf0]  ;;  %v13186_v58 = vld [vmem:[#allocation3 + $0x88] sm:$0xf] }
 0x9b0   :  { %7552 = vmatmul.bf16.gmra.mxu3 %v17003_v9  ;;  %7737 = vmatpush.bf16.msrb.mxu2 %v13491_v5  ;;  %v15039_v3 = vld [vmem:[#allocation3 + $0x94] sm:$0xf0]  ;;  %v13443_v53 = vor.u32 %v15103_v35, %v13442_v52  ;;  %v13570_v33 = vld [vmem:[#allocation3 + $0x388] sm:$0xf] }
 0x9b1   :  { %7766 = vmatpush.bf16.msra.mxu3 %v13619_v14  ;;  %v13187_v11 = vor.u32 %v15039_v3, %v13186_v58  ;;  %v15135_v5 = vld [vmem:[#allocation3 + $0x394] sm:$0xf0]  ;;  %v13314_v43 = vld [vmem:[#allocation3 + $0x188] sm:$0xf] }
 0x9b2   :  { %7680 = vmatpush.bf16.msra.mxu0 %v13219_v48  ;;  %v13571_v38 = vor.u32 %v15135_v5, %v13570_v33  ;;  %v15071_v2 = vld [vmem:[#allocation3 + $0x194] sm:$0xf0]  ;;  %v13426_v14 = vld [vmem:[#allocation3 + $0x268] sm:$0xf] }
 0x9b3   :  { %7709 = vmatpush.bf16.msrb.mxu1 %v13347_v7  ;;  %v13315_v55 = vor.u32 %v15071_v2, %v13314_v43  ;;  %v15099_v41 = vld [vmem:[#allocation3 + $0x274] sm:$0xf0]  ;;  %v13170_v63 = vld [vmem:[#allocation3 + $0x68] sm:$0xf] }
 0x9b4   :  { %7738 = vmatpush.bf16.msrb.mxu2 %v13475_v56  ;;  %v13427_v60 = vor.u32 %v15099_v41, %v13426_v14  ;;  %v15035_v49 = vld [vmem:[#allocation3 + $0x74] sm:$0xf0]  ;;  %v13554_v12 = vld [vmem:[#allocation3 + $0x368] sm:$0xf]  ;;  %v15113_v14 = vld [vmem:[#allocation3 + $0x2ec] sm:$0xf] }
 0x9b5   :  { %7767 = vmatpush.bf16.msra.mxu3 %v13603_v25  ;;  %v15131_v31 = vld [vmem:[#allocation3 + $0x374] sm:$0xf0]  ;;  %v13171_v23 = vor.u32 %v15035_v49, %v13170_v63  ;;  %v13298_v48 = vld [vmem:[#allocation3 + $0x168] sm:$0xf]  ;;  %v13492_v41 = vld [vmem:[#allocation3 + $0x2f8] sm:$0xf0] }
 0x9b6   :  { %7681 = vmatpush.bf16.msra.mxu0 %v13203_v30  ;;  %v13555_v56 = vor.u32 %v15131_v31, %v13554_v12  ;;  %v15067_v24 = vld [vmem:[#allocation3 + $0x174] sm:$0xf0]  ;;  %v13410_v62 = vld [vmem:[#allocation3 + $0x248] sm:$0xf]  ;;  %v15049_v63 = vld [vmem:[#allocation3 + $0xec] sm:$0xf] }
 0x9b7   :  { %7710 = vmatpush.bf16.msrb.mxu1 %v13331_v13  ;;  %v13299_v19 = vor.u32 %v15067_v24, %v13298_v48  ;;  %v15095_v25 = vld [vmem:[#allocation3 + $0x254] sm:$0xf0]  ;;  %v13154_v26 = vld [vmem:[#allocation3 + $0x48] sm:$0xf]  ;;  %v13236_v49 = vld [vmem:[#allocation3 + $0xf8] sm:$0xf0] }
 0x9b8   :  { %7739 = vmatpush.bf16.msrb.mxu2 %v13459_v36  ;;  %v15031_v7 = vld [vmem:[#allocation3 + $0x54] sm:$0xf0]  ;;  %v13411_v50 = vor.u32 %v15095_v25, %v13410_v62  ;;  %v13538_v20 = vld [vmem:[#allocation3 + $0x348] sm:$0xf]  ;;  %v15145_v12 = vld [vmem:[#allocation3 + $0x3ec] sm:$0xf] }
 0x9b9   :  { %7768 = vmatpush.bf16.msra.mxu3 %v13587_v27  ;;  %v13155_v6 = vor.u32 %v15031_v7, %v13154_v26  ;;  %v15127_v37 = vld [vmem:[#allocation3 + $0x354] sm:$0xf0]  ;;  %v13282_v39 = vld [vmem:[#allocation3 + $0x148] sm:$0xf]  ;;  %v13620_v31 = vld [vmem:[#allocation3 + $0x3f8] sm:$0xf0] }
 0x9ba   :  { %7682 = vmatpush.bf16.msra.mxu0 %v13187_v11  ;;  %v13539_v45 = vor.u32 %v15127_v37, %v13538_v20  ;;  %v15063_v59 = vld [vmem:[#allocation3 + $0x154] sm:$0xf0]  ;;  %v13394_v46 = vld [vmem:[#allocation3 + $0x228] sm:$0xf]  ;;  %v15081_v48 = vld [vmem:[#allocation3 + $0x1ec] sm:$0xf] }
 0x9bb   :  { %7711 = vmatpush.bf16.msrb.mxu1 %v13315_v55  ;;  %v13283_v21 = vor.u32 %v15063_v59, %v13282_v39  ;;  %v15091_v0 = vld [vmem:[#allocation3 + $0x234] sm:$0xf0]  ;;  %v13138_v4 = vld [vmem:[#allocation3 + $0x28] sm:$0xf]  ;;  %v13364_v24 = vld [vmem:[#allocation3 + $0x1f8] sm:$0xf0] }
 0x9bc   :  { %7740 = vmatpush.bf16.msrb.mxu2 %v13443_v53  ;;  %v13395_v36 = vor.u32 %v15091_v0, %v13394_v46  ;;  %v15027_v28 = vld [vmem:[#allocation3 + $0x34] sm:$0xf0]  ;;  %v13522_v18 = vld [vmem:[#allocation3 + $0x328] sm:$0xf]  ;;  %v15109_v62 = vld [vmem:[#allocation3 + $0x2cc] sm:$0xf] }
 0x9bd   :  { %7470 = vmatmul.bf16.gmra.mxu0 %v17013_v61  ;;  %7769 = vmatpush.bf16.msra.mxu3 %v13571_v38  ;;  %v15123_v29 = vld [vmem:[#allocation3 + $0x334] sm:$0xf0]  ;;  %v13139_v30 = vor.u32 %v15027_v28, %v13138_v4  ;;  %v13266_v42 = vld [vmem:[#allocation3 + $0x128] sm:$0xf]  ;;  %v13476_v25 = vld [vmem:[#allocation3 + $0x2d8] sm:$0xf0] }
 0x9be   :  { %7499 = vmatmul.bf16.gmra.mxu1 %v17019_v34  ;;  %7683 = vmatpush.bf16.msra.mxu0 %v13171_v23  ;;  %v13523_v27 = vor.u32 %v15123_v29, %v13522_v18  ;;  %v15059_v10 = vld [vmem:[#allocation3 + $0x134] sm:$0xf0]  ;;  %v13378_v52 = vld [vmem:[#allocation3 + $0x208] sm:$0xf]  ;;  %v13239_v23 = vor.u32 %v15049_v63, %v13236_v49  ;;  %v15045_v26 = vld [vmem:[#allocation3 + $0xcc] sm:$0xf] }
 0x9bf   :  { %7528 = vmatmul.bf16.gmra.mxu2 %v17025_v17  ;;  %7712 = vmatpush.bf16.msrb.mxu1 %v13299_v19  ;;  %v13267_v13 = vor.u32 %v15059_v10, %v13266_v42  ;;  %v15087_v35 = vld [vmem:[#allocation3 + $0x214] sm:$0xf0]  ;;  %v13122_v58 = vld [vmem:[#allocation3 + $0x8] sm:$0xf]  ;;  %v13367_v19 = vor.u32 %v15081_v48, %v13364_v24  ;;  %v13220_v7 = vld [vmem:[#allocation3 + $0xd8] sm:$0xf0] }
 0x9c0   :  { %7557 = vmatmul.bf16.gmra.mxu3 %v17031_v40  ;;  %7741 = vmatpush.bf16.msrb.mxu2 %v13427_v60  ;;  %v15023_v3 = vld [vmem:[#allocation3 + $0x14] sm:$0xf0]  ;;  %v13379_v53 = vor.u32 %v15087_v35, %v13378_v52  ;;  %v13506_v33 = vld [vmem:[#allocation3 + $0x308] sm:$0xf]  ;;  %v13495_v60 = vor.u32 %v15113_v14, %v13492_v41  ;;  %v15141_v20 = vld [vmem:[#allocation3 + $0x3cc] sm:$0xf] }
 0x9c1   :  { %7770 = vmatpush.bf16.msra.mxu3 %v13555_v56  ;;  %v13123_v11 = vor.u32 %v15023_v3, %v13122_v58  ;;  %v15119_v5 = vld [vmem:[#allocation3 + $0x314] sm:$0xf0]  ;;  %v13250_v43 = vld [vmem:[#allocation3 + $0x108] sm:$0xf]  ;;  %v13623_v56 = vor.u32 %v15145_v12, %v13620_v31  ;;  %v13604_v37 = vld [vmem:[#allocation3 + $0x3d8] sm:$0xf0] }
 0x9c2   :  { %7684 = vmatpush.bf16.msra.mxu0 %v13155_v6  ;;  %v13507_v38 = vor.u32 %v15119_v5, %v13506_v33  ;;  %v15055_v2 = vld [vmem:[#allocation3 + $0x114] sm:$0xf0]  ;;  %v13223_v6 = vor.u32 %v15045_v26, %v13220_v7  ;;  %v13607_v39 = vor.u32 %v15141_v20, %v13604_v37  ;;  %v13348_v59 = vld [vmem:[#allocation3 + $0x1d8] sm:$0xf0]  ;;  %v15041_v4 = vld [vmem:[#allocation3 + $0xac] sm:$0xf] }
 0x9c3   :  { %7713 = vmatpush.bf16.msrb.mxu1 %v13283_v21  ;;  %v13251_v55 = vor.u32 %v15055_v2, %v13250_v43  ;;  %v15105_v21 = vld [vmem:[#allocation3 + $0x2ac] sm:$0xf]  ;;  %v13460_v0 = vld [vmem:[#allocation3 + $0x2b8] sm:$0xf0]  ;;  %v17053_v28 = vld [vmem:[#allocation35] sm:$0xf] }
 0x9c4   :  { %7742 = vmatpush.bf16.msrb.mxu2 %v13411_v50  ;;  %v13479_v50 = vor.u32 %v15109_v62, %v13476_v25  ;;  %v13463_v18 = vor.u32 %v15105_v21, %v13460_v0  ;;  %v17056_v10 = vperm.slane %v17053_v28, 0  ;;  %v15073_v52 = vld [vmem:[#allocation3 + $0x1ac] sm:$0xf]  ;;  %v13444_v3 = vld [vmem:[#allocation3 + $0x298] sm:$0xf0] }
 0x9c5   :  { %7771 = vmatpush.bf16.msra.mxu3 %v13539_v45  ;;  %v15077_v45 = vld [vmem:[#allocation3 + $0x1cc] sm:$0xf]  ;;  %v13316_v49 = vld [vmem:[#allocation3 + $0x198] sm:$0xf0] }
 0x9c6   :  { %7685 = vmatpush.bf16.msra.mxu0 %v13139_v30  ;;  %v13351_v46 = vor.u32 %v15077_v45, %v13348_v59  ;;  %v15137_v30 = vld [vmem:[#allocation3 + $0x3ac] sm:$0xf]  ;;  %v13172_v24 = vld [vmem:[#allocation3 + $0x78] sm:$0xf0] }
 0x9c7   :  { %7714 = vmatpush.bf16.msrb.mxu1 %v13267_v13  ;;  %v13332_v13 = vld [vmem:[#allocation3 + $0x1b8] sm:$0xf0]  ;;  %v15101_v35 = vld [vmem:[#allocation3 + $0x28c] sm:$0xf] }
 0x9c8   :  { %7743 = vmatpush.bf16.msrb.mxu2 %v13395_v36  ;;  %v13204_v36 = vld [vmem:[#allocation3 + $0xb8] sm:$0xf0]  ;;  %v13335_v58 = vor.u32 %v15073_v52, %v13332_v13  ;;  %v13447_v33 = vor.u32 %v15101_v35, %v13444_v3  ;;  %v15133_v43 = vld [vmem:[#allocation3 + $0x38c] sm:$0xf] }
 0x9c9   :  { %7772 = vmatpush.bf16.msra.mxu3 %v13523_v27  ;;  %v13207_v29 = vor.u32 %v15041_v4, %v13204_v36  ;;  %v13588_v27 = vld [vmem:[#allocation3 + $0x3b8] sm:$0xf0]  ;;  %v15097_v12 = vld [vmem:[#allocation3 + $0x26c] sm:$0xf] }
 0x9ca   :  { %7686 = vmatpush.bf16.msra.mxu0 %v13123_v11  ;;  %v13591_v42 = vor.u32 %v15137_v30, %v13588_v27  ;;  %v13188_v11 = vld [vmem:[#allocation3 + $0x98] sm:$0xf0]  ;;  %v15033_v48 = vld [vmem:[#allocation3 + $0x6c] sm:$0xf] }
 0x9cb   :  { %7715 = vmatpush.bf16.msrb.mxu1 %v13251_v55  ;;  %v13175_v7 = vor.u32 %v15033_v48, %v13172_v24  ;;  %v15065_v21 = vld [vmem:[#allocation3 + $0x16c] sm:$0xf]  ;;  %v13412_v36 = vld [vmem:[#allocation3 + $0x258] sm:$0xf0] }
 0x9cc   :  { %7744 = vmatpush.bf16.msrb.mxu2 %v13379_v53  ;;  %v15037_v53 = vld [vmem:[#allocation3 + $0x8c] sm:$0xf]  ;;  %v13156_v30 = vld [vmem:[#allocation3 + $0x58] sm:$0xf0] }
 0x9cd   :  { %7571 = vmatmul.bf16.vlgmr.msrb.gmra.mxu0 %v16929_v51  ;;  %7773 = vmatpush.bf16.msra.mxu3 %v13507_v38  ;;  %v13191_v5 = vor.u32 %v15037_v53, %v13188_v11  ;;  %v13572_v38 = vld [vmem:[#allocation3 + $0x398] sm:$0xf0]  ;;  %v15093_v4 = vld [vmem:[#allocation3 + $0x24c] sm:$0xf] }
 0x9ce   :  { %7600 = vmatmul.bf16.vlgmr.msra.gmra.mxu1 %v16935_v47  ;;  %7795 = vmatpush.bf16.msrb.mxu0 %v13239_v23  ;;  %v13575_v2 = vor.u32 %v15133_v43, %v13572_v38  ;;  %v15125_v27 = vld [vmem:[#allocation3 + $0x34c] sm:$0xf] }
 0x9cf   :  { %7629 = vmatmul.bf16.vlgmr.msra.gmra.mxu2 %v16941_v16  ;;  %7824 = vmatpush.bf16.msra.mxu1 %v13367_v19  ;;  %v15061_v38 = vld [vmem:[#allocation3 + $0x14c] sm:$0xf] }
 0x9d0   :  { %7658 = vmatmul.bf16.vlgmr.msrb.gmra.mxu3 %v16947_v1  ;;  %7853 = vmatpush.bf16.msra.mxu2 %v13495_v60  ;;  %v15069_v60 = vld [vmem:[#allocation3 + $0x18c] sm:$0xf] }
 0x9d1   :  { %7882 = vmatpush.bf16.msrb.mxu3 %v13623_v56  ;;  %v13319_v23 = vor.u32 %v15069_v60, %v13316_v49  ;;  %v13428_v56 = vld [vmem:[#allocation3 + $0x278] sm:$0xf0]  ;;  %v15025_v60 = vld [vmem:[#allocation3 + $0x2c] sm:$0xf] }
 0x9d2   :  { %7796 = vmatpush.bf16.msrb.mxu0 %v13223_v6  ;;  %v13431_v26 = vor.u32 %v15097_v12, %v13428_v56  ;;  %v13556_v6 = vld [vmem:[#allocation3 + $0x378] sm:$0xf0]  ;;  %v15121_v24 = vld [vmem:[#allocation3 + $0x32c] sm:$0xf] }
 0x9d3   :  { %7825 = vmatpush.bf16.msra.mxu1 %v13351_v46  ;;  %v13300_v46 = vld [vmem:[#allocation3 + $0x178] sm:$0xf0] }
 0x9d4   :  { %7854 = vmatpush.bf16.msra.mxu2 %v13479_v50  ;;  %v15129_v50 = vld [vmem:[#allocation3 + $0x36c] sm:$0xf]  ;;  %v13303_v0 = vor.u32 %v15065_v21, %v13300_v46  ;;  %v13140_v49 = vld [vmem:[#allocation3 + $0x38] sm:$0xf0] }
 0x9d5   :  { %7883 = vmatpush.bf16.msrb.mxu3 %v13607_v39  ;;  %v13559_v39 = vor.u32 %v15129_v50, %v13556_v6  ;;  %v13143_v48 = vor.u32 %v15025_v60, %v13140_v49  ;;  %v15057_v6 = vld [vmem:[#allocation3 + $0x12c] sm:$0xf] }
 0x9d6   :  { %7797 = vmatpush.bf16.msrb.mxu0 %v13207_v29  ;;  %v13415_v29 = vor.u32 %v15093_v4, %v13412_v36  ;;  %v15021_v46 = vld [vmem:[#allocation3 + $0xc] sm:$0xf] }
 0x9d7   :  { %7826 = vmatpush.bf16.msra.mxu1 %v13335_v58  ;;  %v15117_v4 = vld [vmem:[#allocation3 + $0x30c] sm:$0xf] }
 0x9d8   :  { %7855 = vmatpush.bf16.msra.mxu2 %v13463_v18  ;;  %v15029_v18 = vld [vmem:[#allocation3 + $0x4c] sm:$0xf] }
 0x9d9   :  { %7884 = vmatpush.bf16.msrb.mxu3 %v13591_v42  ;;  %v13540_v42 = vld [vmem:[#allocation3 + $0x358] sm:$0xf0]  ;;  %v13159_v13 = vor.u32 %v15029_v18, %v13156_v30 }
 0x9da   :  { %7798 = vmatpush.bf16.msrb.mxu0 %v13191_v5  ;;  %v13543_v35 = vor.u32 %v15125_v27, %v13540_v42  ;;  %v13508_v18 = vld [vmem:[#allocation3 + $0x318] sm:$0xf0]  ;;  %v15053_v27 = vld [vmem:[#allocation3 + $0x10c] sm:$0xf] }
 0x9db   :  { %7827 = vmatpush.bf16.msra.mxu1 %v13319_v23  ;;  %v13511_v30 = vor.u32 %v15117_v4, %v13508_v18  ;;  %v13252_v42 = vld [vmem:[#allocation3 + $0x118] sm:$0xf0]  ;;  %v13682_v18 = vld [vmem:[#allocation4 + $0x70] sm:$0xf] }
 0x9dc   :  { %7856 = vmatpush.bf16.msra.mxu2 %v13447_v33 }
 0x9dd   :  { %7576 = vmatmul.bf16.gmra.mxu0 %v16957_v54  ;;  %7885 = vmatpush.bf16.msrb.mxu3 %v13575_v2  ;;  %v13284_v2 = vld [vmem:[#allocation3 + $0x158] sm:$0xf0] }
 0x9de   :  { %7605 = vmatmul.bf16.gmra.mxu1 %v16963_v32  ;;  %7799 = vmatpush.bf16.msrb.mxu0 %v13175_v7 }
 0x9df   :  { %7634 = vmatmul.bf16.gmra.mxu2 %v16969_v22  ;;  %7828 = vmatpush.bf16.msra.mxu1 %v13303_v0  ;;  %v13124_v0 = vld [vmem:[#allocation3 + $0x18] sm:$0xf0] }
 0x9e0   :  { %7663 = vmatmul.bf16.gmra.mxu3 %v16975_v57  ;;  %7857 = vmatpush.bf16.msra.mxu2 %v13431_v26  ;;  %v13127_v36 = vor.u32 %v15021_v46, %v13124_v0 }
 0x9e1   :  { %7886 = vmatpush.bf16.msrb.mxu3 %v13559_v39  ;;  %v15085_v39 = vld [vmem:[#allocation3 + $0x20c] sm:$0xf] }
 0x9e2   :  { %7800 = vmatpush.bf16.msrb.mxu0 %v13159_v13 }
 0x9e4   :  { %7858 = vmatpush.bf16.msra.mxu2 %v13415_v29 }
 0x9e5   :  { %7887 = vmatpush.bf16.msrb.mxu3 %v13543_v35 }
 0x9e6   :  { %7801 = vmatpush.bf16.msrb.mxu0 %v13143_v48 }
 0x9ea   :  { %7802 = vmatpush.bf16.msrb.mxu0 %v13127_v36 }
 0x9ed   :  { %7581 = vmatmul.bf16.gmra.mxu0 %v16985_v8 }
 0x9ee   :  { %7610 = vmatmul.bf16.gmra.mxu1 %v16991_v15 }
 0x9ef   :  { %7639 = vmatmul.bf16.gmra.mxu2 %v16997_v44 }
 0x9f0   :  { %7668 = vmatmul.bf16.gmra.mxu3 %v17003_v9 }
 0x9fd   :  { %7586 = vmatmul.bf16.gmra.mxu0 %v17013_v61 }
 0x9fe   :  { %7615 = vmatmul.bf16.gmra.mxu1 %v17019_v34 }
 0x9ff   :  { %7644 = vmatmul.bf16.gmra.mxu2 %v17025_v17 }
 0xa00   :  { %7673 = vmatmul.bf16.gmra.mxu3 %v17031_v40 }
 0xa0a   :  { %v7456_v55 = vpop.f32.mrf.mxu0 }
 0xa0b   :  { %v7457_v14 = vadd.f32 %v7456_v55, %v17056_v10  ;;  %v7485_v41 = vpop.f32.mrf.mxu1  ;;  %v15089_v55 = vld [vmem:[#allocation3 + $0x22c] sm:$0xf] }
 0xa0d   :  { %v7486_v63 = vadd.f32 %v7485_v41, %v7457_v14  ;;  %7687 = vmatmul.bf16.vlgmr.msra.gmra.mxu0 %v16929_v51  ;;  %v13287_v41 = vor.u32 %v15061_v38, %v13284_v2 }
 0xa0e   :  { %7716 = vmatmul.bf16.vlgmr.msrb.gmra.mxu1 %v16935_v47 }
 0xa0f   :  { %7745 = vmatmul.bf16.vlgmr.msrb.gmra.mxu2 %v16941_v16  ;;  %7829 = vmatpush.bf16.msra.mxu1 %v13287_v41 }
 0xa10   :  { %7774 = vmatmul.bf16.vlgmr.msra.gmra.mxu3 %v16947_v1 }
 0xa12   :  { %v7514_v31 = vpop.f32.mrf.mxu2  ;;  %v7458_v25 = vpop.f32.mrf.mxu0 }
 0xa13   :  { %v7515_v62 = vadd.f32 %v7514_v31, %v7486_v63  ;;  %v7543_v19 = vpop.f32.mrf.mxu3  ;;  %v7459_v20 = vadd.f32 %v7458_v25, %v17056_v10  ;;  %v7487_v37 = vpop.f32.mrf.mxu1  ;;  %v13396_v63 = vld [vmem:[#allocation3 + $0x238] sm:$0xf0] }
 0xa14   :  { %v13399_v56 = vor.u32 %v15089_v55, %v13396_v63 }
 0xa15   :  { %v17064_v45 = vadd.f32 %v7543_v19, %v7515_v62  ;;  %v7488_v59 = vadd.f32 %v7487_v37, %v7459_v20  ;;  %v13524_v62 = vld [vmem:[#allocation3 + $0x338] sm:$0xf0] }
 0xa16   :  { %v13527_v26 = vor.u32 %v15121_v24, %v13524_v62  ;;  %7859 = vmatpush.bf16.msra.mxu2 %v13399_v56  ;;  %v13268_v20 = vld [vmem:[#allocation3 + $0x138] sm:$0xf0] }
 0xa17   :  { %v13271_v37 = vor.u32 %v15057_v6, %v13268_v20 }
 0xa18   :  { %7888 = vmatpush.bf16.msrb.mxu3 %v13527_v26 }
 0xa19   :  { %7830 = vmatpush.bf16.msra.mxu1 %v13271_v37 }
 0xa1a   :  { %v7516_v52 = vpop.f32.mrf.mxu2  ;;  %v7461_v53 = vpop.f32.mrf.mxu0 }
 0xa1b   :  { %v7517_v58 = vadd.f32 %v7516_v52, %v7488_v59  ;;  %v7545_v3 = vpop.f32.mrf.mxu3  ;;  %v7462_v11 = vadd.f32 %v7461_v53, %v17056_v10  ;;  %v7490_v33 = vpop.f32.mrf.mxu1  ;;  %v13380_v59 = vld [vmem:[#allocation3 + $0x218] sm:$0xf0] }
 0xa1c   :  { %v13383_v21 = vor.u32 %v15085_v39, %v13380_v59  ;;  %7889 = vmatpush.bf16.msrb.mxu3 %v13511_v30  ;;  %v13746_v30 = vld [vmem:[#allocation4 + $0xf0] sm:$0xf] }
 0xa1d   :  { %v17067_v5 = vadd.f32 %v7545_v3, %v7517_v58  ;;  %v7491_v43 = vadd.f32 %v7490_v33, %v7462_v11  ;;  %7692 = vmatmul.bf16.gmra.mxu0 %v16957_v54  ;;  %v13255_v58 = vor.u32 %v15053_v27, %v13252_v42  ;;  %v15179_v27 = vld [vmem:[#allocation4 + $0xf4] sm:$0xf0] }
 0xa1e   :  { %7721 = vmatmul.bf16.gmra.mxu1 %v16963_v32  ;;  %7860 = vmatpush.bf16.msra.mxu2 %v13383_v21  ;;  %v13747_v42 = vor.u32 %v15179_v27, %v13746_v30 }
 0xa1f   :  { %7750 = vmatmul.bf16.gmra.mxu2 %v16969_v22  ;;  %7831 = vmatpush.bf16.msra.mxu1 %v13255_v58  ;;  %v13738_v58 = vld [vmem:[#allocation4 + $0xe0] sm:$0xf] }
 0xa20   :  { %7779 = vmatmul.bf16.gmra.mxu3 %v16975_v57 }
 0xa22   :  { %v7519_v14 = vpop.f32.mrf.mxu2  ;;  %v7463_v23 = vpop.f32.mrf.mxu0 }
 0xa23   :  { %v7520_v12 = vadd.f32 %v7519_v14, %v7491_v43  ;;  %v7548_v31 = vpop.f32.mrf.mxu3  ;;  %v7464_v19 = vadd.f32 %v7463_v23, %v17056_v10  ;;  %v7492_v25 = vpop.f32.mrf.mxu1  ;;  %8378 = vmatpush.bf16.msrb.mxu1 %v13747_v42 }
 0xa25   :  { %v17074_v7 = vadd.f32 %v7548_v31, %v7520_v12  ;;  %v7493_v50 = vadd.f32 %v7492_v25, %v7464_v19 }
 0xa2a   :  { %v7521_v29 = vpop.f32.mrf.mxu2  ;;  %v7466_v35 = vpop.f32.mrf.mxu0 }
 0xa2b   :  { %v7522_v52 = vadd.f32 %v7521_v29, %v7493_v50  ;;  %v7550_v13 = vpop.f32.mrf.mxu3  ;;  %v7467_v3 = vadd.f32 %v7466_v35, %v17056_v10  ;;  %v7495_v53 = vpop.f32.mrf.mxu1  ;;  %v15163_v29 = vld [vmem:[#allocation4 + $0x74] sm:$0xf0]  ;;  %v15161_v35 = vld [vmem:[#allocation4 + $0x64] sm:$0xf0] }
 0xa2d   :  { %v17077_v11 = vadd.f32 %v7550_v13, %v7522_v52  ;;  %v7496_v33 = vadd.f32 %v7495_v53, %v7467_v3  ;;  %7697 = vmatmul.bf16.gmra.mxu0 %v16985_v8  ;;  %v13674_v13 = vld [vmem:[#allocation4 + $0x60] sm:$0xf] }
 0xa2e   :  { %7726 = vmatmul.bf16.gmra.mxu1 %v16991_v15  ;;  %v13675_v53 = vor.u32 %v15161_v35, %v13674_v13  ;;  %v13634_v13 = vld [vmem:[#allocation4 + $0x10] sm:$0xf]  ;;  %v15151_v35 = vld [vmem:[#allocation4 + $0x14] sm:$0xf0] }
 0xa2f   :  { %7755 = vmatmul.bf16.gmra.mxu2 %v16997_v44 }
 0xa30   :  { %7784 = vmatmul.bf16.gmra.mxu3 %v17003_v9 }
 0xa32   :  { %v7524_v43 = vpop.f32.mrf.mxu2  ;;  %v7468_v55 = vpop.f32.mrf.mxu0 }
 0xa33   :  { %v7525_v38 = vadd.f32 %v7524_v43, %v7496_v33  ;;  %v7553_v2 = vpop.f32.mrf.mxu3  ;;  %v7469_v14 = vadd.f32 %v7468_v55, %v17056_v10  ;;  %v7497_v41 = vpop.f32.mrf.mxu1  ;;  %v15159_v43 = vld [vmem:[#allocation4 + $0x54] sm:$0xf0] }
 0xa34   :  { %v15175_v55 = vld [vmem:[#allocation4 + $0xd4] sm:$0xf0] }
 0xa35   :  { %v17084_v63 = vadd.f32 %v7553_v2, %v7525_v38  ;;  %v7498_v60 = vadd.f32 %v7497_v41, %v7469_v14  ;;  %v13730_v38 = vld [vmem:[#allocation4 + $0xd0] sm:$0xf] }
 0xa36   :  { %v13731_v14 = vor.u32 %v15175_v55, %v13730_v38  ;;  %v13626_v55 = vld [vmem:[#allocation4] sm:$0xf] }
 0xa3a   :  { %v7526_v49 = vpop.f32.mrf.mxu2  ;;  %v7471_v23 = vpop.f32.mrf.mxu0 }
 0xa3b   :  { %v7527_v12 = vadd.f32 %v7526_v49, %v7498_v60  ;;  %v7555_v31 = vpop.f32.mrf.mxu3  ;;  %v7472_v56 = vadd.f32 %v7471_v23, %v17056_v10  ;;  %v7500_v48 = vpop.f32.mrf.mxu1  ;;  %v13658_v60 = vld [vmem:[#allocation4 + $0x40] sm:$0xf]  ;;  %v15157_v49 = vld [vmem:[#allocation4 + $0x44] sm:$0xf0] }
 0xa3d   :  { %v17087_v24 = vadd.f32 %v7555_v31, %v7527_v12  ;;  %v7501_v62 = vadd.f32 %v7500_v48, %v7472_v56  ;;  %7702 = vmatmul.bf16.gmra.mxu0 %v17013_v61  ;;  %v13722_v12 = vld [vmem:[#allocation4 + $0xc0] sm:$0xf]  ;;  %v13659_v56 = vor.u32 %v15157_v49, %v13658_v60  ;;  %v15173_v48 = vld [vmem:[#allocation4 + $0xc4] sm:$0xf0] }
 0xa3e   :  { %7731 = vmatmul.bf16.gmra.mxu1 %v17019_v34  ;;  %v13690_v60 = vld [vmem:[#allocation4 + $0x80] sm:$0xf] }
 0xa3f   :  { %18002 = vst [vmem:[#allocation72_spill] sm:$0xff] %v17087_v24  ;;  %7760 = vmatmul.bf16.gmra.mxu2 %v17025_v17 }
 0xa40   :  { %7789 = vmatmul.bf16.gmra.mxu3 %v17031_v40 }
 0xa42   :  { %v7529_v19 = vpop.f32.mrf.mxu2  ;;  %v7473_v50 = vpop.f32.mrf.mxu0 }
 0xa43   :  { %v7530_v25 = vadd.f32 %v7529_v19, %v7501_v62  ;;  %v7558_v26 = vpop.f32.mrf.mxu3  ;;  %v7474_v6 = vadd.f32 %v7473_v50, %v17056_v10  ;;  %v7502_v20 = vpop.f32.mrf.mxu1  ;;  %v13683_v10 = vor.u32 %v15163_v29, %v13682_v18  ;;  %v13723_v19 = vor.u32 %v15173_v48, %v13722_v12  ;;  %v13714_v50 = vld [vmem:[#allocation4 + $0xb0] sm:$0xf]  ;;  %v15165_v48 = vld [vmem:[#allocation4 + $0x84] sm:$0xf0] }
 0xa45   :  { %v17094_v37 = vadd.f32 %v7558_v26, %v7530_v25  ;;  %v7503_v39 = vadd.f32 %v7502_v20, %v7474_v6  ;;  %8349 = vmatpush.bf16.msra.mxu0 %v13683_v10  ;;  %v13650_v25 = vld [vmem:[#allocation4 + $0x30] sm:$0xf]  ;;  %v15155_v26 = vld [vmem:[#allocation4 + $0x34] sm:$0xf0] }
 0xa46   :  { %v13651_v6 = vor.u32 %v15155_v26, %v13650_v25  ;;  %v15171_v20 = vld [vmem:[#allocation4 + $0xb4] sm:$0xf0]  ;;  %v13810_v10 = vld [vmem:[#allocation4 + $0x170] sm:$0xf] }
 0xa47   :  { %18003 = vst [vmem:[#allocation73_spill] sm:$0xff] %v17094_v37  ;;  %v15191_v25 = vld [vmem:[#allocation4 + $0x154] sm:$0xf0] }
 0xa49   :  { %8350 = vmatpush.bf16.msra.mxu0 %v13675_v53  ;;  %v13635_v53 = vor.u32 %v15151_v35, %v13634_v13  ;;  %v13762_v13 = vld [vmem:[#allocation4 + $0x110] sm:$0xf]  ;;  %v15183_v35 = vld [vmem:[#allocation4 + $0x114] sm:$0xf0] }
 0xa4a   :  { %v7531_v59 = vpop.f32.mrf.mxu2  ;;  %v17096_v0 = vpop.f32.mrf.mxu0 }
 0xa4b   :  { %v7532_v21 = vadd.f32 %v7531_v59, %v7503_v39  ;;  %v7560_v46 = vpop.f32.mrf.mxu3  ;;  %v17098_v4 = vpop.f32.mrf.mxu1  ;;  %v13715_v39 = vor.u32 %v15171_v20, %v13714_v50  ;;  %v13691_v50 = vor.u32 %v15165_v48, %v13690_v60  ;;  %v13786_v20 = vld [vmem:[#allocation4 + $0x140] sm:$0xf] }
 0xa4d   :  { %v17100_v36 = vadd.f32 %v7560_v46, %v7532_v21  ;;  %7803 = vmatmul.bf16.vlgmr.msrb.gmra.mxu0 %v16929_v51  ;;  %v13642_v21 = vld [vmem:[#allocation4 + $0x20] sm:$0xf]  ;;  %v15153_v46 = vld [vmem:[#allocation4 + $0x24] sm:$0xf0] }
 0xa4e   :  { %7832 = vmatmul.bf16.vlgmr.msra.gmra.mxu1 %v16935_v47  ;;  %v15177_v47 = vld [vmem:[#allocation4 + $0xe4] sm:$0xf0]  ;;  %v13643_v30 = vor.u32 %v15153_v46, %v13642_v21 }
 0xa4f   :  { %18004 = vst [vmem:[#allocation74_spill] sm:$0xff] %v17100_v36  ;;  %7861 = vmatmul.bf16.vlgmr.msra.gmra.mxu2 %v16941_v16  ;;  %v13739_v16 = vor.u32 %v15177_v47, %v13738_v58  ;;  %v13698_v58 = vld [vmem:[#allocation4 + $0x90] sm:$0xf]  ;;  %v15167_v47 = vld [vmem:[#allocation4 + $0x94] sm:$0xf0] }
 0xa50   :  { %7890 = vmatmul.bf16.vlgmr.msrb.gmra.mxu3 %v16947_v1  ;;  %v13666_v1 = vld [vmem:[#allocation4 + $0x50] sm:$0xf] }
 0xa51   :  { %8379 = vmatpush.bf16.msrb.mxu1 %v13739_v16  ;;  %v13667_v2 = vor.u32 %v15159_v43, %v13666_v1  ;;  %v13802_v16 = vld [vmem:[#allocation4 + $0x160] sm:$0xf]  ;;  %v13699_v1 = vor.u32 %v15167_v47, %v13698_v58  ;;  %v15193_v43 = vld [vmem:[#allocation4 + $0x164] sm:$0xf0] }
 0xa52   :  { %v17106_v52 = vpop.f32.mrf.mxu2  ;;  %v17110_v3 = vpop.f32.mrf.mxu0  ;;  %v13803_v38 = vor.u32 %v15193_v43, %v13802_v16  ;;  %v13763_v43 = vor.u32 %v15183_v35, %v13762_v13 }
 0xa53   :  { %v17108_v51 = vpop.f32.mrf.mxu3  ;;  %v17112_v33 = vpop.f32.mrf.mxu1  ;;  %8351 = vmatpush.bf16.msra.mxu0 %v13667_v2 }
 0xa55   :  { %8380 = vmatpush.bf16.msrb.mxu1 %v13731_v14  ;;  %v15149_v14 = vld [vmem:[#allocation4 + $0x4] sm:$0xf0] }
 0xa57   :  { %8352 = vmatpush.bf16.msra.mxu0 %v13659_v56  ;;  %v13627_v56 = vor.u32 %v15149_v14, %v13626_v55  ;;  %v15181_v55 = vld [vmem:[#allocation4 + $0x104] sm:$0xf0] }
 0xa59   :  { %8381 = vmatpush.bf16.msrb.mxu1 %v13723_v19  ;;  %v13794_v19 = vld [vmem:[#allocation4 + $0x150] sm:$0xf] }
 0xa5a   :  { %v17114_v41 = vpop.f32.mrf.mxu2  ;;  %v17118_v23 = vpop.f32.mrf.mxu0 }
 0xa5b   :  { %v17116_v31 = vpop.f32.mrf.mxu3  ;;  %v17120_v62 = vpop.f32.mrf.mxu1  ;;  %8353 = vmatpush.bf16.msra.mxu0 %v13651_v6  ;;  %v13795_v6 = vor.u32 %v15191_v25, %v13794_v19 }
 0xa5d   :  { %7808 = vmatmul.bf16.gmra.mxu0 %v16957_v54  ;;  %8382 = vmatpush.bf16.msrb.mxu1 %v13715_v39  ;;  %v13706_v54 = vld [vmem:[#allocation4 + $0xa0] sm:$0xf]  ;;  %v15189_v39 = vld [vmem:[#allocation4 + $0x144] sm:$0xf0] }
 0xa5e   :  { %7837 = vmatmul.bf16.gmra.mxu1 %v16963_v32  ;;  %v15169_v32 = vld [vmem:[#allocation4 + $0xa4] sm:$0xf0]  ;;  %v13787_v21 = vor.u32 %v15189_v39, %v13786_v20 }
 0xa5f   :  { %7866 = vmatmul.bf16.gmra.mxu2 %v16969_v22  ;;  %v15195_v22 = vld [vmem:[#allocation4 + $0x174] sm:$0xf0]  ;;  %v13707_v42 = vor.u32 %v15169_v32, %v13706_v54  ;;  %8354 = vmatpush.bf16.msra.mxu0 %v13643_v30  ;;  %v13778_v54 = vld [vmem:[#allocation4 + $0x130] sm:$0xf] }
 0xa60   :  { %7895 = vmatmul.bf16.gmra.mxu3 %v16975_v57  ;;  %v13811_v57 = vor.u32 %v15195_v22, %v13810_v10  ;;  %v15187_v30 = vld [vmem:[#allocation4 + $0x134] sm:$0xf0] }
 0xa61   :  { %8383 = vmatpush.bf16.msrb.mxu1 %v13707_v42  ;;  %v13779_v22 = vor.u32 %v15187_v30, %v13778_v54  ;;  %v13770_v42 = vld [vmem:[#allocation4 + $0x120] sm:$0xf] }
 0xa62   :  { %v17126_v59 = vpop.f32.mrf.mxu2  ;;  %v17130_v29 = vpop.f32.mrf.mxu0  ;;  %8407 = vmatpush.bf16.msrb.mxu2 %v13811_v57 }
 0xa63   :  { %v17128_v18 = vpop.f32.mrf.mxu3  ;;  %v17132_v27 = vpop.f32.mrf.mxu1  ;;  %8355 = vmatpush.bf16.msra.mxu0 %v13635_v53 }
 0xa65   :  { %8384 = vmatpush.bf16.msrb.mxu1 %v13699_v1 }
 0xa66   :  { %8408 = vmatpush.bf16.msrb.mxu2 %v13803_v38  ;;  %v13754_v38 = vld [vmem:[#allocation4 + $0x100] sm:$0xf] }
 0xa67   :  { %8356 = vmatpush.bf16.msra.mxu0 %v13627_v56 }
 0xa69   :  { %8385 = vmatpush.bf16.msrb.mxu1 %v13691_v50  ;;  %v17890_v50 = vmax.f32 %v17064_v45, 0.0 }
 0xa6a   :  { %v17134_v2 = vpop.f32.mrf.mxu2  ;;  %v17138_v12 = vpop.f32.mrf.mxu0  ;;  %8409 = vmatpush.bf16.msrb.mxu2 %v13795_v6 }
 0xa6b   :  { %v17136_v49 = vpop.f32.mrf.mxu3  ;;  %v17140_v26 = vpop.f32.mrf.mxu1 }
 0xa6d   :  { %7813 = vmatmul.bf16.gmra.mxu0 %v16985_v8 }
 0xa6e   :  { %7842 = vmatmul.bf16.gmra.mxu1 %v16991_v15  ;;  %8410 = vmatpush.bf16.msrb.mxu2 %v13787_v21  ;;  %v15185_v15 = vld [vmem:[#allocation4 + $0x124] sm:$0xf0]  ;;  %v17204_v21 = vperm.slane %v17053_v28, 2 }
 0xa6f   :  { %7871 = vmatmul.bf16.gmra.mxu2 %v16997_v44  ;;  %v17155_v44 = vperm.slane %v17053_v28, 1  ;;  %v15178_v28 = vld [vmem:[#allocation4 + $0xf4] sm:$0xf] }
 0xa70   :  { %7900 = vmatmul.bf16.gmra.mxu3 %v17003_v9  ;;  %v13771_v9 = vor.u32 %v15185_v15, %v13770_v42  ;;  %v13684_v42 = vld [vmem:[#allocation4 + $0x78] sm:$0xf0] }
 0xa71   :  { %v7573_v58 = vadd.f32 %v17096_v0, %v17155_v44  ;;  %v7575_v53 = vadd.f32 %v17110_v3, %v17155_v44  ;;  %v13755_v0 = vor.u32 %v15181_v55, %v13754_v38  ;;  %v13866_v38 = vld [vmem:[#allocation4 + $0x1e0] sm:$0xf]  ;;  %v15209_v55 = vld [vmem:[#allocation4 + $0x1e4] sm:$0xf0] }
 0xa72   :  { %v17146_v46 = vpop.f32.mrf.mxu2  ;;  %v17150_v10 = vpop.f32.mrf.mxu0  ;;  %8411 = vmatpush.bf16.msrb.mxu2 %v13779_v22 }
 0xa73   :  { %v17148_v32 = vpop.f32.mrf.mxu3  ;;  %v17152_v8 = vpop.f32.mrf.mxu1  ;;  %v7602_v14 = vadd.f32 %v17098_v4, %v7573_v58  ;;  %v7604_v60 = vadd.f32 %v17112_v33, %v7575_v53  ;;  %v15211_v33 = vld [vmem:[#allocation4 + $0x1f4] sm:$0xf0]  ;;  %v13748_v58 = vld [vmem:[#allocation4 + $0xf8] sm:$0xf0] }
 0xa74   :  { %v13751_v53 = vor.u32 %v15178_v28, %v13748_v58  ;;  %v15158_v28 = vld [vmem:[#allocation4 + $0x54] sm:$0xf] }
 0xa75   :  { %v7633_v3 = vadd.f32 %v17114_v41, %v7604_v60  ;;  %v17891_v41 = vmax.f32 %v17067_v5, 0.0  ;;  %v13867_v60 = vor.u32 %v15209_v55, %v13866_v38  ;;  %v17887_v38 = vmax.f32 %v17074_v7, 0.0 }
 0xa76   :  { %8412 = vmatpush.bf16.msrb.mxu2 %v13771_v9  ;;  %8494 = vmatpush.bf16.msra.mxu1 %v13751_v53 }
 0xa77   :  { %v17210_v30 = vpack.c.bf16 %v17891_v41, %v17890_v50  ;;  %v13844_v50 = vld [vmem:[#allocation4 + $0x1b8] sm:$0xf0] }
 0xa7a   :  { %v17157_v57 = vpop.f32.mrf.mxu2  ;;  %v17165_v16 = vpop.f32.mrf.mxu0  ;;  %8413 = vmatpush.bf16.msrb.mxu2 %v13763_v43 }
 0xa7b   :  { %v17163_v47 = vpop.f32.mrf.mxu3  ;;  %v17167_v1 = vpop.f32.mrf.mxu1 }
 0xa7d   :  { %7818 = vmatmul.bf16.gmra.mxu0 %v17013_v61  ;;  %v7631_v61 = vadd.f32 %v17106_v52, %v7602_v14 }
 0xa7e   :  { %7847 = vmatmul.bf16.gmra.mxu1 %v17019_v34  ;;  %8414 = vmatpush.bf16.msrb.mxu2 %v13755_v0  ;;  %v17186_v34 = vadd.f32 %v17116_v31, %v7633_v3  ;;  %v7578_v31 = vadd.f32 %v17118_v23, %v17155_v44  ;;  %v15160_v0 = vld [vmem:[#allocation4 + $0x64] sm:$0xf]  ;;  %v13676_v3 = vld [vmem:[#allocation4 + $0x68] sm:$0xf0] }
 0xa7f   :  { %7876 = vmatmul.bf16.gmra.mxu2 %v17025_v17  ;;  %v17189_v17 = vadd.f32 %v17108_v51, %v7631_v61  ;;  %v7580_v51 = vadd.f32 %v17130_v29, %v17155_v44  ;;  %v15162_v29 = vld [vmem:[#allocation4 + $0x74] sm:$0xf] }
 0xa80   :  { %7905 = vmatmul.bf16.gmra.mxu3 %v17031_v40  ;;  %v13874_v40 = vld [vmem:[#allocation4 + $0x1f0] sm:$0xf]  ;;  %v17869_v52 = vmax.f32 %v17186_v34, 0.0  ;;  %v7607_v15 = vadd.f32 %v17120_v62, %v7578_v31  ;;  %v13687_v35 = vor.u32 %v15162_v29, %v13684_v42  ;;  %v15176_v62 = vld [vmem:[#allocation4 + $0xe4] sm:$0xf]  ;;  %v7583_v42 = vadd.f32 %v17138_v12, %v17155_v44 }
 0xa81   :  { %v13875_v25 = vor.u32 %v15211_v33, %v13874_v40  ;;  %v17886_v20 = vmax.f32 %v17189_v17, 0.0  ;;  %v7609_v9 = vadd.f32 %v17132_v27, %v7580_v51  ;;  %v13740_v31 = vld [vmem:[#allocation4 + $0xe8] sm:$0xf0] }
 0xa82   :  { %v17176_v56 = vpop.f32.mrf.mxu2  ;;  %v17181_v19 = vpop.f32.mrf.mxu0  ;;  %8465 = vmatpush.bf16.msrb.mxu0 %v13687_v35  ;;  %v7636_v27 = vadd.f32 %v17126_v59, %v7607_v15  ;;  %v13668_v59 = vld [vmem:[#allocation4 + $0x58] sm:$0xf0]  ;;  %v15207_v35 = vld [vmem:[#allocation4 + $0x1d4] sm:$0xf0] }
 0xa83   :  { %v17179_v48 = vpop.f32.mrf.mxu3  ;;  %v17183_v4 = vpop.f32.mrf.mxu1  ;;  %8436 = vmatpush.bf16.msra.mxu3 %v13875_v25  ;;  %v17216_v23 = vpack.c.bf16 %v17869_v52, %v17886_v20  ;;  %v7638_v43 = vadd.f32 %v17134_v2, %v7609_v9  ;;  %v13679_v25 = vor.u32 %v15160_v0, %v13676_v3  ;;  %v13671_v58 = vor.u32 %v15158_v28, %v13668_v59  ;;  %v15156_v3 = vld [vmem:[#allocation4 + $0x44] sm:$0xf] }
 0xa84   :  { %v17232_v15 = vadd.f32 %v17128_v18, %v7636_v27  ;;  %v7612_v0 = vadd.f32 %v17140_v26, %v7583_v42  ;;  %v7585_v18 = vadd.f32 %v17150_v10, %v17155_v44  ;;  %v15172_v27 = vld [vmem:[#allocation4 + $0xc4] sm:$0xf] }
 0xa85   :  { %v17226_v2 = vadd.f32 %v17136_v49, %v7638_v43  ;;  %v17867_v49 = vmax.f32 %v17077_v11, 0.0  ;;  %v13732_v43 = vld [vmem:[#allocation4 + $0xd8] sm:$0xf0]  ;;  %v15164_v52 = vld [vmem:[#allocation4 + $0x84] sm:$0xf] }
 0xa86   :  { %8466 = vmatpush.bf16.msrb.mxu0 %v13679_v25  ;;  %v7641_v59 = vadd.f32 %v17146_v46, %v7612_v0  ;;  %v13850_v0 = vld [vmem:[#allocation4 + $0x1c0] sm:$0xf] }
 0xa87   :  { %8437 = vmatpush.bf16.msra.mxu3 %v13867_v60  ;;  %v17866_v55 = vmax.f32 %v17226_v2, 0.0  ;;  %v17247_v26 = vpack.c.bf16 %v17867_v49, %v17887_v38  ;;  %v7588_v49 = vadd.f32 %v17165_v16, %v17155_v44 }
 0xa8a   :  { %v17194_v6 = vpop.f32.mrf.mxu2  ;;  %v7688_v54 = vpop.f32.mrf.mxu0  ;;  %8467 = vmatpush.bf16.msrb.mxu0 %v13671_v58 }
 0xa8b   :  { %v17201_v39 = vpop.f32.mrf.mxu3  ;;  %v7717_v22 = vpop.f32.mrf.mxu1  ;;  %v7689_v13 = vadd.f32 %v7688_v54, %v17204_v21  ;;  %v13743_v54 = vor.u32 %v15176_v62, %v13740_v31  ;;  %v13660_v62 = vld [vmem:[#allocation4 + $0x48] sm:$0xf0] }
 0xa8d   :  { %8357 = vmatmul.bf16.vlgmr.msra.gmra.mxu0 %v17210_v30  ;;  %v7718_v61 = vadd.f32 %v7717_v22, %v7689_v13  ;;  %8495 = vmatpush.bf16.msra.mxu1 %v13743_v54  ;;  %v15174_v22 = vld [vmem:[#allocation4 + $0xd4] sm:$0xf]  ;;  %v13858_v13 = vld [vmem:[#allocation4 + $0x1d0] sm:$0xf] }
 0xa8e   :  { %8386 = vmatmul.bf16.vlgmr.msrb.gmra.mxu1 %v17216_v23  ;;  %v13859_v53 = vor.u32 %v15207_v35, %v13858_v13  ;;  %v13735_v60 = vor.u32 %v15174_v22, %v13732_v43  ;;  %v7614_v22 = vadd.f32 %v17152_v8, %v7585_v18  ;;  %v13652_v13 = vld [vmem:[#allocation4 + $0x38] sm:$0xf0]  ;;  %v15170_v35 = vld [vmem:[#allocation4 + $0xb4] sm:$0xf]  ;;  %v15205_v18 = vld [vmem:[#allocation4 + $0x1c4] sm:$0xf0] }
 0xa90   :  { %8438 = vmatpush.bf16.msra.mxu3 %v13859_v53  ;;  %v7643_v46 = vadd.f32 %v17157_v57, %v7614_v22  ;;  %v13708_v22 = vld [vmem:[#allocation4 + $0xa8] sm:$0xf0] }
 0xa91   :  { %8496 = vmatpush.bf16.msra.mxu1 %v13735_v60  ;;  %v13716_v60 = vld [vmem:[#allocation4 + $0xb8] sm:$0xf0] }
 0xa92   :  { %v7746_v14 = vpop.f32.mrf.mxu2  ;;  %v7690_v33 = vpop.f32.mrf.mxu0 }
 0xa93   :  { %v7775_v40 = vpop.f32.mrf.mxu3  ;;  %v7719_v51 = vpop.f32.mrf.mxu1  ;;  %v7691_v29 = vadd.f32 %v7690_v33, %v17204_v21  ;;  %v7747_v9 = vadd.f32 %v7746_v14, %v7718_v61  ;;  %v17884_v61 = vmax.f32 %v17232_v15, 0.0 }
 0xa95   :  { %v7720_v12 = vadd.f32 %v7719_v51, %v7691_v29  ;;  %v17241_v33 = vadd.f32 %v7775_v40, %v7747_v9  ;;  %v13663_v51 = vor.u32 %v15156_v3, %v13660_v62  ;;  %v13724_v29 = vld [vmem:[#allocation4 + $0xc8] sm:$0xf0]  ;;  %v17253_v40 = vpack.c.bf16 %v17866_v55, %v17884_v61  ;;  %v15154_v9 = vld [vmem:[#allocation4 + $0x34] sm:$0xf]  ;;  %v15239_v61 = vld [vmem:[#allocation5 + $0xd4] sm:$0xf0] }
 0xa96   :  { %v13727_v42 = vor.u32 %v15172_v27, %v13724_v29  ;;  %v13851_v62 = vor.u32 %v15205_v18, %v13850_v0  ;;  %v15152_v27 = vld [vmem:[#allocation4 + $0x24] sm:$0xf]  ;;  %v17882_v0 = vmax.f32 %v17084_v63, 0.0  ;;  %v17277_v18 = vadd.f32 %v17163_v47, %v7643_v46  ;;  %v13804_v46 = vld [vmem:[#allocation4 + $0x168] sm:$0xf0] }
 0xa97   :  { %8468 = vmatpush.bf16.msrb.mxu0 %v13663_v51  ;;  %v17885_v58 = vmax.f32 %v17241_v33, 0.0  ;;  %v15192_v47 = vld [vmem:[#allocation4 + $0x164] sm:$0xf] }
 0xa98   :  { %8497 = vmatpush.bf16.msra.mxu1 %v13727_v42  ;;  %8439 = vmatpush.bf16.msra.mxu3 %v13851_v62  ;;  %18005 = vst [vmem:[#allocation75_spill] sm:$0xff] %v17277_v18  ;;  %v13807_v55 = vor.u32 %v15192_v47, %v13804_v46 }
 0xa9a   :  { %v7748_v14 = vpop.f32.mrf.mxu2  ;;  %v7693_v54 = vpop.f32.mrf.mxu0 }
 0xa9b   :  { %v7749_v25 = vadd.f32 %v7748_v14, %v7720_v12  ;;  %v7777_v31 = vpop.f32.mrf.mxu3  ;;  %v7722_v10 = vpop.f32.mrf.mxu1  ;;  %v7694_v43 = vadd.f32 %v7693_v54, %v17204_v21  ;;  %v13655_v12 = vor.u32 %v15154_v9, %v13652_v13  ;;  %v13719_v14 = vor.u32 %v15170_v35, %v13716_v60  ;;  %v15194_v9 = vld [vmem:[#allocation4 + $0x174] sm:$0xf]  ;;  %v13812_v13 = vld [vmem:[#allocation4 + $0x178] sm:$0xf0] }
 0xa9c   :  { %v17272_v54 = vadd.f32 %v17148_v32, %v7641_v59  ;;  %v13815_v60 = vor.u32 %v15194_v9, %v13812_v13  ;;  %v13636_v59 = vld [vmem:[#allocation4 + $0x18] sm:$0xf0] }
 0xa9d   :  { %v17255_v28 = vadd.f32 %v7777_v31, %v7749_v25  ;;  %8362 = vmatmul.bf16.gmra.mxu0 %v17247_v26  ;;  %v13644_v25 = vld [vmem:[#allocation4 + $0x28] sm:$0xf0]  ;;  %v15168_v31 = vld [vmem:[#allocation4 + $0xa4] sm:$0xf]  ;;  %v7723_v51 = vadd.f32 %v7722_v10, %v7694_v43  ;;  %8498 = vmatpush.bf16.msra.mxu1 %v13719_v14  ;;  %v15150_v10 = vld [vmem:[#allocation4 + $0x14] sm:$0xf] }
 0xa9e   :  { %8391 = vmatmul.bf16.gmra.mxu1 %v17253_v40  ;;  %8469 = vmatpush.bf16.msrb.mxu0 %v13655_v12  ;;  %v13647_v42 = vor.u32 %v15152_v27, %v13644_v25  ;;  %v13711_v12 = vor.u32 %v15168_v31, %v13708_v22  ;;  %v15166_v43 = vld [vmem:[#allocation4 + $0x94] sm:$0xf]  ;;  %v17876_v27 = vmax.f32 %v17087_v24, 0.0  ;;  %v17879_v25 = vmax.f32 %v17272_v54, 0.0  ;;  %v13842_v14 = vld [vmem:[#allocation4 + $0x1b0] sm:$0xf] }
 0xa9f   :  { %v17868_v53 = vmax.f32 %v17255_v28, 0.0  ;;  %8523 = vmatpush.bf16.msra.mxu2 %v13815_v60  ;;  %v15203_v31 = vld [vmem:[#allocation4 + $0x1b4] sm:$0xf0]  ;;  %v13639_v22 = vor.u32 %v15150_v10, %v13636_v59  ;;  %v13700_v13 = vld [vmem:[#allocation4 + $0x98] sm:$0xf0] }
 0xaa0   :  { %v13843_v9 = vor.u32 %v15203_v31, %v13842_v14  ;;  %v13703_v60 = vor.u32 %v15166_v43, %v13700_v13  ;;  %v15190_v43 = vld [vmem:[#allocation4 + $0x154] sm:$0xf]  ;;  %v17293_v16 = vpack.c.bf16 %v17876_v27, %v17882_v0 }
 0xaa1   :  { %v17269_v8 = vpack.c.bf16 %v17868_v53, %v17885_v58  ;;  %8499 = vmatpush.bf16.msra.mxu1 %v13711_v12  ;;  %v7590_v12 = vadd.f32 %v17181_v19, %v17155_v44  ;;  %v15206_v0 = vld [vmem:[#allocation4 + $0x1d4] sm:$0xf] }
 0xaa2   :  { %v7751_v3 = vpop.f32.mrf.mxu2  ;;  %v7695_v57 = vpop.f32.mrf.mxu0  ;;  %8470 = vmatpush.bf16.msrb.mxu0 %v13647_v42  ;;  %8440 = vmatpush.bf16.msra.mxu3 %v13843_v9 }
 0xaa3   :  { %v7780_v29 = vpop.f32.mrf.mxu3  ;;  %8415 = vmatmul.bf16.vlgmr.msrb.gmra.mxu2 %v17269_v8  ;;  %v7724_v35 = vpop.f32.mrf.mxu1  ;;  %v7696_v32 = vadd.f32 %v7695_v57, %v17204_v21  ;;  %v7752_v62 = vadd.f32 %v7751_v3, %v7723_v51  ;;  %v17875_v57 = vmax.f32 %v17277_v18, 0.0  ;;  %v15148_v3 = vld [vmem:[#allocation4 + $0x4] sm:$0xf]  ;;  %v13628_v51 = vld [vmem:[#allocation4 + $0x8] sm:$0xf0]  ;;  %v7619_v47 = vadd.f32 %v17183_v4, %v7590_v12 }
 0xaa4   :  { %8524 = vmatpush.bf16.msra.mxu2 %v13807_v55  ;;  %v13834_v4 = vld [vmem:[#allocation4 + $0x1a0] sm:$0xf]  ;;  %v15246_v18 = vld [vmem:[#allocation5 + $0x114] sm:$0xf] }
 0xaa5   :  { %v7725_v42 = vadd.f32 %v7724_v35, %v7696_v32  ;;  %v17287_v10 = vadd.f32 %v7780_v29, %v7752_v62  ;;  %v13631_v35 = vor.u32 %v15148_v3, %v13628_v51  ;;  %v13692_v32 = vld [vmem:[#allocation4 + $0x88] sm:$0xf0]  ;;  %8500 = vmatpush.bf16.msra.mxu1 %v13703_v60  ;;  %v17299_v19 = vpack.c.bf16 %v17875_v57, %v17879_v25  ;;  %v15188_v29 = vld [vmem:[#allocation4 + $0x144] sm:$0xf] }
 0xaa6   :  { %8471 = vmatpush.bf16.msrb.mxu0 %v13639_v22  ;;  %v13796_v22 = vld [vmem:[#allocation4 + $0x158] sm:$0xf0]  ;;  %v13695_v13 = vor.u32 %v15164_v52, %v13692_v32  ;;  %v13788_v62 = vld [vmem:[#allocation4 + $0x148] sm:$0xf0]  ;;  %v7648_v3 = vadd.f32 %v17194_v6, %v7619_v47 }
 0xaa7   :  { %v13799_v44 = vor.u32 %v15190_v43, %v13796_v22  ;;  %v17883_v52 = vmax.f32 %v17287_v10, 0.0  ;;  %v13791_v60 = vor.u32 %v15188_v29, %v13788_v62  ;;  %v15184_v29 = vld [vmem:[#allocation4 + $0x124] sm:$0xf]  ;;  %v13772_v62 = vld [vmem:[#allocation4 + $0x128] sm:$0xf0] }
 0xaa9   :  { %8525 = vmatpush.bf16.msra.mxu2 %v13799_v44  ;;  %8501 = vmatpush.bf16.msra.mxu1 %v13695_v13  ;;  %v17320_v13 = vadd.f32 %v17201_v39, %v7648_v3  ;;  %v17873_v39 = vmax.f32 %v17094_v37, 0.0 }
 0xaaa   :  { %v7753_v53 = vpop.f32.mrf.mxu2  ;;  %v7698_v31 = vpop.f32.mrf.mxu0  ;;  %8472 = vmatpush.bf16.msrb.mxu0 %v13631_v35 }
 0xaab   :  { %v7754_v59 = vadd.f32 %v7753_v53, %v7725_v42  ;;  %v7782_v14 = vpop.f32.mrf.mxu3  ;;  %v7727_v9 = vpop.f32.mrf.mxu1  ;;  %v7617_v53 = vadd.f32 %v17167_v1, %v7588_v49  ;;  %v7699_v42 = vadd.f32 %v7698_v31, %v17204_v21  ;;  %v15201_v49 = vld [vmem:[#allocation4 + $0x1a4] sm:$0xf0]  ;;  %18007 = vst [vmem:[#allocation77_spill] sm:$0xff] %v17320_v13 }
 0xaac   :  { %v13835_v12 = vor.u32 %v15201_v49, %v13834_v4  ;;  %v13775_v49 = vor.u32 %v15184_v29, %v13772_v62  ;;  %v13818_v62 = vld [vmem:[#allocation4 + $0x180] sm:$0xf] }
 0xaad   :  { %v17301_v55 = vadd.f32 %v7782_v14, %v7754_v59  ;;  %8367 = vmatmul.bf16.gmra.mxu0 %v17293_v16  ;;  %v15186_v59 = vld [vmem:[#allocation4 + $0x134] sm:$0xf]  ;;  %v13780_v14 = vld [vmem:[#allocation4 + $0x138] sm:$0xf0]  ;;  %v7646_v31 = vadd.f32 %v17176_v56, %v7617_v53  ;;  %v7728_v35 = vadd.f32 %v7727_v9, %v7699_v42  ;;  %8526 = vmatpush.bf16.msra.mxu2 %v13791_v60  ;;  %v13826_v9 = vld [vmem:[#allocation4 + $0x190] sm:$0xf] }
 0xaae   :  { %8396 = vmatmul.bf16.gmra.mxu1 %v17299_v19  ;;  %8441 = vmatpush.bf16.msra.mxu3 %v13835_v12  ;;  %v13783_v22 = vor.u32 %v15186_v59, %v13780_v14  ;;  %v15199_v53 = vld [vmem:[#allocation4 + $0x194] sm:$0xf0]  ;;  %v17871_v42 = vmax.f32 %v17100_v36, 0.0  ;;  %v17870_v60 = vmax.f32 %v17320_v13, 0.0  ;;  %v15182_v59 = vld [vmem:[#allocation4 + $0x114] sm:$0xf] }
 0xaaf   :  { %18006 = vst [vmem:[#allocation76_spill] sm:$0xff] %v17301_v55  ;;  %v17877_v46 = vmax.f32 %v17301_v55, 0.0  ;;  %v17324_v47 = vadd.f32 %v17179_v48, %v7646_v31  ;;  %v13827_v4 = vor.u32 %v15199_v53, %v13826_v9  ;;  %v13764_v14 = vld [vmem:[#allocation4 + $0x118] sm:$0xf0]  ;;  %v15180_v9 = vld [vmem:[#allocation4 + $0x104] sm:$0xf] }
 0xab0   :  { %v15257_v13 = vld [vmem:[#allocation5 + $0x164] sm:$0xf0]  ;;  %v14018_v36 = vld [vmem:[#allocation5 + $0x110] sm:$0xf] }
 0xab1   :  { %v17315_v1 = vpack.c.bf16 %v17877_v46, %v17883_v52  ;;  %18008 = vst [vmem:[#allocation78_spill] sm:$0xff] %v17324_v47  ;;  %8527 = vmatpush.bf16.msra.mxu2 %v13783_v22  ;;  %v17872_v48 = vmax.f32 %v17324_v47, 0.0  ;;  %v17336_v22 = vpack.c.bf16 %v17871_v42, %v17873_v39  ;;  %v13860_v52 = vld [vmem:[#allocation4 + $0x1d8] sm:$0xf0] }
 0xab2   :  { %v7756_v51 = vpop.f32.mrf.mxu2  ;;  %v7700_v43 = vpop.f32.mrf.mxu0  ;;  %8442 = vmatpush.bf16.msra.mxu3 %v13827_v4 }
 0xab3   :  { %v7785_v32 = vpop.f32.mrf.mxu3  ;;  %8420 = vmatmul.bf16.gmra.mxu2 %v17315_v1  ;;  %v7729_v6 = vpop.f32.mrf.mxu1  ;;  %v7701_v44 = vadd.f32 %v7700_v43, %v17204_v21  ;;  %v7757_v56 = vadd.f32 %v7756_v51, %v7728_v35  ;;  %v17342_v29 = vpack.c.bf16 %v17870_v60, %v17872_v48 }
 0xab5   :  { %v7730_v12 = vadd.f32 %v7729_v6, %v7701_v44  ;;  %v17330_v31 = vadd.f32 %v7785_v32, %v7757_v56  ;;  %8528 = vmatpush.bf16.msra.mxu2 %v13775_v49  ;;  %v13767_v44 = vor.u32 %v15182_v59, %v13764_v14  ;;  %v15197_v56 = vld [vmem:[#allocation4 + $0x184] sm:$0xf0] }
 0xab7   :  { %v17878_v53 = vmax.f32 %v17330_v31, 0.0 }
 0xab9   :  { %8529 = vmatpush.bf16.msra.mxu2 %v13767_v44  ;;  %v15210_v44 = vld [vmem:[#allocation4 + $0x1f4] sm:$0xf] }
 0xaba   :  { %v7758_v3 = vpop.f32.mrf.mxu2  ;;  %v7703_v43 = vpop.f32.mrf.mxu0 }
 0xabb   :  { %v7759_v51 = vadd.f32 %v7758_v3, %v7730_v12  ;;  %v7787_v35 = vpop.f32.mrf.mxu3  ;;  %v7732_v6 = vpop.f32.mrf.mxu1  ;;  %v7704_v49 = vadd.f32 %v7703_v43, %v17204_v21  ;;  %v13819_v12 = vor.u32 %v15197_v56, %v13818_v62  ;;  %v13756_v3 = vld [vmem:[#allocation4 + $0x108] sm:$0xf0] }
 0xabc   :  { %v13759_v59 = vor.u32 %v15180_v9, %v13756_v3  ;;  %v13876_v9 = vld [vmem:[#allocation4 + $0x1f8] sm:$0xf0] }
 0xabd   :  { %v17344_v32 = vadd.f32 %v7787_v35, %v7759_v51  ;;  %8372 = vmatmul.bf16.gmra.mxu0 %v17336_v22  ;;  %8443 = vmatpush.bf16.msra.mxu3 %v13819_v12  ;;  %v7733_v35 = vadd.f32 %v7732_v6, %v7704_v49  ;;  %v13879_v3 = vor.u32 %v15210_v44, %v13876_v9  ;;  %v15485_v6 = vld [vmem:[#allocation35] sm:$0xf] }
 0xabe   :  { %8401 = vmatmul.bf16.gmra.mxu1 %v17342_v29  ;;  %8530 = vmatpush.bf16.msra.mxu2 %v13759_v59  ;;  %v17361_v49 = vperm.slane %v15485_v6, 3  ;;  %v14002_v59 = vld [vmem:[#allocation5 + $0xf0] sm:$0xf] }
 0xabf   :  { %18009 = vst [vmem:[#allocation79_spill] sm:$0xff] %v17344_v32  ;;  %v17874_v4 = vmax.f32 %v17344_v32, 0.0 }
 0xac1   :  { %v17355_v14 = vpack.c.bf16 %v17874_v4, %v17878_v53  ;;  %8552 = vmatpush.bf16.msrb.mxu3 %v13879_v3  ;;  %v13930_v3 = vld [vmem:[#allocation5 + $0x60] sm:$0xf] }
 0xac2   :  { %v7761_v51 = vpop.f32.mrf.mxu2  ;;  %v7705_v42 = vpop.f32.mrf.mxu0 }
 0xac3   :  { %v7790_v60 = vpop.f32.mrf.mxu3  ;;  %8425 = vmatmul.bf16.gmra.mxu2 %v17355_v14  ;;  %v7734_v43 = vpop.f32.mrf.mxu1  ;;  %v7706_v62 = vadd.f32 %v7705_v42, %v17204_v21  ;;  %v7762_v56 = vadd.f32 %v7761_v51, %v7733_v35  ;;  %v13938_v21 = vld [vmem:[#allocation5 + $0x70] sm:$0xf]  ;;  %v15227_v42 = vld [vmem:[#allocation5 + $0x74] sm:$0xf0] }
 0xac5   :  { %v7735_v48 = vadd.f32 %v7734_v43, %v7706_v62  ;;  %v17359_v4 = vadd.f32 %v7790_v60, %v7762_v56  ;;  %v15208_v62 = vld [vmem:[#allocation4 + $0x1e4] sm:$0xf]  ;;  %v13868_v56 = vld [vmem:[#allocation4 + $0x1e8] sm:$0xf0] }
 0xac6   :  { %v13871_v9 = vor.u32 %v15208_v62, %v13868_v56  ;;  %v15223_v62 = vld [vmem:[#allocation5 + $0x54] sm:$0xf0] }
 0xac7   :  { %18010 = vst [vmem:[#allocation80_spill] sm:$0xff] %v17359_v4  ;;  %v17881_v51 = vmax.f32 %v17359_v4, 0.0  ;;  %v15247_v4 = vld [vmem:[#allocation5 + $0x114] sm:$0xf0] }
 0xac8   :  { %8553 = vmatpush.bf16.msrb.mxu3 %v13871_v9  ;;  %v13914_v9 = vld [vmem:[#allocation5 + $0x40] sm:$0xf] }
 0xaca   :  { %v7763_v39 = vpop.f32.mrf.mxu2  ;;  %v7804_v27 = vpop.f32.mrf.mxu0 }
 0xacb   :  { %v7764_v12 = vadd.f32 %v7763_v39, %v7735_v48  ;;  %v7792_v57 = vpop.f32.mrf.mxu3  ;;  %v7833_v46 = vpop.f32.mrf.mxu1  ;;  %v7805_v60 = vadd.f32 %v7804_v27, %v17361_v49  ;;  %v13939_v39 = vor.u32 %v15227_v42, %v13938_v21  ;;  %v15243_v48 = vld [vmem:[#allocation5 + $0xf4] sm:$0xf0]  ;;  %v13994_v27 = vld [vmem:[#allocation5 + $0xe0] sm:$0xf] }
 0xacc   :  { %v14003_v43 = vor.u32 %v15243_v48, %v14002_v59  ;;  %v15241_v59 = vld [vmem:[#allocation5 + $0xe4] sm:$0xf0] }
 0xacd   :  { %v17363_v53 = vadd.f32 %v7792_v57, %v7764_v12  ;;  %8473 = vmatmul.bf16.vlgmr.msrb.gmra.mxu0 %v17210_v30  ;;  %v15225_v12 = vld [vmem:[#allocation5 + $0x64] sm:$0xf0]  ;;  %v7834_v6 = vadd.f32 %v7833_v46, %v7805_v60  ;;  %v13863_v60 = vor.u32 %v15206_v0, %v13860_v52  ;;  %v15219_v52 = vld [vmem:[#allocation5 + $0x34] sm:$0xf0] }
 0xace   :  { %8502 = vmatmul.bf16.vlgmr.msra.gmra.mxu1 %v17216_v23  ;;  %8987 = vmatpush.bf16.msra.mxu0 %v13939_v39  ;;  %v13931_v42 = vor.u32 %v15225_v12, %v13930_v3  ;;  %v13922_v39 = vld [vmem:[#allocation5 + $0x50] sm:$0xf] }
 0xacf   :  { %18011 = vst [vmem:[#allocation81_spill] sm:$0xff] %v17363_v53  ;;  %v17880_v35 = vmax.f32 %v17363_v53, 0.0  ;;  %9016 = vmatpush.bf16.msrb.mxu1 %v14003_v43  ;;  %v13986_v43 = vld [vmem:[#allocation5 + $0xd0] sm:$0xf]  ;;  %v13923_v46 = vor.u32 %v15223_v62, %v13922_v39  ;;  %8554 = vmatpush.bf16.msrb.mxu3 %v13863_v60  ;;  %v15204_v60 = vld [vmem:[#allocation4 + $0x1c4] sm:$0xf] }
 0xad0   :  { %v13987_v3 = vor.u32 %v15239_v61, %v13986_v43  ;;  %v13906_v61 = vld [vmem:[#allocation5 + $0x30] sm:$0xf]  ;;  %v15235_v43 = vld [vmem:[#allocation5 + $0xb4] sm:$0xf0]  ;;  %v14058_v53 = vld [vmem:[#allocation5 + $0x160] sm:$0xf] }
 0xad1   :  { %v17374_v57 = vpack.c.bf16 %v17880_v35, %v17881_v51  ;;  %v13995_v35 = vor.u32 %v15241_v59, %v13994_v27  ;;  %v15221_v27 = vld [vmem:[#allocation5 + $0x44] sm:$0xf0]  ;;  %v13978_v59 = vld [vmem:[#allocation5 + $0xc0] sm:$0xf]  ;;  %v13907_v62 = vor.u32 %v15219_v52, %v13906_v61  ;;  %v14066_v61 = vld [vmem:[#allocation5 + $0x170] sm:$0xf] }
 0xad2   :  { %v7862_v44 = vpop.f32.mrf.mxu2  ;;  %v7806_v21 = vpop.f32.mrf.mxu0  ;;  %8988 = vmatpush.bf16.msra.mxu0 %v13931_v42  ;;  %v15259_v52 = vld [vmem:[#allocation5 + $0x174] sm:$0xf0] }
 0xad3   :  { %v7891_v25 = vpop.f32.mrf.mxu3  ;;  %8430 = vmatmul.bf16.gmra.mxu2 %v17374_v57  ;;  %v7835_v48 = vpop.f32.mrf.mxu1  ;;  %v7807_v51 = vadd.f32 %v7806_v21, %v17361_v49  ;;  %9017 = vmatpush.bf16.msrb.mxu1 %v13995_v35  ;;  %v7863_v56 = vadd.f32 %v7862_v44, %v7834_v6  ;;  %v13915_v44 = vor.u32 %v15221_v27, %v13914_v9  ;;  %v15237_v6 = vld [vmem:[#allocation5 + $0xc4] sm:$0xf0]  ;;  %v13898_v27 = vld [vmem:[#allocation5 + $0x20] sm:$0xf] }
 0xad4   :  { %v13979_v39 = vor.u32 %v15237_v6, %v13978_v59  ;;  %v15217_v59 = vld [vmem:[#allocation5 + $0x24] sm:$0xf0] }
 0xad5   :  { %v7836_v58 = vadd.f32 %v7835_v48, %v7807_v51  ;;  %v17378_v21 = vadd.f32 %v7891_v25, %v7863_v56  ;;  %v13970_v51 = vld [vmem:[#allocation5 + $0xb0] sm:$0xf]  ;;  %v13899_v6 = vor.u32 %v15217_v59, %v13898_v27  ;;  %v15231_v59 = vld [vmem:[#allocation5 + $0x94] sm:$0xf0] }
 0xad6   :  { %8989 = vmatpush.bf16.msra.mxu0 %v13923_v46  ;;  %v13971_v56 = vor.u32 %v15235_v43, %v13970_v51  ;;  %v14067_v43 = vor.u32 %v15259_v52, %v14066_v61  ;;  %v13946_v61 = vld [vmem:[#allocation5 + $0x80] sm:$0xf] }
 0xad7   :  { %9018 = vmatpush.bf16.msrb.mxu1 %v13987_v3  ;;  %v17889_v48 = vmax.f32 %v17378_v21, 0.0  ;;  %v13852_v3 = vld [vmem:[#allocation4 + $0x1c8] sm:$0xf0] }
 0xad8   :  { %v13855_v9 = vor.u32 %v15204_v60, %v13852_v3  ;;  %9045 = vmatpush.bf16.msrb.mxu2 %v14067_v43  ;;  %v13954_v3 = vld [vmem:[#allocation5 + $0x90] sm:$0xf] }
 0xada   :  { %v7864_v12 = vpop.f32.mrf.mxu2  ;;  %v7809_v20 = vpop.f32.mrf.mxu0  ;;  %8990 = vmatpush.bf16.msra.mxu0 %v13915_v44  ;;  %8555 = vmatpush.bf16.msrb.mxu3 %v13855_v9 }
 0xadb   :  { %v7865_v35 = vadd.f32 %v7864_v12, %v7836_v58  ;;  %v7893_v42 = vpop.f32.mrf.mxu3  ;;  %v7838_v38 = vpop.f32.mrf.mxu1  ;;  %v7810_v58 = vadd.f32 %v7809_v20, %v17361_v49  ;;  %9019 = vmatpush.bf16.msrb.mxu1 %v13979_v39  ;;  %v13962_v20 = vld [vmem:[#allocation5 + $0xa0] sm:$0xf]  ;;  %v15233_v39 = vld [vmem:[#allocation5 + $0xa4] sm:$0xf0] }
 0xadd   :  { %v17380_v0 = vadd.f32 %v7893_v42, %v7865_v35  ;;  %8478 = vmatmul.bf16.gmra.mxu0 %v17247_v26  ;;  %v7839_v35 = vadd.f32 %v7838_v38, %v7810_v58  ;;  %v13890_v38 = vld [vmem:[#allocation5 + $0x10] sm:$0xf]  ;;  %v15215_v58 = vld [vmem:[#allocation5 + $0x14] sm:$0xf0] }
 0xade   :  { %8507 = vmatmul.bf16.gmra.mxu1 %v17253_v40  ;;  %8991 = vmatpush.bf16.msra.mxu0 %v13907_v62  ;;  %v13963_v62 = vor.u32 %v15233_v39, %v13962_v20  ;;  %v13891_v41 = vor.u32 %v15215_v58, %v13890_v38  ;;  %v14059_v20 = vor.u32 %v15257_v13, %v14058_v53  ;;  %v14042_v53 = vld [vmem:[#allocation5 + $0x140] sm:$0xf] }
 0xadf   :  { %18012 = vst [vmem:[#allocation82_spill] sm:$0xff] %v17380_v0  ;;  %v17888_v25 = vmax.f32 %v17380_v0, 0.0  ;;  %9020 = vmatpush.bf16.msrb.mxu1 %v13971_v56  ;;  %v13955_v56 = vor.u32 %v15231_v59, %v13954_v3 }
 0xae0   :  { %9046 = vmatpush.bf16.msrb.mxu2 %v14059_v20 }
 0xae1   :  { %v17391_v46 = vpack.c.bf16 %v17888_v25, %v17889_v48  ;;  %v15202_v48 = vld [vmem:[#allocation4 + $0x1b4] sm:$0xf] }
 0xae2   :  { %v7867_v12 = vpop.f32.mrf.mxu2  ;;  %v7811_v44 = vpop.f32.mrf.mxu0  ;;  %8992 = vmatpush.bf16.msra.mxu0 %v13899_v6  ;;  %v13847_v27 = vor.u32 %v15202_v48, %v13844_v50  ;;  %v15213_v6 = vld [vmem:[#allocation5 + $0x4] sm:$0xf0] }
 0xae3   :  { %v7896_v42 = vpop.f32.mrf.mxu3  ;;  %8444 = vmatmul.bf16.vlgmr.msra.gmra.mxu3 %v17391_v46  ;;  %8531 = vmatmul.bf16.vlgmr.msra.gmra.mxu2 %v17269_v8  ;;  %v7840_v51 = vpop.f32.mrf.mxu1  ;;  %v7812_v60 = vadd.f32 %v7811_v44, %v17361_v49  ;;  %v7868_v25 = vadd.f32 %v7867_v12, %v7839_v35  ;;  %v13882_v44 = vld [vmem:[#allocation5] sm:$0xf]  ;;  %v15229_v48 = vld [vmem:[#allocation5 + $0x84] sm:$0xf0] }
 0xae4   :  { %9021 = vmatpush.bf16.msrb.mxu1 %v13963_v62  ;;  %8556 = vmatpush.bf16.msrb.mxu3 %v13847_v27  ;;  %v13883_v50 = vor.u32 %v15213_v6, %v13882_v44  ;;  %v14050_v62 = vld [vmem:[#allocation5 + $0x150] sm:$0xf]  ;;  %v15251_v6 = vld [vmem:[#allocation5 + $0x134] sm:$0xf0] }
 0xae5   :  { %v7841_v9 = vadd.f32 %v7840_v51, %v7812_v60  ;;  %v17396_v52 = vadd.f32 %v7896_v42, %v7868_v25  ;;  %v13947_v51 = vor.u32 %v15229_v48, %v13946_v61  ;;  %v15253_v25 = vld [vmem:[#allocation5 + $0x144] sm:$0xf0]  ;;  %v14034_v44 = vld [vmem:[#allocation5 + $0x130] sm:$0xf] }
 0xae6   :  { %8993 = vmatpush.bf16.msra.mxu0 %v13891_v41  ;;  %v15255_v41 = vld [vmem:[#allocation5 + $0x154] sm:$0xf0]  ;;  %v14043_v27 = vor.u32 %v15253_v25, %v14042_v53  ;;  %v15249_v53 = vld [vmem:[#allocation5 + $0x124] sm:$0xf0]  ;;  %v15196_v25 = vld [vmem:[#allocation4 + $0x184] sm:$0xf] }
 0xae7   :  { %v14051_v13 = vor.u32 %v15255_v41, %v14050_v62  ;;  %v17895_v42 = vmax.f32 %v17396_v52, 0.0 }
 0xae8   :  { %9022 = vmatpush.bf16.msrb.mxu1 %v13955_v56  ;;  %v13836_v56 = vld [vmem:[#allocation4 + $0x1a8] sm:$0xf0] }
 0xae9   :  { %9047 = vmatpush.bf16.msrb.mxu2 %v14051_v13  ;;  %v14026_v13 = vld [vmem:[#allocation5 + $0x120] sm:$0xf] }
 0xaea   :  { %v7869_v39 = vpop.f32.mrf.mxu2  ;;  %v7814_v43 = vpop.f32.mrf.mxu0  ;;  %8994 = vmatpush.bf16.msra.mxu0 %v13883_v50  ;;  %v13828_v50 = vld [vmem:[#allocation4 + $0x198] sm:$0xf0] }
 0xaeb   :  { %v7870_v12 = vadd.f32 %v7869_v39, %v7841_v9  ;;  %v7898_v35 = vpop.f32.mrf.mxu3  ;;  %v7843_v38 = vpop.f32.mrf.mxu1  ;;  %v7815_v3 = vadd.f32 %v7814_v43, %v17361_v49  ;;  %v15200_v9 = vld [vmem:[#allocation4 + $0x1a4] sm:$0xf]  ;;  %v15198_v43 = vld [vmem:[#allocation4 + $0x194] sm:$0xf] }
 0xaec   :  { %9023 = vmatpush.bf16.msrb.mxu1 %v13947_v51  ;;  %v13839_v39 = vor.u32 %v15200_v9, %v13836_v56  ;;  %v13831_v62 = vor.u32 %v15198_v43, %v13828_v50  ;;  %v14035_v51 = vor.u32 %v15251_v6, %v14034_v44 }
 0xaed   :  { %v17398_v60 = vadd.f32 %v7898_v35, %v7870_v12  ;;  %8483 = vmatmul.bf16.gmra.mxu0 %v17293_v16  ;;  %v7844_v61 = vadd.f32 %v7843_v38, %v7815_v3  ;;  %9048 = vmatpush.bf16.msrb.mxu2 %v14043_v27  ;;  %v13820_v38 = vld [vmem:[#allocation4 + $0x188] sm:$0xf0]  ;;  %v14027_v3 = vor.u32 %v15249_v53, %v14026_v13  ;;  %v15275_v13 = vld [vmem:[#allocation5 + $0x1f4] sm:$0xf0] }
 0xaee   :  { %8512 = vmatmul.bf16.gmra.mxu1 %v17299_v19  ;;  %8557 = vmatpush.bf16.msrb.mxu3 %v13839_v39  ;;  %v13823_v56 = vor.u32 %v15196_v25, %v13820_v38  ;;  %v17432_v38 = vld [vmem:[#allocation37] sm:$0x3] }
 0xaef   :  { %18013 = vst [vmem:[#allocation83_spill] sm:$0xff] %v17398_v60  ;;  %v17894_v58 = vmax.f32 %v17398_v60, 0.0 }
 0xaf1   :  { %v17409_v59 = vpack.c.bf16 %v17894_v58, %v17895_v42  ;;  %9049 = vmatpush.bf16.msrb.mxu2 %v14035_v51 }
 0xaf2   :  { %v7872_v20 = vpop.f32.mrf.mxu2  ;;  %v7816_v35 = vpop.f32.mrf.mxu0  ;;  %8558 = vmatpush.bf16.msrb.mxu3 %v13831_v62 }
 0xaf3   :  { %v7901_v12 = vpop.f32.mrf.mxu3  ;;  %8449 = vmatmul.bf16.gmra.mxu3 %v17409_v59  ;;  %8536 = vmatmul.bf16.gmra.mxu2 %v17315_v1  ;;  %v7845_v48 = vpop.f32.mrf.mxu1  ;;  %v7817_v41 = vadd.f32 %v7816_v35, %v17361_v49  ;;  %v7873_v9 = vadd.f32 %v7872_v20, %v7844_v61  ;;  %v14019_v35 = vor.u32 %v15247_v4, %v14018_v36  ;;  %v14010_v20 = vld [vmem:[#allocation5 + $0x100] sm:$0xf]  ;;  %v15245_v61 = vld [vmem:[#allocation5 + $0x104] sm:$0xf0] }
 0xaf5   :  { %v7846_v58 = vadd.f32 %v7845_v48, %v7817_v41  ;;  %v17414_v47 = vadd.f32 %v7901_v12, %v7873_v9  ;;  %9050 = vmatpush.bf16.msrb.mxu2 %v14027_v3  ;;  %v14130_v41 = vld [vmem:[#allocation5 + $0x1f0] sm:$0xf] }
 0xaf6   :  { %8559 = vmatpush.bf16.msrb.mxu3 %v13823_v56  ;;  %v14131_v25 = vor.u32 %v15275_v13, %v14130_v41  ;;  %v14122_v56 = vld [vmem:[#allocation5 + $0x1e0] sm:$0xf]  ;;  %v13940_v13 = vld [vmem:[#allocation5 + $0x78] sm:$0xf0] }
 0xaf7   :  { %v17902_v50 = vmax.f32 %v17414_v47, 0.0 }
 0xaf9   :  { %9051 = vmatpush.bf16.msrb.mxu2 %v14019_v35 }
 0xafa   :  { %v7874_v42 = vpop.f32.mrf.mxu2  ;;  %v7819_v44 = vpop.f32.mrf.mxu0  ;;  %9074 = vmatpush.bf16.msra.mxu3 %v14131_v25  ;;  %v15242_v25 = vld [vmem:[#allocation5 + $0xf4] sm:$0xf] }
 0xafb   :  { %v7875_v27 = vadd.f32 %v7874_v42, %v7846_v58  ;;  %v7903_v39 = vpop.f32.mrf.mxu3  ;;  %v7848_v6 = vpop.f32.mrf.mxu1  ;;  %v7820_v12 = vadd.f32 %v7819_v44, %v17361_v49  ;;  %v14011_v42 = vor.u32 %v15245_v61, %v14010_v20 }
 0xafd   :  { %v17416_v43 = vadd.f32 %v7903_v39, %v7875_v27  ;;  %8488 = vmatmul.bf16.gmra.mxu0 %v17336_v22  ;;  %v7849_v58 = vadd.f32 %v7848_v6, %v7820_v12  ;;  %9052 = vmatpush.bf16.msrb.mxu2 %v14011_v42  ;;  %v15273_v27 = vld [vmem:[#allocation5 + $0x1e4] sm:$0xf0]  ;;  %v17435_v39 = vperm.slane %v17432_v38, 0 }
 0xafe   :  { %8517 = vmatmul.bf16.gmra.mxu1 %v17342_v29  ;;  %v14123_v44 = vor.u32 %v15273_v27, %v14122_v56 }
 0xaff   :  { %18014 = vst [vmem:[#allocation84_spill] sm:$0xff] %v17416_v43  ;;  %v17901_v48 = vmax.f32 %v17416_v43, 0.0  ;;  %v15230_v43 = vld [vmem:[#allocation5 + $0x94] sm:$0xf] }
 0xb00   :  { %9075 = vmatpush.bf16.msra.mxu3 %v14123_v44  ;;  %v15224_v44 = vld [vmem:[#allocation5 + $0x64] sm:$0xf] }
 0xb01   :  { %v17427_v36 = vpack.c.bf16 %v17901_v48, %v17902_v50  ;;  %v13988_v50 = vld [vmem:[#allocation5 + $0xd8] sm:$0xf0] }
 0xb02   :  { %v7877_v4 = vpop.f32.mrf.mxu2  ;;  %v7821_v51 = vpop.f32.mrf.mxu0 }
 0xb03   :  { %v7906_v62 = vpop.f32.mrf.mxu3  ;;  %8454 = vmatmul.bf16.gmra.mxu3 %v17427_v36  ;;  %8541 = vmatmul.bf16.gmra.mxu2 %v17355_v14  ;;  %v7850_v53 = vpop.f32.mrf.mxu1  ;;  %v7822_v9 = vadd.f32 %v7821_v51, %v17361_v49  ;;  %v7878_v3 = vadd.f32 %v7877_v4, %v7849_v58  ;;  %v15226_v58 = vld [vmem:[#allocation5 + $0x74] sm:$0xf] }
 0xb05   :  { %v7851_v6 = vadd.f32 %v7850_v53, %v7822_v9  ;;  %v17437_v20 = vadd.f32 %v7906_v62, %v7878_v3  ;;  %v13943_v9 = vor.u32 %v15226_v58, %v13940_v13  ;;  %v14004_v3 = vld [vmem:[#allocation5 + $0xf8] sm:$0xf0] }
 0xb06   :  { %v14007_v56 = vor.u32 %v15242_v25, %v14004_v3 }
 0xb07   :  { %18015 = vst [vmem:[#allocation85_spill] sm:$0xff] %v17437_v20  ;;  %v17900_v53 = vmax.f32 %v17437_v20, 0.0  ;;  %9103 = vmatpush.bf16.msrb.mxu0 %v13943_v9  ;;  %v15269_v20 = vld [vmem:[#allocation5 + $0x1c4] sm:$0xf0] }
 0xb08   :  { %9132 = vmatpush.bf16.msra.mxu1 %v14007_v56  ;;  %v15222_v56 = vld [vmem:[#allocation5 + $0x54] sm:$0xf] }
 0xb0a   :  { %v7879_v35 = vpop.f32.mrf.mxu2  ;;  %v8358_v12 = vpop.f32.mrf.mxu0 }
 0xb0b   :  { %v7880_v61 = vadd.f32 %v7879_v35, %v7851_v6  ;;  %v7908_v42 = vpop.f32.mrf.mxu3  ;;  %v8359_v49 = vadd.f32 %v8358_v12, %v17435_v39  ;;  %v8387_v51 = vpop.f32.mrf.mxu1  ;;  %v13932_v6 = vld [vmem:[#allocation5 + $0x68] sm:$0xf0]  ;;  %v15240_v35 = vld [vmem:[#allocation5 + $0xe4] sm:$0xf]  ;;  %v14114_v12 = vld [vmem:[#allocation5 + $0x1d0] sm:$0xf] }
 0xb0d   :  { %v17440_v41 = vadd.f32 %v7908_v42, %v7880_v61  ;;  %v17442_v4 = vadd.f32 %v8387_v51, %v8359_v49  ;;  %8995 = vmatmul.bf16.vlgmr.msra.gmra.mxu0 %v17210_v30  ;;  %v15271_v42 = vld [vmem:[#allocation5 + $0x1d4] sm:$0xf0]  ;;  %v13935_v49 = vor.u32 %v15224_v44, %v13932_v6  ;;  %v13996_v51 = vld [vmem:[#allocation5 + $0xe8] sm:$0xf0]  ;;  %v15220_v6 = vld [vmem:[#allocation5 + $0x44] sm:$0xf] }
 0xb0e   :  { %9024 = vmatmul.bf16.vlgmr.msrb.gmra.mxu1 %v17216_v23  ;;  %v14115_v25 = vor.u32 %v15271_v42, %v14114_v12  ;;  %v13999_v3 = vor.u32 %v15240_v35, %v13996_v51  ;;  %v15236_v35 = vld [vmem:[#allocation5 + $0xc4] sm:$0xf] }
 0xb0f   :  { %18016 = vst [vmem:[#allocation86_spill] sm:$0xff] %v17440_v41  ;;  %v17899_v62 = vmax.f32 %v17440_v41, 0.0  ;;  %9104 = vmatpush.bf16.msrb.mxu0 %v13935_v49  ;;  %v14106_v41 = vld [vmem:[#allocation5 + $0x1c0] sm:$0xf]  ;;  %v13980_v49 = vld [vmem:[#allocation5 + $0xc8] sm:$0xf0] }
 0xb10   :  { %9076 = vmatpush.bf16.msra.mxu3 %v14115_v25  ;;  %9133 = vmatpush.bf16.msra.mxu1 %v13999_v3  ;;  %v14107_v44 = vor.u32 %v15269_v20, %v14106_v41  ;;  %v13972_v41 = vld [vmem:[#allocation5 + $0xb8] sm:$0xf0]  ;;  %v15216_v25 = vld [vmem:[#allocation5 + $0x24] sm:$0xf]  ;;  %v13900_v3 = vld [vmem:[#allocation5 + $0x28] sm:$0xf0] }
 0xb11   :  { %v17452_v27 = vpack.c.bf16 %v17899_v62, %v17900_v53  ;;  %v13924_v62 = vld [vmem:[#allocation5 + $0x58] sm:$0xf0]  ;;  %v15238_v53 = vld [vmem:[#allocation5 + $0xd4] sm:$0xf] }
 0xb12   :  { %v8360_v61 = vpop.f32.mrf.mxu0  ;;  %v13927_v48 = vor.u32 %v15222_v56, %v13924_v62  ;;  %v13991_v37 = vor.u32 %v15238_v53, %v13988_v50  ;;  %v15218_v50 = vld [vmem:[#allocation5 + $0x34] sm:$0xf]  ;;  %v15232_v56 = vld [vmem:[#allocation5 + $0xa4] sm:$0xf] }
 0xb13   :  { %8459 = vmatmul.bf16.gmra.mxu3 %v17452_v27  ;;  %8546 = vmatmul.bf16.gmra.mxu2 %v17374_v57  ;;  %v8361_v58 = vadd.f32 %v8360_v61, %v17435_v39  ;;  %v8389_v13 = vpop.f32.mrf.mxu1  ;;  %v13916_v61 = vld [vmem:[#allocation5 + $0x48] sm:$0xf0] }
 0xb14   :  { %9105 = vmatpush.bf16.msrb.mxu0 %v13927_v48  ;;  %9134 = vmatpush.bf16.msra.mxu1 %v13991_v37  ;;  %v13919_v42 = vor.u32 %v15220_v6, %v13916_v61  ;;  %v13908_v48 = vld [vmem:[#allocation5 + $0x38] sm:$0xf0]  ;;  %v15234_v37 = vld [vmem:[#allocation5 + $0xb4] sm:$0xf]  ;;  %v14098_v6 = vld [vmem:[#allocation5 + $0x1b0] sm:$0xf] }
 0xb15   :  { %v17457_v9 = vadd.f32 %v8389_v13, %v8361_v58  ;;  %9077 = vmatpush.bf16.msra.mxu3 %v14107_v44  ;;  %v13983_v13 = vor.u32 %v15236_v35, %v13980_v49  ;;  %v13911_v20 = vor.u32 %v15218_v50, %v13908_v48  ;;  %v13975_v53 = vor.u32 %v15234_v37, %v13972_v41  ;;  %v15267_v61 = vld [vmem:[#allocation5 + $0x1b4] sm:$0xf0]  ;;  %v14068_v50 = vld [vmem:[#allocation5 + $0x178] sm:$0xf0]  ;;  %v15214_v41 = vld [vmem:[#allocation5 + $0x14] sm:$0xf] }
 0xb16   :  { %v13903_v35 = vor.u32 %v15216_v25, %v13900_v3 }
 0xb18   :  { %9106 = vmatpush.bf16.msrb.mxu0 %v13919_v42  ;;  %9135 = vmatpush.bf16.msra.mxu1 %v13983_v13  ;;  %v15258_v13 = vld [vmem:[#allocation5 + $0x174] sm:$0xf] }
 0xb19   :  { %v14071_v48 = vor.u32 %v15258_v13, %v14068_v50  ;;  %v15265_v13 = vld [vmem:[#allocation5 + $0x1a4] sm:$0xf0] }
 0xb1a   :  { %v8363_v12 = vpop.f32.mrf.mxu0 }
 0xb1b   :  { %v8364_v51 = vadd.f32 %v8363_v12, %v17435_v39  ;;  %v8392_v58 = vpop.f32.mrf.mxu1  ;;  %v13964_v12 = vld [vmem:[#allocation5 + $0xa8] sm:$0xf0]  ;;  %9161 = vmatpush.bf16.msra.mxu2 %v14071_v48  ;;  %v15254_v48 = vld [vmem:[#allocation5 + $0x154] sm:$0xf] }
 0xb1c   :  { %9107 = vmatpush.bf16.msrb.mxu0 %v13911_v20  ;;  %9136 = vmatpush.bf16.msra.mxu1 %v13975_v53  ;;  %v13892_v53 = vld [vmem:[#allocation5 + $0x18] sm:$0xf0] }
 0xb1d   :  { %v17460_v62 = vadd.f32 %v8392_v58, %v8364_v51  ;;  %9000 = vmatmul.bf16.gmra.mxu0 %v17247_v26  ;;  %v14099_v51 = vor.u32 %v15267_v61, %v14098_v6  ;;  %v13967_v58 = vor.u32 %v15232_v56, %v13964_v12  ;;  %v13895_v3 = vor.u32 %v15214_v41, %v13892_v53  ;;  %v15256_v6 = vld [vmem:[#allocation5 + $0x164] sm:$0xf]  ;;  %v14060_v56 = vld [vmem:[#allocation5 + $0x168] sm:$0xf0]  ;;  %v14052_v41 = vld [vmem:[#allocation5 + $0x158] sm:$0xf0] }
 0xb1e   :  { %9029 = vmatmul.bf16.gmra.mxu1 %v17253_v40  ;;  %v14063_v12 = vor.u32 %v15256_v6, %v14060_v56  ;;  %v15252_v56 = vld [vmem:[#allocation5 + $0x144] sm:$0xf] }
 0xb1f   :  { %9078 = vmatpush.bf16.msra.mxu3 %v14099_v51  ;;  %v13884_v51 = vld [vmem:[#allocation5 + $0x8] sm:$0xf0] }
 0xb20   :  { %9108 = vmatpush.bf16.msrb.mxu0 %v13903_v35  ;;  %9137 = vmatpush.bf16.msra.mxu1 %v13967_v58  ;;  %v14090_v35 = vld [vmem:[#allocation5 + $0x1a0] sm:$0xf]  ;;  %v15228_v58 = vld [vmem:[#allocation5 + $0x84] sm:$0xf] }
 0xb21   :  { %9162 = vmatpush.bf16.msra.mxu2 %v14063_v12 }
 0xb22   :  { %v8365_v44 = vpop.f32.mrf.mxu0 }
 0xb23   :  { %8560 = vmatmul.bf16.vlgmr.msrb.gmra.mxu3 %v17391_v46  ;;  %9053 = vmatmul.bf16.vlgmr.msrb.gmra.mxu2 %v17269_v8  ;;  %v8366_v42 = vadd.f32 %v8365_v44, %v17435_v39  ;;  %v8394_v49 = vpop.f32.mrf.mxu1  ;;  %v13956_v44 = vld [vmem:[#allocation5 + $0x98] sm:$0xf0] }
 0xb24   :  { %v13959_v61 = vor.u32 %v15230_v43, %v13956_v44  ;;  %9109 = vmatpush.bf16.msrb.mxu0 %v13895_v3  ;;  %v14055_v44 = vor.u32 %v15254_v48, %v14052_v41  ;;  %v15248_v41 = vld [vmem:[#allocation5 + $0x124] sm:$0xf] }
 0xb25   :  { %v17467_v37 = vadd.f32 %v8394_v49, %v8366_v42  ;;  %v14091_v42 = vor.u32 %v15265_v13, %v14090_v35  ;;  %v15212_v49 = vld [vmem:[#allocation5 + $0x4] sm:$0xf]  ;;  %v15250_v13 = vld [vmem:[#allocation5 + $0x134] sm:$0xf] }
 0xb26   :  { %v8416_v20 = vpop.f32.mrf.mxu2  ;;  %9138 = vmatpush.bf16.msra.mxu1 %v13959_v61  ;;  %v14044_v61 = vld [vmem:[#allocation5 + $0x148] sm:$0xf0]  ;;  %9163 = vmatpush.bf16.msra.mxu2 %v14055_v44  ;;  %v14074_v44 = vld [vmem:[#allocation5 + $0x180] sm:$0xf] }
 0xb27   :  { %v17470_v25 = vadd.f32 %v8416_v20, %v17442_v4  ;;  %9079 = vmatpush.bf16.msra.mxu3 %v14091_v42  ;;  %v13887_v4 = vor.u32 %v15212_v49, %v13884_v51  ;;  %v13948_v20 = vld [vmem:[#allocation5 + $0x88] sm:$0xf0]  ;;  %v14047_v35 = vor.u32 %v15252_v56, %v14044_v61  ;;  %v14036_v42 = vld [vmem:[#allocation5 + $0x138] sm:$0xf0]  ;;  %v14082_v49 = vld [vmem:[#allocation5 + $0x190] sm:$0xf] }
 0xb28   :  { %v13951_v43 = vor.u32 %v15228_v58, %v13948_v20  ;;  %v15263_v51 = vld [vmem:[#allocation5 + $0x194] sm:$0xf0] }
 0xb29   :  { %9110 = vmatpush.bf16.msrb.mxu0 %v13887_v4  ;;  %v14083_v4 = vor.u32 %v15263_v51, %v14082_v49 }
 0xb2a   :  { %v8368_v50 = vpop.f32.mrf.mxu0  ;;  %9139 = vmatpush.bf16.msra.mxu1 %v13951_v43  ;;  %9164 = vmatpush.bf16.msra.mxu2 %v14047_v35 }
 0xb2b   :  { %v8369_v53 = vadd.f32 %v8368_v50, %v17435_v39  ;;  %v8397_v32 = vpop.f32.mrf.mxu1  ;;  %9080 = vmatpush.bf16.msra.mxu3 %v14083_v4 }
 0xb2d   :  { %v8398_v6 = vadd.f32 %v8397_v32, %v8369_v53  ;;  %9005 = vmatmul.bf16.gmra.mxu0 %v17293_v16  ;;  %v14028_v53 = vld [vmem:[#allocation5 + $0x128] sm:$0xf0] }
 0xb2e   :  { %v8418_v3 = vpop.f32.mrf.mxu2  ;;  %9034 = vmatmul.bf16.gmra.mxu1 %v17299_v19  ;;  %v14031_v56 = vor.u32 %v15248_v41, %v14028_v53 }
 0xb2f   :  { %v17475_v12 = vadd.f32 %v8418_v3, %v17457_v9  ;;  %v14039_v9 = vor.u32 %v15250_v13, %v14036_v42  ;;  %v15261_v3 = vld [vmem:[#allocation5 + $0x184] sm:$0xf0] }
 0xb30   :  { %v14075_v61 = vor.u32 %v15261_v3, %v14074_v44 }
 0xb31   :  { %9165 = vmatpush.bf16.msra.mxu2 %v14039_v9  ;;  %v15274_v9 = vld [vmem:[#allocation5 + $0x1f4] sm:$0xf] }
 0xb32   :  { %v8370_v32 = vpop.f32.mrf.mxu0  ;;  %9081 = vmatpush.bf16.msra.mxu3 %v14075_v61  ;;  %v15272_v61 = vld [vmem:[#allocation5 + $0x1e4] sm:$0xf] }
 0xb33   :  { %8565 = vmatmul.bf16.gmra.mxu3 %v17409_v59  ;;  %9058 = vmatmul.bf16.gmra.mxu2 %v17315_v1  ;;  %v8371_v58 = vadd.f32 %v8370_v32, %v17435_v39  ;;  %v8399_v50 = vpop.f32.mrf.mxu1  ;;  %v14020_v32 = vld [vmem:[#allocation5 + $0x118] sm:$0xf0] }
 0xb34   :  { %v14023_v42 = vor.u32 %v15246_v18, %v14020_v32  ;;  %v14132_v18 = vld [vmem:[#allocation5 + $0x1f8] sm:$0xf0]  ;;  %v14124_v32 = vld [vmem:[#allocation5 + $0x1e8] sm:$0xf0] }
 0xb35   :  { %v8400_v20 = vadd.f32 %v8399_v50, %v8371_v58  ;;  %9166 = vmatpush.bf16.msra.mxu2 %v14031_v56  ;;  %v14012_v58 = vld [vmem:[#allocation5 + $0x108] sm:$0xf0]  ;;  %v14135_v53 = vor.u32 %v15274_v9, %v14132_v18  ;;  %v17496_v56 = vperm.slane %v17432_v38, 1 }
 0xb36   :  { %v8421_v48 = vpop.f32.mrf.mxu2 }
 0xb37   :  { %v17482_v43 = vadd.f32 %v8421_v48, %v17460_v62  ;;  %v15244_v62 = vld [vmem:[#allocation5 + $0x104] sm:$0xf]  ;;  %9190 = vmatpush.bf16.msrb.mxu3 %v14135_v53 }
 0xb38   :  { %v14015_v4 = vor.u32 %v15244_v62, %v14012_v58 }
 0xb39   :  { %9167 = vmatpush.bf16.msra.mxu2 %v14023_v42 }
 0xb3a   :  { %v8373_v24 = vpop.f32.mrf.mxu0 }
 0xb3b   :  { %v8374_v35 = vadd.f32 %v8373_v24, %v17435_v39  ;;  %v8402_v13 = vpop.f32.mrf.mxu1 }
 0xb3d   :  { %v8403_v49 = vadd.f32 %v8402_v13, %v8374_v35  ;;  %9010 = vmatmul.bf16.gmra.mxu0 %v17336_v22  ;;  %9168 = vmatpush.bf16.msra.mxu2 %v14015_v4  ;;  %v14127_v35 = vor.u32 %v15272_v61, %v14124_v32  ;;  %v14116_v4 = vld [vmem:[#allocation5 + $0x1d8] sm:$0xf0] }
 0xb3e   :  { %v8423_v51 = vpop.f32.mrf.mxu2  ;;  %9039 = vmatmul.bf16.gmra.mxu1 %v17342_v29 }
 0xb3f   :  { %v17487_v50 = vadd.f32 %v8423_v51, %v17467_v37  ;;  %9191 = vmatpush.bf16.msrb.mxu3 %v14127_v35 }
 0xb42   :  { %v8375_v24 = vpop.f32.mrf.mxu0 }
 0xb43   :  { %8570 = vmatmul.bf16.gmra.mxu3 %v17427_v36  ;;  %9063 = vmatmul.bf16.gmra.mxu2 %v17355_v14  ;;  %v8376_v48 = vadd.f32 %v8375_v24, %v17435_v39  ;;  %v8404_v41 = vpop.f32.mrf.mxu1 }
 0xb45   :  { %v8405_v44 = vadd.f32 %v8404_v41, %v8376_v48 }
 0xb46   :  { %v8426_v3 = vpop.f32.mrf.mxu2 }
 0xb47   :  { %v17493_v37 = vadd.f32 %v8426_v3, %v8398_v6  ;;  %v15270_v6 = vld [vmem:[#allocation5 + $0x1d4] sm:$0xf] }
 0xb48   :  { %v14119_v9 = vor.u32 %v15270_v6, %v14116_v4 }
 0xb4a   :  { %v8474_v13 = vpop.f32.mrf.mxu0  ;;  %9192 = vmatpush.bf16.msrb.mxu3 %v14119_v9 }
 0xb4b   :  { %v8475_v42 = vadd.f32 %v8474_v13, %v17496_v56  ;;  %v8503_v51 = vpop.f32.mrf.mxu1  ;;  %v15266_v13 = vld [vmem:[#allocation5 + $0x1b4] sm:$0xf] }
 0xb4d   :  { %v8504_v39 = vadd.f32 %v8503_v51, %v8475_v42  ;;  %9111 = vmatmul.bf16.vlgmr.msrb.gmra.mxu0 %v17210_v30  ;;  %v15268_v30 = vld [vmem:[#allocation5 + $0x1c4] sm:$0xf]  ;;  %v14100_v42 = vld [vmem:[#allocation5 + $0x1b8] sm:$0xf0] }
 0xb4e   :  { %v8428_v62 = vpop.f32.mrf.mxu2  ;;  %9140 = vmatmul.bf16.vlgmr.msra.gmra.mxu1 %v17216_v23  ;;  %v14103_v6 = vor.u32 %v15266_v13, %v14100_v42  ;;  %v14084_v13 = vld [vmem:[#allocation5 + $0x198] sm:$0xf0] }
 0xb4f   :  { %v17500_v58 = vadd.f32 %v8428_v62, %v8400_v20  ;;  %v14108_v20 = vld [vmem:[#allocation5 + $0x1c8] sm:$0xf0] }
 0xb50   :  { %v14111_v41 = vor.u32 %v15268_v30, %v14108_v20  ;;  %v14092_v30 = vld [vmem:[#allocation5 + $0x1a8] sm:$0xf0] }
 0xb52   :  { %v17505_v38 = vpop.f32.mrf.mxu0  ;;  %9193 = vmatpush.bf16.msrb.mxu3 %v14111_v41 }
 0xb53   :  { %8575 = vmatmul.bf16.gmra.mxu3 %v17452_v27  ;;  %9068 = vmatmul.bf16.gmra.mxu2 %v17374_v57  ;;  %v17507_v24 = vpop.f32.mrf.mxu1 }
 0xb56   :  { %v8431_v18 = vpop.f32.mrf.mxu2  ;;  %9194 = vmatpush.bf16.msrb.mxu3 %v14103_v6 }
 0xb57   :  { %v17509_v48 = vadd.f32 %v8431_v18, %v8403_v49 }
 0xb5a   :  { %v8479_v53 = vpop.f32.mrf.mxu0 }
 0xb5b   :  { %v8480_v23 = vadd.f32 %v8479_v53, %v17496_v56  ;;  %v8508_v3 = vpop.f32.mrf.mxu1 }
 0xb5d   :  { %v8509_v61 = vadd.f32 %v8508_v3, %v8480_v23  ;;  %9116 = vmatmul.bf16.gmra.mxu0 %v17247_v26 }
 0xb5e   :  { %v8433_v32 = vpop.f32.mrf.mxu2  ;;  %9145 = vmatmul.bf16.gmra.mxu1 %v17253_v40  ;;  %v15264_v40 = vld [vmem:[#allocation5 + $0x1a4] sm:$0xf] }
 0xb5f   :  { %v17513_v35 = vadd.f32 %v8433_v32, %v8405_v44  ;;  %v14095_v20 = vor.u32 %v15264_v40, %v14092_v30  ;;  %v14076_v40 = vld [vmem:[#allocation5 + $0x188] sm:$0xf0] }
 0xb61   :  { %9195 = vmatpush.bf16.msrb.mxu3 %v14095_v20 }
 0xb62   :  { %v8481_v49 = vpop.f32.mrf.mxu0 }
 0xb63   :  { %9082 = vmatmul.bf16.vlgmr.msra.gmra.mxu3 %v17391_v46  ;;  %9169 = vmatmul.bf16.vlgmr.msra.gmra.mxu2 %v17269_v8  ;;  %v8482_v51 = vadd.f32 %v8481_v49, %v17496_v56  ;;  %v8510_v62 = vpop.f32.mrf.mxu1 }
 0xb65   :  { %v8511_v4 = vadd.f32 %v8510_v62, %v8482_v51 }
 0xb66   :  { %v8445_v9 = vpop.f32.mrf.mxu3  ;;  %v8532_v18 = vpop.f32.mrf.mxu2 }
 0xb67   :  { %v17520_v26 = vadd.f32 %v8445_v9, %v17470_v25  ;;  %v17522_v44 = vadd.f32 %v8532_v18, %v8504_v39  ;;  %v15262_v39 = vld [vmem:[#allocation5 + $0x194] sm:$0xf] }
 0xb68   :  { %v14087_v62 = vor.u32 %v15262_v39, %v14084_v13 }
 0xb6a   :  { %v8484_v8 = vpop.f32.mrf.mxu0  ;;  %9196 = vmatpush.bf16.msrb.mxu3 %v14087_v62 }
 0xb6b   :  { %v8485_v41 = vadd.f32 %v8484_v8, %v17496_v56  ;;  %v8513_v53 = vpop.f32.mrf.mxu1 }
 0xb6d   :  { %v8514_v23 = vadd.f32 %v8513_v53, %v8485_v41  ;;  %9121 = vmatmul.bf16.gmra.mxu0 %v17293_v16 }
 0xb6e   :  { %v8447_v3 = vpop.f32.mrf.mxu3  ;;  %v17525_v32 = vpop.f32.mrf.mxu2  ;;  %9150 = vmatmul.bf16.gmra.mxu1 %v17299_v19  ;;  %v15260_v19 = vld [vmem:[#allocation5 + $0x184] sm:$0xf] }
 0xb6f   :  { %v17529_v49 = vadd.f32 %v8447_v3, %v17475_v12  ;;  %v14079_v30 = vor.u32 %v15260_v19, %v14076_v40 }
 0xb71   :  { %9197 = vmatpush.bf16.msrb.mxu3 %v14079_v30 }
 0xb72   :  { %v8486_v25 = vpop.f32.mrf.mxu0 }
 0xb73   :  { %9087 = vmatmul.bf16.gmra.mxu3 %v17409_v59  ;;  %9174 = vmatmul.bf16.gmra.mxu2 %v17315_v1  ;;  %v8487_v42 = vadd.f32 %v8486_v25, %v17496_v56  ;;  %v8515_v51 = vpop.f32.mrf.mxu1 }
 0xb75   :  { %v8516_v6 = vadd.f32 %v8515_v51, %v8487_v42  ;;  %v17551_v42 = vld [vmem:[#allocation38] sm:$0x3] }
 0xb76   :  { %v8450_v9 = vpop.f32.mrf.mxu3  ;;  %v8537_v18 = vpop.f32.mrf.mxu2 }
 0xb77   :  { %v17536_v16 = vadd.f32 %v8450_v9, %v17482_v43  ;;  %v17538_v12 = vadd.f32 %v8537_v18, %v8509_v61 }
 0xb7a   :  { %v8489_v1 = vpop.f32.mrf.mxu0 }
 0xb7b   :  { %v8490_v20 = vadd.f32 %v8489_v1, %v17496_v56  ;;  %v8518_v8 = vpop.f32.mrf.mxu1 }
 0xb7d   :  { %v8519_v41 = vadd.f32 %v8518_v8, %v8490_v20  ;;  %9126 = vmatmul.bf16.gmra.mxu0 %v17336_v22 }
 0xb7e   :  { %v8452_v53 = vpop.f32.mrf.mxu3  ;;  %v8539_v3 = vpop.f32.mrf.mxu2  ;;  %9155 = vmatmul.bf16.gmra.mxu1 %v17342_v29  ;;  %v8663_v29 = vperm.slane %v17551_v42, 0 }
 0xb7f   :  { %v17543_v25 = vadd.f32 %v8452_v53, %v17487_v50  ;;  %v17545_v43 = vadd.f32 %v8539_v3, %v8511_v4 }
 0xb82   :  { %v8491_v61 = vpop.f32.mrf.mxu0 }
 0xb83   :  { %9092 = vmatmul.bf16.gmra.mxu3 %v17427_v36  ;;  %9179 = vmatmul.bf16.gmra.mxu2 %v17355_v14  ;;  %v8492_v39 = vadd.f32 %v8491_v61, %v17496_v56  ;;  %v8520_v13 = vpop.f32.mrf.mxu1 }
 0xb85   :  { %v8521_v51 = vadd.f32 %v8520_v13, %v8492_v39 }
 0xb86   :  { %v8455_v62 = vpop.f32.mrf.mxu3  ;;  %v8542_v22 = vpop.f32.mrf.mxu2 }
 0xb87   :  { %v17554_v50 = vadd.f32 %v8455_v62, %v17493_v37  ;;  %v17556_v4 = vadd.f32 %v8542_v22, %v8514_v23 }
 0xb8a   :  { %v8996_v9 = vpop.f32.mrf.mxu0 }
 0xb8b   :  { %v8997_v18 = vadd.f32 %v8996_v9, %v8663_v29  ;;  %v9025_v19 = vpop.f32.mrf.mxu1 }
 0xb8d   :  { %v9026_v14 = vadd.f32 %v9025_v19, %v8997_v18 }
 0xb8e   :  { %v8457_v40 = vpop.f32.mrf.mxu3  ;;  %v8544_v30 = vpop.f32.mrf.mxu2 }
 0xb8f   :  { %v17560_v1 = vadd.f32 %v8457_v40, %v17500_v58  ;;  %v17562_v20 = vadd.f32 %v8544_v30, %v8516_v6 }
 0xb92   :  { %v8998_v37 = vpop.f32.mrf.mxu0 }
 0xb93   :  { %9097 = vmatmul.bf16.gmra.mxu3 %v17452_v27  ;;  %9184 = vmatmul.bf16.gmra.mxu2 %v17374_v57  ;;  %v8999_v23 = vadd.f32 %v8998_v37, %v8663_v29  ;;  %v9027_v8 = vpop.f32.mrf.mxu1 }
 0xb95   :  { %v9028_v53 = vadd.f32 %v9027_v8, %v8999_v23 }
 0xb96   :  { %v8460_v3 = vpop.f32.mrf.mxu3  ;;  %v8547_v61 = vpop.f32.mrf.mxu2 }
 0xb97   :  { %v17567_v39 = vadd.f32 %v8460_v3, %v17509_v48  ;;  %v8548_v13 = vadd.f32 %v8547_v61, %v8519_v41 }
 0xb9a   :  { %v9001_v62 = vpop.f32.mrf.mxu0 }
 0xb9b   :  { %v9002_v22 = vadd.f32 %v9001_v62, %v8663_v29  ;;  %v9030_v58 = vpop.f32.mrf.mxu1 }
 0xb9d   :  { %v9031_v9 = vadd.f32 %v9030_v58, %v9002_v22 }
 0xb9e   :  { %v8462_v6 = vpop.f32.mrf.mxu3  ;;  %v8549_v18 = vpop.f32.mrf.mxu2 }
 0xb9f   :  { %v17570_v19 = vadd.f32 %v8462_v6, %v17513_v35  ;;  %v8550_v57 = vadd.f32 %v8549_v18, %v8521_v51 }
 0xba2   :  { %v9003_v40 = vpop.f32.mrf.mxu0 }
 0xba3   :  { %9198 = vmatmul.bf16.vlgmr.msrb.gmra.mxu3 %v17391_v46  ;;  %v9004_v30 = vadd.f32 %v9003_v40, %v8663_v29  ;;  %v9032_v37 = vpop.f32.mrf.mxu1 }
 0xba5   :  { %v9033_v23 = vadd.f32 %v9032_v37, %v9004_v30 }
 0xba6   :  { %v8561_v8 = vpop.f32.mrf.mxu3  ;;  %v9054_v48 = vpop.f32.mrf.mxu2 }
 0xba7   :  { %v17574_v41 = vadd.f32 %v8561_v8, %v17522_v44  ;;  %v9055_v3 = vadd.f32 %v9054_v48, %v9026_v14 }
 0xbaa   :  { %v9006_v61 = vpop.f32.mrf.mxu0 }
 0xbab   :  { %v9007_v62 = vadd.f32 %v9006_v61, %v8663_v29  ;;  %v9035_v22 = vpop.f32.mrf.mxu1 }
 0xbad   :  { %v9036_v58 = vadd.f32 %v9035_v22, %v9007_v62 }
 0xbae   :  { %v17576_v60 = vpop.f32.mrf.mxu3  ;;  %v9056_v35 = vpop.f32.mrf.mxu2 }
 0xbaf   :  { %v9057_v51 = vadd.f32 %v9056_v35, %v9028_v53 }
 0xbb2   :  { %v9008_v46 = vpop.f32.mrf.mxu0 }
 0xbb3   :  { %9203 = vmatmul.bf16.gmra.mxu3 %v17409_v59  ;;  %v9009_v6 = vadd.f32 %v9008_v46, %v8663_v29  ;;  %v9037_v18 = vpop.f32.mrf.mxu1 }
 0xbb5   :  { %v9038_v40 = vadd.f32 %v9037_v18, %v9009_v6 }
 0xbb6   :  { %v8566_v30 = vpop.f32.mrf.mxu3  ;;  %v9059_v37 = vpop.f32.mrf.mxu2 }
 0xbb7   :  { %v17580_v44 = vadd.f32 %v8566_v30, %v17538_v12  ;;  %v9060_v14 = vadd.f32 %v9059_v37, %v9031_v9 }
 0xbba   :  { %v9011_v8 = vpop.f32.mrf.mxu0 }
 0xbbb   :  { %v9012_v48 = vadd.f32 %v9011_v8, %v8663_v29  ;;  %v9040_v61 = vpop.f32.mrf.mxu1 }
 0xbbd   :  { %v9041_v62 = vadd.f32 %v9040_v61, %v9012_v48 }
 0xbbe   :  { %v8568_v22 = vpop.f32.mrf.mxu3  ;;  %v9061_v55 = vpop.f32.mrf.mxu2 }
 0xbbf   :  { %v17583_v53 = vadd.f32 %v8568_v22, %v17545_v43  ;;  %v9062_v59 = vadd.f32 %v9061_v55, %v9033_v23 }
 0xbc2   :  { %v9013_v35 = vpop.f32.mrf.mxu0 }
 0xbc3   :  { %9208 = vmatmul.bf16.gmra.mxu3 %v17427_v36  ;;  %v9014_v46 = vadd.f32 %v9013_v35, %v8663_v29  ;;  %v9042_v6 = vpop.f32.mrf.mxu1 }
 0xbc5   :  { %v9043_v18 = vadd.f32 %v9042_v6, %v9014_v46 }
 0xbc6   :  { %v8571_v0 = vpop.f32.mrf.mxu3  ;;  %v9064_v12 = vpop.f32.mrf.mxu2 }
 0xbc7   :  { %v17587_v9 = vadd.f32 %v8571_v0, %v17556_v4  ;;  %v9065_v30 = vadd.f32 %v9064_v12, %v9036_v58 }
 0xbce   :  { %v8573_v37 = vpop.f32.mrf.mxu3  ;;  %v9066_v8 = vpop.f32.mrf.mxu2 }
 0xbcf   :  { %v17590_v48 = vadd.f32 %v8573_v37, %v17562_v20  ;;  %v17592_v43 = vadd.f32 %v9066_v8, %v9038_v40 }
 0xbd3   :  { %9213 = vmatmul.bf16.gmra.mxu3 %v17452_v27 }
 0xbd6   :  { %v8576_v55 = vpop.f32.mrf.mxu3  ;;  %v9069_v36 = vpop.f32.mrf.mxu2 }
 0xbd7   :  { %v17595_v29 = vadd.f32 %v8576_v55, %v8548_v13  ;;  %v17597_v23 = vadd.f32 %v9069_v36, %v9041_v62 }
 0xbde   :  { %v8578_v61 = vpop.f32.mrf.mxu3  ;;  %v9071_v22 = vpop.f32.mrf.mxu2 }
 0xbdf   :  { %v17599_v0 = vadd.f32 %v8578_v61, %v8550_v57  ;;  %v17601_v4 = vadd.f32 %v9071_v22, %v9043_v18 }
 0xbe6   :  { %v9083_v58 = vpop.f32.mrf.mxu3 }
 0xbe7   :  { %v9084_v35 = vadd.f32 %v9083_v58, %v9055_v3 }
 0xbe9   :  { %v14136_v20 = vmul.f32 -1.442695, %v9084_v35 }
 0xbeb   :  { %15369 = vpow2.f32 %v14136_v20 }
 0xbee   :  { %v9085_v40 = vpop.f32.mrf.mxu3 }
 0xbef   :  { %v9086_v46 = vadd.f32 %v9085_v40, %v9057_v51 }
 0xbf1   :  { %v15370_v6 = vpop.eup %15369  ;;  %v14138_v27 = vmul.f32 -1.442695, %v9086_v46 }
 0xbf2   :  { %v9267_v12 = vadd.f32 1.0, %v15370_v6 }
 0xbf3   :  { %15371 = vpow2.f32 %v14138_v27 }
 0xbf4   :  { %15373 = vrcp.f32 %v9267_v12  ;;  %v9294_v61 = vand.u32 2147483648, %v9267_v12  ;;  %v9292_v58 = vand.u32 2147483647, %v9267_v12  ;;  %vm9288_vm1 = vweird.f32 %v9267_v12 }
 0xbf6   :  { %v9088_v13 = vpop.f32.mrf.mxu3  ;;  %v9295_v6 = vor.u32 1.1754944e-38, %v9294_v61  ;;  %vm9293_vm3 = vcmp.eq.f32.partialorder %v9292_v58, 8.507059e+37 }
 0xbf7   :  { %v9089_v62 = vadd.f32 %v9088_v13, %v9060_v14 }
 0xbf9   :  { %v15372_v37 = vpop.eup %15371  ;;  %v14140_v8 = vmul.f32 -1.442695, %v9089_v62 }
 0xbfa   :  { %v15374_v55 = vpop.eup %15373  ;;  %v9269_v57 = vadd.f32 1.0, %v15372_v37 }
 0xbfb   :  { %v9284_v36 = vmul.f32 %v15374_v55, %v9267_v12  ;;  %15375 = vpow2.f32 %v14140_v8  ;;  %vm9289_vm0 = vweird.f32 %v15374_v55 }
 0xbfc   :  { %15377 = vrcp.f32 %v9269_v57  ;;  %vm9290_vm2 = vmor %vm9288_vm1, %vm9289_vm0  ;;  %vm9318_vm5 = vweird.f32 %v9269_v57 }
 0xbfd   :  { %v9285_v18 = vsub.f32 1.0, %v9284_v36  ;;  %15379 = vtanh.f32 %v17520_v26  ;;  %v9324_v36 = vand.u32 2147483648, %v9269_v57 }
 0xbfe   :  { %v9090_v3 = vpop.f32.mrf.mxu3 }
 0xbff   :  { %v9091_v51 = vadd.f32 %v9090_v3, %v9062_v59  ;;  %v9286_v22 = vmul.f32 %v15374_v55, %v9285_v18  ;;  %v9322_v3 = vand.u32 2147483647, %v9269_v57 }
 0xc01   :  { %v15376_v35 = vpop.eup %15375  ;;  %v14142_v20 = vmul.f32 -1.442695, %v9091_v51  ;;  %v9287_v40 = vadd.f32 %v15374_v55, %v9286_v22  ;;  %vm9323_vm7 = vcmp.eq.f32.partialorder %v9322_v3, 8.507059e+37 }
 0xc02   :  { %v15378_v14 = vpop.eup %15377  ;;  %v9271_v46 = vadd.f32 1.0, %v15376_v35  ;;  %v9325_v35 = vor.u32 1.1754944e-38, %v9324_v36 }
 0xc03   :  { %v9314_v27 = vmul.f32 %v15378_v14, %v9269_v57  ;;  %15381 = vpow2.f32 %v14142_v20  ;;  %v9291_v13 = vsel %vm9290_vm2, %v15374_v55, %v9287_v40  ;;  %v15380_v62 = vpop.eup %15379  ;;  %vm9319_vm4 = vweird.f32 %v15378_v14 }
 0xc04   :  { %15383 = vrcp.f32 %v9271_v46  ;;  %v9296_v26 = vsel %vm9293_vm3, %v9295_v6, %v9291_v13  ;;  %vm9320_vm6 = vmor %vm9318_vm5, %vm9319_vm4  ;;  %vm9348_vm9 = vweird.f32 %v9271_v46 }
 0xc05   :  { %v9315_v37 = vsub.f32 1.0, %v9314_v27  ;;  %v17604_v59 = vmul.f32 %v15380_v62, %v9296_v26  ;;  %15385 = vtanh.f32 %v17529_v49  ;;  %v9112_v27 = vpop.f32.mrf.mxu0  ;;  %v9354_v26 = vand.u32 2147483648, %v9271_v46 }
 0xc06   :  { %v9093_v8 = vpop.f32.mrf.mxu3 }
 0xc07   :  { %v9094_v18 = vadd.f32 %v9093_v8, %v9065_v30  ;;  %v9316_v12 = vmul.f32 %v15378_v14, %v9315_v37  ;;  %v9352_v8 = vand.u32 2147483647, %v9271_v46 }
 0xc09   :  { %v15382_v51 = vpop.eup %15381  ;;  %v14144_v61 = vmul.f32 -1.442695, %v9094_v18  ;;  %v9317_v22 = vadd.f32 %v15378_v14, %v9316_v12  ;;  %vm9353_vm11 = vcmp.eq.f32.partialorder %v9352_v8, 8.507059e+37 }
 0xc0a   :  { %v15384_v55 = vpop.eup %15383  ;;  %v9273_v58 = vadd.f32 1.0, %v15382_v51  ;;  %v9355_v51 = vor.u32 1.1754944e-38, %v9354_v26 }
 0xc0b   :  { %v9344_v20 = vmul.f32 %v15384_v55, %v9271_v46  ;;  %15387 = vpow2.f32 %v14144_v61  ;;  %v9321_v40 = vsel %vm9320_vm6, %v15378_v14, %v9317_v22  ;;  %v15386_v6 = vpop.eup %15385  ;;  %vm9349_vm8 = vweird.f32 %v15384_v55  ;;  %v9141_v61 = vpop.f32.mrf.mxu1 }
 0xc0c   :  { %15389 = vrcp.f32 %v9273_v58  ;;  %v9326_v49 = vsel %vm9323_vm7, %v9325_v35, %v9321_v40  ;;  %vm9350_vm10 = vmor %vm9348_vm9, %vm9349_vm8  ;;  %vm9378_vm13 = vweird.f32 %v9273_v58 }
 0xc0d   :  { %v17607_v30 = vmul.f32 %v15386_v6, %v9326_v49  ;;  %v9345_v13 = vsub.f32 1.0, %v9344_v20  ;;  %15391 = vtanh.f32 %v17536_v16  ;;  %v9170_v20 = vpop.f32.mrf.mxu2  ;;  %v9384_v49 = vand.u32 2147483648, %v9273_v58 }
 0xc0e   :  { %v9095_v62 = vpop.f32.mrf.mxu3 }
 0xc0f   :  { %v9096_v57 = vadd.f32 %v9095_v62, %v17592_v43  ;;  %v9346_v37 = vmul.f32 %v15384_v55, %v9345_v13  ;;  %v9114_v13 = vpop.f32.mrf.mxu0 }
 0xc11   :  { %v15388_v36 = vpop.eup %15387  ;;  %v14146_v18 = vmul.f32 -1.442695, %v9096_v57  ;;  %v9347_v14 = vadd.f32 %v15384_v55, %v9346_v37  ;;  %v9382_v57 = vand.u32 2147483647, %v9273_v58 }
 0xc12   :  { %v15390_v12 = vpop.eup %15389  ;;  %v17611_v3 = vadd.f32 1.0, %v15388_v36 }
 0xc13   :  { %v9374_v22 = vmul.f32 %v15390_v12, %v9273_v58  ;;  %15393 = vpow2.f32 %v14146_v18  ;;  %v9351_v16 = vsel %vm9350_vm10, %v15384_v55, %v9347_v14  ;;  %v15392_v35 = vpop.eup %15391  ;;  %vm9379_vm12 = vweird.f32 %v15390_v12 }
 0xc14   :  { %15395 = vrcp.f32 %v17611_v3  ;;  %v9356_v43 = vsel %vm9353_vm11, %v9355_v51, %v9351_v16  ;;  %v17619_v18 = vperm.slane %v17551_v42, 1  ;;  %vm9380_vm14 = vmor %vm9378_vm13, %vm9379_vm12  ;;  %vm9383_vm15 = vcmp.eq.f32.partialorder %v9382_v57, 8.507059e+37 }
 0xc15   :  { %v9375_v40 = vsub.f32 1.0, %v9374_v22  ;;  %v17614_v6 = vmul.f32 %v15392_v35, %v9356_v43  ;;  %15397 = vtanh.f32 %v17543_v25  ;;  %v9385_v25 = vor.u32 1.1754944e-38, %v9384_v49  ;;  %v9143_v35 = vpop.f32.mrf.mxu1 }
 0xc16   :  { %v9098_v46 = vpop.f32.mrf.mxu3  ;;  %v9113_v42 = vadd.f32 %v9112_v27, %v17619_v18  ;;  %v9414_v49 = vand.u32 2147483648, %v17611_v3  ;;  %vm9408_vm1 = vweird.f32 %v17611_v3 }
 0xc17   :  { %v9099_v62 = vadd.f32 %v9098_v46, %v17597_v23  ;;  %v9376_v26 = vmul.f32 %v15390_v12, %v9375_v40  ;;  %v9172_v40 = vpop.f32.mrf.mxu2 }
 0xc18   :  { %v9415_v27 = vor.u32 1.1754944e-38, %v9414_v49 }
 0xc19   :  { %v15394_v55 = vpop.eup %15393  ;;  %v14148_v37 = vmul.f32 -1.442695, %v9099_v62  ;;  %v9377_v8 = vadd.f32 %v15390_v12, %v9376_v26  ;;  %v9412_v26 = vand.u32 2147483647, %v17611_v3 }
 0xc1a   :  { %v15396_v36 = vpop.eup %15395  ;;  %v17621_v14 = vadd.f32 1.0, %v15394_v55  ;;  %v9117_v55 = vpop.f32.mrf.mxu0 }
 0xc1b   :  { %v9404_v51 = vmul.f32 %v15396_v36, %v17611_v3  ;;  %15399 = vpow2.f32 %v14148_v37  ;;  %v9381_v22 = vsel %vm9380_vm14, %v15390_v12, %v9377_v8  ;;  %v15398_v23 = vpop.eup %15397  ;;  %vm9409_vm0 = vweird.f32 %v15396_v36 }
 0xc1c   :  { %15401 = vrcp.f32 %v17621_v14  ;;  %v9386_v16 = vsel %vm9383_vm15, %v9385_v25, %v9381_v22  ;;  %vm9410_vm2 = vmor %vm9408_vm1, %vm9409_vm0  ;;  %vm9413_vm3 = vcmp.eq.f32.partialorder %v9412_v26, 8.507059e+37  ;;  %v9115_v3 = vadd.f32 %v9114_v13, %v17619_v18 }
 0xc1d   :  { %v17625_v43 = vmul.f32 %v15398_v23, %v9386_v16  ;;  %v9405_v58 = vsub.f32 1.0, %v9404_v51  ;;  %15403 = vtanh.f32 %v17554_v50  ;;  %v9142_v50 = vadd.f32 %v9141_v61, %v9113_v42  ;;  %v9146_v49 = vpop.f32.mrf.mxu1 }
 0xc1e   :  { %v9100_v46 = vpop.f32.mrf.mxu3  ;;  %v9444_v42 = vand.u32 2147483648, %v17621_v14  ;;  %vm9438_vm5 = vweird.f32 %v17621_v14 }
 0xc1f   :  { %v9101_v62 = vadd.f32 %v9100_v46, %v17601_v4  ;;  %v9406_v12 = vmul.f32 %v15396_v36, %v9405_v58  ;;  %v9171_v58 = vadd.f32 %v9170_v20, %v9142_v50  ;;  %v9175_v26 = vpop.f32.mrf.mxu2 }
 0xc20   :  { %v9445_v13 = vor.u32 1.1754944e-38, %v9444_v42 }
 0xc21   :  { %v15400_v57 = vpop.eup %15399  ;;  %v14150_v37 = vmul.f32 -1.442695, %v9101_v62  ;;  %v9407_v8 = vadd.f32 %v15396_v36, %v9406_v12 }
 0xc22   :  { %v15402_v25 = vpop.eup %15401  ;;  %v17633_v51 = vadd.f32 1.0, %v15400_v57 }
 0xc23   :  { %v9434_v22 = vmul.f32 %v15402_v25, %v17621_v14  ;;  %15405 = vpow2.f32 %v14150_v37  ;;  %v9411_v4 = vsel %vm9410_vm2, %v15396_v36, %v9407_v8  ;;  %v15404_v23 = vpop.eup %15403  ;;  %vm9439_vm4 = vweird.f32 %v15402_v25 }
 0xc24   :  { %15407 = vrcp.f32 %v17633_v51  ;;  %v9416_v16 = vsel %vm9413_vm3, %v9415_v27, %v9411_v4  ;;  %v9442_v36 = vand.u32 2147483647, %v17621_v14  ;;  %v9144_v27 = vadd.f32 %v9143_v35, %v9115_v3  ;;  %vm9440_vm6 = vmor %vm9438_vm5, %vm9439_vm4 }
 0xc25   :  { %v9435_v46 = vsub.f32 1.0, %v9434_v22  ;;  %v17637_v62 = vmul.f32 %v15404_v23, %v9416_v16  ;;  %15409 = vtanh.f32 %v17560_v1  ;;  %v9119_v22 = vpop.f32.mrf.mxu0  ;;  %v9118_v14 = vadd.f32 %v9117_v55, %v17619_v18 }
 0xc26   :  { %v9199_v61 = vpop.f32.mrf.mxu3  ;;  %vm9443_vm7 = vcmp.eq.f32.partialorder %v9442_v36, 8.507059e+37  ;;  %vm9468_vm9 = vweird.f32 %v17633_v51 }
 0xc27   :  { %v9200_v12 = vadd.f32 %v9199_v61, %v9171_v58  ;;  %v9436_v57 = vmul.f32 %v15402_v25, %v9435_v46  ;;  %v9173_v46 = vadd.f32 %v9172_v40, %v9144_v27  ;;  %v9147_v27 = vadd.f32 %v9146_v49, %v9118_v14 }
 0xc28   :  { %v9120_v49 = vadd.f32 %v9119_v22, %v17619_v18 }
 0xc29   :  { %v15406_v37 = vpop.eup %15405  ;;  %v14137_v8 = vmul.f32 -1.442695, %v9200_v12  ;;  %v9437_v20 = vadd.f32 %v15402_v25, %v9436_v57  ;;  %v9474_v57 = vand.u32 2147483648, %v17633_v51 }
 0xc2a   :  { %v15408_v50 = vpop.eup %15407  ;;  %v17644_v1 = vadd.f32 1.0, %v15406_v37  ;;  %v9148_v37 = vpop.f32.mrf.mxu1 }
 0xc2b   :  { %v9464_v4 = vmul.f32 %v15408_v50, %v17633_v51  ;;  %15411 = vpow2.f32 %v14137_v8  ;;  %v9441_v23 = vsel %vm9440_vm6, %v15402_v25, %v9437_v20  ;;  %v15410_v16 = vpop.eup %15409  ;;  %vm9469_vm8 = vweird.f32 %v15408_v50 }
 0xc2c   :  { %15413 = vrcp.f32 %v17644_v1  ;;  %v9446_v58 = vsel %vm9443_vm7, %v9445_v13, %v9441_v23  ;;  %v9472_v25 = vand.u32 2147483647, %v17633_v51  ;;  %v9177_v13 = vpop.f32.mrf.mxu2  ;;  %vm9470_vm10 = vmor %vm9468_vm9, %vm9469_vm8  ;;  %v9475_v23 = vor.u32 1.1754944e-38, %v9474_v57 }
 0xc2d   :  { %v9465_v61 = vsub.f32 1.0, %v9464_v4  ;;  %v17648_v12 = vmul.f32 %v15410_v16, %v9446_v58  ;;  %15415 = vtanh.f32 %v17567_v39  ;;  %v9122_v58 = vpop.f32.mrf.mxu0  ;;  %v8477_v51 = vadd.f32 %v17505_v38, %v17496_v56 }
 0xc2e   :  { %v9201_v35 = vpop.f32.mrf.mxu3  ;;  %vm9473_vm11 = vcmp.eq.f32.partialorder %v9472_v25, 8.507059e+37  ;;  %v9504_v57 = vand.u32 2147483648, %v17644_v1  ;;  %v9502_v25 = vand.u32 2147483647, %v17644_v1  ;;  %vm9498_vm13 = vweird.f32 %v17644_v1 }
 0xc2f   :  { %v9202_v3 = vadd.f32 %v9201_v35, %v9173_v46  ;;  %v9466_v42 = vmul.f32 %v15408_v50, %v9465_v61  ;;  %v9176_v46 = vadd.f32 %v9175_v26, %v9147_v27  ;;  %v8506_v38 = vadd.f32 %v17507_v24, %v8477_v51 }
 0xc30   :  { %vm9503_vm15 = vcmp.eq.f32.partialorder %v9502_v25, 8.507059e+37 }
 0xc31   :  { %v15412_v36 = vpop.eup %15411  ;;  %v14139_v8 = vmul.f32 -1.442695, %v9202_v3  ;;  %v9467_v20 = vadd.f32 %v15408_v50, %v9466_v42 }
 0xc32   :  { %v15414_v40 = vpop.eup %15413  ;;  %v17655_v39 = vadd.f32 1.0, %v15412_v36 }
 0xc33   :  { %v9494_v55 = vmul.f32 %v15414_v40, %v17644_v1  ;;  %15417 = vpow2.f32 %v14139_v8  ;;  %v9471_v4 = vsel %vm9470_vm10, %v15408_v50, %v9467_v20  ;;  %v15416_v16 = vpop.eup %15415  ;;  %vm9499_vm12 = vweird.f32 %v15414_v40  ;;  %v9151_v20 = vpop.f32.mrf.mxu1 }
 0xc34   :  { %15419 = vrcp.f32 %v17655_v39  ;;  %v9476_v35 = vsel %vm9473_vm11, %v9475_v23, %v9471_v4  ;;  %vm9500_vm14 = vmor %vm9498_vm13, %vm9499_vm12  ;;  %v9505_v4 = vor.u32 1.1754944e-38, %v9504_v57  ;;  %v8535_v1 = vadd.f32 %v17525_v32, %v8506_v38 }
 0xc35   :  { %v9495_v61 = vsub.f32 1.0, %v9494_v55  ;;  %15421 = vtanh.f32 %v17570_v19  ;;  %v17663_v3 = vmul.f32 %v15416_v16, %v9476_v35  ;;  %v9149_v19 = vadd.f32 %v9148_v37, %v9120_v49  ;;  %v9180_v16 = vpop.f32.mrf.mxu2  ;;  %v9539_v49 = vld [vmem:[#allocation40] sm:$0x3] }
 0xc36   :  { %v9204_v14 = vpop.f32.mrf.mxu3  ;;  %v9123_v37 = vadd.f32 %v9122_v58, %v17619_v18  ;;  %v9309_v51 = vand.u32 2147483648, %v17655_v39  ;;  %v9307_v57 = vand.u32 2147483647, %v17655_v39  ;;  %v8564_v32 = vadd.f32 %v17576_v60, %v8535_v1 }
 0xc37   :  { %v9205_v50 = vadd.f32 %v9204_v14, %v9176_v46  ;;  %v9496_v42 = vmul.f32 %v15414_v40, %v9495_v61  ;;  %v9178_v46 = vadd.f32 %v9177_v13, %v9149_v19  ;;  %v9124_v14 = vpop.f32.mrf.mxu0  ;;  %vm9303_vm1 = vweird.f32 %v17655_v39 }
 0xc38   :  { %v9310_v38 = vor.u32 1.1754944e-38, %v9309_v51  ;;  %v17686_v19 = vperm.slane %v9539_v49, 1  ;;  %vm9308_vm3 = vcmp.eq.f32.partialorder %v9307_v57, 8.507059e+37 }
 0xc39   :  { %v15418_v26 = vpop.eup %15417  ;;  %v14141_v36 = vmul.f32 -1.442695, %v9205_v50  ;;  %v9497_v8 = vadd.f32 %v15414_v40, %v9496_v42 }
 0xc3a   :  { %v15420_v56 = vpop.eup %15419  ;;  %v17669_v22 = vadd.f32 1.0, %v15418_v26 }
 0xc3b   :  { %v9299_v27 = vmul.f32 %v15420_v56, %v17655_v39  ;;  %15423 = vpow2.f32 %v14141_v36  ;;  %v9501_v55 = vsel %vm9500_vm14, %v15414_v40, %v9497_v8  ;;  %v15422_v23 = vpop.eup %15421  ;;  %vm9304_vm0 = vweird.f32 %v15420_v56  ;;  %v9153_v39 = vpop.f32.mrf.mxu1 }
 0xc3c   :  { %15425 = vrcp.f32 %v17669_v22  ;;  %v9506_v24 = vsel %vm9503_vm15, %v9505_v4, %v9501_v55  ;;  %v9152_v36 = vadd.f32 %v9151_v20, %v9123_v37  ;;  %vm9305_vm2 = vmor %vm9303_vm1, %vm9304_vm0  ;;  %vm9333_vm5 = vweird.f32 %v17669_v22 }
 0xc3d   :  { %v9300_v61 = vsub.f32 1.0, %v9299_v27  ;;  %15427 = vtanh.f32 %v17574_v41  ;;  %v17677_v40 = vmul.f32 %v15422_v23, %v9506_v24  ;;  %v17682_v41 = vperm.slane %v9539_v49, 0 }
 0xc3e   :  { %v9206_v35 = vpop.f32.mrf.mxu3  ;;  %v9181_v23 = vadd.f32 %v9180_v16, %v9152_v36 }
 0xc3f   :  { %v9207_v50 = vadd.f32 %v9206_v35, %v9178_v46  ;;  %v9301_v42 = vmul.f32 %v15420_v56, %v9300_v61  ;;  %v9125_v46 = vadd.f32 %v9124_v14, %v17619_v18  ;;  %v9182_v61 = vpop.f32.mrf.mxu2  ;;  %v9545_v37 = vmul.f32 %v17682_v41, %v17604_v59  ;;  %v9127_v16 = vpop.f32.mrf.mxu0 }
 0xc40   :  { %v9337_v35 = vand.u32 2147483647, %v17669_v22 }
 0xc41   :  { %v15424_v13 = vpop.eup %15423  ;;  %v14143_v25 = vmul.f32 -1.442695, %v9207_v50  ;;  %v9302_v26 = vadd.f32 %v15420_v56, %v9301_v42 }
 0xc42   :  { %v15426_v58 = vpop.eup %15425  ;;  %v17684_v8 = vadd.f32 1.0, %v15424_v13  ;;  %vm9338_vm7 = vcmp.eq.f32.partialorder %v9337_v35, 8.507059e+37 }
 0xc43   :  { %v9329_v27 = vmul.f32 %v15426_v58, %v17669_v22  ;;  %15429 = vpow2.f32 %v14143_v25  ;;  %v9306_v55 = vsel %vm9305_vm2, %v15420_v56, %v9302_v26  ;;  %v15428_v60 = vpop.eup %15427  ;;  %v9339_v56 = vand.u32 2147483648, %v17669_v22 }
 0xc44   :  { %15431 = vrcp.f32 %v17684_v8  ;;  %v9311_v4 = vsel %vm9308_vm3, %v9310_v38, %v9306_v55  ;;  %vm9334_vm4 = vweird.f32 %v15426_v58  ;;  %v9154_v25 = vadd.f32 %v9153_v39, %v9125_v46 }
 0xc45   :  { %15433 = vtanh.f32 %v8564_v32  ;;  %v9330_v1 = vsub.f32 1.0, %v9329_v27  ;;  %v9524_v20 = vmul.f32 %v15428_v60, %v9311_v4  ;;  %vm9335_vm6 = vmor %vm9333_vm5, %vm9334_vm4  ;;  %v9340_v59 = vor.u32 1.1754944e-38, %v9339_v56 }
 0xc46   :  { %v9209_v24 = vpop.f32.mrf.mxu3  ;;  %v9183_v60 = vadd.f32 %v9182_v61, %v9154_v25  ;;  %v9128_v39 = vadd.f32 %v9127_v16, %v17619_v18  ;;  %v9369_v46 = vand.u32 2147483648, %v17684_v8  ;;  %vm9363_vm9 = vweird.f32 %v17684_v8 }
 0xc47   :  { %v9210_v51 = vadd.f32 %v9209_v24, %v9181_v23  ;;  %v9546_v49 = vmul.f32 %v17686_v19, %v9524_v20  ;;  %v9331_v50 = vmul.f32 %v15426_v58, %v9330_v1  ;;  %v9547_v1 = vmul.f32 %v17682_v41, %v17607_v30 }
 0xc48   :  { %v9367_v20 = vand.u32 2147483647, %v17684_v8  ;;  %v9370_v16 = vor.u32 1.1754944e-38, %v9369_v46 }
 0xc49   :  { %v15430_v42 = vpop.eup %15429  ;;  %v14145_v57 = vmul.f32 -1.442695, %v9210_v51  ;;  %v9561_v32 = vadd.f32 %v9546_v49, %v9545_v37  ;;  %v9332_v13 = vadd.f32 %v15426_v58, %v9331_v50 }
 0xc4a   :  { %v15432_v14 = vpop.eup %15431  ;;  %v17697_v26 = vadd.f32 1.0, %v15430_v42  ;;  %vm9368_vm11 = vcmp.eq.f32.partialorder %v9367_v20, 8.507059e+37 }
 0xc4b   :  { %v15434_v36 = vpop.eup %15433  ;;  %v9359_v38 = vmul.f32 %v15432_v14, %v17684_v8  ;;  %15435 = vpow2.f32 %v14145_v57  ;;  %9562 = vadd.xlane.f32.xlu0 %v9561_v32  ;;  %v9336_v27 = vsel %vm9335_vm6, %v15426_v58, %v9332_v13  ;;  %v9156_v58 = vpop.f32.mrf.mxu1  ;;  %vm9364_vm8 = vweird.f32 %v15432_v14 }
 0xc4c   :  { %15437 = vrcp.f32 %v17697_v26  ;;  %v9341_v55 = vsel %vm9338_vm7, %v9340_v59, %v9336_v27  ;;  %v9157_v42 = vadd.f32 %v9156_v58, %v9128_v39  ;;  %vm9365_vm10 = vmor %vm9363_vm9, %vm9364_vm8  ;;  %v9129_v32 = vpop.f32.mrf.mxu0  ;;  %vm9393_vm13 = vweird.f32 %v17697_v26 }
 0xc4d   :  { %15439 = vtanh.f32 %v17580_v44  ;;  %v9526_v22 = vmul.f32 %v15434_v36, %v9341_v55  ;;  %v9360_v4 = vsub.f32 1.0, %v9359_v38  ;;  %v9185_v44 = vpop.f32.mrf.mxu2  ;;  %v9130_v27 = vadd.f32 %v9129_v32, %v17619_v18 }
 0xc4e   :  { %v9211_v23 = vpop.f32.mrf.mxu3  ;;  %v9186_v8 = vadd.f32 %v9185_v44, %v9157_v42 }
 0xc4f   :  { %v9212_v24 = vadd.f32 %v9211_v23, %v9183_v60  ;;  %v9548_v37 = vmul.f32 %v17686_v19, %v9526_v22  ;;  %v9361_v35 = vmul.f32 %v15432_v14, %v9360_v4  ;;  %v9549_v60 = vmul.f32 %v17682_v41, %v17614_v6 }
 0xc50   :  { %v9397_v22 = vand.u32 2147483647, %v17697_v26  ;;  %v9399_v4 = vand.u32 2147483648, %v17697_v26 }
 0xc51   :  { %v15436_v61 = vpop.eup %15435  ;;  %v14147_v56 = vmul.f32 -1.442695, %v9212_v24  ;;  %v9564_v51 = vadd.f32 %v9548_v37, %v9547_v1  ;;  %v9362_v49 = vadd.f32 %v15432_v14, %v9361_v35 }
 0xc52   :  { %v15438_v50 = vpop.eup %15437  ;;  %v17709_v30 = vadd.f32 1.0, %v15436_v61  ;;  %v9400_v35 = vor.u32 1.1754944e-38, %v9399_v4  ;;  %vm9398_vm15 = vcmp.eq.f32.partialorder %v9397_v22, 8.507059e+37 }
 0xc53   :  { %v15440_v57 = vpop.eup %15439  ;;  %v9389_v13 = vmul.f32 %v15438_v50, %v17697_v26  ;;  %15441 = vpow2.f32 %v14147_v56  ;;  %9565 = vadd.xlane.f32.xlu0 %v9564_v51  ;;  %v9366_v25 = vsel %vm9365_vm10, %v15432_v14, %v9362_v49  ;;  %vm9394_vm12 = vweird.f32 %v15438_v50 }
 0xc54   :  { %15443 = vrcp.f32 %v17709_v30  ;;  %v9371_v59 = vsel %vm9368_vm11, %v9370_v16, %v9366_v25  ;;  %vm9395_vm14 = vmor %vm9393_vm13, %vm9394_vm12  ;;  %v9427_v32 = vand.u32 2147483647, %v17709_v30  ;;  %vm9423_vm1 = vweird.f32 %v17709_v30 }
 0xc55   :  { %15445 = vtanh.f32 %v17583_v53  ;;  %v9390_v36 = vsub.f32 1.0, %v9389_v13  ;;  %v9528_v38 = vmul.f32 %v15440_v57, %v9371_v59  ;;  %v9158_v53 = vpop.f32.mrf.mxu1  ;;  %v9187_v37 = vpop.f32.mrf.mxu2  ;;  %v9551_v57 = vmul.f32 %v17682_v41, %v17625_v43 }
 0xc56   :  { %v9214_v55 = vpop.f32.mrf.mxu3  ;;  %v9159_v24 = vadd.f32 %v9158_v53, %v9130_v27  ;;  %v9429_v13 = vand.u32 2147483648, %v17709_v30  ;;  %vm9428_vm3 = vcmp.eq.f32.partialorder %v9427_v32, 8.507059e+37 }
 0xc57   :  { %v9215_v14 = vadd.f32 %v9214_v55, %v9186_v8  ;;  %v9550_v39 = vmul.f32 %v17686_v19, %v9528_v38  ;;  %v9391_v23 = vmul.f32 %v15438_v50, %v9390_v36 }
 0xc58   :  { %v9188_v49 = vadd.f32 %v9187_v37, %v9159_v24 }
 0xc59   :  { %v15442_v1 = vpop.eup %15441  ;;  %v14149_v20 = vmul.f32 -1.442695, %v9215_v14  ;;  %v9567_v46 = vadd.f32 %v9550_v39, %v9549_v60  ;;  %v9392_v58 = vadd.f32 %v15438_v50, %v9391_v23  ;;  %v9430_v60 = vor.u32 1.1754944e-38, %v9429_v13 }
 0xc5a   :  { %v15444_v18 = vpop.eup %15443  ;;  %v9278_v6 = vadd.f32 1.0, %v15442_v1  ;;  %v9553_v1 = vmul.f32 %v17682_v41, %v17637_v62 }
 0xc5b   :  { %v15446_v44 = vpop.eup %15445  ;;  %v9419_v61 = vmul.f32 %v15444_v18, %v17709_v30  ;;  %15447 = vpow2.f32 %v14149_v20  ;;  %9568 = vadd.xlane.f32.xlu1 %v9567_v46  ;;  %v9396_v56 = vsel %vm9395_vm14, %v15438_v50, %v9392_v58  ;;  %vm9424_vm0 = vweird.f32 %v15444_v18 }
 0xc5c   :  { %15449 = vrcp.f32 %v9278_v6  ;;  %v9401_v51 = vsel %vm9398_vm15, %v9400_v35, %v9396_v56  ;;  %vm9425_vm2 = vmor %vm9423_vm1, %vm9424_vm0  ;;  %v9459_v30 = vand.u32 2147483648, %v9278_v6  ;;  %v9457_v46 = vand.u32 2147483647, %v9278_v6 }
 0xc5d   :  { %v9530_v42 = vmul.f32 %v15446_v44, %v9401_v51  ;;  %v9420_v16 = vsub.f32 1.0, %v9419_v61  ;;  %15451 = vtanh.f32 %v17587_v9  ;;  %vm9453_vm5 = vweird.f32 %v9278_v6 }
 0xc5e   :  { %v9216_v26 = vpop.f32.mrf.mxu3  ;;  %v9460_v44 = vor.u32 1.1754944e-38, %v9459_v30  ;;  %vm9458_vm7 = vcmp.eq.f32.partialorder %v9457_v46, 8.507059e+37  ;;  %v16227_v46 = vmov 0  }
 0xc5f   :  { %v9217_v25 = vadd.f32 %v9216_v26, %v9188_v49  ;;  %v9552_v59 = vmul.f32 %v17686_v19, %v9530_v42  ;;  %v9421_v50 = vmul.f32 %v15444_v18, %v9420_v16  ;;  %v9555_v42 = vmul.f32 %v17682_v41, %v17648_v12  ;;  %15366 = vset.pattern.permute.xlu1 %v16227_v46 }
 0xc60   :  { %15364 = vset.pattern.permute.xlu2 %v16227_v46  ;;  %15365 = vset.pattern.permute.xlu0 %v16227_v46  ;;  %v15299_v46 = vld [vmem:[#allocation41 + $0xb8] sm:$0xff] }
 0xc61   :  { %v15448_v8 = vpop.eup %15447  ;;  %v14151_v36 = vmul.f32 -1.442695, %v9217_v25  ;;  %v9570_v38 = vadd.f32 %v9552_v59, %v9551_v57  ;;  %v9422_v27 = vadd.f32 %v15444_v18, %v9421_v50  ;;  %10077 = vmatpush.bf16.msrb.mxu2 %v15299_v46 }
 0xc62   :  { %v15450_v9 = vpop.eup %15449  ;;  %v9280_v55 = vadd.f32 1.0, %v15448_v8 }
 0xc63   :  { %v9449_v43 = vmul.f32 %v15450_v9, %v9278_v6  ;;  %15453 = vpow2.f32 %v14151_v36  ;;  %9571 = vadd.xlane.f32.xlu1 %v9570_v38  ;;  %v9426_v22 = vsel %vm9425_vm2, %v15444_v18, %v9422_v27  ;;  %v15452_v4 = vpop.eup %15451  ;;  %vm9454_vm4 = vweird.f32 %v15450_v9 }
 0xc64   :  { %15455 = vrcp.f32 %v9280_v55  ;;  %v9431_v14 = vsel %vm9428_vm3, %v9430_v60, %v9426_v22  ;;  %vm9455_vm6 = vmor %vm9453_vm5, %vm9454_vm4  ;;  %v9489_v16 = vand.u32 2147483648, %v9280_v55  ;;  %v9487_v57 = vand.u32 2147483647, %v9280_v55 }
 0xc65   :  { %v9450_v39 = vsub.f32 1.0, %v9449_v43  ;;  %v9532_v23 = vmul.f32 %v15452_v4, %v9431_v14  ;;  %15457 = vtanh.f32 %v17590_v48  ;;  %vm9483_vm9 = vweird.f32 %v9280_v55 }
 0xc66   :  { %v9490_v59 = vor.u32 1.1754944e-38, %v9489_v16  ;;  %vm9488_vm11 = vcmp.eq.f32.partialorder %v9487_v57, 8.507059e+37  ;;  %v9557_v27 = vmul.f32 %v17682_v41, %v17663_v3  ;;  %v9559_v3 = vmul.f32 %v17682_v41, %v17677_v40 }
 0xc67   :  { %v9554_v53 = vmul.f32 %v17686_v19, %v9532_v23  ;;  %v9451_v20 = vmul.f32 %v15450_v9, %v9450_v39 }
 0xc69   :  { %v15454_v58 = vpop.eup %15453  ;;  %v9573_v24 = vadd.f32 %v9554_v53, %v9553_v1  ;;  %v9452_v18 = vadd.f32 %v15450_v9, %v9451_v20 }
 0xc6a   :  { %v15456_v37 = vpop.eup %15455  ;;  %v9282_v35 = vadd.f32 1.0, %v15454_v58 }
 0xc6b   :  { %v9479_v61 = vmul.f32 %v15456_v37, %v9280_v55  ;;  %9574 = vadd.xlane.f32.xlu2 %v9573_v24  ;;  %v9456_v48 = vsel %vm9455_vm6, %v15450_v9, %v9452_v18  ;;  %v15458_v56 = vpop.eup %15457  ;;  %vm9484_vm8 = vweird.f32 %v15456_v37 }
 0xc6c   :  { %15459 = vrcp.f32 %v9282_v35  ;;  %v9461_v62 = vsel %vm9458_vm7, %v9460_v44, %v9456_v48  ;;  %vm9485_vm10 = vmor %vm9483_vm9, %vm9484_vm8  ;;  %v9519_v9 = vand.u32 2147483648, %v9282_v35  ;;  %v9517_v43 = vand.u32 2147483647, %v9282_v35 }
 0xc6d   :  { %v9480_v51 = vsub.f32 1.0, %v9479_v61  ;;  %v9534_v49 = vmul.f32 %v15458_v56, %v9461_v62  ;;  %15461 = vtanh.f32 %v17595_v29  ;;  %vm9513_vm13 = vweird.f32 %v9282_v35 }
 0xc6e   :  { %15463 = vtanh.f32 %v17599_v0  ;;  %v9520_v14 = vor.u32 1.1754944e-38, %v9519_v9  ;;  %vm9518_vm15 = vcmp.eq.f32.partialorder %v9517_v43, 8.507059e+37 }
 0xc6f   :  { %v9556_v6 = vmul.f32 %v17686_v19, %v9534_v49  ;;  %v9481_v26 = vmul.f32 %v15456_v37, %v9480_v51 }
 0xc71   :  { %v9576_v32 = vadd.f32 %v9556_v6, %v9555_v42  ;;  %v9482_v13 = vadd.f32 %v15456_v37, %v9481_v26 }
 0xc72   :  { %v15460_v25 = vpop.eup %15459 }
 0xc73   :  { %v9509_v50 = vmul.f32 %v15460_v25, %v9282_v35  ;;  %9577 = vadd.xlane.f32.xlu2 %v9576_v32  ;;  %v9486_v8 = vsel %vm9485_vm10, %v15456_v37, %v9482_v13  ;;  %v15462_v29 = vpop.eup %15461  ;;  %vm9514_vm12 = vweird.f32 %v15460_v25  ;;  %v15367_v37 = vld [vmem:[#allocation7] ss:$0 sm:$0xff] }
 0xc74   :  { %v9491_v36 = vsel %vm9488_vm11, %v9490_v59, %v9486_v8  ;;  %vm9515_vm14 = vmor %vm9513_vm13, %vm9514_vm12  ;;  %v15464_v23 = vpop.eup %15463 }
 0xc75   :  { %v9510_v38 = vsub.f32 1.0, %v9509_v50  ;;  %v9536_v12 = vmul.f32 %v15462_v29, %v9491_v36 }
 0xc77   :  { %v9558_v60 = vmul.f32 %v17686_v19, %v9536_v12  ;;  %v9511_v55 = vmul.f32 %v15460_v25, %v9510_v38 }
 0xc79   :  { %v9579_v22 = vadd.f32 %v9558_v60, %v9557_v27  ;;  %v9512_v4 = vadd.f32 %v15460_v25, %v9511_v55 }
 0xc7b   :  { %9580 = vadd.xlane.f32.xlu0 %v9579_v22  ;;  %v9516_v39 = vsel %vm9515_vm14, %v15460_v25, %v9512_v4 }
 0xc7c   :  { %v9521_v1 = vsel %vm9518_vm15, %v9520_v14, %v9516_v39 }
 0xc7d   :  { %v9538_v0 = vmul.f32 %v15464_v23, %v9521_v1 }
 0xc7f   :  { %v9560_v30 = vmul.f32 %v17686_v19, %v9538_v0 }
 0xc81   :  { %v9582_v53 = vadd.f32 %v9560_v30, %v9559_v3 }
 0xc83   :  { %9583 = vadd.xlane.f32.xlu1 %v9582_v53 }
 0xcbe   :  { %v9563_v20 = vpop.xlane.xlu0 %9562 }
 0xcbf   :  { %v9589_v44 = vadd.f32 %v15367_v37, %v9563_v20 }
 0xcc6   :  { %v9566_v24 = vpop.xlane.xlu0 %9565 }
 0xcc7   :  { %v9590_v42 = vadd.f32 %v15367_v37, %v9566_v24  ;;  %v15307_v24 = vld [vmem:[#allocation41 + $0xf8] sm:$0xff] }
 0xcc8   :  { %10091 = vmatpush.bf16.msra.mxu3 %v15307_v24 }
 0xcce   :  { %v9569_v58 = vpop.xlane.xlu1 %9568 }
 0xccf   :  { %v9591_v35 = vadd.f32 %v15367_v37, %v9569_v58  ;;  %v15283_v58 = vld [vmem:[#allocation41 + $0x38] sm:$0xff] }
 0xcd0   :  { %10049 = vmatpush.bf16.msra.mxu0 %v15283_v58 }
 0xcd1   :  { %v9597_v48 = vmax.f32 %v9589_v44, %v9591_v35 }
 0xcd6   :  { %v9572_v56 = vpop.xlane.xlu1 %9571 }
 0xcd7   :  { %v9592_v51 = vadd.f32 %v15367_v37, %v9572_v56  ;;  %v15306_v56 = vld [vmem:[#allocation41 + $0xf0] sm:$0xff] }
 0xcd8   :  { %10092 = vmatpush.bf16.msra.mxu3 %v15306_v56 }
 0xcd9   :  { %v9598_v13 = vmax.f32 %v9590_v42, %v9592_v51 }
 0xcde   :  { %v9575_v18 = vpop.xlane.xlu2 %9574 }
 0xcdf   :  { %v9593_v61 = vadd.f32 %v15367_v37, %v9575_v18 }
 0xce1   :  { %v9599_v40 = vmax.f32 %v9597_v48, %v9593_v61  ;;  %v15282_v48 = vld [vmem:[#allocation41 + $0x30] sm:$0xff] }
 0xce2   :  { %10050 = vmatpush.bf16.msra.mxu0 %v15282_v48  ;;  %v18021_v48 = vmax.f32 %v17067_v5, 0.0  ;;  %v18027_v5 = vmax.f32 %v17232_v15, 0.0  ;;  %v18033_v15 = vmax.f32 %v17414_v47, 0.0 }
 0xce6   :  { %v9578_v19 = vpop.xlane.xlu2 %9577 }
 0xce7   :  { %v9594_v16 = vadd.f32 %v15367_v37, %v9578_v19  ;;  %v15290_v19 = vld [vmem:[#allocation41 + $0x70] sm:$0xff] }
 0xce9   :  { %v9600_v29 = vmax.f32 %v9598_v13, %v9594_v16  ;;  %v15295_v13 = vld [vmem:[#allocation41 + $0x98] sm:$0xff] }
 0xcee   :  { %v9581_v62 = vpop.xlane.xlu0 %9580 }
 0xcef   :  { %v9595_v41 = vadd.f32 %v15367_v37, %v9581_v62 }
 0xcf1   :  { %v9601_v49 = vmax.f32 %v9599_v40, %v9595_v41 }
 0xcf3   :  { %v9603_v6 = vsub.f32 %v9589_v44, %v9601_v49  ;;  %v9637_v26 = vsub.f32 %v9591_v35, %v9601_v49  ;;  %v9671_v57 = vsub.f32 %v9593_v61, %v9601_v49  ;;  %v9705_v32 = vsub.f32 %v9595_v41, %v9601_v49  ;;  %v15298_v44 = vld [vmem:[#allocation41 + $0xb0] sm:$0xff]  ;;  %v15281_v49 = vld [vmem:[#allocation41 + $0x28] sm:$0xff] }
 0xcf4   :  { %10078 = vmatpush.bf16.msrb.mxu2 %v15298_v44  ;;  %10051 = vmatpush.bf16.msra.mxu0 %v15281_v49  ;;  %v18024_v49 = vmax.f32 %v17189_v17, 0.0 }
 0xcf5   :  { %v9605_v25 = vmul.f32 1.442695, %v9603_v6  ;;  %v9639_v59 = vmul.f32 1.442695, %v9637_v26  ;;  %v9673_v50 = vmul.f32 1.442695, %v9671_v57 }
 0xcf6   :  { %v9584_v8 = vpop.xlane.xlu1 %9583  ;;  %v9707_v38 = vmul.f32 1.442695, %v9705_v32  ;;  %v15296_v6 = vld [vmem:[#allocation41 + $0xa0] sm:$0xff] }
 0xcf7   :  { %15465 = vpow2.f32 %v9605_v25  ;;  %v9596_v36 = vadd.f32 %v15367_v37, %v9584_v8  ;;  %v15291_v37 = vld [vmem:[#allocation41 + $0x78] sm:$0xff]  ;;  %v15280_v26 = vld [vmem:[#allocation41 + $0x20] sm:$0xff]  ;;  %v15294_v8 = vld [vmem:[#allocation41 + $0x90] sm:$0xff] }
 0xcf8   :  { %15467 = vpow2.f32 %v9639_v59  ;;  %10063 = vmatpush.bf16.msrb.mxu1 %v15291_v37  ;;  %v15304_v57 = vld [vmem:[#allocation41 + $0xe0] sm:$0xff]  ;;  %10052 = vmatpush.bf16.msra.mxu0 %v15280_v26  ;;  %v15279_v25 = vld [vmem:[#allocation41 + $0x18] sm:$0xff]  ;;  %v18026_v26 = vmax.f32 %v17378_v21, 0.0  ;;  %v18032_v21 = vmax.f32 %v17330_v31, 0.0 }
 0xcf9   :  { %v9602_v12 = vmax.f32 %v9600_v29, %v9596_v36  ;;  %15469 = vpow2.f32 %v9673_v50  ;;  %v15288_v32 = vld [vmem:[#allocation41 + $0x60] sm:$0xff]  ;;  %v15303_v59 = vld [vmem:[#allocation41 + $0xd8] sm:$0xff]  ;;  %v15278_v29 = vld [vmem:[#allocation41 + $0x10] sm:$0xff] }
 0xcfa   :  { %15471 = vpow2.f32 %v9707_v38  ;;  %v15287_v50 = vld [vmem:[#allocation41 + $0x58] sm:$0xff] }
 0xcfb   :  { %v9604_v27 = vsub.f32 %v9590_v42, %v9602_v12  ;;  %v9638_v9 = vsub.f32 %v9592_v51, %v9602_v12  ;;  %v9672_v60 = vsub.f32 %v9594_v16, %v9602_v12  ;;  %v9706_v55 = vsub.f32 %v9596_v36, %v9602_v12  ;;  %v15297_v51 = vld [vmem:[#allocation41 + $0xa8] sm:$0xff]  ;;  %v15302_v36 = vld [vmem:[#allocation41 + $0xd0] sm:$0xff] }
 0xcfc   :  { %v15305_v42 = vld [vmem:[#allocation41 + $0xe8] sm:$0xff]  ;;  %10064 = vmatpush.bf16.msrb.mxu1 %v15290_v19  ;;  %10079 = vmatpush.bf16.msrb.mxu2 %v15297_v51  ;;  %v18023_v19 = vmax.f32 %v17074_v7, 0.0  ;;  %v18030_v7 = vmax.f32 %v17084_v63, 0.0 }
 0xcfd   :  { %v15466_v43 = vpop.eup %15465  ;;  %v9607_v22 = vmul.f32 1.442695, %v9604_v27  ;;  %v9641_v4 = vmul.f32 1.442695, %v9638_v9  ;;  %v9675_v39 = vmul.f32 1.442695, %v9672_v60  ;;  %10093 = vmatpush.bf16.msra.mxu3 %v15305_v42  ;;  %10053 = vmatpush.bf16.msra.mxu0 %v15279_v25 }
 0xcfe   :  { %v15468_v14 = vpop.eup %15467  ;;  %9613 = vperm.xlu1 %15366, %v15466_v43   ;;  %v9709_v0 = vmul.f32 1.442695, %v9706_v55  ;;  %v15289_v16 = vld [vmem:[#allocation41 + $0x68] sm:$0xff]  ;;  %v15286_v27 = vld [vmem:[#allocation41 + $0x50] sm:$0xff]  ;;  %v18029_v25 = vmax.f32 %v17396_v52, 0.0  ;;  %v18035_v52 = vmax.f32 %v17255_v28, 0.0 }
 0xcff   :  { %15473 = vpow2.f32 %v9607_v22  ;;  %v9643_v23 = vadd.f32 %v15468_v14, %v15466_v43  ;;  %v15470_v1 = vpop.eup %15469  ;;  %v15293_v60 = vld [vmem:[#allocation41 + $0x88] sm:$0xff] }
 0xd00   :  { %15475 = vpow2.f32 %v9641_v4  ;;  %v15472_v30 = vpop.eup %15471  ;;  %10065 = vmatpush.bf16.msrb.mxu1 %v15289_v16  ;;  %10080 = vmatpush.bf16.msrb.mxu2 %v15296_v6  ;;  %v15277_v55 = vld [vmem:[#allocation41 + $0x8] sm:$0xff]  ;;  %v18025_v16 = vmax.f32 %v17241_v33, 0.0  ;;  %v18031_v33 = vmax.f32 %v17272_v54, 0.0 }
 0xd01   :  { %v9677_v3 = vadd.f32 %v15470_v1, %v9643_v23  ;;  %15477 = vpow2.f32 %v9675_v39  ;;  %10094 = vmatpush.bf16.msra.mxu3 %v15304_v57  ;;  %10054 = vmatpush.bf16.msra.mxu0 %v15278_v29  ;;  %v15301_v43 = vld [vmem:[#allocation41 + $0xc8] sm:$0xff]  ;;  %v15292_v39 = vld [vmem:[#allocation41 + $0x80] sm:$0xff] }
 0xd02   :  { %15479 = vpow2.f32 %v9709_v0  ;;  %v15285_v4 = vld [vmem:[#allocation41 + $0x48] sm:$0xff]  ;;  %v15276_v23 = vld [vmem:[#allocation41] sm:$0xff] }
 0xd03   :  { %v9711_v53 = vadd.f32 %v15472_v30, %v9677_v3 }
 0xd04   :  { %10066 = vmatpush.bf16.msrb.mxu1 %v15288_v32  ;;  %10081 = vmatpush.bf16.msrb.mxu2 %v15295_v13 }
 0xd05   :  { %v15474_v20 = vpop.eup %15473  ;;  %9741 = vperm.xlu2 %15364, %v9711_v53   ;;  %10095 = vmatpush.bf16.msra.mxu3 %v15303_v59 }
 0xd06   :  { %v15476_v18 = vpop.eup %15475  ;;  %10055 = vmatpush.bf16.msra.mxu0 %v15277_v55 }
 0xd07   :  { %9652 = vperm.xlu1 %15366, %v15476_v18   ;;  %v9644_v35 = vadd.f32 %v15476_v18, %v15474_v20  ;;  %v15478_v61 = vpop.eup %15477 }
 0xd08   :  { %v15480_v40 = vpop.eup %15479  ;;  %10067 = vmatpush.bf16.msrb.mxu1 %v15287_v50  ;;  %10082 = vmatpush.bf16.msrb.mxu2 %v15294_v8 }
 0xd09   :  { %v9678_v62 = vadd.f32 %v15478_v61, %v9644_v35  ;;  %10096 = vmatpush.bf16.msra.mxu3 %v15302_v36 }
 0xd0a   :  { %10056 = vmatpush.bf16.msra.mxu0 %v15276_v23 }
 0xd0b   :  { %v9712_v41 = vadd.f32 %v15480_v40, %v9678_v62  ;;  %v18022_v62 = vmax.f32 %v17064_v45, 0.0  ;;  %v18028_v45 = vmax.f32 %v17287_v10, 0.0  ;;  %v18034_v10 = vmax.f32 %v17186_v34, 0.0 }
 0xd0c   :  { %10068 = vmatpush.bf16.msrb.mxu1 %v15286_v27  ;;  %10083 = vmatpush.bf16.msrb.mxu2 %v15293_v60 }
 0xd0d   :  { %9746 = vperm.xlu0 %15365, %v9712_v41   ;;  %9618 = vperm.xlu2 %15364, %v15474_v20  }
 0xd0e   :  { %10097 = vmatpush.bf16.msra.mxu3 %v15301_v43  ;;  %v18037_v43 = vmax.f32 %v17226_v2, 0.0 }
 0xd0f   :  { %9686 = vperm.xlu1 %15366, %v15478_v61  }
 0xd10   :  { %10069 = vmatpush.bf16.msrb.mxu1 %v15285_v4  ;;  %10084 = vmatpush.bf16.msrb.mxu2 %v15292_v39  ;;  %v18038_v4 = vld [vmem:[#allocation82_spill] sm:$0xff]  ;;  %v18040_v39 = vld [vmem:[#allocation76_spill] sm:$0xff] }
 0xd11   :  { %v18039_v34 = vmax.f32 %v18038_v4, 0.0  ;;  %v18041_v28 = vmax.f32 %v18040_v39, 0.0 }
 0xd15   :  { %9715 = vperm.xlu0 %15365, %v15472_v30   ;;  %9647 = vperm.xlu2 %15364, %v15468_v14   ;;  %v15284_v30 = vld [vmem:[#allocation41 + $0x40] sm:$0xff] }
 0xd16   :  { %10070 = vmatpush.bf16.msrb.mxu1 %v15284_v30 }
 0xd1d   :  { %9681 = vperm.xlu2 %15364, %v15470_v1   ;;  %v15300_v1 = vld [vmem:[#allocation41 + $0xc0] sm:$0xff] }
 0xd1e   :  { %10098 = vmatpush.bf16.msra.mxu3 %v15300_v1  ;;  %v18042_v1 = vld [vmem:[#allocation83_spill] sm:$0xff] }
 0xd25   :  { %9720 = vperm.xlu2 %15364, %v15480_v40  }
 0xd5f   :  { %v9742_v38 = vpop.permute.xlu2 %9741 }
 0xd60   :  { %15481 = vrcp.f32 %v9742_v38  ;;  %v9758_v20 = vand.u32 2147483647, %v9742_v38  ;;  %v9760_v24 = vand.u32 2147483648, %v9742_v38  ;;  %vm9754_vm1 = vweird.f32 %v9742_v38 }
 0xd62   :  { %vm17748_vm3 = vcmp.eq.f32.partialorder %v9758_v20, 8.507059e+37  ;;  %v9761_v61 = vor.u32 1.1754944e-38, %v9760_v24 }
 0xd66   :  { %v15482_v9 = vpop.eup %15481 }
 0xd67   :  { %v9619_v12 = vpop.permute.xlu2 %9618  ;;  %v9750_v22 = vmul.f32 %v15482_v9, %v9742_v38  ;;  %vm9755_vm0 = vweird.f32 %v15482_v9 }
 0xd68   :  { %vm17744_vm2 = vmor %vm9754_vm1, %vm9755_vm0  ;;  %v9625_v56 = vmul.f32 %v9619_v12, %v18021_v48  ;;  %v9626_v36 = vmul.f32 %v9619_v12, %v18034_v10  ;;  %v9627_v38 = vmul.f32 %v9619_v12, %v18035_v52 }
 0xd69   :  { %v9751_v0 = vsub.f32 1.0, %v9750_v22 }
 0xd6b   :  { %v9752_v53 = vmul.f32 %v15482_v9, %v9751_v0  ;;  %v18043_v0 = vmax.f32 %v18042_v1, 0.0 }
 0xd6d   :  { %v9753_v58 = vadd.f32 %v15482_v9, %v9752_v53 }
 0xd6f   :  { %v9648_v3 = vpop.permute.xlu2 %9647  ;;  %v9757_v44 = vsel %vm17744_vm2, %v15482_v9, %v9753_v58  ;;  %v18036_v9 = vmax.f32 %v17077_v11, 0.0 }
 0xd70   :  { %v9614_v14 = vpop.permute.xlu1 %9613  ;;  %v9655_v51 = vmul.f32 %v9648_v3, %v18023_v19  ;;  %v9656_v32 = vmul.f32 %v9648_v3, %v18027_v5  ;;  %v9657_v13 = vmul.f32 %v9648_v3, %v18028_v45  ;;  %v9658_v59 = vmul.f32 %v9648_v3, %v18029_v25  ;;  %v18054_v5 = vld [vmem:[#allocation78_spill] sm:$0xff] }
 0xd71   :  { %v9621_v40 = vmul.f32 %v9614_v14, %v18022_v62  ;;  %v9622_v42 = vmul.f32 %v9614_v14, %v18024_v49  ;;  %v9623_v6 = vmul.f32 %v9614_v14, %v18025_v16  ;;  %v9624_v57 = vmul.f32 %v9614_v14, %v18026_v26  ;;  %v18050_v49 = vld [vmem:[#allocation84_spill] sm:$0xff] }
 0xd72   :  { %v9762_v47 = vsel %vm17748_vm3, %v9761_v61, %v9757_v44  ;;  %v9628_v14 = vmul.f32 %v9619_v12, %v18039_v34  ;;  %v18046_v44 = vld [vmem:[#allocation75_spill] sm:$0xff]  ;;  %v18064_v34 = vld [vmem:[#allocation81_spill] sm:$0xff] }
 0xd73   :  { %v9663_v27 = vadd.f32 %v9655_v51, %v9621_v40  ;;  %v9664_v60 = vadd.f32 %v9656_v32, %v9622_v42  ;;  %v9665_v55 = vadd.f32 %v9657_v13, %v9623_v6  ;;  %v9666_v54 = vadd.f32 %v9658_v59, %v9624_v57  ;;  %v18048_v12 = vld [vmem:[#allocation79_spill] sm:$0xff]  ;;  %v18052_v6 = vld [vmem:[#allocation73_spill] sm:$0xff]  ;;  %v18056_v13 = vld [vmem:[#allocation80_spill] sm:$0xff] }
 0xd74   :  { %v18047_v61 = vmax.f32 %v18046_v44, 0.0  ;;  %v18049_v62 = vmax.f32 %v18048_v12, 0.0  ;;  %v18051_v42 = vmax.f32 %v18050_v49, 0.0  ;;  %v18053_v26 = vmax.f32 %v18052_v6, 0.0 }
 0xd75   :  { %v18055_v32 = vmax.f32 %v18054_v5, 0.0  ;;  %v18057_v25 = vmax.f32 %v18056_v13, 0.0  ;;  %v18065_v39 = vmax.f32 %v18064_v34, 0.0 }
 0xd77   :  { %v9682_v18 = vpop.permute.xlu2 %9681 }
 0xd78   :  { %v9689_v17 = vmul.f32 %v9682_v18, %v18030_v7  ;;  %v9690_v50 = vmul.f32 %v9682_v18, %v18031_v33  ;;  %v9691_v8 = vmul.f32 %v9682_v18, %v18032_v21  ;;  %v9692_v29 = vmul.f32 %v9682_v18, %v18033_v15  ;;  %v18044_v18 = vld [vmem:[#allocation72_spill] sm:$0xff]  ;;  %v18058_v7 = vld [vmem:[#allocation85_spill] sm:$0xff] }
 0xd79   :  { %v9653_v46 = vpop.permute.xlu1 %9652  ;;  %v18045_v37 = vmax.f32 %v18044_v18, 0.0 }
 0xd7a   :  { %v9659_v63 = vmul.f32 %v9653_v46, %v18036_v9  ;;  %v9660_v31 = vmul.f32 %v9653_v46, %v18037_v43  ;;  %v9661_v23 = vmul.f32 %v9653_v46, %v18041_v28  ;;  %v9662_v11 = vmul.f32 %v9653_v46, %v18043_v0 }
 0xd7b   :  { %v9697_v3 = vadd.f32 %v9689_v17, %v9663_v27  ;;  %v9698_v30 = vadd.f32 %v9690_v50, %v9664_v60  ;;  %v9699_v53 = vadd.f32 %v9691_v8, %v9665_v55  ;;  %v9700_v20 = vadd.f32 %v9692_v29, %v9666_v54  ;;  %v18060_v50 = vld [vmem:[#allocation74_spill] sm:$0xff]  ;;  %v18062_v55 = vld [vmem:[#allocation77_spill] sm:$0xff] }
 0xd7c   :  { %v9667_v24 = vadd.f32 %v9659_v63, %v9625_v56  ;;  %v9668_v46 = vadd.f32 %v9660_v31, %v9626_v36  ;;  %v9669_v56 = vadd.f32 %v9661_v23, %v9627_v38  ;;  %v18059_v17 = vmax.f32 %v18058_v7, 0.0  ;;  %v18066_v23 = vld [vmem:[#allocation86_spill] sm:$0xff] }
 0xd7d   :  { %v18061_v21 = vmax.f32 %v18060_v50, 0.0  ;;  %v9670_v10 = vadd.f32 %v9662_v11, %v9628_v14  ;;  %v18063_v54 = vmax.f32 %v18062_v55, 0.0  ;;  %v18067_v14 = vmax.f32 %v18066_v23, 0.0 }
 0xd7f   :  { %v17758_v41 = vpop.permute.xlu0 %9746  ;;  %v9721_v2 = vpop.permute.xlu2 %9720 }
 0xd80   :  { %15483 = vrcp.f32 %v17758_v41  ;;  %v9727_v8 = vmul.f32 %v9721_v2, %v18061_v21  ;;  %v9776_v29 = vand.u32 2147483647, %v17758_v41  ;;  %v9778_v36 = vand.u32 2147483648, %v17758_v41 }
 0xd81   :  { %v9687_v22 = vpop.permute.xlu1 %9686  ;;  %v9728_v43 = vmul.f32 %v9721_v2, %v18063_v54  ;;  %v9729_v28 = vmul.f32 %v9721_v2, %v18065_v39  ;;  %v9730_v1 = vmul.f32 %v9721_v2, %v18067_v14  ;;  %vm9772_vm5 = vweird.f32 %v17758_v41 }
 0xd82   :  { %v9693_v35 = vmul.f32 %v9687_v22, %v18045_v37  ;;  %v9694_v48 = vmul.f32 %v9687_v22, %v18047_v61  ;;  %v9695_v40 = vmul.f32 %v9687_v22, %v18049_v62  ;;  %v9696_v16 = vmul.f32 %v9687_v22, %v18051_v42 }
 0xd83   :  { %vm9777_vm7 = vcmp.eq.f32.partialorder %v9776_v29, 8.507059e+37  ;;  %v9779_v11 = vor.u32 1.1754944e-38, %v9778_v36 }
 0xd84   :  { %v9701_v52 = vadd.f32 %v9693_v35, %v9667_v24  ;;  %v9702_v38 = vadd.f32 %v9694_v48, %v9668_v46  ;;  %v9703_v27 = vadd.f32 %v9695_v40, %v9669_v56  ;;  %v9704_v63 = vadd.f32 %v9696_v16, %v9670_v10 }
 0xd86   :  { %v15484_v58 = vpop.eup %15483  ;;  %v9735_v24 = vadd.f32 %v9727_v8, %v9701_v52  ;;  %v9737_v37 = vadd.f32 %v9729_v28, %v9703_v27  ;;  %v9738_v35 = vadd.f32 %v9730_v1, %v9704_v63 }
 0xd87   :  { %v9716_v19 = vpop.permute.xlu0 %9715  ;;  %v9768_v51 = vmul.f32 %v15484_v58, %v17758_v41  ;;  %vm9773_vm4 = vweird.f32 %v15484_v58 }
 0xd88   :  { %v9723_v57 = vmul.f32 %v9716_v19, %v18053_v26  ;;  %v9724_v45 = vmul.f32 %v9716_v19, %v18055_v32  ;;  %v9725_v59 = vmul.f32 %v9716_v19, %v18057_v25  ;;  %v9726_v33 = vmul.f32 %v9716_v19, %v18059_v17  ;;  %vm9774_vm6 = vmor %vm9772_vm5, %vm9773_vm4 }
 0xd89   :  { %v9769_v15 = vsub.f32 1.0, %v9768_v51 }
 0xd8a   :  { %v9731_v60 = vadd.f32 %v9723_v57, %v9697_v3  ;;  %v9732_v31 = vadd.f32 %v9724_v45, %v9698_v30  ;;  %v9733_v22 = vadd.f32 %v9725_v59, %v9699_v53  ;;  %v9734_v4 = vadd.f32 %v9726_v33, %v9700_v20 }
 0xd8b   :  { %v9770_v9 = vmul.f32 %v15484_v58, %v9769_v15  ;;  %v9736_v3 = vadd.f32 %v9728_v43, %v9702_v38 }
 0xd8c   :  { %v9763_v30 = vmul.f32 %v9762_v47, %v9731_v60  ;;  %v9764_v20 = vmul.f32 %v9762_v47, %v9732_v31  ;;  %v9765_v44 = vmul.f32 %v9762_v47, %v9733_v22  ;;  %v9766_v61 = vmul.f32 %v9762_v47, %v9734_v4 }
 0xd8d   :  { %v9771_v0 = vadd.f32 %v15484_v58, %v9770_v9 }
 0xd8f   :  { %v9775_v18 = vsel %vm9774_vm6, %v15484_v58, %v9771_v0  ;;  %v15368_v58 = vld [vmem:[#allocation43] ss:$0 sm:$0xff] }
 0xd90   :  { %v9780_v53 = vsel %vm9777_vm7, %v9779_v11, %v9775_v18 }
 0xd91   :  { %v9781_v48 = vmul.f32 %v9780_v53, %v9735_v24  ;;  %v9782_v12 = vmul.f32 %v9780_v53, %v9736_v3  ;;  %v9783_v62 = vmul.f32 %v9780_v53, %v9737_v37  ;;  %v9784_v2 = vmul.f32 %v9780_v53, %v9738_v35 }
 0xd93   :  { %v9850_v40 = vpack.c.bf16 %v9781_v48, %v9763_v30  ;;  %v9851_v19 = vpack.c.bf16 %v9782_v12, %v9764_v20  ;;  %v9852_v41 = vpack.c.bf16 %v9783_v62, %v9765_v44  ;;  %v9853_v51 = vpack.c.bf16 %v9784_v2, %v9766_v61 }
 0xd95   :  { %10057 = vmatmul.bf16.vlgmr.msra.gmra.mxu0 %v9850_v40  ;;  %10071 = vmatmul.bf16.vlgmr.msrb.gmra.mxu1 %v9851_v19 }
 0xd96   :  { %10085 = vmatmul.bf16.vlgmr.msrb.gmra.mxu2 %v9852_v41  ;;  %10099 = vmatmul.bf16.vlgmr.msra.gmra.mxu3 %v9853_v51 }
 0xe12   :  { %v10058_v46 = vpop.f32.mrf.mxu0  ;;  %v10072_v42 = vpop.f32.mrf.mxu1 }
 0xe13   :  { %v10059_v49 = vadd.f32 %v15368_v58, %v10058_v46 }
 0xe15   :  { %v10073_v16 = vadd.f32 %v10072_v42, %v10059_v49 }
 0xe19   :  { %v10086_v6 = vpop.f32.mrf.mxu2  ;;  %v10100_v26 = vpop.f32.mrf.mxu3 }
 0xe1a   :  { %v10087_v47 = vadd.f32 %v10086_v6, %v10073_v16  ;;  %v10060_v57 = vpop.f32.mrf.mxu0  ;;  %v10074_v45 = vpop.f32.mrf.mxu1 }
 0xe1b   :  { %v10061_v5 = vadd.f32 %v15368_v58, %v10060_v57 }
 0xe1c   :  { %v10101_v56 = vadd.f32 %v10100_v26, %v10087_v47 }
 0xe1d   :  { %v10075_v13 = vadd.f32 %v10074_v45, %v10061_v5 }
 0xe1e   :  { %v10105_v32 = vmax.f32 %v10101_v56, 0.0 }
 0xe20   :  { %10107 = vst [vmem:[#allocation44] sm:$0xff] %v10105_v32 }
 0xe21   :  { %v10088_v25 = vpop.f32.mrf.mxu2  ;;  %v10102_v7 = vpop.f32.mrf.mxu3 }
 0xe22   :  { %v10089_v59 = vadd.f32 %v10088_v25, %v10075_v13 }
 0xe24   :  { %v10103_v17 = vadd.f32 %v10102_v7, %v10089_v59 }
 0xe26   :  { %v10106_v33 = vmax.f32 %v10103_v17, 0.0 }
 0xe28   :  { %10108 = vst [vmem:[#allocation44 + $0x8] sm:$0xff] %v10106_v33 }
 0xe29   :  { %10121 = dma.vmem_to_hbm [thread:$0]  %s10114_s23, 256, %s10116_s26, [#allocation10], %s17937_s9, %s17937_s9, %s17936_s5  }
 0xe2a   :  { %16190 = dma.done.wait [#allocation10], 256  }
 0xe2b   :  { %16191 = vsyncadd [#allocation10], 4294967040 }
 0xe2c   :  { %10126 = vsyncpa [#allocation9], 1 }
 0xe2d   :  { %10127 = vsyncpa [#allocation12], 1 }
 0xe2e   :  { %10128 = vsyncpa [#allocation15], 1 }
 0xe2f   :  { %10129 = vsyncpa [#allocation18], 1 }
 0xe30   :  { %10130 = vsyncpa [#allocation21], 1 }
 0xe31   :  { %10131 = vsyncpa [#allocation24], 1 }
 0xe32   :  { %10132 = vsyncpa [#allocation27], 1 }
 0xe33   :  { %10133 = vsyncpa [#allocation30], 1 }
 0xe34   :  { %10134 = vsyncpa [#allocation33], 1 }
 0xe35   :  { %10135 = vsyncpa [#allocation36], 1 }
 0xe36   :  { %10136 = vsyncpa [#allocation39], 1 }
 0xe37   :  { %10137 = vsyncpa [#allocation42], 1 }
 0xe38   :  { %10138 = vsyncpa [#allocation10], 1 }
 0xe39   :  { %10139 = vsyncmov [#allocation6] }
 0xe3c   :  { %s10140_s13 = vpop.sfrf %10139 }
 0xe3d   :  { %p14280_p0 = scmp.ne.s32.totalorder %s10140_s13, 0 }
 0xe3f   :  { %10144 = shalt.err (%p14280_p0)  }
 0xe40   :  { %10146 = vsyncmov [#allocation6 + $0x1] }
 0xe43   :  { %s10147_s5 = vpop.sfrf %10146 }
 0xe44   :  { %p14281_p1 = scmp.ne.s32.totalorder %s10147_s5, 0 }
 0xe46   :  { %10151 = shalt.err (%p14281_p1)  }
 0xe47   :  { %10153 = vsyncmov [#allocation6 + $0x2] }
 0xe4a   :  { %s10154_s9 = vpop.sfrf %10153 }
 0xe4b   :  { %p14282_p2 = scmp.ne.s32.totalorder %s10154_s9, 0 }
 0xe4d   :  { %10158 = shalt.err (%p14282_p2)  }
 0xe4e   :  { %10160 = vsyncmov [#allocation6 + $0x3] }
 0xe51   :  { %s10161_s10 = vpop.sfrf %10160 }
 0xe52   :  { %p14283_p3 = scmp.ne.s32.totalorder %s10161_s10, 0 }
 0xe54   :  { %10165 = shalt.err (%p14283_p3)  }

</bundles_post_ra>
